<compile_context>
chip_gen: v7x
topology: tpu7x:2x2x1
jax: 0.10.0
libtpu: 0.0.40
codegen_flags: <defaults>
</compile_context>

<pallas_src>
import math

import jax
import jax.numpy as jnp
from jax.experimental import pallas as pl
from jax.experimental.pallas import tpu as pltpu

# ---------------------------------------------------------------------------
# Model hyperparameters (scaled down but structurally identical to the module)
# ---------------------------------------------------------------------------
INPUT_SIZE = 4           # number of input variables (E of src)
NUM_PRED = 1             # num_predicted_features
DIM_VAL = 32             # d_model
N_HEADS = 4              # attention heads
HEAD_DIM = DIM_VAL // N_HEADS
N_ENC_LAYERS = 2
N_DEC_LAYERS = 2
DIM_FF = 64              # feedforward width
SEQ_SRC = 8              # S
SEQ_TGT = 8              # T (dec_seq_len)
BATCH = 2                # N
LN_EPS = 1e-5            # PyTorch LayerNorm default
ATT_SCALE = 1.0 / math.sqrt(HEAD_DIM)

# Fixed flattening order for kernel operands.
_TOP_KEYS = ("enc_in_w", "enc_in_b", "dec_in_w", "dec_in_b", "map_w", "map_b")
_ENC_KEYS = ("wq", "bq", "wk", "bk", "wv", "bv", "wo", "bo",
             "ln1_g", "ln1_b", "w1", "b1", "w2", "b2", "ln2_g", "ln2_b")
_DEC_KEYS = ("s_wq", "s_bq", "s_wk", "s_bk", "s_wv", "s_bv", "s_wo", "s_bo",
             "ln1_g", "ln1_b",
             "c_wq", "c_bq", "c_wk", "c_bk", "c_wv", "c_bv", "c_wo", "c_bo",
             "ln2_g", "ln2_b",
             "w1", "b1", "w2", "b2", "ln3_g", "ln3_b")


# ---------------------------------------------------------------------------
# In-kernel helpers (traced inside the single fused kernel)
# ---------------------------------------------------------------------------
def _layer_norm(x, g, b):
    mu = jnp.mean(x, axis=-1, keepdims=True)
    c = x - mu
    var = jnp.mean(c * c, axis=-1, keepdims=True)
    return c * jax.lax.rsqrt(var + LN_EPS) * g + b


def _mha(xq, xkv, tq, tk, wq, bq, wk, bk, wv, bv, wo, bo):
    """Multi-head attention over batch-folded rows (no mask: masks are None).

    xq: (BATCH*tq, D), xkv: (BATCH*tk, D), rows ordered batch-major (n, t).
    wq/wk/wv: (H, D, dh), bq/bk/bv: (H, 1, dh), wo: (H, dh, D), bo: (1, D).

    Per-head projections are computed over ALL batch rows in one matmul; only the
    small (tq, tk) score/softmax/context core is per (batch, head).  All slices and
    the concat are sublane-only at multiples of 8 (tile-aligned) — no lane relayouts.
    """
    f32 = jnp.float32
    acc = None
    for h in range(N_HEADS):
        qh = jnp.dot(xq, wq[h], preferred_element_type=f32) + bq[h]      # (N*tq, dh)
        kh = jnp.dot(xkv, wk[h], preferred_element_type=f32) + bk[h]     # (N*tk, dh)
        vh = jnp.dot(xkv, wv[h], preferred_element_type=f32) + bv[h]     # (N*tk, dh)
        ctx_rows = []
        for n in range(BATCH):
            qhn = jax.lax.slice(qh, (n * tq, 0), ((n + 1) * tq, HEAD_DIM))
            khn = jax.lax.slice(kh, (n * tk, 0), ((n + 1) * tk, HEAD_DIM))
            vhn = jax.lax.slice(vh, (n * tk, 0), ((n + 1) * tk, HEAD_DIM))
            # scores = q @ k^T (contract last dims; avoids explicit transpose)
            s = jax.lax.dot_general(qhn, khn, (((1,), (1,)), ((), ())),
                                    preferred_element_type=f32) * ATT_SCALE   # (tq, tk)
            m = jnp.max(s, axis=-1, keepdims=True)
            e = jnp.exp(s - m)
            p = e * pl.reciprocal(jnp.sum(e, axis=-1, keepdims=True), approx=True)
            ctx_rows.append(jnp.dot(p, vhn, preferred_element_type=f32))  # (tq, dh)
        ctx = jnp.concatenate(ctx_rows, axis=0)                           # (N*tq, dh)
        contrib = jnp.dot(ctx, wo[h], preferred_element_type=f32)         # (N*tq, D)
        acc = contrib if acc is None else acc + contrib
    return acc + bo


def _model_kernel(*args):
    out_ref = args[-1]
    refs = args[:-1]

    src_ref, pe_ref, tgt_ref = refs[0], refs[1], refs[2]
    top = dict(zip(_TOP_KEYS, refs[3:3 + len(_TOP_KEYS)]))
    o = 3 + len(_TOP_KEYS)
    enc = dict(zip(_ENC_KEYS, refs[o:o + len(_ENC_KEYS)]))
    o += len(_ENC_KEYS)
    dec = dict(zip(_DEC_KEYS, refs[o:o + len(_DEC_KEYS)]))

    f32 = jnp.float32
    S, T = SEQ_SRC, SEQ_TGT

    # ---- encoder input layer + positional encoding (dropout_pos_enc: eval identity) ----
    x = (jnp.dot(src_ref[...], top["enc_in_w"][...], preferred_element_type=f32)
         + top["enc_in_b"][...] + pe_ref[...])                            # (N*S, D)

    # ---- encoder stack (post-norm, relu, eval dropout) ----
    for l in range(N_ENC_LAYERS):
        attn = _mha(x, x, S, S,
                    enc["wq"][l], enc["bq"][l], enc["wk"][l], enc["bk"][l],
                    enc["wv"][l], enc["bv"][l], enc["wo"][l], enc["bo"][l])
        x = _layer_norm(x + attn, enc["ln1_g"][l], enc["ln1_b"][l])
        h1 = jnp.maximum(
            jnp.dot(x, enc["w1"][l], preferred_element_type=f32) + enc["b1"][l], 0.0)
        ff = jnp.dot(h1, enc["w2"][l], preferred_element_type=f32) + enc["b2"][l]
        x = _layer_norm(x + ff, enc["ln2_g"][l], enc["ln2_b"][l])
    mem = x                                                               # (N*S, D)

    # ---- decoder input layer ----
    y = (jnp.dot(tgt_ref[...], top["dec_in_w"][...], preferred_element_type=f32)
         + top["dec_in_b"][...])                                          # (N*T, D)

    # ---- decoder stack (self-attn, cross-attn, FFN; post-norm) ----
    for l in range(N_DEC_LAYERS):
        sa = _mha(y, y, T, T,
                  dec["s_wq"][l], dec["s_bq"][l], dec["s_wk"][l], dec["s_bk"][l],
                  dec["s_wv"][l], dec["s_bv"][l], dec["s_wo"][l], dec["s_bo"][l])
        y = _layer_norm(y + sa, dec["ln1_g"][l], dec["ln1_b"][l])
        ca = _mha(y, mem, T, S,
                  dec["c_wq"][l], dec["c_bq"][l], dec["c_wk"][l], dec["c_bk"][l],
                  dec["c_wv"][l], dec["c_bv"][l], dec["c_wo"][l], dec["c_bo"][l])
        y = _layer_norm(y + ca, dec["ln2_g"][l], dec["ln2_b"][l])
        h1 = jnp.maximum(
            jnp.dot(y, dec["w1"][l], preferred_element_type=f32) + dec["b1"][l], 0.0)
        ff = jnp.dot(h1, dec["w2"][l], preferred_element_type=f32) + dec["b2"][l]
        y = _layer_norm(y + ff, dec["ln3_g"][l], dec["ln3_b"][l])

    # ---- final linear mapping ----
    out_ref[...] = (jnp.dot(y, top["map_w"][...], preferred_element_type=f32)
                    + top["map_b"][...])                                  # (N*T, P)


# ---------------------------------------------------------------------------
# Wrapper: one grid-less pallas_call for the whole forward pass
# ---------------------------------------------------------------------------
def time_series_transformer_forward(params, src, tgt):
    """src: (S, N, input_size), tgt: (T, N, num_predicted_features) ->
       (T, N, num_predicted_features)."""
    S, N, E = src.shape
    T, _, P = tgt.shape

    # Batch-major row folding (one-time layout plumbing in XLA, not compute):
    # rows ordered (n, t) so all in-kernel linear/LN/FFN ops see the whole batch.
    src_rows = jnp.transpose(src, (1, 0, 2)).reshape(N * S, E).astype(jnp.float32)
    tgt_rows = jnp.transpose(tgt, (1, 0, 2)).reshape(N * T, P).astype(jnp.float32)
    pe_rows = jnp.tile(params["pe"][:S], (N, 1)).astype(jnp.float32)      # (N*S, D)

    flat_w = ([params[k] for k in _TOP_KEYS]
              + [params["enc"][k] for k in _ENC_KEYS]
              + [params["dec"][k] for k in _DEC_KEYS])

    vmem_spec = pl.BlockSpec(memory_space=pltpu.MemorySpace.VMEM)
    n_inputs = 3 + len(flat_w)

    out_rows = pl.pallas_call(
        _model_kernel,
        out_shape=jax.ShapeDtypeStruct((N * T, NUM_PRED), jnp.float32),
        in_specs=[vmem_spec] * n_inputs,
        out_specs=vmem_spec,
    )(src_rows, pe_rows, tgt_rows, *flat_w)

    return jnp.transpose(out_rows.reshape(N, T, NUM_PRED), (1, 0, 2))     # (T, N, P)


# ---------------------------------------------------------------------------
# Deterministic synthetic parameter initialization (shapes follow the module;
# MHA weights stored pre-split per head: wq/wk/wv (L, H, D, dh), wo (L, H, dh, D))
# ---------------------------------------------------------------------------
def _w(key, shape, fan_in):
    return (1.0 / math.sqrt(fan_in)) * jax.random.normal(key, shape, dtype=jnp.float32)


def positional_encoding_table(max_len, d_model):
    pos = jnp.arange(max_len, dtype=jnp.float32)[:, None]
    div = jnp.exp(jnp.arange(0, d_model, 2, dtype=jnp.float32)
                  * (-math.log(10000.0) / d_model))
    pe = jnp.zeros((max_len, d_model), dtype=jnp.float32)
    pe = pe.at[:, 0::2].set(jnp.sin(pos * div))
    pe = pe.at[:, 1::2].set(jnp.cos(pos * div))
    return pe


def _attn_params(nk, L, prefix):
    D, H, dh = DIM_VAL, N_HEADS, HEAD_DIM
    z = jnp.zeros
    return {
        prefix + "wq": _w(nk(), (L, H, D, dh), D), prefix + "bq": z((L, H, 1, dh), jnp.float32),
        prefix + "wk": _w(nk(), (L, H, D, dh), D), prefix + "bk": z((L, H, 1, dh), jnp.float32),
        prefix + "wv": _w(nk(), (L, H, D, dh), D), prefix + "bv": z((L, H, 1, dh), jnp.float32),
        prefix + "wo": _w(nk(), (L, H, dh, D), D), prefix + "bo": z((L, 1, D), jnp.float32),
    }


def init_params(seed=0):
    keys = iter(jax.random.split(jax.random.PRNGKey(seed), 32))
    nk = lambda: next(keys)
    D, F, P, E = DIM_VAL, DIM_FF, NUM_PRED, INPUT_SIZE
    Le, Ld = N_ENC_LAYERS, N_DEC_LAYERS
    z, ones = jnp.zeros, jnp.ones

    enc = {}
    enc.update(_attn_params(nk, Le, ""))
    enc.update({
        "ln1_g": ones((Le, 1, D), jnp.float32), "ln1_b": z((Le, 1, D), jnp.float32),
        "w1": _w(nk(), (Le, D, F), D), "b1": z((Le, 1, F), jnp.float32),
        "w2": _w(nk(), (Le, F, D), F), "b2": z((Le, 1, D), jnp.float32),
        "ln2_g": ones((Le, 1, D), jnp.float32), "ln2_b": z((Le, 1, D), jnp.float32),
    })

    dec = {}
    dec.update(_attn_params(nk, Ld, "s_"))
    dec.update(_attn_params(nk, Ld, "c_"))
    dec.update({
        "ln1_g": ones((Ld, 1, D), jnp.float32), "ln1_b": z((Ld, 1, D), jnp.float32),
        "ln2_g": ones((Ld, 1, D), jnp.float32), "ln2_b": z((Ld, 1, D), jnp.float32),
        "ln3_g": ones((Ld, 1, D), jnp.float32), "ln3_b": z((Ld, 1, D), jnp.float32),
        "w1": _w(nk(), (Ld, D, F), D), "b1": z((Ld, 1, F), jnp.float32),
        "w2": _w(nk(), (Ld, F, D), F), "b2": z((Ld, 1, D), jnp.float32),
    })

    return {
        "enc_in_w": _w(nk(), (E, D), E), "enc_in_b": z((1, D), jnp.float32),
        "dec_in_w": _w(nk(), (P, D), P), "dec_in_b": z((1, D), jnp.float32),
        "map_w": _w(nk(), (D, P), D), "map_b": z((1, P), jnp.float32),
        "pe": positional_encoding_table(max(SEQ_SRC, SEQ_TGT) + 8, D),
        "enc": enc,
        "dec": dec,
    }


# TODO(synk): dropout (encoder/decoder/pos-enc) is a no-op under eval semantics and is omitted;
# src_mask / tgt_mask are None as in the default forward call.

if __name__ == "__main__":
    params = init_params(0)

    key = jax.random.PRNGKey(0)
    k_src, k_tgt = jax.random.split(key)
    src = jax.random.normal(k_src, (SEQ_SRC, BATCH, INPUT_SIZE), dtype=jnp.float32)
    tgt = jax.random.normal(k_tgt, (SEQ_TGT, BATCH, NUM_PRED), dtype=jnp.float32)

    fwd = jax.jit(time_series_transformer_forward)
    out = jax.block_until_ready(fwd(params, src, tgt))

    assert out.shape == (SEQ_TGT, BATCH, NUM_PRED), out.shape
    assert bool(jnp.all(jnp.isfinite(out)))
    print("KERNEL_OK")
</pallas_src>

<mosaic_0001>
module attributes {stable_mosaic.version = 11 : i64} {
  func.func @_model_kernel(%arg0: memref<16x4xf32, #tpu.memory_space<vmem>>, %arg1: memref<16x32xf32, #tpu.memory_space<vmem>>, %arg2: memref<16x1xf32, #tpu.memory_space<vmem>>, %arg3: memref<4x32xf32, #tpu.memory_space<vmem>>, %arg4: memref<1x32xf32, #tpu.memory_space<vmem>>, %arg5: memref<1x32xf32, #tpu.memory_space<vmem>>, %arg6: memref<1x32xf32, #tpu.memory_space<vmem>>, %arg7: memref<32x1xf32, #tpu.memory_space<vmem>>, %arg8: memref<1x1xf32, #tpu.memory_space<vmem>>, %arg9: memref<2x4x32x8xf32, #tpu.memory_space<vmem>>, %arg10: memref<2x4x1x8xf32, #tpu.memory_space<vmem>>, %arg11: memref<2x4x32x8xf32, #tpu.memory_space<vmem>>, %arg12: memref<2x4x1x8xf32, #tpu.memory_space<vmem>>, %arg13: memref<2x4x32x8xf32, #tpu.memory_space<vmem>>, %arg14: memref<2x4x1x8xf32, #tpu.memory_space<vmem>>, %arg15: memref<2x4x8x32xf32, #tpu.memory_space<vmem>>, %arg16: memref<2x1x32xf32, #tpu.memory_space<vmem>>, %arg17: memref<2x1x32xf32, #tpu.memory_space<vmem>>, %arg18: memref<2x1x32xf32, #tpu.memory_space<vmem>>, %arg19: memref<2x32x64xf32, #tpu.memory_space<vmem>>, %arg20: memref<2x1x64xf32, #tpu.memory_space<vmem>>, %arg21: memref<2x64x32xf32, #tpu.memory_space<vmem>>, %arg22: memref<2x1x32xf32, #tpu.memory_space<vmem>>, %arg23: memref<2x1x32xf32, #tpu.memory_space<vmem>>, %arg24: memref<2x1x32xf32, #tpu.memory_space<vmem>>, %arg25: memref<2x4x32x8xf32, #tpu.memory_space<vmem>>, %arg26: memref<2x4x1x8xf32, #tpu.memory_space<vmem>>, %arg27: memref<2x4x32x8xf32, #tpu.memory_space<vmem>>, %arg28: memref<2x4x1x8xf32, #tpu.memory_space<vmem>>, %arg29: memref<2x4x32x8xf32, #tpu.memory_space<vmem>>, %arg30: memref<2x4x1x8xf32, #tpu.memory_space<vmem>>, %arg31: memref<2x4x8x32xf32, #tpu.memory_space<vmem>>, %arg32: memref<2x1x32xf32, #tpu.memory_space<vmem>>, %arg33: memref<2x1x32xf32, #tpu.memory_space<vmem>>, %arg34: memref<2x1x32xf32, #tpu.memory_space<vmem>>, %arg35: memref<2x4x32x8xf32, #tpu.memory_space<vmem>>, %arg36: memref<2x4x1x8xf32, #tpu.memory_space<vmem>>, %arg37: memref<2x4x32x8xf32, #tpu.memory_space<vmem>>, %arg38: memref<2x4x1x8xf32, #tpu.memory_space<vmem>>, %arg39: memref<2x4x32x8xf32, #tpu.memory_space<vmem>>, %arg40: memref<2x4x1x8xf32, #tpu.memory_space<vmem>>, %arg41: memref<2x4x8x32xf32, #tpu.memory_space<vmem>>, %arg42: memref<2x1x32xf32, #tpu.memory_space<vmem>>, %arg43: memref<2x1x32xf32, #tpu.memory_space<vmem>>, %arg44: memref<2x1x32xf32, #tpu.memory_space<vmem>>, %arg45: memref<2x32x64xf32, #tpu.memory_space<vmem>>, %arg46: memref<2x1x64xf32, #tpu.memory_space<vmem>>, %arg47: memref<2x64x32xf32, #tpu.memory_space<vmem>>, %arg48: memref<2x1x32xf32, #tpu.memory_space<vmem>>, %arg49: memref<2x1x32xf32, #tpu.memory_space<vmem>>, %arg50: memref<2x1x32xf32, #tpu.memory_space<vmem>>, %arg51: memref<16x1xf32, #tpu.memory_space<vmem>>) attributes {dimension_semantics = [], scalar_prefetch = 0 : i64, scratch_operands = 0 : i64, tpu.core_type = #tpu.core_type<tc>} {
    %c0 = arith.constant 0 : index
    %c0_0 = arith.constant 0 : index
    %0 = vector.load %arg0[%c0, %c0_0] : memref<16x4xf32, #tpu.memory_space<vmem>>, vector<16x4xf32>
    %c0_1 = arith.constant 0 : index
    %c0_2 = arith.constant 0 : index
    %1 = vector.load %arg3[%c0_1, %c0_2] : memref<4x32xf32, #tpu.memory_space<vmem>>, vector<4x32xf32>
    %cst = arith.constant dense<0.000000e+00> : vector<16x32xf32>
    %2 = tpu.matmul %0, %1, %cst {dimension_numbers = #tpu.dot_dimension_numbers<[1], [0], [0], [1], [0, 0, 1, 1], [], []>} : vector<16x4xf32>, vector<4x32xf32>, vector<16x32xf32> -> vector<16x32xf32>
    %c0_3 = arith.constant 0 : index
    %c0_4 = arith.constant 0 : index
    %3 = vector.load %arg4[%c0_3, %c0_4] : memref<1x32xf32, #tpu.memory_space<vmem>>, vector<1x32xf32>
    %4 = vector.broadcast %3 : vector<1x32xf32> to vector<16x32xf32>
    %5 = arith.addf %2, %4 : vector<16x32xf32>
    %c0_5 = arith.constant 0 : index
    %c0_6 = arith.constant 0 : index
    %6 = vector.load %arg1[%c0_5, %c0_6] : memref<16x32xf32, #tpu.memory_space<vmem>>, vector<16x32xf32>
    %7 = arith.addf %5, %6 : vector<16x32xf32>
    %c0_7 = arith.constant 0 : index
    %c0_8 = arith.constant 0 : index
    %c0_9 = arith.constant 0 : index
    %c0_10 = arith.constant 0 : index
    %8 = vector.load %arg9[%c0_7, %c0_8, %c0_9, %c0_10] : memref<2x4x32x8xf32, #tpu.memory_space<vmem>>, vector<1x4x32x8xf32>
    %9 = vector.shape_cast %8 : vector<1x4x32x8xf32> to vector<4x32x8xf32>
    %c0_11 = arith.constant 0 : index
    %c0_12 = arith.constant 0 : index
    %c0_13 = arith.constant 0 : index
    %c0_14 = arith.constant 0 : index
    %10 = vector.load %arg10[%c0_11, %c0_12, %c0_13, %c0_14] : memref<2x4x1x8xf32, #tpu.memory_space<vmem>>, vector<1x4x1x8xf32>
    %11 = vector.shape_cast %10 : vector<1x4x1x8xf32> to vector<4x1x8xf32>
    %c0_15 = arith.constant 0 : index
    %c0_16 = arith.constant 0 : index
    %c0_17 = arith.constant 0 : index
    %c0_18 = arith.constant 0 : index
    %12 = vector.load %arg11[%c0_15, %c0_16, %c0_17, %c0_18] : memref<2x4x32x8xf32, #tpu.memory_space<vmem>>, vector<1x4x32x8xf32>
    %13 = vector.shape_cast %12 : vector<1x4x32x8xf32> to vector<4x32x8xf32>
    %c0_19 = arith.constant 0 : index
    %c0_20 = arith.constant 0 : index
    %c0_21 = arith.constant 0 : index
    %c0_22 = arith.constant 0 : index
    %14 = vector.load %arg12[%c0_19, %c0_20, %c0_21, %c0_22] : memref<2x4x1x8xf32, #tpu.memory_space<vmem>>, vector<1x4x1x8xf32>
    %15 = vector.shape_cast %14 : vector<1x4x1x8xf32> to vector<4x1x8xf32>
    %c0_23 = arith.constant 0 : index
    %c0_24 = arith.constant 0 : index
    %c0_25 = arith.constant 0 : index
    %c0_26 = arith.constant 0 : index
    %16 = vector.load %arg13[%c0_23, %c0_24, %c0_25, %c0_26] : memref<2x4x32x8xf32, #tpu.memory_space<vmem>>, vector<1x4x32x8xf32>
    %17 = vector.shape_cast %16 : vector<1x4x32x8xf32> to vector<4x32x8xf32>
    %c0_27 = arith.constant 0 : index
    %c0_28 = arith.constant 0 : index
    %c0_29 = arith.constant 0 : index
    %c0_30 = arith.constant 0 : index
    %18 = vector.load %arg14[%c0_27, %c0_28, %c0_29, %c0_30] : memref<2x4x1x8xf32, #tpu.memory_space<vmem>>, vector<1x4x1x8xf32>
    %19 = vector.shape_cast %18 : vector<1x4x1x8xf32> to vector<4x1x8xf32>
    %c0_31 = arith.constant 0 : index
    %c0_32 = arith.constant 0 : index
    %c0_33 = arith.constant 0 : index
    %c0_34 = arith.constant 0 : index
    %20 = vector.load %arg15[%c0_31, %c0_32, %c0_33, %c0_34] : memref<2x4x8x32xf32, #tpu.memory_space<vmem>>, vector<1x4x8x32xf32>
    %21 = vector.shape_cast %20 : vector<1x4x8x32xf32> to vector<4x8x32xf32>
    %c0_35 = arith.constant 0 : index
    %c0_36 = arith.constant 0 : index
    %c0_37 = arith.constant 0 : index
    %22 = vector.load %arg16[%c0_35, %c0_36, %c0_37] : memref<2x1x32xf32, #tpu.memory_space<vmem>>, vector<1x1x32xf32>
    %23 = vector.shape_cast %22 : vector<1x1x32xf32> to vector<1x32xf32>
    %24 = vector.extract_strided_slice %9 {offsets = [0, 0, 0], sizes = [1, 32, 8], strides = [1, 1, 1]} : vector<4x32x8xf32> to vector<1x32x8xf32>
    %25 = vector.shape_cast %24 : vector<1x32x8xf32> to vector<32x8xf32>
    %cst_38 = arith.constant dense<0.000000e+00> : vector<16x8xf32>
    %26 = tpu.matmul %7, %25, %cst_38 {dimension_numbers = #tpu.dot_dimension_numbers<[1], [0], [0], [1], [0, 0, 1, 1], [], []>} : vector<16x32xf32>, vector<32x8xf32>, vector<16x8xf32> -> vector<16x8xf32>
    %27 = vector.extract_strided_slice %11 {offsets = [0, 0, 0], sizes = [1, 1, 8], strides = [1, 1, 1]} : vector<4x1x8xf32> to vector<1x1x8xf32>
    %28 = vector.shape_cast %27 : vector<1x1x8xf32> to vector<1x8xf32>
    %29 = vector.broadcast %28 : vector<1x8xf32> to vector<16x8xf32>
    %30 = arith.addf %26, %29 : vector<16x8xf32>
    %31 = vector.extract_strided_slice %13 {offsets = [0, 0, 0], sizes = [1, 32, 8], strides = [1, 1, 1]} : vector<4x32x8xf32> to vector<1x32x8xf32>
    %32 = vector.shape_cast %31 : vector<1x32x8xf32> to vector<32x8xf32>
    %cst_39 = arith.constant dense<0.000000e+00> : vector<16x8xf32>
    %33 = tpu.matmul %7, %32, %cst_39 {dimension_numbers = #tpu.dot_dimension_numbers<[1], [0], [0], [1], [0, 0, 1, 1], [], []>} : vector<16x32xf32>, vector<32x8xf32>, vector<16x8xf32> -> vector<16x8xf32>
    %34 = vector.extract_strided_slice %15 {offsets = [0, 0, 0], sizes = [1, 1, 8], strides = [1, 1, 1]} : vector<4x1x8xf32> to vector<1x1x8xf32>
    %35 = vector.shape_cast %34 : vector<1x1x8xf32> to vector<1x8xf32>
    %36 = vector.broadcast %35 : vector<1x8xf32> to vector<16x8xf32>
    %37 = arith.addf %33, %36 : vector<16x8xf32>
    %38 = vector.extract_strided_slice %17 {offsets = [0, 0, 0], sizes = [1, 32, 8], strides = [1, 1, 1]} : vector<4x32x8xf32> to vector<1x32x8xf32>
    %39 = vector.shape_cast %38 : vector<1x32x8xf32> to vector<32x8xf32>
    %cst_40 = arith.constant dense<0.000000e+00> : vector<16x8xf32>
    %40 = tpu.matmul %7, %39, %cst_40 {dimension_numbers = #tpu.dot_dimension_numbers<[1], [0], [0], [1], [0, 0, 1, 1], [], []>} : vector<16x32xf32>, vector<32x8xf32>, vector<16x8xf32> -> vector<16x8xf32>
    %41 = vector.extract_strided_slice %19 {offsets = [0, 0, 0], sizes = [1, 1, 8], strides = [1, 1, 1]} : vector<4x1x8xf32> to vector<1x1x8xf32>
    %42 = vector.shape_cast %41 : vector<1x1x8xf32> to vector<1x8xf32>
    %43 = vector.broadcast %42 : vector<1x8xf32> to vector<16x8xf32>
    %44 = arith.addf %40, %43 : vector<16x8xf32>
    %45 = vector.extract_strided_slice %30 {offsets = [0, 0], sizes = [8, 8], strides = [1, 1]} : vector<16x8xf32> to vector<8x8xf32>
    %46 = vector.extract_strided_slice %37 {offsets = [0, 0], sizes = [8, 8], strides = [1, 1]} : vector<16x8xf32> to vector<8x8xf32>
    %47 = vector.extract_strided_slice %44 {offsets = [0, 0], sizes = [8, 8], strides = [1, 1]} : vector<16x8xf32> to vector<8x8xf32>
    %cst_41 = arith.constant dense<0.000000e+00> : vector<8x8xf32>
    %48 = tpu.matmul %45, %46, %cst_41 {dimension_numbers = #tpu.dot_dimension_numbers<[1], [1], [0], [0], [0, 0, 1, 0], [], []>} : vector<8x8xf32>, vector<8x8xf32>, vector<8x8xf32> -> vector<8x8xf32>
    %cst_42 = arith.constant 0.353553385 : f32
    %49 = vector.broadcast %cst_42 : f32 to vector<8x8xf32>
    %50 = arith.mulf %48, %49 : vector<8x8xf32>
    %cst_43 = arith.constant dense<0xFF800000> : vector<8xf32>
    %51 = vector.multi_reduction <maximumf>, %50, %cst_43 [1] : vector<8x8xf32> to vector<8xf32>
    %52 = vector.shape_cast %51 : vector<8xf32> to vector<8x1xf32>
    %53 = vector.broadcast %52 : vector<8x1xf32> to vector<8x8xf32>
    %54 = arith.subf %50, %53 : vector<8x8xf32>
    %55 = math.exp %54 : vector<8x8xf32>
    %cst_44 = arith.constant dense<0.000000e+00> : vector<8xf32>
    %56 = vector.multi_reduction <add>, %55, %cst_44 [1] : vector<8x8xf32> to vector<8xf32>
    %57 = vector.shape_cast %56 : vector<8xf32> to vector<8x1xf32>
    %58 = tpu.reciprocal %57 {approx = true} : vector<8x1xf32> -> vector<8x1xf32>
    %59 = vector.broadcast %58 : vector<8x1xf32> to vector<8x8xf32>
    %60 = arith.mulf %55, %59 : vector<8x8xf32>
    %cst_45 = arith.constant dense<0.000000e+00> : vector<8x8xf32>
    %61 = tpu.matmul %60, %47, %cst_45 {dimension_numbers = #tpu.dot_dimension_numbers<[1], [0], [0], [1], [0, 0, 1, 1], [], []>} : vector<8x8xf32>, vector<8x8xf32>, vector<8x8xf32> -> vector<8x8xf32>
    %62 = vector.extract_strided_slice %30 {offsets = [8, 0], sizes = [8, 8], strides = [1, 1]} : vector<16x8xf32> to vector<8x8xf32>
    %63 = vector.extract_strided_slice %37 {offsets = [8, 0], sizes = [8, 8], strides = [1, 1]} : vector<16x8xf32> to vector<8x8xf32>
    %64 = vector.extract_strided_slice %44 {offsets = [8, 0], sizes = [8, 8], strides = [1, 1]} : vector<16x8xf32> to vector<8x8xf32>
    %cst_46 = arith.constant dense<0.000000e+00> : vector<8x8xf32>
    %65 = tpu.matmul %62, %63, %cst_46 {dimension_numbers = #tpu.dot_dimension_numbers<[1], [1], [0], [0], [0, 0, 1, 0], [], []>} : vector<8x8xf32>, vector<8x8xf32>, vector<8x8xf32> -> vector<8x8xf32>
    %cst_47 = arith.constant 0.353553385 : f32
    %66 = vector.broadcast %cst_47 : f32 to vector<8x8xf32>
    %67 = arith.mulf %65, %66 : vector<8x8xf32>
    %cst_48 = arith.constant dense<0xFF800000> : vector<8xf32>
    %68 = vector.multi_reduction <maximumf>, %67, %cst_48 [1] : vector<8x8xf32> to vector<8xf32>
    %69 = vector.shape_cast %68 : vector<8xf32> to vector<8x1xf32>
    %70 = vector.broadcast %69 : vector<8x1xf32> to vector<8x8xf32>
    %71 = arith.subf %67, %70 : vector<8x8xf32>
    %72 = math.exp %71 : vector<8x8xf32>
    %cst_49 = arith.constant dense<0.000000e+00> : vector<8xf32>
    %73 = vector.multi_reduction <add>, %72, %cst_49 [1] : vector<8x8xf32> to vector<8xf32>
    %74 = vector.shape_cast %73 : vector<8xf32> to vector<8x1xf32>
    %75 = tpu.reciprocal %74 {approx = true} : vector<8x1xf32> -> vector<8x1xf32>
    %76 = vector.broadcast %75 : vector<8x1xf32> to vector<8x8xf32>
    %77 = arith.mulf %72, %76 : vector<8x8xf32>
    %cst_50 = arith.constant dense<0.000000e+00> : vector<8x8xf32>
    %78 = tpu.matmul %77, %64, %cst_50 {dimension_numbers = #tpu.dot_dimension_numbers<[1], [0], [0], [1], [0, 0, 1, 1], [], []>} : vector<8x8xf32>, vector<8x8xf32>, vector<8x8xf32> -> vector<8x8xf32>
    %79 = tpu.concatenate %61, %78 in 0 : vector<8x8xf32>, vector<8x8xf32> -> vector<16x8xf32>
    %80 = vector.extract_strided_slice %21 {offsets = [0, 0, 0], sizes = [1, 8, 32], strides = [1, 1, 1]} : vector<4x8x32xf32> to vector<1x8x32xf32>
    %81 = vector.shape_cast %80 : vector<1x8x32xf32> to vector<8x32xf32>
    %cst_51 = arith.constant dense<0.000000e+00> : vector<16x32xf32>
    %82 = tpu.matmul %79, %81, %cst_51 {dimension_numbers = #tpu.dot_dimension_numbers<[1], [0], [0], [1], [0, 0, 1, 1], [], []>} : vector<16x8xf32>, vector<8x32xf32>, vector<16x32xf32> -> vector<16x32xf32>
    %83 = vector.extract_strided_slice %9 {offsets = [1, 0, 0], sizes = [1, 32, 8], strides = [1, 1, 1]} : vector<4x32x8xf32> to vector<1x32x8xf32>
    %84 = vector.shape_cast %83 : vector<1x32x8xf32> to vector<32x8xf32>
    %cst_52 = arith.constant dense<0.000000e+00> : vector<16x8xf32>
    %85 = tpu.matmul %7, %84, %cst_52 {dimension_numbers = #tpu.dot_dimension_numbers<[1], [0], [0], [1], [0, 0, 1, 1], [], []>} : vector<16x32xf32>, vector<32x8xf32>, vector<16x8xf32> -> vector<16x8xf32>
    %86 = vector.extract_strided_slice %11 {offsets = [1, 0, 0], sizes = [1, 1, 8], strides = [1, 1, 1]} : vector<4x1x8xf32> to vector<1x1x8xf32>
    %87 = vector.shape_cast %86 : vector<1x1x8xf32> to vector<1x8xf32>
    %88 = vector.broadcast %87 : vector<1x8xf32> to vector<16x8xf32>
    %89 = arith.addf %85, %88 : vector<16x8xf32>
    %90 = vector.extract_strided_slice %13 {offsets = [1, 0, 0], sizes = [1, 32, 8], strides = [1, 1, 1]} : vector<4x32x8xf32> to vector<1x32x8xf32>
    %91 = vector.shape_cast %90 : vector<1x32x8xf32> to vector<32x8xf32>
    %cst_53 = arith.constant dense<0.000000e+00> : vector<16x8xf32>
    %92 = tpu.matmul %7, %91, %cst_53 {dimension_numbers = #tpu.dot_dimension_numbers<[1], [0], [0], [1], [0, 0, 1, 1], [], []>} : vector<16x32xf32>, vector<32x8xf32>, vector<16x8xf32> -> vector<16x8xf32>
    %93 = vector.extract_strided_slice %15 {offsets = [1, 0, 0], sizes = [1, 1, 8], strides = [1, 1, 1]} : vector<4x1x8xf32> to vector<1x1x8xf32>
    %94 = vector.shape_cast %93 : vector<1x1x8xf32> to vector<1x8xf32>
    %95 = vector.broadcast %94 : vector<1x8xf32> to vector<16x8xf32>
    %96 = arith.addf %92, %95 : vector<16x8xf32>
    %97 = vector.extract_strided_slice %17 {offsets = [1, 0, 0], sizes = [1, 32, 8], strides = [1, 1, 1]} : vector<4x32x8xf32> to vector<1x32x8xf32>
    %98 = vector.shape_cast %97 : vector<1x32x8xf32> to vector<32x8xf32>
    %cst_54 = arith.constant dense<0.000000e+00> : vector<16x8xf32>
    %99 = tpu.matmul %7, %98, %cst_54 {dimension_numbers = #tpu.dot_dimension_numbers<[1], [0], [0], [1], [0, 0, 1, 1], [], []>} : vector<16x32xf32>, vector<32x8xf32>, vector<16x8xf32> -> vector<16x8xf32>
    %100 = vector.extract_strided_slice %19 {offsets = [1, 0, 0], sizes = [1, 1, 8], strides = [1, 1, 1]} : vector<4x1x8xf32> to vector<1x1x8xf32>
    %101 = vector.shape_cast %100 : vector<1x1x8xf32> to vector<1x8xf32>
    %102 = vector.broadcast %101 : vector<1x8xf32> to vector<16x8xf32>
    %103 = arith.addf %99, %102 : vector<16x8xf32>
    %104 = vector.extract_strided_slice %89 {offsets = [0, 0], sizes = [8, 8], strides = [1, 1]} : vector<16x8xf32> to vector<8x8xf32>
    %105 = vector.extract_strided_slice %96 {offsets = [0, 0], sizes = [8, 8], strides = [1, 1]} : vector<16x8xf32> to vector<8x8xf32>
    %106 = vector.extract_strided_slice %103 {offsets = [0, 0], sizes = [8, 8], strides = [1, 1]} : vector<16x8xf32> to vector<8x8xf32>
    %cst_55 = arith.constant dense<0.000000e+00> : vector<8x8xf32>
    %107 = tpu.matmul %104, %105, %cst_55 {dimension_numbers = #tpu.dot_dimension_numbers<[1], [1], [0], [0], [0, 0, 1, 0], [], []>} : vector<8x8xf32>, vector<8x8xf32>, vector<8x8xf32> -> vector<8x8xf32>
    %cst_56 = arith.constant 0.353553385 : f32
    %108 = vector.broadcast %cst_56 : f32 to vector<8x8xf32>
    %109 = arith.mulf %107, %108 : vector<8x8xf32>
    %cst_57 = arith.constant dense<0xFF800000> : vector<8xf32>
    %110 = vector.multi_reduction <maximumf>, %109, %cst_57 [1] : vector<8x8xf32> to vector<8xf32>
    %111 = vector.shape_cast %110 : vector<8xf32> to vector<8x1xf32>
    %112 = vector.broadcast %111 : vector<8x1xf32> to vector<8x8xf32>
    %113 = arith.subf %109, %112 : vector<8x8xf32>
    %114 = math.exp %113 : vector<8x8xf32>
    %cst_58 = arith.constant dense<0.000000e+00> : vector<8xf32>
    %115 = vector.multi_reduction <add>, %114, %cst_58 [1] : vector<8x8xf32> to vector<8xf32>
    %116 = vector.shape_cast %115 : vector<8xf32> to vector<8x1xf32>
    %117 = tpu.reciprocal %116 {approx = true} : vector<8x1xf32> -> vector<8x1xf32>
    %118 = vector.broadcast %117 : vector<8x1xf32> to vector<8x8xf32>
    %119 = arith.mulf %114, %118 : vector<8x8xf32>
    %cst_59 = arith.constant dense<0.000000e+00> : vector<8x8xf32>
    %120 = tpu.matmul %119, %106, %cst_59 {dimension_numbers = #tpu.dot_dimension_numbers<[1], [0], [0], [1], [0, 0, 1, 1], [], []>} : vector<8x8xf32>, vector<8x8xf32>, vector<8x8xf32> -> vector<8x8xf32>
    %121 = vector.extract_strided_slice %89 {offsets = [8, 0], sizes = [8, 8], strides = [1, 1]} : vector<16x8xf32> to vector<8x8xf32>
    %122 = vector.extract_strided_slice %96 {offsets = [8, 0], sizes = [8, 8], strides = [1, 1]} : vector<16x8xf32> to vector<8x8xf32>
    %123 = vector.extract_strided_slice %103 {offsets = [8, 0], sizes = [8, 8], strides = [1, 1]} : vector<16x8xf32> to vector<8x8xf32>
    %cst_60 = arith.constant dense<0.000000e+00> : vector<8x8xf32>
    %124 = tpu.matmul %121, %122, %cst_60 {dimension_numbers = #tpu.dot_dimension_numbers<[1], [1], [0], [0], [0, 0, 1, 0], [], []>} : vector<8x8xf32>, vector<8x8xf32>, vector<8x8xf32> -> vector<8x8xf32>
    %cst_61 = arith.constant 0.353553385 : f32
    %125 = vector.broadcast %cst_61 : f32 to vector<8x8xf32>
    %126 = arith.mulf %124, %125 : vector<8x8xf32>
    %cst_62 = arith.constant dense<0xFF800000> : vector<8xf32>
    %127 = vector.multi_reduction <maximumf>, %126, %cst_62 [1] : vector<8x8xf32> to vector<8xf32>
    %128 = vector.shape_cast %127 : vector<8xf32> to vector<8x1xf32>
    %129 = vector.broadcast %128 : vector<8x1xf32> to vector<8x8xf32>
    %130 = arith.subf %126, %129 : vector<8x8xf32>
    %131 = math.exp %130 : vector<8x8xf32>
    %cst_63 = arith.constant dense<0.000000e+00> : vector<8xf32>
    %132 = vector.multi_reduction <add>, %131, %cst_63 [1] : vector<8x8xf32> to vector<8xf32>
    %133 = vector.shape_cast %132 : vector<8xf32> to vector<8x1xf32>
    %134 = tpu.reciprocal %133 {approx = true} : vector<8x1xf32> -> vector<8x1xf32>
    %135 = vector.broadcast %134 : vector<8x1xf32> to vector<8x8xf32>
    %136 = arith.mulf %131, %135 : vector<8x8xf32>
    %cst_64 = arith.constant dense<0.000000e+00> : vector<8x8xf32>
    %137 = tpu.matmul %136, %123, %cst_64 {dimension_numbers = #tpu.dot_dimension_numbers<[1], [0], [0], [1], [0, 0, 1, 1], [], []>} : vector<8x8xf32>, vector<8x8xf32>, vector<8x8xf32> -> vector<8x8xf32>
    %138 = tpu.concatenate %120, %137 in 0 : vector<8x8xf32>, vector<8x8xf32> -> vector<16x8xf32>
    %139 = vector.extract_strided_slice %21 {offsets = [1, 0, 0], sizes = [1, 8, 32], strides = [1, 1, 1]} : vector<4x8x32xf32> to vector<1x8x32xf32>
    %140 = vector.shape_cast %139 : vector<1x8x32xf32> to vector<8x32xf32>
    %cst_65 = arith.constant dense<0.000000e+00> : vector<16x32xf32>
    %141 = tpu.matmul %138, %140, %cst_65 {dimension_numbers = #tpu.dot_dimension_numbers<[1], [0], [0], [1], [0, 0, 1, 1], [], []>} : vector<16x8xf32>, vector<8x32xf32>, vector<16x32xf32> -> vector<16x32xf32>
    %142 = arith.addf %82, %141 : vector<16x32xf32>
    %143 = vector.extract_strided_slice %9 {offsets = [2, 0, 0], sizes = [1, 32, 8], strides = [1, 1, 1]} : vector<4x32x8xf32> to vector<1x32x8xf32>
    %144 = vector.shape_cast %143 : vector<1x32x8xf32> to vector<32x8xf32>
    %cst_66 = arith.constant dense<0.000000e+00> : vector<16x8xf32>
    %145 = tpu.matmul %7, %144, %cst_66 {dimension_numbers = #tpu.dot_dimension_numbers<[1], [0], [0], [1], [0, 0, 1, 1], [], []>} : vector<16x32xf32>, vector<32x8xf32>, vector<16x8xf32> -> vector<16x8xf32>
    %146 = vector.extract_strided_slice %11 {offsets = [2, 0, 0], sizes = [1, 1, 8], strides = [1, 1, 1]} : vector<4x1x8xf32> to vector<1x1x8xf32>
    %147 = vector.shape_cast %146 : vector<1x1x8xf32> to vector<1x8xf32>
    %148 = vector.broadcast %147 : vector<1x8xf32> to vector<16x8xf32>
    %149 = arith.addf %145, %148 : vector<16x8xf32>
    %150 = vector.extract_strided_slice %13 {offsets = [2, 0, 0], sizes = [1, 32, 8], strides = [1, 1, 1]} : vector<4x32x8xf32> to vector<1x32x8xf32>
    %151 = vector.shape_cast %150 : vector<1x32x8xf32> to vector<32x8xf32>
    %cst_67 = arith.constant dense<0.000000e+00> : vector<16x8xf32>
    %152 = tpu.matmul %7, %151, %cst_67 {dimension_numbers = #tpu.dot_dimension_numbers<[1], [0], [0], [1], [0, 0, 1, 1], [], []>} : vector<16x32xf32>, vector<32x8xf32>, vector<16x8xf32> -> vector<16x8xf32>
    %153 = vector.extract_strided_slice %15 {offsets = [2, 0, 0], sizes = [1, 1, 8], strides = [1, 1, 1]} : vector<4x1x8xf32> to vector<1x1x8xf32>
    %154 = vector.shape_cast %153 : vector<1x1x8xf32> to vector<1x8xf32>
    %155 = vector.broadcast %154 : vector<1x8xf32> to vector<16x8xf32>
    %156 = arith.addf %152, %155 : vector<16x8xf32>
    %157 = vector.extract_strided_slice %17 {offsets = [2, 0, 0], sizes = [1, 32, 8], strides = [1, 1, 1]} : vector<4x32x8xf32> to vector<1x32x8xf32>
    %158 = vector.shape_cast %157 : vector<1x32x8xf32> to vector<32x8xf32>
    %cst_68 = arith.constant dense<0.000000e+00> : vector<16x8xf32>
    %159 = tpu.matmul %7, %158, %cst_68 {dimension_numbers = #tpu.dot_dimension_numbers<[1], [0], [0], [1], [0, 0, 1, 1], [], []>} : vector<16x32xf32>, vector<32x8xf32>, vector<16x8xf32> -> vector<16x8xf32>
    %160 = vector.extract_strided_slice %19 {offsets = [2, 0, 0], sizes = [1, 1, 8], strides = [1, 1, 1]} : vector<4x1x8xf32> to vector<1x1x8xf32>
    %161 = vector.shape_cast %160 : vector<1x1x8xf32> to vector<1x8xf32>
    %162 = vector.broadcast %161 : vector<1x8xf32> to vector<16x8xf32>
    %163 = arith.addf %159, %162 : vector<16x8xf32>
    %164 = vector.extract_strided_slice %149 {offsets = [0, 0], sizes = [8, 8], strides = [1, 1]} : vector<16x8xf32> to vector<8x8xf32>
    %165 = vector.extract_strided_slice %156 {offsets = [0, 0], sizes = [8, 8], strides = [1, 1]} : vector<16x8xf32> to vector<8x8xf32>
    %166 = vector.extract_strided_slice %163 {offsets = [0, 0], sizes = [8, 8], strides = [1, 1]} : vector<16x8xf32> to vector<8x8xf32>
    %cst_69 = arith.constant dense<0.000000e+00> : vector<8x8xf32>
    %167 = tpu.matmul %164, %165, %cst_69 {dimension_numbers = #tpu.dot_dimension_numbers<[1], [1], [0], [0], [0, 0, 1, 0], [], []>} : vector<8x8xf32>, vector<8x8xf32>, vector<8x8xf32> -> vector<8x8xf32>
    %cst_70 = arith.constant 0.353553385 : f32
    %168 = vector.broadcast %cst_70 : f32 to vector<8x8xf32>
    %169 = arith.mulf %167, %168 : vector<8x8xf32>
    %cst_71 = arith.constant dense<0xFF800000> : vector<8xf32>
    %170 = vector.multi_reduction <maximumf>, %169, %cst_71 [1] : vector<8x8xf32> to vector<8xf32>
    %171 = vector.shape_cast %170 : vector<8xf32> to vector<8x1xf32>
    %172 = vector.broadcast %171 : vector<8x1xf32> to vector<8x8xf32>
    %173 = arith.subf %169, %172 : vector<8x8xf32>
    %174 = math.exp %173 : vector<8x8xf32>
    %cst_72 = arith.constant dense<0.000000e+00> : vector<8xf32>
    %175 = vector.multi_reduction <add>, %174, %cst_72 [1] : vector<8x8xf32> to vector<8xf32>
    %176 = vector.shape_cast %175 : vector<8xf32> to vector<8x1xf32>
    %177 = tpu.reciprocal %176 {approx = true} : vector<8x1xf32> -> vector<8x1xf32>
    %178 = vector.broadcast %177 : vector<8x1xf32> to vector<8x8xf32>
    %179 = arith.mulf %174, %178 : vector<8x8xf32>
    %cst_73 = arith.constant dense<0.000000e+00> : vector<8x8xf32>
    %180 = tpu.matmul %179, %166, %cst_73 {dimension_numbers = #tpu.dot_dimension_numbers<[1], [0], [0], [1], [0, 0, 1, 1], [], []>} : vector<8x8xf32>, vector<8x8xf32>, vector<8x8xf32> -> vector<8x8xf32>
    %181 = vector.extract_strided_slice %149 {offsets = [8, 0], sizes = [8, 8], strides = [1, 1]} : vector<16x8xf32> to vector<8x8xf32>
    %182 = vector.extract_strided_slice %156 {offsets = [8, 0], sizes = [8, 8], strides = [1, 1]} : vector<16x8xf32> to vector<8x8xf32>
    %183 = vector.extract_strided_slice %163 {offsets = [8, 0], sizes = [8, 8], strides = [1, 1]} : vector<16x8xf32> to vector<8x8xf32>
    %cst_74 = arith.constant dense<0.000000e+00> : vector<8x8xf32>
    %184 = tpu.matmul %181, %182, %cst_74 {dimension_numbers = #tpu.dot_dimension_numbers<[1], [1], [0], [0], [0, 0, 1, 0], [], []>} : vector<8x8xf32>, vector<8x8xf32>, vector<8x8xf32> -> vector<8x8xf32>
    %cst_75 = arith.constant 0.353553385 : f32
    %185 = vector.broadcast %cst_75 : f32 to vector<8x8xf32>
    %186 = arith.mulf %184, %185 : vector<8x8xf32>
    %cst_76 = arith.constant dense<0xFF800000> : vector<8xf32>
    %187 = vector.multi_reduction <maximumf>, %186, %cst_76 [1] : vector<8x8xf32> to vector<8xf32>
    %188 = vector.shape_cast %187 : vector<8xf32> to vector<8x1xf32>
    %189 = vector.broadcast %188 : vector<8x1xf32> to vector<8x8xf32>
    %190 = arith.subf %186, %189 : vector<8x8xf32>
    %191 = math.exp %190 : vector<8x8xf32>
    %cst_77 = arith.constant dense<0.000000e+00> : vector<8xf32>
    %192 = vector.multi_reduction <add>, %191, %cst_77 [1] : vector<8x8xf32> to vector<8xf32>
    %193 = vector.shape_cast %192 : vector<8xf32> to vector<8x1xf32>
    %194 = tpu.reciprocal %193 {approx = true} : vector<8x1xf32> -> vector<8x1xf32>
    %195 = vector.broadcast %194 : vector<8x1xf32> to vector<8x8xf32>
    %196 = arith.mulf %191, %195 : vector<8x8xf32>
    %cst_78 = arith.constant dense<0.000000e+00> : vector<8x8xf32>
    %197 = tpu.matmul %196, %183, %cst_78 {dimension_numbers = #tpu.dot_dimension_numbers<[1], [0], [0], [1], [0, 0, 1, 1], [], []>} : vector<8x8xf32>, vector<8x8xf32>, vector<8x8xf32> -> vector<8x8xf32>
    %198 = tpu.concatenate %180, %197 in 0 : vector<8x8xf32>, vector<8x8xf32> -> vector<16x8xf32>
    %199 = vector.extract_strided_slice %21 {offsets = [2, 0, 0], sizes = [1, 8, 32], strides = [1, 1, 1]} : vector<4x8x32xf32> to vector<1x8x32xf32>
    %200 = vector.shape_cast %199 : vector<1x8x32xf32> to vector<8x32xf32>
    %cst_79 = arith.constant dense<0.000000e+00> : vector<16x32xf32>
    %201 = tpu.matmul %198, %200, %cst_79 {dimension_numbers = #tpu.dot_dimension_numbers<[1], [0], [0], [1], [0, 0, 1, 1], [], []>} : vector<16x8xf32>, vector<8x32xf32>, vector<16x32xf32> -> vector<16x32xf32>
    %202 = arith.addf %142, %201 : vector<16x32xf32>
    %203 = vector.extract_strided_slice %9 {offsets = [3, 0, 0], sizes = [1, 32, 8], strides = [1, 1, 1]} : vector<4x32x8xf32> to vector<1x32x8xf32>
    %204 = vector.shape_cast %203 : vector<1x32x8xf32> to vector<32x8xf32>
    %cst_80 = arith.constant dense<0.000000e+00> : vector<16x8xf32>
    %205 = tpu.matmul %7, %204, %cst_80 {dimension_numbers = #tpu.dot_dimension_numbers<[1], [0], [0], [1], [0, 0, 1, 1], [], []>} : vector<16x32xf32>, vector<32x8xf32>, vector<16x8xf32> -> vector<16x8xf32>
    %206 = vector.extract_strided_slice %11 {offsets = [3, 0, 0], sizes = [1, 1, 8], strides = [1, 1, 1]} : vector<4x1x8xf32> to vector<1x1x8xf32>
    %207 = vector.shape_cast %206 : vector<1x1x8xf32> to vector<1x8xf32>
    %208 = vector.broadcast %207 : vector<1x8xf32> to vector<16x8xf32>
    %209 = arith.addf %205, %208 : vector<16x8xf32>
    %210 = vector.extract_strided_slice %13 {offsets = [3, 0, 0], sizes = [1, 32, 8], strides = [1, 1, 1]} : vector<4x32x8xf32> to vector<1x32x8xf32>
    %211 = vector.shape_cast %210 : vector<1x32x8xf32> to vector<32x8xf32>
    %cst_81 = arith.constant dense<0.000000e+00> : vector<16x8xf32>
    %212 = tpu.matmul %7, %211, %cst_81 {dimension_numbers = #tpu.dot_dimension_numbers<[1], [0], [0], [1], [0, 0, 1, 1], [], []>} : vector<16x32xf32>, vector<32x8xf32>, vector<16x8xf32> -> vector<16x8xf32>
    %213 = vector.extract_strided_slice %15 {offsets = [3, 0, 0], sizes = [1, 1, 8], strides = [1, 1, 1]} : vector<4x1x8xf32> to vector<1x1x8xf32>
    %214 = vector.shape_cast %213 : vector<1x1x8xf32> to vector<1x8xf32>
    %215 = vector.broadcast %214 : vector<1x8xf32> to vector<16x8xf32>
    %216 = arith.addf %212, %215 : vector<16x8xf32>
    %217 = vector.extract_strided_slice %17 {offsets = [3, 0, 0], sizes = [1, 32, 8], strides = [1, 1, 1]} : vector<4x32x8xf32> to vector<1x32x8xf32>
    %218 = vector.shape_cast %217 : vector<1x32x8xf32> to vector<32x8xf32>
    %cst_82 = arith.constant dense<0.000000e+00> : vector<16x8xf32>
    %219 = tpu.matmul %7, %218, %cst_82 {dimension_numbers = #tpu.dot_dimension_numbers<[1], [0], [0], [1], [0, 0, 1, 1], [], []>} : vector<16x32xf32>, vector<32x8xf32>, vector<16x8xf32> -> vector<16x8xf32>
    %220 = vector.extract_strided_slice %19 {offsets = [3, 0, 0], sizes = [1, 1, 8], strides = [1, 1, 1]} : vector<4x1x8xf32> to vector<1x1x8xf32>
    %221 = vector.shape_cast %220 : vector<1x1x8xf32> to vector<1x8xf32>
    %222 = vector.broadcast %221 : vector<1x8xf32> to vector<16x8xf32>
    %223 = arith.addf %219, %222 : vector<16x8xf32>
    %224 = vector.extract_strided_slice %209 {offsets = [0, 0], sizes = [8, 8], strides = [1, 1]} : vector<16x8xf32> to vector<8x8xf32>
    %225 = vector.extract_strided_slice %216 {offsets = [0, 0], sizes = [8, 8], strides = [1, 1]} : vector<16x8xf32> to vector<8x8xf32>
    %226 = vector.extract_strided_slice %223 {offsets = [0, 0], sizes = [8, 8], strides = [1, 1]} : vector<16x8xf32> to vector<8x8xf32>
    %cst_83 = arith.constant dense<0.000000e+00> : vector<8x8xf32>
    %227 = tpu.matmul %224, %225, %cst_83 {dimension_numbers = #tpu.dot_dimension_numbers<[1], [1], [0], [0], [0, 0, 1, 0], [], []>} : vector<8x8xf32>, vector<8x8xf32>, vector<8x8xf32> -> vector<8x8xf32>
    %cst_84 = arith.constant 0.353553385 : f32
    %228 = vector.broadcast %cst_84 : f32 to vector<8x8xf32>
    %229 = arith.mulf %227, %228 : vector<8x8xf32>
    %cst_85 = arith.constant dense<0xFF800000> : vector<8xf32>
    %230 = vector.multi_reduction <maximumf>, %229, %cst_85 [1] : vector<8x8xf32> to vector<8xf32>
    %231 = vector.shape_cast %230 : vector<8xf32> to vector<8x1xf32>
    %232 = vector.broadcast %231 : vector<8x1xf32> to vector<8x8xf32>
    %233 = arith.subf %229, %232 : vector<8x8xf32>
    %234 = math.exp %233 : vector<8x8xf32>
    %cst_86 = arith.constant dense<0.000000e+00> : vector<8xf32>
    %235 = vector.multi_reduction <add>, %234, %cst_86 [1] : vector<8x8xf32> to vector<8xf32>
    %236 = vector.shape_cast %235 : vector<8xf32> to vector<8x1xf32>
    %237 = tpu.reciprocal %236 {approx = true} : vector<8x1xf32> -> vector<8x1xf32>
    %238 = vector.broadcast %237 : vector<8x1xf32> to vector<8x8xf32>
    %239 = arith.mulf %234, %238 : vector<8x8xf32>
    %cst_87 = arith.constant dense<0.000000e+00> : vector<8x8xf32>
    %240 = tpu.matmul %239, %226, %cst_87 {dimension_numbers = #tpu.dot_dimension_numbers<[1], [0], [0], [1], [0, 0, 1, 1], [], []>} : vector<8x8xf32>, vector<8x8xf32>, vector<8x8xf32> -> vector<8x8xf32>
    %241 = vector.extract_strided_slice %209 {offsets = [8, 0], sizes = [8, 8], strides = [1, 1]} : vector<16x8xf32> to vector<8x8xf32>
    %242 = vector.extract_strided_slice %216 {offsets = [8, 0], sizes = [8, 8], strides = [1, 1]} : vector<16x8xf32> to vector<8x8xf32>
    %243 = vector.extract_strided_slice %223 {offsets = [8, 0], sizes = [8, 8], strides = [1, 1]} : vector<16x8xf32> to vector<8x8xf32>
    %cst_88 = arith.constant dense<0.000000e+00> : vector<8x8xf32>
    %244 = tpu.matmul %241, %242, %cst_88 {dimension_numbers = #tpu.dot_dimension_numbers<[1], [1], [0], [0], [0, 0, 1, 0], [], []>} : vector<8x8xf32>, vector<8x8xf32>, vector<8x8xf32> -> vector<8x8xf32>
    %cst_89 = arith.constant 0.353553385 : f32
    %245 = vector.broadcast %cst_89 : f32 to vector<8x8xf32>
    %246 = arith.mulf %244, %245 : vector<8x8xf32>
    %cst_90 = arith.constant dense<0xFF800000> : vector<8xf32>
    %247 = vector.multi_reduction <maximumf>, %246, %cst_90 [1] : vector<8x8xf32> to vector<8xf32>
    %248 = vector.shape_cast %247 : vector<8xf32> to vector<8x1xf32>
    %249 = vector.broadcast %248 : vector<8x1xf32> to vector<8x8xf32>
    %250 = arith.subf %246, %249 : vector<8x8xf32>
    %251 = math.exp %250 : vector<8x8xf32>
    %cst_91 = arith.constant dense<0.000000e+00> : vector<8xf32>
    %252 = vector.multi_reduction <add>, %251, %cst_91 [1] : vector<8x8xf32> to vector<8xf32>
    %253 = vector.shape_cast %252 : vector<8xf32> to vector<8x1xf32>
    %254 = tpu.reciprocal %253 {approx = true} : vector<8x1xf32> -> vector<8x1xf32>
    %255 = vector.broadcast %254 : vector<8x1xf32> to vector<8x8xf32>
    %256 = arith.mulf %251, %255 : vector<8x8xf32>
    %cst_92 = arith.constant dense<0.000000e+00> : vector<8x8xf32>
    %257 = tpu.matmul %256, %243, %cst_92 {dimension_numbers = #tpu.dot_dimension_numbers<[1], [0], [0], [1], [0, 0, 1, 1], [], []>} : vector<8x8xf32>, vector<8x8xf32>, vector<8x8xf32> -> vector<8x8xf32>
    %258 = tpu.concatenate %240, %257 in 0 : vector<8x8xf32>, vector<8x8xf32> -> vector<16x8xf32>
    %259 = vector.extract_strided_slice %21 {offsets = [3, 0, 0], sizes = [1, 8, 32], strides = [1, 1, 1]} : vector<4x8x32xf32> to vector<1x8x32xf32>
    %260 = vector.shape_cast %259 : vector<1x8x32xf32> to vector<8x32xf32>
    %cst_93 = arith.constant dense<0.000000e+00> : vector<16x32xf32>
    %261 = tpu.matmul %258, %260, %cst_93 {dimension_numbers = #tpu.dot_dimension_numbers<[1], [0], [0], [1], [0, 0, 1, 1], [], []>} : vector<16x8xf32>, vector<8x32xf32>, vector<16x32xf32> -> vector<16x32xf32>
    %262 = arith.addf %202, %261 : vector<16x32xf32>
    %263 = vector.broadcast %23 : vector<1x32xf32> to vector<16x32xf32>
    %264 = arith.addf %262, %263 : vector<16x32xf32>
    %265 = arith.addf %7, %264 : vector<16x32xf32>
    %c0_94 = arith.constant 0 : index
    %c0_95 = arith.constant 0 : index
    %c0_96 = arith.constant 0 : index
    %266 = vector.load %arg17[%c0_94, %c0_95, %c0_96] : memref<2x1x32xf32, #tpu.memory_space<vmem>>, vector<1x1x32xf32>
    %267 = vector.shape_cast %266 : vector<1x1x32xf32> to vector<1x32xf32>
    %c0_97 = arith.constant 0 : index
    %c0_98 = arith.constant 0 : index
    %c0_99 = arith.constant 0 : index
    %268 = vector.load %arg18[%c0_97, %c0_98, %c0_99] : memref<2x1x32xf32, #tpu.memory_space<vmem>>, vector<1x1x32xf32>
    %269 = vector.shape_cast %268 : vector<1x1x32xf32> to vector<1x32xf32>
    %cst_100 = arith.constant dense<0.000000e+00> : vector<16xf32>
    %270 = vector.multi_reduction <add>, %265, %cst_100 [1] : vector<16x32xf32> to vector<16xf32>
    %271 = vector.shape_cast %270 : vector<16xf32> to vector<16x1xf32>
    %cst_101 = arith.constant 3.200000e+01 : f32
    %272 = vector.broadcast %cst_101 : f32 to vector<16x1xf32>
    %273 = arith.divf %271, %272 : vector<16x1xf32>
    %274 = vector.broadcast %273 : vector<16x1xf32> to vector<16x32xf32>
    %275 = arith.subf %265, %274 : vector<16x32xf32>
    %276 = arith.mulf %275, %275 : vector<16x32xf32>
    %cst_102 = arith.constant dense<0.000000e+00> : vector<16xf32>
    %277 = vector.multi_reduction <add>, %276, %cst_102 [1] : vector<16x32xf32> to vector<16xf32>
    %278 = vector.shape_cast %277 : vector<16xf32> to vector<16x1xf32>
    %cst_103 = arith.constant 3.200000e+01 : f32
    %279 = vector.broadcast %cst_103 : f32 to vector<16x1xf32>
    %280 = arith.divf %278, %279 : vector<16x1xf32>
    %cst_104 = arith.constant 9.99999974E-6 : f32
    %281 = vector.broadcast %cst_104 : f32 to vector<16x1xf32>
    %282 = arith.addf %280, %281 : vector<16x1xf32>
    %283 = math.rsqrt %282 : vector<16x1xf32>
    %284 = vector.broadcast %283 : vector<16x1xf32> to vector<16x32xf32>
    %285 = arith.mulf %275, %284 : vector<16x32xf32>
    %286 = vector.broadcast %267 : vector<1x32xf32> to vector<16x32xf32>
    %287 = arith.mulf %285, %286 : vector<16x32xf32>
    %288 = vector.broadcast %269 : vector<1x32xf32> to vector<16x32xf32>
    %289 = arith.addf %287, %288 : vector<16x32xf32>
    %c0_105 = arith.constant 0 : index
    %c0_106 = arith.constant 0 : index
    %c0_107 = arith.constant 0 : index
    %290 = vector.load %arg19[%c0_105, %c0_106, %c0_107] : memref<2x32x64xf32, #tpu.memory_space<vmem>>, vector<1x32x64xf32>
    %291 = vector.shape_cast %290 : vector<1x32x64xf32> to vector<32x64xf32>
    %cst_108 = arith.constant dense<0.000000e+00> : vector<16x64xf32>
    %292 = tpu.matmul %289, %291, %cst_108 {dimension_numbers = #tpu.dot_dimension_numbers<[1], [0], [0], [1], [0, 0, 1, 1], [], []>} : vector<16x32xf32>, vector<32x64xf32>, vector<16x64xf32> -> vector<16x64xf32>
    %c0_109 = arith.constant 0 : index
    %c0_110 = arith.constant 0 : index
    %c0_111 = arith.constant 0 : index
    %293 = vector.load %arg20[%c0_109, %c0_110, %c0_111] : memref<2x1x64xf32, #tpu.memory_space<vmem>>, vector<1x1x64xf32>
    %294 = vector.shape_cast %293 : vector<1x1x64xf32> to vector<1x64xf32>
    %295 = vector.broadcast %294 : vector<1x64xf32> to vector<16x64xf32>
    %296 = arith.addf %292, %295 : vector<16x64xf32>
    %cst_112 = arith.constant 0.000000e+00 : f32
    %297 = vector.broadcast %cst_112 : f32 to vector<16x64xf32>
    %298 = arith.maximumf %296, %297 : vector<16x64xf32>
    %c0_113 = arith.constant 0 : index
    %c0_114 = arith.constant 0 : index
    %c0_115 = arith.constant 0 : index
    %299 = vector.load %arg21[%c0_113, %c0_114, %c0_115] : memref<2x64x32xf32, #tpu.memory_space<vmem>>, vector<1x64x32xf32>
    %300 = vector.shape_cast %299 : vector<1x64x32xf32> to vector<64x32xf32>
    %cst_116 = arith.constant dense<0.000000e+00> : vector<16x32xf32>
    %301 = tpu.matmul %298, %300, %cst_116 {dimension_numbers = #tpu.dot_dimension_numbers<[1], [0], [0], [1], [0, 0, 1, 1], [], []>} : vector<16x64xf32>, vector<64x32xf32>, vector<16x32xf32> -> vector<16x32xf32>
    %c0_117 = arith.constant 0 : index
    %c0_118 = arith.constant 0 : index
    %c0_119 = arith.constant 0 : index
    %302 = vector.load %arg22[%c0_117, %c0_118, %c0_119] : memref<2x1x32xf32, #tpu.memory_space<vmem>>, vector<1x1x32xf32>
    %303 = vector.shape_cast %302 : vector<1x1x32xf32> to vector<1x32xf32>
    %304 = vector.broadcast %303 : vector<1x32xf32> to vector<16x32xf32>
    %305 = arith.addf %301, %304 : vector<16x32xf32>
    %306 = arith.addf %289, %305 : vector<16x32xf32>
    %c0_120 = arith.constant 0 : index
    %c0_121 = arith.constant 0 : index
    %c0_122 = arith.constant 0 : index
    %307 = vector.load %arg23[%c0_120, %c0_121, %c0_122] : memref<2x1x32xf32, #tpu.memory_space<vmem>>, vector<1x1x32xf32>
    %308 = vector.shape_cast %307 : vector<1x1x32xf32> to vector<1x32xf32>
    %c0_123 = arith.constant 0 : index
    %c0_124 = arith.constant 0 : index
    %c0_125 = arith.constant 0 : index
    %309 = vector.load %arg24[%c0_123, %c0_124, %c0_125] : memref<2x1x32xf32, #tpu.memory_space<vmem>>, vector<1x1x32xf32>
    %310 = vector.shape_cast %309 : vector<1x1x32xf32> to vector<1x32xf32>
    %cst_126 = arith.constant dense<0.000000e+00> : vector<16xf32>
    %311 = vector.multi_reduction <add>, %306, %cst_126 [1] : vector<16x32xf32> to vector<16xf32>
    %312 = vector.shape_cast %311 : vector<16xf32> to vector<16x1xf32>
    %cst_127 = arith.constant 3.200000e+01 : f32
    %313 = vector.broadcast %cst_127 : f32 to vector<16x1xf32>
    %314 = arith.divf %312, %313 : vector<16x1xf32>
    %315 = vector.broadcast %314 : vector<16x1xf32> to vector<16x32xf32>
    %316 = arith.subf %306, %315 : vector<16x32xf32>
    %317 = arith.mulf %316, %316 : vector<16x32xf32>
    %cst_128 = arith.constant dense<0.000000e+00> : vector<16xf32>
    %318 = vector.multi_reduction <add>, %317, %cst_128 [1] : vector<16x32xf32> to vector<16xf32>
    %319 = vector.shape_cast %318 : vector<16xf32> to vector<16x1xf32>
    %cst_129 = arith.constant 3.200000e+01 : f32
    %320 = vector.broadcast %cst_129 : f32 to vector<16x1xf32>
    %321 = arith.divf %319, %320 : vector<16x1xf32>
    %cst_130 = arith.constant 9.99999974E-6 : f32
    %322 = vector.broadcast %cst_130 : f32 to vector<16x1xf32>
    %323 = arith.addf %321, %322 : vector<16x1xf32>
    %324 = math.rsqrt %323 : vector<16x1xf32>
    %325 = vector.broadcast %324 : vector<16x1xf32> to vector<16x32xf32>
    %326 = arith.mulf %316, %325 : vector<16x32xf32>
    %327 = vector.broadcast %308 : vector<1x32xf32> to vector<16x32xf32>
    %328 = arith.mulf %326, %327 : vector<16x32xf32>
    %329 = vector.broadcast %310 : vector<1x32xf32> to vector<16x32xf32>
    %330 = arith.addf %328, %329 : vector<16x32xf32>
    %c1 = arith.constant 1 : index
    %c0_131 = arith.constant 0 : index
    %c0_132 = arith.constant 0 : index
    %c0_133 = arith.constant 0 : index
    %331 = vector.load %arg9[%c1, %c0_131, %c0_132, %c0_133] : memref<2x4x32x8xf32, #tpu.memory_space<vmem>>, vector<1x4x32x8xf32>
    %332 = vector.shape_cast %331 : vector<1x4x32x8xf32> to vector<4x32x8xf32>
    %c1_134 = arith.constant 1 : index
    %c0_135 = arith.constant 0 : index
    %c0_136 = arith.constant 0 : index
    %c0_137 = arith.constant 0 : index
    %333 = vector.load %arg10[%c1_134, %c0_135, %c0_136, %c0_137] : memref<2x4x1x8xf32, #tpu.memory_space<vmem>>, vector<1x4x1x8xf32>
    %334 = vector.shape_cast %333 : vector<1x4x1x8xf32> to vector<4x1x8xf32>
    %c1_138 = arith.constant 1 : index
    %c0_139 = arith.constant 0 : index
    %c0_140 = arith.constant 0 : index
    %c0_141 = arith.constant 0 : index
    %335 = vector.load %arg11[%c1_138, %c0_139, %c0_140, %c0_141] : memref<2x4x32x8xf32, #tpu.memory_space<vmem>>, vector<1x4x32x8xf32>
    %336 = vector.shape_cast %335 : vector<1x4x32x8xf32> to vector<4x32x8xf32>
    %c1_142 = arith.constant 1 : index
    %c0_143 = arith.constant 0 : index
    %c0_144 = arith.constant 0 : index
    %c0_145 = arith.constant 0 : index
    %337 = vector.load %arg12[%c1_142, %c0_143, %c0_144, %c0_145] : memref<2x4x1x8xf32, #tpu.memory_space<vmem>>, vector<1x4x1x8xf32>
    %338 = vector.shape_cast %337 : vector<1x4x1x8xf32> to vector<4x1x8xf32>
    %c1_146 = arith.constant 1 : index
    %c0_147 = arith.constant 0 : index
    %c0_148 = arith.constant 0 : index
    %c0_149 = arith.constant 0 : index
    %339 = vector.load %arg13[%c1_146, %c0_147, %c0_148, %c0_149] : memref<2x4x32x8xf32, #tpu.memory_space<vmem>>, vector<1x4x32x8xf32>
    %340 = vector.shape_cast %339 : vector<1x4x32x8xf32> to vector<4x32x8xf32>
    %c1_150 = arith.constant 1 : index
    %c0_151 = arith.constant 0 : index
    %c0_152 = arith.constant 0 : index
    %c0_153 = arith.constant 0 : index
    %341 = vector.load %arg14[%c1_150, %c0_151, %c0_152, %c0_153] : memref<2x4x1x8xf32, #tpu.memory_space<vmem>>, vector<1x4x1x8xf32>
    %342 = vector.shape_cast %341 : vector<1x4x1x8xf32> to vector<4x1x8xf32>
    %c1_154 = arith.constant 1 : index
    %c0_155 = arith.constant 0 : index
    %c0_156 = arith.constant 0 : index
    %c0_157 = arith.constant 0 : index
    %343 = vector.load %arg15[%c1_154, %c0_155, %c0_156, %c0_157] : memref<2x4x8x32xf32, #tpu.memory_space<vmem>>, vector<1x4x8x32xf32>
    %344 = vector.shape_cast %343 : vector<1x4x8x32xf32> to vector<4x8x32xf32>
    %c1_158 = arith.constant 1 : index
    %c0_159 = arith.constant 0 : index
    %c0_160 = arith.constant 0 : index
    %345 = vector.load %arg16[%c1_158, %c0_159, %c0_160] : memref<2x1x32xf32, #tpu.memory_space<vmem>>, vector<1x1x32xf32>
    %346 = vector.shape_cast %345 : vector<1x1x32xf32> to vector<1x32xf32>
    %347 = vector.extract_strided_slice %332 {offsets = [0, 0, 0], sizes = [1, 32, 8], strides = [1, 1, 1]} : vector<4x32x8xf32> to vector<1x32x8xf32>
    %348 = vector.shape_cast %347 : vector<1x32x8xf32> to vector<32x8xf32>
    %cst_161 = arith.constant dense<0.000000e+00> : vector<16x8xf32>
    %349 = tpu.matmul %330, %348, %cst_161 {dimension_numbers = #tpu.dot_dimension_numbers<[1], [0], [0], [1], [0, 0, 1, 1], [], []>} : vector<16x32xf32>, vector<32x8xf32>, vector<16x8xf32> -> vector<16x8xf32>
    %350 = vector.extract_strided_slice %334 {offsets = [0, 0, 0], sizes = [1, 1, 8], strides = [1, 1, 1]} : vector<4x1x8xf32> to vector<1x1x8xf32>
    %351 = vector.shape_cast %350 : vector<1x1x8xf32> to vector<1x8xf32>
    %352 = vector.broadcast %351 : vector<1x8xf32> to vector<16x8xf32>
    %353 = arith.addf %349, %352 : vector<16x8xf32>
    %354 = vector.extract_strided_slice %336 {offsets = [0, 0, 0], sizes = [1, 32, 8], strides = [1, 1, 1]} : vector<4x32x8xf32> to vector<1x32x8xf32>
    %355 = vector.shape_cast %354 : vector<1x32x8xf32> to vector<32x8xf32>
    %cst_162 = arith.constant dense<0.000000e+00> : vector<16x8xf32>
    %356 = tpu.matmul %330, %355, %cst_162 {dimension_numbers = #tpu.dot_dimension_numbers<[1], [0], [0], [1], [0, 0, 1, 1], [], []>} : vector<16x32xf32>, vector<32x8xf32>, vector<16x8xf32> -> vector<16x8xf32>
    %357 = vector.extract_strided_slice %338 {offsets = [0, 0, 0], sizes = [1, 1, 8], strides = [1, 1, 1]} : vector<4x1x8xf32> to vector<1x1x8xf32>
    %358 = vector.shape_cast %357 : vector<1x1x8xf32> to vector<1x8xf32>
    %359 = vector.broadcast %358 : vector<1x8xf32> to vector<16x8xf32>
    %360 = arith.addf %356, %359 : vector<16x8xf32>
    %361 = vector.extract_strided_slice %340 {offsets = [0, 0, 0], sizes = [1, 32, 8], strides = [1, 1, 1]} : vector<4x32x8xf32> to vector<1x32x8xf32>
    %362 = vector.shape_cast %361 : vector<1x32x8xf32> to vector<32x8xf32>
    %cst_163 = arith.constant dense<0.000000e+00> : vector<16x8xf32>
    %363 = tpu.matmul %330, %362, %cst_163 {dimension_numbers = #tpu.dot_dimension_numbers<[1], [0], [0], [1], [0, 0, 1, 1], [], []>} : vector<16x32xf32>, vector<32x8xf32>, vector<16x8xf32> -> vector<16x8xf32>
    %364 = vector.extract_strided_slice %342 {offsets = [0, 0, 0], sizes = [1, 1, 8], strides = [1, 1, 1]} : vector<4x1x8xf32> to vector<1x1x8xf32>
    %365 = vector.shape_cast %364 : vector<1x1x8xf32> to vector<1x8xf32>
    %366 = vector.broadcast %365 : vector<1x8xf32> to vector<16x8xf32>
    %367 = arith.addf %363, %366 : vector<16x8xf32>
    %368 = vector.extract_strided_slice %353 {offsets = [0, 0], sizes = [8, 8], strides = [1, 1]} : vector<16x8xf32> to vector<8x8xf32>
    %369 = vector.extract_strided_slice %360 {offsets = [0, 0], sizes = [8, 8], strides = [1, 1]} : vector<16x8xf32> to vector<8x8xf32>
    %370 = vector.extract_strided_slice %367 {offsets = [0, 0], sizes = [8, 8], strides = [1, 1]} : vector<16x8xf32> to vector<8x8xf32>
    %cst_164 = arith.constant dense<0.000000e+00> : vector<8x8xf32>
    %371 = tpu.matmul %368, %369, %cst_164 {dimension_numbers = #tpu.dot_dimension_numbers<[1], [1], [0], [0], [0, 0, 1, 0], [], []>} : vector<8x8xf32>, vector<8x8xf32>, vector<8x8xf32> -> vector<8x8xf32>
    %cst_165 = arith.constant 0.353553385 : f32
    %372 = vector.broadcast %cst_165 : f32 to vector<8x8xf32>
    %373 = arith.mulf %371, %372 : vector<8x8xf32>
    %cst_166 = arith.constant dense<0xFF800000> : vector<8xf32>
    %374 = vector.multi_reduction <maximumf>, %373, %cst_166 [1] : vector<8x8xf32> to vector<8xf32>
    %375 = vector.shape_cast %374 : vector<8xf32> to vector<8x1xf32>
    %376 = vector.broadcast %375 : vector<8x1xf32> to vector<8x8xf32>
    %377 = arith.subf %373, %376 : vector<8x8xf32>
    %378 = math.exp %377 : vector<8x8xf32>
    %cst_167 = arith.constant dense<0.000000e+00> : vector<8xf32>
    %379 = vector.multi_reduction <add>, %378, %cst_167 [1] : vector<8x8xf32> to vector<8xf32>
    %380 = vector.shape_cast %379 : vector<8xf32> to vector<8x1xf32>
    %381 = tpu.reciprocal %380 {approx = true} : vector<8x1xf32> -> vector<8x1xf32>
    %382 = vector.broadcast %381 : vector<8x1xf32> to vector<8x8xf32>
    %383 = arith.mulf %378, %382 : vector<8x8xf32>
    %cst_168 = arith.constant dense<0.000000e+00> : vector<8x8xf32>
    %384 = tpu.matmul %383, %370, %cst_168 {dimension_numbers = #tpu.dot_dimension_numbers<[1], [0], [0], [1], [0, 0, 1, 1], [], []>} : vector<8x8xf32>, vector<8x8xf32>, vector<8x8xf32> -> vector<8x8xf32>
    %385 = vector.extract_strided_slice %353 {offsets = [8, 0], sizes = [8, 8], strides = [1, 1]} : vector<16x8xf32> to vector<8x8xf32>
    %386 = vector.extract_strided_slice %360 {offsets = [8, 0], sizes = [8, 8], strides = [1, 1]} : vector<16x8xf32> to vector<8x8xf32>
    %387 = vector.extract_strided_slice %367 {offsets = [8, 0], sizes = [8, 8], strides = [1, 1]} : vector<16x8xf32> to vector<8x8xf32>
    %cst_169 = arith.constant dense<0.000000e+00> : vector<8x8xf32>
    %388 = tpu.matmul %385, %386, %cst_169 {dimension_numbers = #tpu.dot_dimension_numbers<[1], [1], [0], [0], [0, 0, 1, 0], [], []>} : vector<8x8xf32>, vector<8x8xf32>, vector<8x8xf32> -> vector<8x8xf32>
    %cst_170 = arith.constant 0.353553385 : f32
    %389 = vector.broadcast %cst_170 : f32 to vector<8x8xf32>
    %390 = arith.mulf %388, %389 : vector<8x8xf32>
    %cst_171 = arith.constant dense<0xFF800000> : vector<8xf32>
    %391 = vector.multi_reduction <maximumf>, %390, %cst_171 [1] : vector<8x8xf32> to vector<8xf32>
    %392 = vector.shape_cast %391 : vector<8xf32> to vector<8x1xf32>
    %393 = vector.broadcast %392 : vector<8x1xf32> to vector<8x8xf32>
    %394 = arith.subf %390, %393 : vector<8x8xf32>
    %395 = math.exp %394 : vector<8x8xf32>
    %cst_172 = arith.constant dense<0.000000e+00> : vector<8xf32>
    %396 = vector.multi_reduction <add>, %395, %cst_172 [1] : vector<8x8xf32> to vector<8xf32>
    %397 = vector.shape_cast %396 : vector<8xf32> to vector<8x1xf32>
    %398 = tpu.reciprocal %397 {approx = true} : vector<8x1xf32> -> vector<8x1xf32>
    %399 = vector.broadcast %398 : vector<8x1xf32> to vector<8x8xf32>
    %400 = arith.mulf %395, %399 : vector<8x8xf32>
    %cst_173 = arith.constant dense<0.000000e+00> : vector<8x8xf32>
    %401 = tpu.matmul %400, %387, %cst_173 {dimension_numbers = #tpu.dot_dimension_numbers<[1], [0], [0], [1], [0, 0, 1, 1], [], []>} : vector<8x8xf32>, vector<8x8xf32>, vector<8x8xf32> -> vector<8x8xf32>
    %402 = tpu.concatenate %384, %401 in 0 : vector<8x8xf32>, vector<8x8xf32> -> vector<16x8xf32>
    %403 = vector.extract_strided_slice %344 {offsets = [0, 0, 0], sizes = [1, 8, 32], strides = [1, 1, 1]} : vector<4x8x32xf32> to vector<1x8x32xf32>
    %404 = vector.shape_cast %403 : vector<1x8x32xf32> to vector<8x32xf32>
    %cst_174 = arith.constant dense<0.000000e+00> : vector<16x32xf32>
    %405 = tpu.matmul %402, %404, %cst_174 {dimension_numbers = #tpu.dot_dimension_numbers<[1], [0], [0], [1], [0, 0, 1, 1], [], []>} : vector<16x8xf32>, vector<8x32xf32>, vector<16x32xf32> -> vector<16x32xf32>
    %406 = vector.extract_strided_slice %332 {offsets = [1, 0, 0], sizes = [1, 32, 8], strides = [1, 1, 1]} : vector<4x32x8xf32> to vector<1x32x8xf32>
    %407 = vector.shape_cast %406 : vector<1x32x8xf32> to vector<32x8xf32>
    %cst_175 = arith.constant dense<0.000000e+00> : vector<16x8xf32>
    %408 = tpu.matmul %330, %407, %cst_175 {dimension_numbers = #tpu.dot_dimension_numbers<[1], [0], [0], [1], [0, 0, 1, 1], [], []>} : vector<16x32xf32>, vector<32x8xf32>, vector<16x8xf32> -> vector<16x8xf32>
    %409 = vector.extract_strided_slice %334 {offsets = [1, 0, 0], sizes = [1, 1, 8], strides = [1, 1, 1]} : vector<4x1x8xf32> to vector<1x1x8xf32>
    %410 = vector.shape_cast %409 : vector<1x1x8xf32> to vector<1x8xf32>
    %411 = vector.broadcast %410 : vector<1x8xf32> to vector<16x8xf32>
    %412 = arith.addf %408, %411 : vector<16x8xf32>
    %413 = vector.extract_strided_slice %336 {offsets = [1, 0, 0], sizes = [1, 32, 8], strides = [1, 1, 1]} : vector<4x32x8xf32> to vector<1x32x8xf32>
    %414 = vector.shape_cast %413 : vector<1x32x8xf32> to vector<32x8xf32>
    %cst_176 = arith.constant dense<0.000000e+00> : vector<16x8xf32>
    %415 = tpu.matmul %330, %414, %cst_176 {dimension_numbers = #tpu.dot_dimension_numbers<[1], [0], [0], [1], [0, 0, 1, 1], [], []>} : vector<16x32xf32>, vector<32x8xf32>, vector<16x8xf32> -> vector<16x8xf32>
    %416 = vector.extract_strided_slice %338 {offsets = [1, 0, 0], sizes = [1, 1, 8], strides = [1, 1, 1]} : vector<4x1x8xf32> to vector<1x1x8xf32>
    %417 = vector.shape_cast %416 : vector<1x1x8xf32> to vector<1x8xf32>
    %418 = vector.broadcast %417 : vector<1x8xf32> to vector<16x8xf32>
    %419 = arith.addf %415, %418 : vector<16x8xf32>
    %420 = vector.extract_strided_slice %340 {offsets = [1, 0, 0], sizes = [1, 32, 8], strides = [1, 1, 1]} : vector<4x32x8xf32> to vector<1x32x8xf32>
    %421 = vector.shape_cast %420 : vector<1x32x8xf32> to vector<32x8xf32>
    %cst_177 = arith.constant dense<0.000000e+00> : vector<16x8xf32>
    %422 = tpu.matmul %330, %421, %cst_177 {dimension_numbers = #tpu.dot_dimension_numbers<[1], [0], [0], [1], [0, 0, 1, 1], [], []>} : vector<16x32xf32>, vector<32x8xf32>, vector<16x8xf32> -> vector<16x8xf32>
    %423 = vector.extract_strided_slice %342 {offsets = [1, 0, 0], sizes = [1, 1, 8], strides = [1, 1, 1]} : vector<4x1x8xf32> to vector<1x1x8xf32>
    %424 = vector.shape_cast %423 : vector<1x1x8xf32> to vector<1x8xf32>
    %425 = vector.broadcast %424 : vector<1x8xf32> to vector<16x8xf32>
    %426 = arith.addf %422, %425 : vector<16x8xf32>
    %427 = vector.extract_strided_slice %412 {offsets = [0, 0], sizes = [8, 8], strides = [1, 1]} : vector<16x8xf32> to vector<8x8xf32>
    %428 = vector.extract_strided_slice %419 {offsets = [0, 0], sizes = [8, 8], strides = [1, 1]} : vector<16x8xf32> to vector<8x8xf32>
    %429 = vector.extract_strided_slice %426 {offsets = [0, 0], sizes = [8, 8], strides = [1, 1]} : vector<16x8xf32> to vector<8x8xf32>
    %cst_178 = arith.constant dense<0.000000e+00> : vector<8x8xf32>
    %430 = tpu.matmul %427, %428, %cst_178 {dimension_numbers = #tpu.dot_dimension_numbers<[1], [1], [0], [0], [0, 0, 1, 0], [], []>} : vector<8x8xf32>, vector<8x8xf32>, vector<8x8xf32> -> vector<8x8xf32>
    %cst_179 = arith.constant 0.353553385 : f32
    %431 = vector.broadcast %cst_179 : f32 to vector<8x8xf32>
    %432 = arith.mulf %430, %431 : vector<8x8xf32>
    %cst_180 = arith.constant dense<0xFF800000> : vector<8xf32>
    %433 = vector.multi_reduction <maximumf>, %432, %cst_180 [1] : vector<8x8xf32> to vector<8xf32>
    %434 = vector.shape_cast %433 : vector<8xf32> to vector<8x1xf32>
    %435 = vector.broadcast %434 : vector<8x1xf32> to vector<8x8xf32>
    %436 = arith.subf %432, %435 : vector<8x8xf32>
    %437 = math.exp %436 : vector<8x8xf32>
    %cst_181 = arith.constant dense<0.000000e+00> : vector<8xf32>
    %438 = vector.multi_reduction <add>, %437, %cst_181 [1] : vector<8x8xf32> to vector<8xf32>
    %439 = vector.shape_cast %438 : vector<8xf32> to vector<8x1xf32>
    %440 = tpu.reciprocal %439 {approx = true} : vector<8x1xf32> -> vector<8x1xf32>
    %441 = vector.broadcast %440 : vector<8x1xf32> to vector<8x8xf32>
    %442 = arith.mulf %437, %441 : vector<8x8xf32>
    %cst_182 = arith.constant dense<0.000000e+00> : vector<8x8xf32>
    %443 = tpu.matmul %442, %429, %cst_182 {dimension_numbers = #tpu.dot_dimension_numbers<[1], [0], [0], [1], [0, 0, 1, 1], [], []>} : vector<8x8xf32>, vector<8x8xf32>, vector<8x8xf32> -> vector<8x8xf32>
    %444 = vector.extract_strided_slice %412 {offsets = [8, 0], sizes = [8, 8], strides = [1, 1]} : vector<16x8xf32> to vector<8x8xf32>
    %445 = vector.extract_strided_slice %419 {offsets = [8, 0], sizes = [8, 8], strides = [1, 1]} : vector<16x8xf32> to vector<8x8xf32>
    %446 = vector.extract_strided_slice %426 {offsets = [8, 0], sizes = [8, 8], strides = [1, 1]} : vector<16x8xf32> to vector<8x8xf32>
    %cst_183 = arith.constant dense<0.000000e+00> : vector<8x8xf32>
    %447 = tpu.matmul %444, %445, %cst_183 {dimension_numbers = #tpu.dot_dimension_numbers<[1], [1], [0], [0], [0, 0, 1, 0], [], []>} : vector<8x8xf32>, vector<8x8xf32>, vector<8x8xf32> -> vector<8x8xf32>
    %cst_184 = arith.constant 0.353553385 : f32
    %448 = vector.broadcast %cst_184 : f32 to vector<8x8xf32>
    %449 = arith.mulf %447, %448 : vector<8x8xf32>
    %cst_185 = arith.constant dense<0xFF800000> : vector<8xf32>
    %450 = vector.multi_reduction <maximumf>, %449, %cst_185 [1] : vector<8x8xf32> to vector<8xf32>
    %451 = vector.shape_cast %450 : vector<8xf32> to vector<8x1xf32>
    %452 = vector.broadcast %451 : vector<8x1xf32> to vector<8x8xf32>
    %453 = arith.subf %449, %452 : vector<8x8xf32>
    %454 = math.exp %453 : vector<8x8xf32>
    %cst_186 = arith.constant dense<0.000000e+00> : vector<8xf32>
    %455 = vector.multi_reduction <add>, %454, %cst_186 [1] : vector<8x8xf32> to vector<8xf32>
    %456 = vector.shape_cast %455 : vector<8xf32> to vector<8x1xf32>
    %457 = tpu.reciprocal %456 {approx = true} : vector<8x1xf32> -> vector<8x1xf32>
    %458 = vector.broadcast %457 : vector<8x1xf32> to vector<8x8xf32>
    %459 = arith.mulf %454, %458 : vector<8x8xf32>
    %cst_187 = arith.constant dense<0.000000e+00> : vector<8x8xf32>
    %460 = tpu.matmul %459, %446, %cst_187 {dimension_numbers = #tpu.dot_dimension_numbers<[1], [0], [0], [1], [0, 0, 1, 1], [], []>} : vector<8x8xf32>, vector<8x8xf32>, vector<8x8xf32> -> vector<8x8xf32>
    %461 = tpu.concatenate %443, %460 in 0 : vector<8x8xf32>, vector<8x8xf32> -> vector<16x8xf32>
    %462 = vector.extract_strided_slice %344 {offsets = [1, 0, 0], sizes = [1, 8, 32], strides = [1, 1, 1]} : vector<4x8x32xf32> to vector<1x8x32xf32>
    %463 = vector.shape_cast %462 : vector<1x8x32xf32> to vector<8x32xf32>
    %cst_188 = arith.constant dense<0.000000e+00> : vector<16x32xf32>
    %464 = tpu.matmul %461, %463, %cst_188 {dimension_numbers = #tpu.dot_dimension_numbers<[1], [0], [0], [1], [0, 0, 1, 1], [], []>} : vector<16x8xf32>, vector<8x32xf32>, vector<16x32xf32> -> vector<16x32xf32>
    %465 = arith.addf %405, %464 : vector<16x32xf32>
    %466 = vector.extract_strided_slice %332 {offsets = [2, 0, 0], sizes = [1, 32, 8], strides = [1, 1, 1]} : vector<4x32x8xf32> to vector<1x32x8xf32>
    %467 = vector.shape_cast %466 : vector<1x32x8xf32> to vector<32x8xf32>
    %cst_189 = arith.constant dense<0.000000e+00> : vector<16x8xf32>
    %468 = tpu.matmul %330, %467, %cst_189 {dimension_numbers = #tpu.dot_dimension_numbers<[1], [0], [0], [1], [0, 0, 1, 1], [], []>} : vector<16x32xf32>, vector<32x8xf32>, vector<16x8xf32> -> vector<16x8xf32>
    %469 = vector.extract_strided_slice %334 {offsets = [2, 0, 0], sizes = [1, 1, 8], strides = [1, 1, 1]} : vector<4x1x8xf32> to vector<1x1x8xf32>
    %470 = vector.shape_cast %469 : vector<1x1x8xf32> to vector<1x8xf32>
    %471 = vector.broadcast %470 : vector<1x8xf32> to vector<16x8xf32>
    %472 = arith.addf %468, %471 : vector<16x8xf32>
    %473 = vector.extract_strided_slice %336 {offsets = [2, 0, 0], sizes = [1, 32, 8], strides = [1, 1, 1]} : vector<4x32x8xf32> to vector<1x32x8xf32>
    %474 = vector.shape_cast %473 : vector<1x32x8xf32> to vector<32x8xf32>
    %cst_190 = arith.constant dense<0.000000e+00> : vector<16x8xf32>
    %475 = tpu.matmul %330, %474, %cst_190 {dimension_numbers = #tpu.dot_dimension_numbers<[1], [0], [0], [1], [0, 0, 1, 1], [], []>} : vector<16x32xf32>, vector<32x8xf32>, vector<16x8xf32> -> vector<16x8xf32>
    %476 = vector.extract_strided_slice %338 {offsets = [2, 0, 0], sizes = [1, 1, 8], strides = [1, 1, 1]} : vector<4x1x8xf32> to vector<1x1x8xf32>
    %477 = vector.shape_cast %476 : vector<1x1x8xf32> to vector<1x8xf32>
    %478 = vector.broadcast %477 : vector<1x8xf32> to vector<16x8xf32>
    %479 = arith.addf %475, %478 : vector<16x8xf32>
    %480 = vector.extract_strided_slice %340 {offsets = [2, 0, 0], sizes = [1, 32, 8], strides = [1, 1, 1]} : vector<4x32x8xf32> to vector<1x32x8xf32>
    %481 = vector.shape_cast %480 : vector<1x32x8xf32> to vector<32x8xf32>
    %cst_191 = arith.constant dense<0.000000e+00> : vector<16x8xf32>
    %482 = tpu.matmul %330, %481, %cst_191 {dimension_numbers = #tpu.dot_dimension_numbers<[1], [0], [0], [1], [0, 0, 1, 1], [], []>} : vector<16x32xf32>, vector<32x8xf32>, vector<16x8xf32> -> vector<16x8xf32>
    %483 = vector.extract_strided_slice %342 {offsets = [2, 0, 0], sizes = [1, 1, 8], strides = [1, 1, 1]} : vector<4x1x8xf32> to vector<1x1x8xf32>
    %484 = vector.shape_cast %483 : vector<1x1x8xf32> to vector<1x8xf32>
    %485 = vector.broadcast %484 : vector<1x8xf32> to vector<16x8xf32>
    %486 = arith.addf %482, %485 : vector<16x8xf32>
    %487 = vector.extract_strided_slice %472 {offsets = [0, 0], sizes = [8, 8], strides = [1, 1]} : vector<16x8xf32> to vector<8x8xf32>
    %488 = vector.extract_strided_slice %479 {offsets = [0, 0], sizes = [8, 8], strides = [1, 1]} : vector<16x8xf32> to vector<8x8xf32>
    %489 = vector.extract_strided_slice %486 {offsets = [0, 0], sizes = [8, 8], strides = [1, 1]} : vector<16x8xf32> to vector<8x8xf32>
    %cst_192 = arith.constant dense<0.000000e+00> : vector<8x8xf32>
    %490 = tpu.matmul %487, %488, %cst_192 {dimension_numbers = #tpu.dot_dimension_numbers<[1], [1], [0], [0], [0, 0, 1, 0], [], []>} : vector<8x8xf32>, vector<8x8xf32>, vector<8x8xf32> -> vector<8x8xf32>
    %cst_193 = arith.constant 0.353553385 : f32
    %491 = vector.broadcast %cst_193 : f32 to vector<8x8xf32>
    %492 = arith.mulf %490, %491 : vector<8x8xf32>
    %cst_194 = arith.constant dense<0xFF800000> : vector<8xf32>
    %493 = vector.multi_reduction <maximumf>, %492, %cst_194 [1] : vector<8x8xf32> to vector<8xf32>
    %494 = vector.shape_cast %493 : vector<8xf32> to vector<8x1xf32>
    %495 = vector.broadcast %494 : vector<8x1xf32> to vector<8x8xf32>
    %496 = arith.subf %492, %495 : vector<8x8xf32>
    %497 = math.exp %496 : vector<8x8xf32>
    %cst_195 = arith.constant dense<0.000000e+00> : vector<8xf32>
    %498 = vector.multi_reduction <add>, %497, %cst_195 [1] : vector<8x8xf32> to vector<8xf32>
    %499 = vector.shape_cast %498 : vector<8xf32> to vector<8x1xf32>
    %500 = tpu.reciprocal %499 {approx = true} : vector<8x1xf32> -> vector<8x1xf32>
    %501 = vector.broadcast %500 : vector<8x1xf32> to vector<8x8xf32>
    %502 = arith.mulf %497, %501 : vector<8x8xf32>
    %cst_196 = arith.constant dense<0.000000e+00> : vector<8x8xf32>
    %503 = tpu.matmul %502, %489, %cst_196 {dimension_numbers = #tpu.dot_dimension_numbers<[1], [0], [0], [1], [0, 0, 1, 1], [], []>} : vector<8x8xf32>, vector<8x8xf32>, vector<8x8xf32> -> vector<8x8xf32>
    %504 = vector.extract_strided_slice %472 {offsets = [8, 0], sizes = [8, 8], strides = [1, 1]} : vector<16x8xf32> to vector<8x8xf32>
    %505 = vector.extract_strided_slice %479 {offsets = [8, 0], sizes = [8, 8], strides = [1, 1]} : vector<16x8xf32> to vector<8x8xf32>
    %506 = vector.extract_strided_slice %486 {offsets = [8, 0], sizes = [8, 8], strides = [1, 1]} : vector<16x8xf32> to vector<8x8xf32>
    %cst_197 = arith.constant dense<0.000000e+00> : vector<8x8xf32>
    %507 = tpu.matmul %504, %505, %cst_197 {dimension_numbers = #tpu.dot_dimension_numbers<[1], [1], [0], [0], [0, 0, 1, 0], [], []>} : vector<8x8xf32>, vector<8x8xf32>, vector<8x8xf32> -> vector<8x8xf32>
    %cst_198 = arith.constant 0.353553385 : f32
    %508 = vector.broadcast %cst_198 : f32 to vector<8x8xf32>
    %509 = arith.mulf %507, %508 : vector<8x8xf32>
    %cst_199 = arith.constant dense<0xFF800000> : vector<8xf32>
    %510 = vector.multi_reduction <maximumf>, %509, %cst_199 [1] : vector<8x8xf32> to vector<8xf32>
    %511 = vector.shape_cast %510 : vector<8xf32> to vector<8x1xf32>
    %512 = vector.broadcast %511 : vector<8x1xf32> to vector<8x8xf32>
    %513 = arith.subf %509, %512 : vector<8x8xf32>
    %514 = math.exp %513 : vector<8x8xf32>
    %cst_200 = arith.constant dense<0.000000e+00> : vector<8xf32>
    %515 = vector.multi_reduction <add>, %514, %cst_200 [1] : vector<8x8xf32> to vector<8xf32>
    %516 = vector.shape_cast %515 : vector<8xf32> to vector<8x1xf32>
    %517 = tpu.reciprocal %516 {approx = true} : vector<8x1xf32> -> vector<8x1xf32>
    %518 = vector.broadcast %517 : vector<8x1xf32> to vector<8x8xf32>
    %519 = arith.mulf %514, %518 : vector<8x8xf32>
    %cst_201 = arith.constant dense<0.000000e+00> : vector<8x8xf32>
    %520 = tpu.matmul %519, %506, %cst_201 {dimension_numbers = #tpu.dot_dimension_numbers<[1], [0], [0], [1], [0, 0, 1, 1], [], []>} : vector<8x8xf32>, vector<8x8xf32>, vector<8x8xf32> -> vector<8x8xf32>
    %521 = tpu.concatenate %503, %520 in 0 : vector<8x8xf32>, vector<8x8xf32> -> vector<16x8xf32>
    %522 = vector.extract_strided_slice %344 {offsets = [2, 0, 0], sizes = [1, 8, 32], strides = [1, 1, 1]} : vector<4x8x32xf32> to vector<1x8x32xf32>
    %523 = vector.shape_cast %522 : vector<1x8x32xf32> to vector<8x32xf32>
    %cst_202 = arith.constant dense<0.000000e+00> : vector<16x32xf32>
    %524 = tpu.matmul %521, %523, %cst_202 {dimension_numbers = #tpu.dot_dimension_numbers<[1], [0], [0], [1], [0, 0, 1, 1], [], []>} : vector<16x8xf32>, vector<8x32xf32>, vector<16x32xf32> -> vector<16x32xf32>
    %525 = arith.addf %465, %524 : vector<16x32xf32>
    %526 = vector.extract_strided_slice %332 {offsets = [3, 0, 0], sizes = [1, 32, 8], strides = [1, 1, 1]} : vector<4x32x8xf32> to vector<1x32x8xf32>
    %527 = vector.shape_cast %526 : vector<1x32x8xf32> to vector<32x8xf32>
    %cst_203 = arith.constant dense<0.000000e+00> : vector<16x8xf32>
    %528 = tpu.matmul %330, %527, %cst_203 {dimension_numbers = #tpu.dot_dimension_numbers<[1], [0], [0], [1], [0, 0, 1, 1], [], []>} : vector<16x32xf32>, vector<32x8xf32>, vector<16x8xf32> -> vector<16x8xf32>
    %529 = vector.extract_strided_slice %334 {offsets = [3, 0, 0], sizes = [1, 1, 8], strides = [1, 1, 1]} : vector<4x1x8xf32> to vector<1x1x8xf32>
    %530 = vector.shape_cast %529 : vector<1x1x8xf32> to vector<1x8xf32>
    %531 = vector.broadcast %530 : vector<1x8xf32> to vector<16x8xf32>
    %532 = arith.addf %528, %531 : vector<16x8xf32>
    %533 = vector.extract_strided_slice %336 {offsets = [3, 0, 0], sizes = [1, 32, 8], strides = [1, 1, 1]} : vector<4x32x8xf32> to vector<1x32x8xf32>
    %534 = vector.shape_cast %533 : vector<1x32x8xf32> to vector<32x8xf32>
    %cst_204 = arith.constant dense<0.000000e+00> : vector<16x8xf32>
    %535 = tpu.matmul %330, %534, %cst_204 {dimension_numbers = #tpu.dot_dimension_numbers<[1], [0], [0], [1], [0, 0, 1, 1], [], []>} : vector<16x32xf32>, vector<32x8xf32>, vector<16x8xf32> -> vector<16x8xf32>
    %536 = vector.extract_strided_slice %338 {offsets = [3, 0, 0], sizes = [1, 1, 8], strides = [1, 1, 1]} : vector<4x1x8xf32> to vector<1x1x8xf32>
    %537 = vector.shape_cast %536 : vector<1x1x8xf32> to vector<1x8xf32>
    %538 = vector.broadcast %537 : vector<1x8xf32> to vector<16x8xf32>
    %539 = arith.addf %535, %538 : vector<16x8xf32>
    %540 = vector.extract_strided_slice %340 {offsets = [3, 0, 0], sizes = [1, 32, 8], strides = [1, 1, 1]} : vector<4x32x8xf32> to vector<1x32x8xf32>
    %541 = vector.shape_cast %540 : vector<1x32x8xf32> to vector<32x8xf32>
    %cst_205 = arith.constant dense<0.000000e+00> : vector<16x8xf32>
    %542 = tpu.matmul %330, %541, %cst_205 {dimension_numbers = #tpu.dot_dimension_numbers<[1], [0], [0], [1], [0, 0, 1, 1], [], []>} : vector<16x32xf32>, vector<32x8xf32>, vector<16x8xf32> -> vector<16x8xf32>
    %543 = vector.extract_strided_slice %342 {offsets = [3, 0, 0], sizes = [1, 1, 8], strides = [1, 1, 1]} : vector<4x1x8xf32> to vector<1x1x8xf32>
    %544 = vector.shape_cast %543 : vector<1x1x8xf32> to vector<1x8xf32>
    %545 = vector.broadcast %544 : vector<1x8xf32> to vector<16x8xf32>
    %546 = arith.addf %542, %545 : vector<16x8xf32>
    %547 = vector.extract_strided_slice %532 {offsets = [0, 0], sizes = [8, 8], strides = [1, 1]} : vector<16x8xf32> to vector<8x8xf32>
    %548 = vector.extract_strided_slice %539 {offsets = [0, 0], sizes = [8, 8], strides = [1, 1]} : vector<16x8xf32> to vector<8x8xf32>
    %549 = vector.extract_strided_slice %546 {offsets = [0, 0], sizes = [8, 8], strides = [1, 1]} : vector<16x8xf32> to vector<8x8xf32>
    %cst_206 = arith.constant dense<0.000000e+00> : vector<8x8xf32>
    %550 = tpu.matmul %547, %548, %cst_206 {dimension_numbers = #tpu.dot_dimension_numbers<[1], [1], [0], [0], [0, 0, 1, 0], [], []>} : vector<8x8xf32>, vector<8x8xf32>, vector<8x8xf32> -> vector<8x8xf32>
    %cst_207 = arith.constant 0.353553385 : f32
    %551 = vector.broadcast %cst_207 : f32 to vector<8x8xf32>
    %552 = arith.mulf %550, %551 : vector<8x8xf32>
    %cst_208 = arith.constant dense<0xFF800000> : vector<8xf32>
    %553 = vector.multi_reduction <maximumf>, %552, %cst_208 [1] : vector<8x8xf32> to vector<8xf32>
    %554 = vector.shape_cast %553 : vector<8xf32> to vector<8x1xf32>
    %555 = vector.broadcast %554 : vector<8x1xf32> to vector<8x8xf32>
    %556 = arith.subf %552, %555 : vector<8x8xf32>
    %557 = math.exp %556 : vector<8x8xf32>
    %cst_209 = arith.constant dense<0.000000e+00> : vector<8xf32>
    %558 = vector.multi_reduction <add>, %557, %cst_209 [1] : vector<8x8xf32> to vector<8xf32>
    %559 = vector.shape_cast %558 : vector<8xf32> to vector<8x1xf32>
    %560 = tpu.reciprocal %559 {approx = true} : vector<8x1xf32> -> vector<8x1xf32>
    %561 = vector.broadcast %560 : vector<8x1xf32> to vector<8x8xf32>
    %562 = arith.mulf %557, %561 : vector<8x8xf32>
    %cst_210 = arith.constant dense<0.000000e+00> : vector<8x8xf32>
    %563 = tpu.matmul %562, %549, %cst_210 {dimension_numbers = #tpu.dot_dimension_numbers<[1], [0], [0], [1], [0, 0, 1, 1], [], []>} : vector<8x8xf32>, vector<8x8xf32>, vector<8x8xf32> -> vector<8x8xf32>
    %564 = vector.extract_strided_slice %532 {offsets = [8, 0], sizes = [8, 8], strides = [1, 1]} : vector<16x8xf32> to vector<8x8xf32>
    %565 = vector.extract_strided_slice %539 {offsets = [8, 0], sizes = [8, 8], strides = [1, 1]} : vector<16x8xf32> to vector<8x8xf32>
    %566 = vector.extract_strided_slice %546 {offsets = [8, 0], sizes = [8, 8], strides = [1, 1]} : vector<16x8xf32> to vector<8x8xf32>
    %cst_211 = arith.constant dense<0.000000e+00> : vector<8x8xf32>
    %567 = tpu.matmul %564, %565, %cst_211 {dimension_numbers = #tpu.dot_dimension_numbers<[1], [1], [0], [0], [0, 0, 1, 0], [], []>} : vector<8x8xf32>, vector<8x8xf32>, vector<8x8xf32> -> vector<8x8xf32>
    %cst_212 = arith.constant 0.353553385 : f32
    %568 = vector.broadcast %cst_212 : f32 to vector<8x8xf32>
    %569 = arith.mulf %567, %568 : vector<8x8xf32>
    %cst_213 = arith.constant dense<0xFF800000> : vector<8xf32>
    %570 = vector.multi_reduction <maximumf>, %569, %cst_213 [1] : vector<8x8xf32> to vector<8xf32>
    %571 = vector.shape_cast %570 : vector<8xf32> to vector<8x1xf32>
    %572 = vector.broadcast %571 : vector<8x1xf32> to vector<8x8xf32>
    %573 = arith.subf %569, %572 : vector<8x8xf32>
    %574 = math.exp %573 : vector<8x8xf32>
    %cst_214 = arith.constant dense<0.000000e+00> : vector<8xf32>
    %575 = vector.multi_reduction <add>, %574, %cst_214 [1] : vector<8x8xf32> to vector<8xf32>
    %576 = vector.shape_cast %575 : vector<8xf32> to vector<8x1xf32>
    %577 = tpu.reciprocal %576 {approx = true} : vector<8x1xf32> -> vector<8x1xf32>
    %578 = vector.broadcast %577 : vector<8x1xf32> to vector<8x8xf32>
    %579 = arith.mulf %574, %578 : vector<8x8xf32>
    %cst_215 = arith.constant dense<0.000000e+00> : vector<8x8xf32>
    %580 = tpu.matmul %579, %566, %cst_215 {dimension_numbers = #tpu.dot_dimension_numbers<[1], [0], [0], [1], [0, 0, 1, 1], [], []>} : vector<8x8xf32>, vector<8x8xf32>, vector<8x8xf32> -> vector<8x8xf32>
    %581 = tpu.concatenate %563, %580 in 0 : vector<8x8xf32>, vector<8x8xf32> -> vector<16x8xf32>
    %582 = vector.extract_strided_slice %344 {offsets = [3, 0, 0], sizes = [1, 8, 32], strides = [1, 1, 1]} : vector<4x8x32xf32> to vector<1x8x32xf32>
    %583 = vector.shape_cast %582 : vector<1x8x32xf32> to vector<8x32xf32>
    %cst_216 = arith.constant dense<0.000000e+00> : vector<16x32xf32>
    %584 = tpu.matmul %581, %583, %cst_216 {dimension_numbers = #tpu.dot_dimension_numbers<[1], [0], [0], [1], [0, 0, 1, 1], [], []>} : vector<16x8xf32>, vector<8x32xf32>, vector<16x32xf32> -> vector<16x32xf32>
    %585 = arith.addf %525, %584 : vector<16x32xf32>
    %586 = vector.broadcast %346 : vector<1x32xf32> to vector<16x32xf32>
    %587 = arith.addf %585, %586 : vector<16x32xf32>
    %588 = arith.addf %330, %587 : vector<16x32xf32>
    %c1_217 = arith.constant 1 : index
    %c0_218 = arith.constant 0 : index
    %c0_219 = arith.constant 0 : index
    %589 = vector.load %arg17[%c1_217, %c0_218, %c0_219] : memref<2x1x32xf32, #tpu.memory_space<vmem>>, vector<1x1x32xf32>
    %590 = vector.shape_cast %589 : vector<1x1x32xf32> to vector<1x32xf32>
    %c1_220 = arith.constant 1 : index
    %c0_221 = arith.constant 0 : index
    %c0_222 = arith.constant 0 : index
    %591 = vector.load %arg18[%c1_220, %c0_221, %c0_222] : memref<2x1x32xf32, #tpu.memory_space<vmem>>, vector<1x1x32xf32>
    %592 = vector.shape_cast %591 : vector<1x1x32xf32> to vector<1x32xf32>
    %cst_223 = arith.constant dense<0.000000e+00> : vector<16xf32>
    %593 = vector.multi_reduction <add>, %588, %cst_223 [1] : vector<16x32xf32> to vector<16xf32>
    %594 = vector.shape_cast %593 : vector<16xf32> to vector<16x1xf32>
    %cst_224 = arith.constant 3.200000e+01 : f32
    %595 = vector.broadcast %cst_224 : f32 to vector<16x1xf32>
    %596 = arith.divf %594, %595 : vector<16x1xf32>
    %597 = vector.broadcast %596 : vector<16x1xf32> to vector<16x32xf32>
    %598 = arith.subf %588, %597 : vector<16x32xf32>
    %599 = arith.mulf %598, %598 : vector<16x32xf32>
    %cst_225 = arith.constant dense<0.000000e+00> : vector<16xf32>
    %600 = vector.multi_reduction <add>, %599, %cst_225 [1] : vector<16x32xf32> to vector<16xf32>
    %601 = vector.shape_cast %600 : vector<16xf32> to vector<16x1xf32>
    %cst_226 = arith.constant 3.200000e+01 : f32
    %602 = vector.broadcast %cst_226 : f32 to vector<16x1xf32>
    %603 = arith.divf %601, %602 : vector<16x1xf32>
    %cst_227 = arith.constant 9.99999974E-6 : f32
    %604 = vector.broadcast %cst_227 : f32 to vector<16x1xf32>
    %605 = arith.addf %603, %604 : vector<16x1xf32>
    %606 = math.rsqrt %605 : vector<16x1xf32>
    %607 = vector.broadcast %606 : vector<16x1xf32> to vector<16x32xf32>
    %608 = arith.mulf %598, %607 : vector<16x32xf32>
    %609 = vector.broadcast %590 : vector<1x32xf32> to vector<16x32xf32>
    %610 = arith.mulf %608, %609 : vector<16x32xf32>
    %611 = vector.broadcast %592 : vector<1x32xf32> to vector<16x32xf32>
    %612 = arith.addf %610, %611 : vector<16x32xf32>
    %c1_228 = arith.constant 1 : index
    %c0_229 = arith.constant 0 : index
    %c0_230 = arith.constant 0 : index
    %613 = vector.load %arg19[%c1_228, %c0_229, %c0_230] : memref<2x32x64xf32, #tpu.memory_space<vmem>>, vector<1x32x64xf32>
    %614 = vector.shape_cast %613 : vector<1x32x64xf32> to vector<32x64xf32>
    %cst_231 = arith.constant dense<0.000000e+00> : vector<16x64xf32>
    %615 = tpu.matmul %612, %614, %cst_231 {dimension_numbers = #tpu.dot_dimension_numbers<[1], [0], [0], [1], [0, 0, 1, 1], [], []>} : vector<16x32xf32>, vector<32x64xf32>, vector<16x64xf32> -> vector<16x64xf32>
    %c1_232 = arith.constant 1 : index
    %c0_233 = arith.constant 0 : index
    %c0_234 = arith.constant 0 : index
    %616 = vector.load %arg20[%c1_232, %c0_233, %c0_234] : memref<2x1x64xf32, #tpu.memory_space<vmem>>, vector<1x1x64xf32>
    %617 = vector.shape_cast %616 : vector<1x1x64xf32> to vector<1x64xf32>
    %618 = vector.broadcast %617 : vector<1x64xf32> to vector<16x64xf32>
    %619 = arith.addf %615, %618 : vector<16x64xf32>
    %cst_235 = arith.constant 0.000000e+00 : f32
    %620 = vector.broadcast %cst_235 : f32 to vector<16x64xf32>
    %621 = arith.maximumf %619, %620 : vector<16x64xf32>
    %c1_236 = arith.constant 1 : index
    %c0_237 = arith.constant 0 : index
    %c0_238 = arith.constant 0 : index
    %622 = vector.load %arg21[%c1_236, %c0_237, %c0_238] : memref<2x64x32xf32, #tpu.memory_space<vmem>>, vector<1x64x32xf32>
    %623 = vector.shape_cast %622 : vector<1x64x32xf32> to vector<64x32xf32>
    %cst_239 = arith.constant dense<0.000000e+00> : vector<16x32xf32>
    %624 = tpu.matmul %621, %623, %cst_239 {dimension_numbers = #tpu.dot_dimension_numbers<[1], [0], [0], [1], [0, 0, 1, 1], [], []>} : vector<16x64xf32>, vector<64x32xf32>, vector<16x32xf32> -> vector<16x32xf32>
    %c1_240 = arith.constant 1 : index
    %c0_241 = arith.constant 0 : index
    %c0_242 = arith.constant 0 : index
    %625 = vector.load %arg22[%c1_240, %c0_241, %c0_242] : memref<2x1x32xf32, #tpu.memory_space<vmem>>, vector<1x1x32xf32>
    %626 = vector.shape_cast %625 : vector<1x1x32xf32> to vector<1x32xf32>
    %627 = vector.broadcast %626 : vector<1x32xf32> to vector<16x32xf32>
    %628 = arith.addf %624, %627 : vector<16x32xf32>
    %629 = arith.addf %612, %628 : vector<16x32xf32>
    %c1_243 = arith.constant 1 : index
    %c0_244 = arith.constant 0 : index
    %c0_245 = arith.constant 0 : index
    %630 = vector.load %arg23[%c1_243, %c0_244, %c0_245] : memref<2x1x32xf32, #tpu.memory_space<vmem>>, vector<1x1x32xf32>
    %631 = vector.shape_cast %630 : vector<1x1x32xf32> to vector<1x32xf32>
    %c1_246 = arith.constant 1 : index
    %c0_247 = arith.constant 0 : index
    %c0_248 = arith.constant 0 : index
    %632 = vector.load %arg24[%c1_246, %c0_247, %c0_248] : memref<2x1x32xf32, #tpu.memory_space<vmem>>, vector<1x1x32xf32>
    %633 = vector.shape_cast %632 : vector<1x1x32xf32> to vector<1x32xf32>
    %cst_249 = arith.constant dense<0.000000e+00> : vector<16xf32>
    %634 = vector.multi_reduction <add>, %629, %cst_249 [1] : vector<16x32xf32> to vector<16xf32>
    %635 = vector.shape_cast %634 : vector<16xf32> to vector<16x1xf32>
    %cst_250 = arith.constant 3.200000e+01 : f32
    %636 = vector.broadcast %cst_250 : f32 to vector<16x1xf32>
    %637 = arith.divf %635, %636 : vector<16x1xf32>
    %638 = vector.broadcast %637 : vector<16x1xf32> to vector<16x32xf32>
    %639 = arith.subf %629, %638 : vector<16x32xf32>
    %640 = arith.mulf %639, %639 : vector<16x32xf32>
    %cst_251 = arith.constant dense<0.000000e+00> : vector<16xf32>
    %641 = vector.multi_reduction <add>, %640, %cst_251 [1] : vector<16x32xf32> to vector<16xf32>
    %642 = vector.shape_cast %641 : vector<16xf32> to vector<16x1xf32>
    %cst_252 = arith.constant 3.200000e+01 : f32
    %643 = vector.broadcast %cst_252 : f32 to vector<16x1xf32>
    %644 = arith.divf %642, %643 : vector<16x1xf32>
    %cst_253 = arith.constant 9.99999974E-6 : f32
    %645 = vector.broadcast %cst_253 : f32 to vector<16x1xf32>
    %646 = arith.addf %644, %645 : vector<16x1xf32>
    %647 = math.rsqrt %646 : vector<16x1xf32>
    %648 = vector.broadcast %647 : vector<16x1xf32> to vector<16x32xf32>
    %649 = arith.mulf %639, %648 : vector<16x32xf32>
    %650 = vector.broadcast %631 : vector<1x32xf32> to vector<16x32xf32>
    %651 = arith.mulf %649, %650 : vector<16x32xf32>
    %652 = vector.broadcast %633 : vector<1x32xf32> to vector<16x32xf32>
    %653 = arith.addf %651, %652 : vector<16x32xf32>
    %c0_254 = arith.constant 0 : index
    %c0_255 = arith.constant 0 : index
    %654 = vector.load %arg2[%c0_254, %c0_255] : memref<16x1xf32, #tpu.memory_space<vmem>>, vector<16x1xf32>
    %c0_256 = arith.constant 0 : index
    %c0_257 = arith.constant 0 : index
    %655 = vector.load %arg5[%c0_256, %c0_257] : memref<1x32xf32, #tpu.memory_space<vmem>>, vector<1x32xf32>
    %cst_258 = arith.constant dense<0.000000e+00> : vector<16x32xf32>
    %656 = tpu.matmul %654, %655, %cst_258 {dimension_numbers = #tpu.dot_dimension_numbers<[1], [0], [0], [1], [0, 0, 1, 1], [], []>} : vector<16x1xf32>, vector<1x32xf32>, vector<16x32xf32> -> vector<16x32xf32>
    %c0_259 = arith.constant 0 : index
    %c0_260 = arith.constant 0 : index
    %657 = vector.load %arg6[%c0_259, %c0_260] : memref<1x32xf32, #tpu.memory_space<vmem>>, vector<1x32xf32>
    %658 = vector.broadcast %657 : vector<1x32xf32> to vector<16x32xf32>
    %659 = arith.addf %656, %658 : vector<16x32xf32>
    %c0_261 = arith.constant 0 : index
    %c0_262 = arith.constant 0 : index
    %c0_263 = arith.constant 0 : index
    %c0_264 = arith.constant 0 : index
    %660 = vector.load %arg25[%c0_261, %c0_262, %c0_263, %c0_264] : memref<2x4x32x8xf32, #tpu.memory_space<vmem>>, vector<1x4x32x8xf32>
    %661 = vector.shape_cast %660 : vector<1x4x32x8xf32> to vector<4x32x8xf32>
    %c0_265 = arith.constant 0 : index
    %c0_266 = arith.constant 0 : index
    %c0_267 = arith.constant 0 : index
    %c0_268 = arith.constant 0 : index
    %662 = vector.load %arg26[%c0_265, %c0_266, %c0_267, %c0_268] : memref<2x4x1x8xf32, #tpu.memory_space<vmem>>, vector<1x4x1x8xf32>
    %663 = vector.shape_cast %662 : vector<1x4x1x8xf32> to vector<4x1x8xf32>
    %c0_269 = arith.constant 0 : index
    %c0_270 = arith.constant 0 : index
    %c0_271 = arith.constant 0 : index
    %c0_272 = arith.constant 0 : index
    %664 = vector.load %arg27[%c0_269, %c0_270, %c0_271, %c0_272] : memref<2x4x32x8xf32, #tpu.memory_space<vmem>>, vector<1x4x32x8xf32>
    %665 = vector.shape_cast %664 : vector<1x4x32x8xf32> to vector<4x32x8xf32>
    %c0_273 = arith.constant 0 : index
    %c0_274 = arith.constant 0 : index
    %c0_275 = arith.constant 0 : index
    %c0_276 = arith.constant 0 : index
    %666 = vector.load %arg28[%c0_273, %c0_274, %c0_275, %c0_276] : memref<2x4x1x8xf32, #tpu.memory_space<vmem>>, vector<1x4x1x8xf32>
    %667 = vector.shape_cast %666 : vector<1x4x1x8xf32> to vector<4x1x8xf32>
    %c0_277 = arith.constant 0 : index
    %c0_278 = arith.constant 0 : index
    %c0_279 = arith.constant 0 : index
    %c0_280 = arith.constant 0 : index
    %668 = vector.load %arg29[%c0_277, %c0_278, %c0_279, %c0_280] : memref<2x4x32x8xf32, #tpu.memory_space<vmem>>, vector<1x4x32x8xf32>
    %669 = vector.shape_cast %668 : vector<1x4x32x8xf32> to vector<4x32x8xf32>
    %c0_281 = arith.constant 0 : index
    %c0_282 = arith.constant 0 : index
    %c0_283 = arith.constant 0 : index
    %c0_284 = arith.constant 0 : index
    %670 = vector.load %arg30[%c0_281, %c0_282, %c0_283, %c0_284] : memref<2x4x1x8xf32, #tpu.memory_space<vmem>>, vector<1x4x1x8xf32>
    %671 = vector.shape_cast %670 : vector<1x4x1x8xf32> to vector<4x1x8xf32>
    %c0_285 = arith.constant 0 : index
    %c0_286 = arith.constant 0 : index
    %c0_287 = arith.constant 0 : index
    %c0_288 = arith.constant 0 : index
    %672 = vector.load %arg31[%c0_285, %c0_286, %c0_287, %c0_288] : memref<2x4x8x32xf32, #tpu.memory_space<vmem>>, vector<1x4x8x32xf32>
    %673 = vector.shape_cast %672 : vector<1x4x8x32xf32> to vector<4x8x32xf32>
    %c0_289 = arith.constant 0 : index
    %c0_290 = arith.constant 0 : index
    %c0_291 = arith.constant 0 : index
    %674 = vector.load %arg32[%c0_289, %c0_290, %c0_291] : memref<2x1x32xf32, #tpu.memory_space<vmem>>, vector<1x1x32xf32>
    %675 = vector.shape_cast %674 : vector<1x1x32xf32> to vector<1x32xf32>
    %676 = vector.extract_strided_slice %661 {offsets = [0, 0, 0], sizes = [1, 32, 8], strides = [1, 1, 1]} : vector<4x32x8xf32> to vector<1x32x8xf32>
    %677 = vector.shape_cast %676 : vector<1x32x8xf32> to vector<32x8xf32>
    %cst_292 = arith.constant dense<0.000000e+00> : vector<16x8xf32>
    %678 = tpu.matmul %659, %677, %cst_292 {dimension_numbers = #tpu.dot_dimension_numbers<[1], [0], [0], [1], [0, 0, 1, 1], [], []>} : vector<16x32xf32>, vector<32x8xf32>, vector<16x8xf32> -> vector<16x8xf32>
    %679 = vector.extract_strided_slice %663 {offsets = [0, 0, 0], sizes = [1, 1, 8], strides = [1, 1, 1]} : vector<4x1x8xf32> to vector<1x1x8xf32>
    %680 = vector.shape_cast %679 : vector<1x1x8xf32> to vector<1x8xf32>
    %681 = vector.broadcast %680 : vector<1x8xf32> to vector<16x8xf32>
    %682 = arith.addf %678, %681 : vector<16x8xf32>
    %683 = vector.extract_strided_slice %665 {offsets = [0, 0, 0], sizes = [1, 32, 8], strides = [1, 1, 1]} : vector<4x32x8xf32> to vector<1x32x8xf32>
    %684 = vector.shape_cast %683 : vector<1x32x8xf32> to vector<32x8xf32>
    %cst_293 = arith.constant dense<0.000000e+00> : vector<16x8xf32>
    %685 = tpu.matmul %659, %684, %cst_293 {dimension_numbers = #tpu.dot_dimension_numbers<[1], [0], [0], [1], [0, 0, 1, 1], [], []>} : vector<16x32xf32>, vector<32x8xf32>, vector<16x8xf32> -> vector<16x8xf32>
    %686 = vector.extract_strided_slice %667 {offsets = [0, 0, 0], sizes = [1, 1, 8], strides = [1, 1, 1]} : vector<4x1x8xf32> to vector<1x1x8xf32>
    %687 = vector.shape_cast %686 : vector<1x1x8xf32> to vector<1x8xf32>
    %688 = vector.broadcast %687 : vector<1x8xf32> to vector<16x8xf32>
    %689 = arith.addf %685, %688 : vector<16x8xf32>
    %690 = vector.extract_strided_slice %669 {offsets = [0, 0, 0], sizes = [1, 32, 8], strides = [1, 1, 1]} : vector<4x32x8xf32> to vector<1x32x8xf32>
    %691 = vector.shape_cast %690 : vector<1x32x8xf32> to vector<32x8xf32>
    %cst_294 = arith.constant dense<0.000000e+00> : vector<16x8xf32>
    %692 = tpu.matmul %659, %691, %cst_294 {dimension_numbers = #tpu.dot_dimension_numbers<[1], [0], [0], [1], [0, 0, 1, 1], [], []>} : vector<16x32xf32>, vector<32x8xf32>, vector<16x8xf32> -> vector<16x8xf32>
    %693 = vector.extract_strided_slice %671 {offsets = [0, 0, 0], sizes = [1, 1, 8], strides = [1, 1, 1]} : vector<4x1x8xf32> to vector<1x1x8xf32>
    %694 = vector.shape_cast %693 : vector<1x1x8xf32> to vector<1x8xf32>
    %695 = vector.broadcast %694 : vector<1x8xf32> to vector<16x8xf32>
    %696 = arith.addf %692, %695 : vector<16x8xf32>
    %697 = vector.extract_strided_slice %682 {offsets = [0, 0], sizes = [8, 8], strides = [1, 1]} : vector<16x8xf32> to vector<8x8xf32>
    %698 = vector.extract_strided_slice %689 {offsets = [0, 0], sizes = [8, 8], strides = [1, 1]} : vector<16x8xf32> to vector<8x8xf32>
    %699 = vector.extract_strided_slice %696 {offsets = [0, 0], sizes = [8, 8], strides = [1, 1]} : vector<16x8xf32> to vector<8x8xf32>
    %cst_295 = arith.constant dense<0.000000e+00> : vector<8x8xf32>
    %700 = tpu.matmul %697, %698, %cst_295 {dimension_numbers = #tpu.dot_dimension_numbers<[1], [1], [0], [0], [0, 0, 1, 0], [], []>} : vector<8x8xf32>, vector<8x8xf32>, vector<8x8xf32> -> vector<8x8xf32>
    %cst_296 = arith.constant 0.353553385 : f32
    %701 = vector.broadcast %cst_296 : f32 to vector<8x8xf32>
    %702 = arith.mulf %700, %701 : vector<8x8xf32>
    %cst_297 = arith.constant dense<0xFF800000> : vector<8xf32>
    %703 = vector.multi_reduction <maximumf>, %702, %cst_297 [1] : vector<8x8xf32> to vector<8xf32>
    %704 = vector.shape_cast %703 : vector<8xf32> to vector<8x1xf32>
    %705 = vector.broadcast %704 : vector<8x1xf32> to vector<8x8xf32>
    %706 = arith.subf %702, %705 : vector<8x8xf32>
    %707 = math.exp %706 : vector<8x8xf32>
    %cst_298 = arith.constant dense<0.000000e+00> : vector<8xf32>
    %708 = vector.multi_reduction <add>, %707, %cst_298 [1] : vector<8x8xf32> to vector<8xf32>
    %709 = vector.shape_cast %708 : vector<8xf32> to vector<8x1xf32>
    %710 = tpu.reciprocal %709 {approx = true} : vector<8x1xf32> -> vector<8x1xf32>
    %711 = vector.broadcast %710 : vector<8x1xf32> to vector<8x8xf32>
    %712 = arith.mulf %707, %711 : vector<8x8xf32>
    %cst_299 = arith.constant dense<0.000000e+00> : vector<8x8xf32>
    %713 = tpu.matmul %712, %699, %cst_299 {dimension_numbers = #tpu.dot_dimension_numbers<[1], [0], [0], [1], [0, 0, 1, 1], [], []>} : vector<8x8xf32>, vector<8x8xf32>, vector<8x8xf32> -> vector<8x8xf32>
    %714 = vector.extract_strided_slice %682 {offsets = [8, 0], sizes = [8, 8], strides = [1, 1]} : vector<16x8xf32> to vector<8x8xf32>
    %715 = vector.extract_strided_slice %689 {offsets = [8, 0], sizes = [8, 8], strides = [1, 1]} : vector<16x8xf32> to vector<8x8xf32>
    %716 = vector.extract_strided_slice %696 {offsets = [8, 0], sizes = [8, 8], strides = [1, 1]} : vector<16x8xf32> to vector<8x8xf32>
    %cst_300 = arith.constant dense<0.000000e+00> : vector<8x8xf32>
    %717 = tpu.matmul %714, %715, %cst_300 {dimension_numbers = #tpu.dot_dimension_numbers<[1], [1], [0], [0], [0, 0, 1, 0], [], []>} : vector<8x8xf32>, vector<8x8xf32>, vector<8x8xf32> -> vector<8x8xf32>
    %cst_301 = arith.constant 0.353553385 : f32
    %718 = vector.broadcast %cst_301 : f32 to vector<8x8xf32>
    %719 = arith.mulf %717, %718 : vector<8x8xf32>
    %cst_302 = arith.constant dense<0xFF800000> : vector<8xf32>
    %720 = vector.multi_reduction <maximumf>, %719, %cst_302 [1] : vector<8x8xf32> to vector<8xf32>
    %721 = vector.shape_cast %720 : vector<8xf32> to vector<8x1xf32>
    %722 = vector.broadcast %721 : vector<8x1xf32> to vector<8x8xf32>
    %723 = arith.subf %719, %722 : vector<8x8xf32>
    %724 = math.exp %723 : vector<8x8xf32>
    %cst_303 = arith.constant dense<0.000000e+00> : vector<8xf32>
    %725 = vector.multi_reduction <add>, %724, %cst_303 [1] : vector<8x8xf32> to vector<8xf32>
    %726 = vector.shape_cast %725 : vector<8xf32> to vector<8x1xf32>
    %727 = tpu.reciprocal %726 {approx = true} : vector<8x1xf32> -> vector<8x1xf32>
    %728 = vector.broadcast %727 : vector<8x1xf32> to vector<8x8xf32>
    %729 = arith.mulf %724, %728 : vector<8x8xf32>
    %cst_304 = arith.constant dense<0.000000e+00> : vector<8x8xf32>
    %730 = tpu.matmul %729, %716, %cst_304 {dimension_numbers = #tpu.dot_dimension_numbers<[1], [0], [0], [1], [0, 0, 1, 1], [], []>} : vector<8x8xf32>, vector<8x8xf32>, vector<8x8xf32> -> vector<8x8xf32>
    %731 = tpu.concatenate %713, %730 in 0 : vector<8x8xf32>, vector<8x8xf32> -> vector<16x8xf32>
    %732 = vector.extract_strided_slice %673 {offsets = [0, 0, 0], sizes = [1, 8, 32], strides = [1, 1, 1]} : vector<4x8x32xf32> to vector<1x8x32xf32>
    %733 = vector.shape_cast %732 : vector<1x8x32xf32> to vector<8x32xf32>
    %cst_305 = arith.constant dense<0.000000e+00> : vector<16x32xf32>
    %734 = tpu.matmul %731, %733, %cst_305 {dimension_numbers = #tpu.dot_dimension_numbers<[1], [0], [0], [1], [0, 0, 1, 1], [], []>} : vector<16x8xf32>, vector<8x32xf32>, vector<16x32xf32> -> vector<16x32xf32>
    %735 = vector.extract_strided_slice %661 {offsets = [1, 0, 0], sizes = [1, 32, 8], strides = [1, 1, 1]} : vector<4x32x8xf32> to vector<1x32x8xf32>
    %736 = vector.shape_cast %735 : vector<1x32x8xf32> to vector<32x8xf32>
    %cst_306 = arith.constant dense<0.000000e+00> : vector<16x8xf32>
    %737 = tpu.matmul %659, %736, %cst_306 {dimension_numbers = #tpu.dot_dimension_numbers<[1], [0], [0], [1], [0, 0, 1, 1], [], []>} : vector<16x32xf32>, vector<32x8xf32>, vector<16x8xf32> -> vector<16x8xf32>
    %738 = vector.extract_strided_slice %663 {offsets = [1, 0, 0], sizes = [1, 1, 8], strides = [1, 1, 1]} : vector<4x1x8xf32> to vector<1x1x8xf32>
    %739 = vector.shape_cast %738 : vector<1x1x8xf32> to vector<1x8xf32>
    %740 = vector.broadcast %739 : vector<1x8xf32> to vector<16x8xf32>
    %741 = arith.addf %737, %740 : vector<16x8xf32>
    %742 = vector.extract_strided_slice %665 {offsets = [1, 0, 0], sizes = [1, 32, 8], strides = [1, 1, 1]} : vector<4x32x8xf32> to vector<1x32x8xf32>
    %743 = vector.shape_cast %742 : vector<1x32x8xf32> to vector<32x8xf32>
    %cst_307 = arith.constant dense<0.000000e+00> : vector<16x8xf32>
    %744 = tpu.matmul %659, %743, %cst_307 {dimension_numbers = #tpu.dot_dimension_numbers<[1], [0], [0], [1], [0, 0, 1, 1], [], []>} : vector<16x32xf32>, vector<32x8xf32>, vector<16x8xf32> -> vector<16x8xf32>
    %745 = vector.extract_strided_slice %667 {offsets = [1, 0, 0], sizes = [1, 1, 8], strides = [1, 1, 1]} : vector<4x1x8xf32> to vector<1x1x8xf32>
    %746 = vector.shape_cast %745 : vector<1x1x8xf32> to vector<1x8xf32>
    %747 = vector.broadcast %746 : vector<1x8xf32> to vector<16x8xf32>
    %748 = arith.addf %744, %747 : vector<16x8xf32>
    %749 = vector.extract_strided_slice %669 {offsets = [1, 0, 0], sizes = [1, 32, 8], strides = [1, 1, 1]} : vector<4x32x8xf32> to vector<1x32x8xf32>
    %750 = vector.shape_cast %749 : vector<1x32x8xf32> to vector<32x8xf32>
    %cst_308 = arith.constant dense<0.000000e+00> : vector<16x8xf32>
    %751 = tpu.matmul %659, %750, %cst_308 {dimension_numbers = #tpu.dot_dimension_numbers<[1], [0], [0], [1], [0, 0, 1, 1], [], []>} : vector<16x32xf32>, vector<32x8xf32>, vector<16x8xf32> -> vector<16x8xf32>
    %752 = vector.extract_strided_slice %671 {offsets = [1, 0, 0], sizes = [1, 1, 8], strides = [1, 1, 1]} : vector<4x1x8xf32> to vector<1x1x8xf32>
    %753 = vector.shape_cast %752 : vector<1x1x8xf32> to vector<1x8xf32>
    %754 = vector.broadcast %753 : vector<1x8xf32> to vector<16x8xf32>
    %755 = arith.addf %751, %754 : vector<16x8xf32>
    %756 = vector.extract_strided_slice %741 {offsets = [0, 0], sizes = [8, 8], strides = [1, 1]} : vector<16x8xf32> to vector<8x8xf32>
    %757 = vector.extract_strided_slice %748 {offsets = [0, 0], sizes = [8, 8], strides = [1, 1]} : vector<16x8xf32> to vector<8x8xf32>
    %758 = vector.extract_strided_slice %755 {offsets = [0, 0], sizes = [8, 8], strides = [1, 1]} : vector<16x8xf32> to vector<8x8xf32>
    %cst_309 = arith.constant dense<0.000000e+00> : vector<8x8xf32>
    %759 = tpu.matmul %756, %757, %cst_309 {dimension_numbers = #tpu.dot_dimension_numbers<[1], [1], [0], [0], [0, 0, 1, 0], [], []>} : vector<8x8xf32>, vector<8x8xf32>, vector<8x8xf32> -> vector<8x8xf32>
    %cst_310 = arith.constant 0.353553385 : f32
    %760 = vector.broadcast %cst_310 : f32 to vector<8x8xf32>
    %761 = arith.mulf %759, %760 : vector<8x8xf32>
    %cst_311 = arith.constant dense<0xFF800000> : vector<8xf32>
    %762 = vector.multi_reduction <maximumf>, %761, %cst_311 [1] : vector<8x8xf32> to vector<8xf32>
    %763 = vector.shape_cast %762 : vector<8xf32> to vector<8x1xf32>
    %764 = vector.broadcast %763 : vector<8x1xf32> to vector<8x8xf32>
    %765 = arith.subf %761, %764 : vector<8x8xf32>
    %766 = math.exp %765 : vector<8x8xf32>
    %cst_312 = arith.constant dense<0.000000e+00> : vector<8xf32>
    %767 = vector.multi_reduction <add>, %766, %cst_312 [1] : vector<8x8xf32> to vector<8xf32>
    %768 = vector.shape_cast %767 : vector<8xf32> to vector<8x1xf32>
    %769 = tpu.reciprocal %768 {approx = true} : vector<8x1xf32> -> vector<8x1xf32>
    %770 = vector.broadcast %769 : vector<8x1xf32> to vector<8x8xf32>
    %771 = arith.mulf %766, %770 : vector<8x8xf32>
    %cst_313 = arith.constant dense<0.000000e+00> : vector<8x8xf32>
    %772 = tpu.matmul %771, %758, %cst_313 {dimension_numbers = #tpu.dot_dimension_numbers<[1], [0], [0], [1], [0, 0, 1, 1], [], []>} : vector<8x8xf32>, vector<8x8xf32>, vector<8x8xf32> -> vector<8x8xf32>
    %773 = vector.extract_strided_slice %741 {offsets = [8, 0], sizes = [8, 8], strides = [1, 1]} : vector<16x8xf32> to vector<8x8xf32>
    %774 = vector.extract_strided_slice %748 {offsets = [8, 0], sizes = [8, 8], strides = [1, 1]} : vector<16x8xf32> to vector<8x8xf32>
    %775 = vector.extract_strided_slice %755 {offsets = [8, 0], sizes = [8, 8], strides = [1, 1]} : vector<16x8xf32> to vector<8x8xf32>
    %cst_314 = arith.constant dense<0.000000e+00> : vector<8x8xf32>
    %776 = tpu.matmul %773, %774, %cst_314 {dimension_numbers = #tpu.dot_dimension_numbers<[1], [1], [0], [0], [0, 0, 1, 0], [], []>} : vector<8x8xf32>, vector<8x8xf32>, vector<8x8xf32> -> vector<8x8xf32>
    %cst_315 = arith.constant 0.353553385 : f32
    %777 = vector.broadcast %cst_315 : f32 to vector<8x8xf32>
    %778 = arith.mulf %776, %777 : vector<8x8xf32>
    %cst_316 = arith.constant dense<0xFF800000> : vector<8xf32>
    %779 = vector.multi_reduction <maximumf>, %778, %cst_316 [1] : vector<8x8xf32> to vector<8xf32>
    %780 = vector.shape_cast %779 : vector<8xf32> to vector<8x1xf32>
    %781 = vector.broadcast %780 : vector<8x1xf32> to vector<8x8xf32>
    %782 = arith.subf %778, %781 : vector<8x8xf32>
    %783 = math.exp %782 : vector<8x8xf32>
    %cst_317 = arith.constant dense<0.000000e+00> : vector<8xf32>
    %784 = vector.multi_reduction <add>, %783, %cst_317 [1] : vector<8x8xf32> to vector<8xf32>
    %785 = vector.shape_cast %784 : vector<8xf32> to vector<8x1xf32>
    %786 = tpu.reciprocal %785 {approx = true} : vector<8x1xf32> -> vector<8x1xf32>
    %787 = vector.broadcast %786 : vector<8x1xf32> to vector<8x8xf32>
    %788 = arith.mulf %783, %787 : vector<8x8xf32>
    %cst_318 = arith.constant dense<0.000000e+00> : vector<8x8xf32>
    %789 = tpu.matmul %788, %775, %cst_318 {dimension_numbers = #tpu.dot_dimension_numbers<[1], [0], [0], [1], [0, 0, 1, 1], [], []>} : vector<8x8xf32>, vector<8x8xf32>, vector<8x8xf32> -> vector<8x8xf32>
    %790 = tpu.concatenate %772, %789 in 0 : vector<8x8xf32>, vector<8x8xf32> -> vector<16x8xf32>
    %791 = vector.extract_strided_slice %673 {offsets = [1, 0, 0], sizes = [1, 8, 32], strides = [1, 1, 1]} : vector<4x8x32xf32> to vector<1x8x32xf32>
    %792 = vector.shape_cast %791 : vector<1x8x32xf32> to vector<8x32xf32>
    %cst_319 = arith.constant dense<0.000000e+00> : vector<16x32xf32>
    %793 = tpu.matmul %790, %792, %cst_319 {dimension_numbers = #tpu.dot_dimension_numbers<[1], [0], [0], [1], [0, 0, 1, 1], [], []>} : vector<16x8xf32>, vector<8x32xf32>, vector<16x32xf32> -> vector<16x32xf32>
    %794 = arith.addf %734, %793 : vector<16x32xf32>
    %795 = vector.extract_strided_slice %661 {offsets = [2, 0, 0], sizes = [1, 32, 8], strides = [1, 1, 1]} : vector<4x32x8xf32> to vector<1x32x8xf32>
    %796 = vector.shape_cast %795 : vector<1x32x8xf32> to vector<32x8xf32>
    %cst_320 = arith.constant dense<0.000000e+00> : vector<16x8xf32>
    %797 = tpu.matmul %659, %796, %cst_320 {dimension_numbers = #tpu.dot_dimension_numbers<[1], [0], [0], [1], [0, 0, 1, 1], [], []>} : vector<16x32xf32>, vector<32x8xf32>, vector<16x8xf32> -> vector<16x8xf32>
    %798 = vector.extract_strided_slice %663 {offsets = [2, 0, 0], sizes = [1, 1, 8], strides = [1, 1, 1]} : vector<4x1x8xf32> to vector<1x1x8xf32>
    %799 = vector.shape_cast %798 : vector<1x1x8xf32> to vector<1x8xf32>
    %800 = vector.broadcast %799 : vector<1x8xf32> to vector<16x8xf32>
    %801 = arith.addf %797, %800 : vector<16x8xf32>
    %802 = vector.extract_strided_slice %665 {offsets = [2, 0, 0], sizes = [1, 32, 8], strides = [1, 1, 1]} : vector<4x32x8xf32> to vector<1x32x8xf32>
    %803 = vector.shape_cast %802 : vector<1x32x8xf32> to vector<32x8xf32>
    %cst_321 = arith.constant dense<0.000000e+00> : vector<16x8xf32>
    %804 = tpu.matmul %659, %803, %cst_321 {dimension_numbers = #tpu.dot_dimension_numbers<[1], [0], [0], [1], [0, 0, 1, 1], [], []>} : vector<16x32xf32>, vector<32x8xf32>, vector<16x8xf32> -> vector<16x8xf32>
    %805 = vector.extract_strided_slice %667 {offsets = [2, 0, 0], sizes = [1, 1, 8], strides = [1, 1, 1]} : vector<4x1x8xf32> to vector<1x1x8xf32>
    %806 = vector.shape_cast %805 : vector<1x1x8xf32> to vector<1x8xf32>
    %807 = vector.broadcast %806 : vector<1x8xf32> to vector<16x8xf32>
    %808 = arith.addf %804, %807 : vector<16x8xf32>
    %809 = vector.extract_strided_slice %669 {offsets = [2, 0, 0], sizes = [1, 32, 8], strides = [1, 1, 1]} : vector<4x32x8xf32> to vector<1x32x8xf32>
    %810 = vector.shape_cast %809 : vector<1x32x8xf32> to vector<32x8xf32>
    %cst_322 = arith.constant dense<0.000000e+00> : vector<16x8xf32>
    %811 = tpu.matmul %659, %810, %cst_322 {dimension_numbers = #tpu.dot_dimension_numbers<[1], [0], [0], [1], [0, 0, 1, 1], [], []>} : vector<16x32xf32>, vector<32x8xf32>, vector<16x8xf32> -> vector<16x8xf32>
    %812 = vector.extract_strided_slice %671 {offsets = [2, 0, 0], sizes = [1, 1, 8], strides = [1, 1, 1]} : vector<4x1x8xf32> to vector<1x1x8xf32>
    %813 = vector.shape_cast %812 : vector<1x1x8xf32> to vector<1x8xf32>
    %814 = vector.broadcast %813 : vector<1x8xf32> to vector<16x8xf32>
    %815 = arith.addf %811, %814 : vector<16x8xf32>
    %816 = vector.extract_strided_slice %801 {offsets = [0, 0], sizes = [8, 8], strides = [1, 1]} : vector<16x8xf32> to vector<8x8xf32>
    %817 = vector.extract_strided_slice %808 {offsets = [0, 0], sizes = [8, 8], strides = [1, 1]} : vector<16x8xf32> to vector<8x8xf32>
    %818 = vector.extract_strided_slice %815 {offsets = [0, 0], sizes = [8, 8], strides = [1, 1]} : vector<16x8xf32> to vector<8x8xf32>
    %cst_323 = arith.constant dense<0.000000e+00> : vector<8x8xf32>
    %819 = tpu.matmul %816, %817, %cst_323 {dimension_numbers = #tpu.dot_dimension_numbers<[1], [1], [0], [0], [0, 0, 1, 0], [], []>} : vector<8x8xf32>, vector<8x8xf32>, vector<8x8xf32> -> vector<8x8xf32>
    %cst_324 = arith.constant 0.353553385 : f32
    %820 = vector.broadcast %cst_324 : f32 to vector<8x8xf32>
    %821 = arith.mulf %819, %820 : vector<8x8xf32>
    %cst_325 = arith.constant dense<0xFF800000> : vector<8xf32>
    %822 = vector.multi_reduction <maximumf>, %821, %cst_325 [1] : vector<8x8xf32> to vector<8xf32>
    %823 = vector.shape_cast %822 : vector<8xf32> to vector<8x1xf32>
    %824 = vector.broadcast %823 : vector<8x1xf32> to vector<8x8xf32>
    %825 = arith.subf %821, %824 : vector<8x8xf32>
    %826 = math.exp %825 : vector<8x8xf32>
    %cst_326 = arith.constant dense<0.000000e+00> : vector<8xf32>
    %827 = vector.multi_reduction <add>, %826, %cst_326 [1] : vector<8x8xf32> to vector<8xf32>
    %828 = vector.shape_cast %827 : vector<8xf32> to vector<8x1xf32>
    %829 = tpu.reciprocal %828 {approx = true} : vector<8x1xf32> -> vector<8x1xf32>
    %830 = vector.broadcast %829 : vector<8x1xf32> to vector<8x8xf32>
    %831 = arith.mulf %826, %830 : vector<8x8xf32>
    %cst_327 = arith.constant dense<0.000000e+00> : vector<8x8xf32>
    %832 = tpu.matmul %831, %818, %cst_327 {dimension_numbers = #tpu.dot_dimension_numbers<[1], [0], [0], [1], [0, 0, 1, 1], [], []>} : vector<8x8xf32>, vector<8x8xf32>, vector<8x8xf32> -> vector<8x8xf32>
    %833 = vector.extract_strided_slice %801 {offsets = [8, 0], sizes = [8, 8], strides = [1, 1]} : vector<16x8xf32> to vector<8x8xf32>
    %834 = vector.extract_strided_slice %808 {offsets = [8, 0], sizes = [8, 8], strides = [1, 1]} : vector<16x8xf32> to vector<8x8xf32>
    %835 = vector.extract_strided_slice %815 {offsets = [8, 0], sizes = [8, 8], strides = [1, 1]} : vector<16x8xf32> to vector<8x8xf32>
    %cst_328 = arith.constant dense<0.000000e+00> : vector<8x8xf32>
    %836 = tpu.matmul %833, %834, %cst_328 {dimension_numbers = #tpu.dot_dimension_numbers<[1], [1], [0], [0], [0, 0, 1, 0], [], []>} : vector<8x8xf32>, vector<8x8xf32>, vector<8x8xf32> -> vector<8x8xf32>
    %cst_329 = arith.constant 0.353553385 : f32
    %837 = vector.broadcast %cst_329 : f32 to vector<8x8xf32>
    %838 = arith.mulf %836, %837 : vector<8x8xf32>
    %cst_330 = arith.constant dense<0xFF800000> : vector<8xf32>
    %839 = vector.multi_reduction <maximumf>, %838, %cst_330 [1] : vector<8x8xf32> to vector<8xf32>
    %840 = vector.shape_cast %839 : vector<8xf32> to vector<8x1xf32>
    %841 = vector.broadcast %840 : vector<8x1xf32> to vector<8x8xf32>
    %842 = arith.subf %838, %841 : vector<8x8xf32>
    %843 = math.exp %842 : vector<8x8xf32>
    %cst_331 = arith.constant dense<0.000000e+00> : vector<8xf32>
    %844 = vector.multi_reduction <add>, %843, %cst_331 [1] : vector<8x8xf32> to vector<8xf32>
    %845 = vector.shape_cast %844 : vector<8xf32> to vector<8x1xf32>
    %846 = tpu.reciprocal %845 {approx = true} : vector<8x1xf32> -> vector<8x1xf32>
    %847 = vector.broadcast %846 : vector<8x1xf32> to vector<8x8xf32>
    %848 = arith.mulf %843, %847 : vector<8x8xf32>
    %cst_332 = arith.constant dense<0.000000e+00> : vector<8x8xf32>
    %849 = tpu.matmul %848, %835, %cst_332 {dimension_numbers = #tpu.dot_dimension_numbers<[1], [0], [0], [1], [0, 0, 1, 1], [], []>} : vector<8x8xf32>, vector<8x8xf32>, vector<8x8xf32> -> vector<8x8xf32>
    %850 = tpu.concatenate %832, %849 in 0 : vector<8x8xf32>, vector<8x8xf32> -> vector<16x8xf32>
    %851 = vector.extract_strided_slice %673 {offsets = [2, 0, 0], sizes = [1, 8, 32], strides = [1, 1, 1]} : vector<4x8x32xf32> to vector<1x8x32xf32>
    %852 = vector.shape_cast %851 : vector<1x8x32xf32> to vector<8x32xf32>
    %cst_333 = arith.constant dense<0.000000e+00> : vector<16x32xf32>
    %853 = tpu.matmul %850, %852, %cst_333 {dimension_numbers = #tpu.dot_dimension_numbers<[1], [0], [0], [1], [0, 0, 1, 1], [], []>} : vector<16x8xf32>, vector<8x32xf32>, vector<16x32xf32> -> vector<16x32xf32>
    %854 = arith.addf %794, %853 : vector<16x32xf32>
    %855 = vector.extract_strided_slice %661 {offsets = [3, 0, 0], sizes = [1, 32, 8], strides = [1, 1, 1]} : vector<4x32x8xf32> to vector<1x32x8xf32>
    %856 = vector.shape_cast %855 : vector<1x32x8xf32> to vector<32x8xf32>
    %cst_334 = arith.constant dense<0.000000e+00> : vector<16x8xf32>
    %857 = tpu.matmul %659, %856, %cst_334 {dimension_numbers = #tpu.dot_dimension_numbers<[1], [0], [0], [1], [0, 0, 1, 1], [], []>} : vector<16x32xf32>, vector<32x8xf32>, vector<16x8xf32> -> vector<16x8xf32>
    %858 = vector.extract_strided_slice %663 {offsets = [3, 0, 0], sizes = [1, 1, 8], strides = [1, 1, 1]} : vector<4x1x8xf32> to vector<1x1x8xf32>
    %859 = vector.shape_cast %858 : vector<1x1x8xf32> to vector<1x8xf32>
    %860 = vector.broadcast %859 : vector<1x8xf32> to vector<16x8xf32>
    %861 = arith.addf %857, %860 : vector<16x8xf32>
    %862 = vector.extract_strided_slice %665 {offsets = [3, 0, 0], sizes = [1, 32, 8], strides = [1, 1, 1]} : vector<4x32x8xf32> to vector<1x32x8xf32>
    %863 = vector.shape_cast %862 : vector<1x32x8xf32> to vector<32x8xf32>
    %cst_335 = arith.constant dense<0.000000e+00> : vector<16x8xf32>
    %864 = tpu.matmul %659, %863, %cst_335 {dimension_numbers = #tpu.dot_dimension_numbers<[1], [0], [0], [1], [0, 0, 1, 1], [], []>} : vector<16x32xf32>, vector<32x8xf32>, vector<16x8xf32> -> vector<16x8xf32>
    %865 = vector.extract_strided_slice %667 {offsets = [3, 0, 0], sizes = [1, 1, 8], strides = [1, 1, 1]} : vector<4x1x8xf32> to vector<1x1x8xf32>
    %866 = vector.shape_cast %865 : vector<1x1x8xf32> to vector<1x8xf32>
    %867 = vector.broadcast %866 : vector<1x8xf32> to vector<16x8xf32>
    %868 = arith.addf %864, %867 : vector<16x8xf32>
    %869 = vector.extract_strided_slice %669 {offsets = [3, 0, 0], sizes = [1, 32, 8], strides = [1, 1, 1]} : vector<4x32x8xf32> to vector<1x32x8xf32>
    %870 = vector.shape_cast %869 : vector<1x32x8xf32> to vector<32x8xf32>
    %cst_336 = arith.constant dense<0.000000e+00> : vector<16x8xf32>
    %871 = tpu.matmul %659, %870, %cst_336 {dimension_numbers = #tpu.dot_dimension_numbers<[1], [0], [0], [1], [0, 0, 1, 1], [], []>} : vector<16x32xf32>, vector<32x8xf32>, vector<16x8xf32> -> vector<16x8xf32>
    %872 = vector.extract_strided_slice %671 {offsets = [3, 0, 0], sizes = [1, 1, 8], strides = [1, 1, 1]} : vector<4x1x8xf32> to vector<1x1x8xf32>
    %873 = vector.shape_cast %872 : vector<1x1x8xf32> to vector<1x8xf32>
    %874 = vector.broadcast %873 : vector<1x8xf32> to vector<16x8xf32>
    %875 = arith.addf %871, %874 : vector<16x8xf32>
    %876 = vector.extract_strided_slice %861 {offsets = [0, 0], sizes = [8, 8], strides = [1, 1]} : vector<16x8xf32> to vector<8x8xf32>
    %877 = vector.extract_strided_slice %868 {offsets = [0, 0], sizes = [8, 8], strides = [1, 1]} : vector<16x8xf32> to vector<8x8xf32>
    %878 = vector.extract_strided_slice %875 {offsets = [0, 0], sizes = [8, 8], strides = [1, 1]} : vector<16x8xf32> to vector<8x8xf32>
    %cst_337 = arith.constant dense<0.000000e+00> : vector<8x8xf32>
    %879 = tpu.matmul %876, %877, %cst_337 {dimension_numbers = #tpu.dot_dimension_numbers<[1], [1], [0], [0], [0, 0, 1, 0], [], []>} : vector<8x8xf32>, vector<8x8xf32>, vector<8x8xf32> -> vector<8x8xf32>
    %cst_338 = arith.constant 0.353553385 : f32
    %880 = vector.broadcast %cst_338 : f32 to vector<8x8xf32>
    %881 = arith.mulf %879, %880 : vector<8x8xf32>
    %cst_339 = arith.constant dense<0xFF800000> : vector<8xf32>
    %882 = vector.multi_reduction <maximumf>, %881, %cst_339 [1] : vector<8x8xf32> to vector<8xf32>
    %883 = vector.shape_cast %882 : vector<8xf32> to vector<8x1xf32>
    %884 = vector.broadcast %883 : vector<8x1xf32> to vector<8x8xf32>
    %885 = arith.subf %881, %884 : vector<8x8xf32>
    %886 = math.exp %885 : vector<8x8xf32>
    %cst_340 = arith.constant dense<0.000000e+00> : vector<8xf32>
    %887 = vector.multi_reduction <add>, %886, %cst_340 [1] : vector<8x8xf32> to vector<8xf32>
    %888 = vector.shape_cast %887 : vector<8xf32> to vector<8x1xf32>
    %889 = tpu.reciprocal %888 {approx = true} : vector<8x1xf32> -> vector<8x1xf32>
    %890 = vector.broadcast %889 : vector<8x1xf32> to vector<8x8xf32>
    %891 = arith.mulf %886, %890 : vector<8x8xf32>
    %cst_341 = arith.constant dense<0.000000e+00> : vector<8x8xf32>
    %892 = tpu.matmul %891, %878, %cst_341 {dimension_numbers = #tpu.dot_dimension_numbers<[1], [0], [0], [1], [0, 0, 1, 1], [], []>} : vector<8x8xf32>, vector<8x8xf32>, vector<8x8xf32> -> vector<8x8xf32>
    %893 = vector.extract_strided_slice %861 {offsets = [8, 0], sizes = [8, 8], strides = [1, 1]} : vector<16x8xf32> to vector<8x8xf32>
    %894 = vector.extract_strided_slice %868 {offsets = [8, 0], sizes = [8, 8], strides = [1, 1]} : vector<16x8xf32> to vector<8x8xf32>
    %895 = vector.extract_strided_slice %875 {offsets = [8, 0], sizes = [8, 8], strides = [1, 1]} : vector<16x8xf32> to vector<8x8xf32>
    %cst_342 = arith.constant dense<0.000000e+00> : vector<8x8xf32>
    %896 = tpu.matmul %893, %894, %cst_342 {dimension_numbers = #tpu.dot_dimension_numbers<[1], [1], [0], [0], [0, 0, 1, 0], [], []>} : vector<8x8xf32>, vector<8x8xf32>, vector<8x8xf32> -> vector<8x8xf32>
    %cst_343 = arith.constant 0.353553385 : f32
    %897 = vector.broadcast %cst_343 : f32 to vector<8x8xf32>
    %898 = arith.mulf %896, %897 : vector<8x8xf32>
    %cst_344 = arith.constant dense<0xFF800000> : vector<8xf32>
    %899 = vector.multi_reduction <maximumf>, %898, %cst_344 [1] : vector<8x8xf32> to vector<8xf32>
    %900 = vector.shape_cast %899 : vector<8xf32> to vector<8x1xf32>
    %901 = vector.broadcast %900 : vector<8x1xf32> to vector<8x8xf32>
    %902 = arith.subf %898, %901 : vector<8x8xf32>
    %903 = math.exp %902 : vector<8x8xf32>
    %cst_345 = arith.constant dense<0.000000e+00> : vector<8xf32>
    %904 = vector.multi_reduction <add>, %903, %cst_345 [1] : vector<8x8xf32> to vector<8xf32>
    %905 = vector.shape_cast %904 : vector<8xf32> to vector<8x1xf32>
    %906 = tpu.reciprocal %905 {approx = true} : vector<8x1xf32> -> vector<8x1xf32>
    %907 = vector.broadcast %906 : vector<8x1xf32> to vector<8x8xf32>
    %908 = arith.mulf %903, %907 : vector<8x8xf32>
    %cst_346 = arith.constant dense<0.000000e+00> : vector<8x8xf32>
    %909 = tpu.matmul %908, %895, %cst_346 {dimension_numbers = #tpu.dot_dimension_numbers<[1], [0], [0], [1], [0, 0, 1, 1], [], []>} : vector<8x8xf32>, vector<8x8xf32>, vector<8x8xf32> -> vector<8x8xf32>
    %910 = tpu.concatenate %892, %909 in 0 : vector<8x8xf32>, vector<8x8xf32> -> vector<16x8xf32>
    %911 = vector.extract_strided_slice %673 {offsets = [3, 0, 0], sizes = [1, 8, 32], strides = [1, 1, 1]} : vector<4x8x32xf32> to vector<1x8x32xf32>
    %912 = vector.shape_cast %911 : vector<1x8x32xf32> to vector<8x32xf32>
    %cst_347 = arith.constant dense<0.000000e+00> : vector<16x32xf32>
    %913 = tpu.matmul %910, %912, %cst_347 {dimension_numbers = #tpu.dot_dimension_numbers<[1], [0], [0], [1], [0, 0, 1, 1], [], []>} : vector<16x8xf32>, vector<8x32xf32>, vector<16x32xf32> -> vector<16x32xf32>
    %914 = arith.addf %854, %913 : vector<16x32xf32>
    %915 = vector.broadcast %675 : vector<1x32xf32> to vector<16x32xf32>
    %916 = arith.addf %914, %915 : vector<16x32xf32>
    %917 = arith.addf %659, %916 : vector<16x32xf32>
    %c0_348 = arith.constant 0 : index
    %c0_349 = arith.constant 0 : index
    %c0_350 = arith.constant 0 : index
    %918 = vector.load %arg33[%c0_348, %c0_349, %c0_350] : memref<2x1x32xf32, #tpu.memory_space<vmem>>, vector<1x1x32xf32>
    %919 = vector.shape_cast %918 : vector<1x1x32xf32> to vector<1x32xf32>
    %c0_351 = arith.constant 0 : index
    %c0_352 = arith.constant 0 : index
    %c0_353 = arith.constant 0 : index
    %920 = vector.load %arg34[%c0_351, %c0_352, %c0_353] : memref<2x1x32xf32, #tpu.memory_space<vmem>>, vector<1x1x32xf32>
    %921 = vector.shape_cast %920 : vector<1x1x32xf32> to vector<1x32xf32>
    %cst_354 = arith.constant dense<0.000000e+00> : vector<16xf32>
    %922 = vector.multi_reduction <add>, %917, %cst_354 [1] : vector<16x32xf32> to vector<16xf32>
    %923 = vector.shape_cast %922 : vector<16xf32> to vector<16x1xf32>
    %cst_355 = arith.constant 3.200000e+01 : f32
    %924 = vector.broadcast %cst_355 : f32 to vector<16x1xf32>
    %925 = arith.divf %923, %924 : vector<16x1xf32>
    %926 = vector.broadcast %925 : vector<16x1xf32> to vector<16x32xf32>
    %927 = arith.subf %917, %926 : vector<16x32xf32>
    %928 = arith.mulf %927, %927 : vector<16x32xf32>
    %cst_356 = arith.constant dense<0.000000e+00> : vector<16xf32>
    %929 = vector.multi_reduction <add>, %928, %cst_356 [1] : vector<16x32xf32> to vector<16xf32>
    %930 = vector.shape_cast %929 : vector<16xf32> to vector<16x1xf32>
    %cst_357 = arith.constant 3.200000e+01 : f32
    %931 = vector.broadcast %cst_357 : f32 to vector<16x1xf32>
    %932 = arith.divf %930, %931 : vector<16x1xf32>
    %cst_358 = arith.constant 9.99999974E-6 : f32
    %933 = vector.broadcast %cst_358 : f32 to vector<16x1xf32>
    %934 = arith.addf %932, %933 : vector<16x1xf32>
    %935 = math.rsqrt %934 : vector<16x1xf32>
    %936 = vector.broadcast %935 : vector<16x1xf32> to vector<16x32xf32>
    %937 = arith.mulf %927, %936 : vector<16x32xf32>
    %938 = vector.broadcast %919 : vector<1x32xf32> to vector<16x32xf32>
    %939 = arith.mulf %937, %938 : vector<16x32xf32>
    %940 = vector.broadcast %921 : vector<1x32xf32> to vector<16x32xf32>
    %941 = arith.addf %939, %940 : vector<16x32xf32>
    %c0_359 = arith.constant 0 : index
    %c0_360 = arith.constant 0 : index
    %c0_361 = arith.constant 0 : index
    %c0_362 = arith.constant 0 : index
    %942 = vector.load %arg35[%c0_359, %c0_360, %c0_361, %c0_362] : memref<2x4x32x8xf32, #tpu.memory_space<vmem>>, vector<1x4x32x8xf32>
    %943 = vector.shape_cast %942 : vector<1x4x32x8xf32> to vector<4x32x8xf32>
    %c0_363 = arith.constant 0 : index
    %c0_364 = arith.constant 0 : index
    %c0_365 = arith.constant 0 : index
    %c0_366 = arith.constant 0 : index
    %944 = vector.load %arg36[%c0_363, %c0_364, %c0_365, %c0_366] : memref<2x4x1x8xf32, #tpu.memory_space<vmem>>, vector<1x4x1x8xf32>
    %945 = vector.shape_cast %944 : vector<1x4x1x8xf32> to vector<4x1x8xf32>
    %c0_367 = arith.constant 0 : index
    %c0_368 = arith.constant 0 : index
    %c0_369 = arith.constant 0 : index
    %c0_370 = arith.constant 0 : index
    %946 = vector.load %arg37[%c0_367, %c0_368, %c0_369, %c0_370] : memref<2x4x32x8xf32, #tpu.memory_space<vmem>>, vector<1x4x32x8xf32>
    %947 = vector.shape_cast %946 : vector<1x4x32x8xf32> to vector<4x32x8xf32>
    %c0_371 = arith.constant 0 : index
    %c0_372 = arith.constant 0 : index
    %c0_373 = arith.constant 0 : index
    %c0_374 = arith.constant 0 : index
    %948 = vector.load %arg38[%c0_371, %c0_372, %c0_373, %c0_374] : memref<2x4x1x8xf32, #tpu.memory_space<vmem>>, vector<1x4x1x8xf32>
    %949 = vector.shape_cast %948 : vector<1x4x1x8xf32> to vector<4x1x8xf32>
    %c0_375 = arith.constant 0 : index
    %c0_376 = arith.constant 0 : index
    %c0_377 = arith.constant 0 : index
    %c0_378 = arith.constant 0 : index
    %950 = vector.load %arg39[%c0_375, %c0_376, %c0_377, %c0_378] : memref<2x4x32x8xf32, #tpu.memory_space<vmem>>, vector<1x4x32x8xf32>
    %951 = vector.shape_cast %950 : vector<1x4x32x8xf32> to vector<4x32x8xf32>
    %c0_379 = arith.constant 0 : index
    %c0_380 = arith.constant 0 : index
    %c0_381 = arith.constant 0 : index
    %c0_382 = arith.constant 0 : index
    %952 = vector.load %arg40[%c0_379, %c0_380, %c0_381, %c0_382] : memref<2x4x1x8xf32, #tpu.memory_space<vmem>>, vector<1x4x1x8xf32>
    %953 = vector.shape_cast %952 : vector<1x4x1x8xf32> to vector<4x1x8xf32>
    %c0_383 = arith.constant 0 : index
    %c0_384 = arith.constant 0 : index
    %c0_385 = arith.constant 0 : index
    %c0_386 = arith.constant 0 : index
    %954 = vector.load %arg41[%c0_383, %c0_384, %c0_385, %c0_386] : memref<2x4x8x32xf32, #tpu.memory_space<vmem>>, vector<1x4x8x32xf32>
    %955 = vector.shape_cast %954 : vector<1x4x8x32xf32> to vector<4x8x32xf32>
    %c0_387 = arith.constant 0 : index
    %c0_388 = arith.constant 0 : index
    %c0_389 = arith.constant 0 : index
    %956 = vector.load %arg42[%c0_387, %c0_388, %c0_389] : memref<2x1x32xf32, #tpu.memory_space<vmem>>, vector<1x1x32xf32>
    %957 = vector.shape_cast %956 : vector<1x1x32xf32> to vector<1x32xf32>
    %958 = vector.extract_strided_slice %943 {offsets = [0, 0, 0], sizes = [1, 32, 8], strides = [1, 1, 1]} : vector<4x32x8xf32> to vector<1x32x8xf32>
    %959 = vector.shape_cast %958 : vector<1x32x8xf32> to vector<32x8xf32>
    %cst_390 = arith.constant dense<0.000000e+00> : vector<16x8xf32>
    %960 = tpu.matmul %941, %959, %cst_390 {dimension_numbers = #tpu.dot_dimension_numbers<[1], [0], [0], [1], [0, 0, 1, 1], [], []>} : vector<16x32xf32>, vector<32x8xf32>, vector<16x8xf32> -> vector<16x8xf32>
    %961 = vector.extract_strided_slice %945 {offsets = [0, 0, 0], sizes = [1, 1, 8], strides = [1, 1, 1]} : vector<4x1x8xf32> to vector<1x1x8xf32>
    %962 = vector.shape_cast %961 : vector<1x1x8xf32> to vector<1x8xf32>
    %963 = vector.broadcast %962 : vector<1x8xf32> to vector<16x8xf32>
    %964 = arith.addf %960, %963 : vector<16x8xf32>
    %965 = vector.extract_strided_slice %947 {offsets = [0, 0, 0], sizes = [1, 32, 8], strides = [1, 1, 1]} : vector<4x32x8xf32> to vector<1x32x8xf32>
    %966 = vector.shape_cast %965 : vector<1x32x8xf32> to vector<32x8xf32>
    %cst_391 = arith.constant dense<0.000000e+00> : vector<16x8xf32>
    %967 = tpu.matmul %653, %966, %cst_391 {dimension_numbers = #tpu.dot_dimension_numbers<[1], [0], [0], [1], [0, 0, 1, 1], [], []>} : vector<16x32xf32>, vector<32x8xf32>, vector<16x8xf32> -> vector<16x8xf32>
    %968 = vector.extract_strided_slice %949 {offsets = [0, 0, 0], sizes = [1, 1, 8], strides = [1, 1, 1]} : vector<4x1x8xf32> to vector<1x1x8xf32>
    %969 = vector.shape_cast %968 : vector<1x1x8xf32> to vector<1x8xf32>
    %970 = vector.broadcast %969 : vector<1x8xf32> to vector<16x8xf32>
    %971 = arith.addf %967, %970 : vector<16x8xf32>
    %972 = vector.extract_strided_slice %951 {offsets = [0, 0, 0], sizes = [1, 32, 8], strides = [1, 1, 1]} : vector<4x32x8xf32> to vector<1x32x8xf32>
    %973 = vector.shape_cast %972 : vector<1x32x8xf32> to vector<32x8xf32>
    %cst_392 = arith.constant dense<0.000000e+00> : vector<16x8xf32>
    %974 = tpu.matmul %653, %973, %cst_392 {dimension_numbers = #tpu.dot_dimension_numbers<[1], [0], [0], [1], [0, 0, 1, 1], [], []>} : vector<16x32xf32>, vector<32x8xf32>, vector<16x8xf32> -> vector<16x8xf32>
    %975 = vector.extract_strided_slice %953 {offsets = [0, 0, 0], sizes = [1, 1, 8], strides = [1, 1, 1]} : vector<4x1x8xf32> to vector<1x1x8xf32>
    %976 = vector.shape_cast %975 : vector<1x1x8xf32> to vector<1x8xf32>
    %977 = vector.broadcast %976 : vector<1x8xf32> to vector<16x8xf32>
    %978 = arith.addf %974, %977 : vector<16x8xf32>
    %979 = vector.extract_strided_slice %964 {offsets = [0, 0], sizes = [8, 8], strides = [1, 1]} : vector<16x8xf32> to vector<8x8xf32>
    %980 = vector.extract_strided_slice %971 {offsets = [0, 0], sizes = [8, 8], strides = [1, 1]} : vector<16x8xf32> to vector<8x8xf32>
    %981 = vector.extract_strided_slice %978 {offsets = [0, 0], sizes = [8, 8], strides = [1, 1]} : vector<16x8xf32> to vector<8x8xf32>
    %cst_393 = arith.constant dense<0.000000e+00> : vector<8x8xf32>
    %982 = tpu.matmul %979, %980, %cst_393 {dimension_numbers = #tpu.dot_dimension_numbers<[1], [1], [0], [0], [0, 0, 1, 0], [], []>} : vector<8x8xf32>, vector<8x8xf32>, vector<8x8xf32> -> vector<8x8xf32>
    %cst_394 = arith.constant 0.353553385 : f32
    %983 = vector.broadcast %cst_394 : f32 to vector<8x8xf32>
    %984 = arith.mulf %982, %983 : vector<8x8xf32>
    %cst_395 = arith.constant dense<0xFF800000> : vector<8xf32>
    %985 = vector.multi_reduction <maximumf>, %984, %cst_395 [1] : vector<8x8xf32> to vector<8xf32>
    %986 = vector.shape_cast %985 : vector<8xf32> to vector<8x1xf32>
    %987 = vector.broadcast %986 : vector<8x1xf32> to vector<8x8xf32>
    %988 = arith.subf %984, %987 : vector<8x8xf32>
    %989 = math.exp %988 : vector<8x8xf32>
    %cst_396 = arith.constant dense<0.000000e+00> : vector<8xf32>
    %990 = vector.multi_reduction <add>, %989, %cst_396 [1] : vector<8x8xf32> to vector<8xf32>
    %991 = vector.shape_cast %990 : vector<8xf32> to vector<8x1xf32>
    %992 = tpu.reciprocal %991 {approx = true} : vector<8x1xf32> -> vector<8x1xf32>
    %993 = vector.broadcast %992 : vector<8x1xf32> to vector<8x8xf32>
    %994 = arith.mulf %989, %993 : vector<8x8xf32>
    %cst_397 = arith.constant dense<0.000000e+00> : vector<8x8xf32>
    %995 = tpu.matmul %994, %981, %cst_397 {dimension_numbers = #tpu.dot_dimension_numbers<[1], [0], [0], [1], [0, 0, 1, 1], [], []>} : vector<8x8xf32>, vector<8x8xf32>, vector<8x8xf32> -> vector<8x8xf32>
    %996 = vector.extract_strided_slice %964 {offsets = [8, 0], sizes = [8, 8], strides = [1, 1]} : vector<16x8xf32> to vector<8x8xf32>
    %997 = vector.extract_strided_slice %971 {offsets = [8, 0], sizes = [8, 8], strides = [1, 1]} : vector<16x8xf32> to vector<8x8xf32>
    %998 = vector.extract_strided_slice %978 {offsets = [8, 0], sizes = [8, 8], strides = [1, 1]} : vector<16x8xf32> to vector<8x8xf32>
    %cst_398 = arith.constant dense<0.000000e+00> : vector<8x8xf32>
    %999 = tpu.matmul %996, %997, %cst_398 {dimension_numbers = #tpu.dot_dimension_numbers<[1], [1], [0], [0], [0, 0, 1, 0], [], []>} : vector<8x8xf32>, vector<8x8xf32>, vector<8x8xf32> -> vector<8x8xf32>
    %cst_399 = arith.constant 0.353553385 : f32
    %1000 = vector.broadcast %cst_399 : f32 to vector<8x8xf32>
    %1001 = arith.mulf %999, %1000 : vector<8x8xf32>
    %cst_400 = arith.constant dense<0xFF800000> : vector<8xf32>
    %1002 = vector.multi_reduction <maximumf>, %1001, %cst_400 [1] : vector<8x8xf32> to vector<8xf32>
    %1003 = vector.shape_cast %1002 : vector<8xf32> to vector<8x1xf32>
    %1004 = vector.broadcast %1003 : vector<8x1xf32> to vector<8x8xf32>
    %1005 = arith.subf %1001, %1004 : vector<8x8xf32>
    %1006 = math.exp %1005 : vector<8x8xf32>
    %cst_401 = arith.constant dense<0.000000e+00> : vector<8xf32>
    %1007 = vector.multi_reduction <add>, %1006, %cst_401 [1] : vector<8x8xf32> to vector<8xf32>
    %1008 = vector.shape_cast %1007 : vector<8xf32> to vector<8x1xf32>
    %1009 = tpu.reciprocal %1008 {approx = true} : vector<8x1xf32> -> vector<8x1xf32>
    %1010 = vector.broadcast %1009 : vector<8x1xf32> to vector<8x8xf32>
    %1011 = arith.mulf %1006, %1010 : vector<8x8xf32>
    %cst_402 = arith.constant dense<0.000000e+00> : vector<8x8xf32>
    %1012 = tpu.matmul %1011, %998, %cst_402 {dimension_numbers = #tpu.dot_dimension_numbers<[1], [0], [0], [1], [0, 0, 1, 1], [], []>} : vector<8x8xf32>, vector<8x8xf32>, vector<8x8xf32> -> vector<8x8xf32>
    %1013 = tpu.concatenate %995, %1012 in 0 : vector<8x8xf32>, vector<8x8xf32> -> vector<16x8xf32>
    %1014 = vector.extract_strided_slice %955 {offsets = [0, 0, 0], sizes = [1, 8, 32], strides = [1, 1, 1]} : vector<4x8x32xf32> to vector<1x8x32xf32>
    %1015 = vector.shape_cast %1014 : vector<1x8x32xf32> to vector<8x32xf32>
    %cst_403 = arith.constant dense<0.000000e+00> : vector<16x32xf32>
    %1016 = tpu.matmul %1013, %1015, %cst_403 {dimension_numbers = #tpu.dot_dimension_numbers<[1], [0], [0], [1], [0, 0, 1, 1], [], []>} : vector<16x8xf32>, vector<8x32xf32>, vector<16x32xf32> -> vector<16x32xf32>
    %1017 = vector.extract_strided_slice %943 {offsets = [1, 0, 0], sizes = [1, 32, 8], strides = [1, 1, 1]} : vector<4x32x8xf32> to vector<1x32x8xf32>
    %1018 = vector.shape_cast %1017 : vector<1x32x8xf32> to vector<32x8xf32>
    %cst_404 = arith.constant dense<0.000000e+00> : vector<16x8xf32>
    %1019 = tpu.matmul %941, %1018, %cst_404 {dimension_numbers = #tpu.dot_dimension_numbers<[1], [0], [0], [1], [0, 0, 1, 1], [], []>} : vector<16x32xf32>, vector<32x8xf32>, vector<16x8xf32> -> vector<16x8xf32>
    %1020 = vector.extract_strided_slice %945 {offsets = [1, 0, 0], sizes = [1, 1, 8], strides = [1, 1, 1]} : vector<4x1x8xf32> to vector<1x1x8xf32>
    %1021 = vector.shape_cast %1020 : vector<1x1x8xf32> to vector<1x8xf32>
    %1022 = vector.broadcast %1021 : vector<1x8xf32> to vector<16x8xf32>
    %1023 = arith.addf %1019, %1022 : vector<16x8xf32>
    %1024 = vector.extract_strided_slice %947 {offsets = [1, 0, 0], sizes = [1, 32, 8], strides = [1, 1, 1]} : vector<4x32x8xf32> to vector<1x32x8xf32>
    %1025 = vector.shape_cast %1024 : vector<1x32x8xf32> to vector<32x8xf32>
    %cst_405 = arith.constant dense<0.000000e+00> : vector<16x8xf32>
    %1026 = tpu.matmul %653, %1025, %cst_405 {dimension_numbers = #tpu.dot_dimension_numbers<[1], [0], [0], [1], [0, 0, 1, 1], [], []>} : vector<16x32xf32>, vector<32x8xf32>, vector<16x8xf32> -> vector<16x8xf32>
    %1027 = vector.extract_strided_slice %949 {offsets = [1, 0, 0], sizes = [1, 1, 8], strides = [1, 1, 1]} : vector<4x1x8xf32> to vector<1x1x8xf32>
    %1028 = vector.shape_cast %1027 : vector<1x1x8xf32> to vector<1x8xf32>
    %1029 = vector.broadcast %1028 : vector<1x8xf32> to vector<16x8xf32>
    %1030 = arith.addf %1026, %1029 : vector<16x8xf32>
    %1031 = vector.extract_strided_slice %951 {offsets = [1, 0, 0], sizes = [1, 32, 8], strides = [1, 1, 1]} : vector<4x32x8xf32> to vector<1x32x8xf32>
    %1032 = vector.shape_cast %1031 : vector<1x32x8xf32> to vector<32x8xf32>
    %cst_406 = arith.constant dense<0.000000e+00> : vector<16x8xf32>
    %1033 = tpu.matmul %653, %1032, %cst_406 {dimension_numbers = #tpu.dot_dimension_numbers<[1], [0], [0], [1], [0, 0, 1, 1], [], []>} : vector<16x32xf32>, vector<32x8xf32>, vector<16x8xf32> -> vector<16x8xf32>
    %1034 = vector.extract_strided_slice %953 {offsets = [1, 0, 0], sizes = [1, 1, 8], strides = [1, 1, 1]} : vector<4x1x8xf32> to vector<1x1x8xf32>
    %1035 = vector.shape_cast %1034 : vector<1x1x8xf32> to vector<1x8xf32>
    %1036 = vector.broadcast %1035 : vector<1x8xf32> to vector<16x8xf32>
    %1037 = arith.addf %1033, %1036 : vector<16x8xf32>
    %1038 = vector.extract_strided_slice %1023 {offsets = [0, 0], sizes = [8, 8], strides = [1, 1]} : vector<16x8xf32> to vector<8x8xf32>
    %1039 = vector.extract_strided_slice %1030 {offsets = [0, 0], sizes = [8, 8], strides = [1, 1]} : vector<16x8xf32> to vector<8x8xf32>
    %1040 = vector.extract_strided_slice %1037 {offsets = [0, 0], sizes = [8, 8], strides = [1, 1]} : vector<16x8xf32> to vector<8x8xf32>
    %cst_407 = arith.constant dense<0.000000e+00> : vector<8x8xf32>
    %1041 = tpu.matmul %1038, %1039, %cst_407 {dimension_numbers = #tpu.dot_dimension_numbers<[1], [1], [0], [0], [0, 0, 1, 0], [], []>} : vector<8x8xf32>, vector<8x8xf32>, vector<8x8xf32> -> vector<8x8xf32>
    %cst_408 = arith.constant 0.353553385 : f32
    %1042 = vector.broadcast %cst_408 : f32 to vector<8x8xf32>
    %1043 = arith.mulf %1041, %1042 : vector<8x8xf32>
    %cst_409 = arith.constant dense<0xFF800000> : vector<8xf32>
    %1044 = vector.multi_reduction <maximumf>, %1043, %cst_409 [1] : vector<8x8xf32> to vector<8xf32>
    %1045 = vector.shape_cast %1044 : vector<8xf32> to vector<8x1xf32>
    %1046 = vector.broadcast %1045 : vector<8x1xf32> to vector<8x8xf32>
    %1047 = arith.subf %1043, %1046 : vector<8x8xf32>
    %1048 = math.exp %1047 : vector<8x8xf32>
    %cst_410 = arith.constant dense<0.000000e+00> : vector<8xf32>
    %1049 = vector.multi_reduction <add>, %1048, %cst_410 [1] : vector<8x8xf32> to vector<8xf32>
    %1050 = vector.shape_cast %1049 : vector<8xf32> to vector<8x1xf32>
    %1051 = tpu.reciprocal %1050 {approx = true} : vector<8x1xf32> -> vector<8x1xf32>
    %1052 = vector.broadcast %1051 : vector<8x1xf32> to vector<8x8xf32>
    %1053 = arith.mulf %1048, %1052 : vector<8x8xf32>
    %cst_411 = arith.constant dense<0.000000e+00> : vector<8x8xf32>
    %1054 = tpu.matmul %1053, %1040, %cst_411 {dimension_numbers = #tpu.dot_dimension_numbers<[1], [0], [0], [1], [0, 0, 1, 1], [], []>} : vector<8x8xf32>, vector<8x8xf32>, vector<8x8xf32> -> vector<8x8xf32>
    %1055 = vector.extract_strided_slice %1023 {offsets = [8, 0], sizes = [8, 8], strides = [1, 1]} : vector<16x8xf32> to vector<8x8xf32>
    %1056 = vector.extract_strided_slice %1030 {offsets = [8, 0], sizes = [8, 8], strides = [1, 1]} : vector<16x8xf32> to vector<8x8xf32>
    %1057 = vector.extract_strided_slice %1037 {offsets = [8, 0], sizes = [8, 8], strides = [1, 1]} : vector<16x8xf32> to vector<8x8xf32>
    %cst_412 = arith.constant dense<0.000000e+00> : vector<8x8xf32>
    %1058 = tpu.matmul %1055, %1056, %cst_412 {dimension_numbers = #tpu.dot_dimension_numbers<[1], [1], [0], [0], [0, 0, 1, 0], [], []>} : vector<8x8xf32>, vector<8x8xf32>, vector<8x8xf32> -> vector<8x8xf32>
    %cst_413 = arith.constant 0.353553385 : f32
    %1059 = vector.broadcast %cst_413 : f32 to vector<8x8xf32>
    %1060 = arith.mulf %1058, %1059 : vector<8x8xf32>
    %cst_414 = arith.constant dense<0xFF800000> : vector<8xf32>
    %1061 = vector.multi_reduction <maximumf>, %1060, %cst_414 [1] : vector<8x8xf32> to vector<8xf32>
    %1062 = vector.shape_cast %1061 : vector<8xf32> to vector<8x1xf32>
    %1063 = vector.broadcast %1062 : vector<8x1xf32> to vector<8x8xf32>
    %1064 = arith.subf %1060, %1063 : vector<8x8xf32>
    %1065 = math.exp %1064 : vector<8x8xf32>
    %cst_415 = arith.constant dense<0.000000e+00> : vector<8xf32>
    %1066 = vector.multi_reduction <add>, %1065, %cst_415 [1] : vector<8x8xf32> to vector<8xf32>
    %1067 = vector.shape_cast %1066 : vector<8xf32> to vector<8x1xf32>
    %1068 = tpu.reciprocal %1067 {approx = true} : vector<8x1xf32> -> vector<8x1xf32>
    %1069 = vector.broadcast %1068 : vector<8x1xf32> to vector<8x8xf32>
    %1070 = arith.mulf %1065, %1069 : vector<8x8xf32>
    %cst_416 = arith.constant dense<0.000000e+00> : vector<8x8xf32>
    %1071 = tpu.matmul %1070, %1057, %cst_416 {dimension_numbers = #tpu.dot_dimension_numbers<[1], [0], [0], [1], [0, 0, 1, 1], [], []>} : vector<8x8xf32>, vector<8x8xf32>, vector<8x8xf32> -> vector<8x8xf32>
    %1072 = tpu.concatenate %1054, %1071 in 0 : vector<8x8xf32>, vector<8x8xf32> -> vector<16x8xf32>
    %1073 = vector.extract_strided_slice %955 {offsets = [1, 0, 0], sizes = [1, 8, 32], strides = [1, 1, 1]} : vector<4x8x32xf32> to vector<1x8x32xf32>
    %1074 = vector.shape_cast %1073 : vector<1x8x32xf32> to vector<8x32xf32>
    %cst_417 = arith.constant dense<0.000000e+00> : vector<16x32xf32>
    %1075 = tpu.matmul %1072, %1074, %cst_417 {dimension_numbers = #tpu.dot_dimension_numbers<[1], [0], [0], [1], [0, 0, 1, 1], [], []>} : vector<16x8xf32>, vector<8x32xf32>, vector<16x32xf32> -> vector<16x32xf32>
    %1076 = arith.addf %1016, %1075 : vector<16x32xf32>
    %1077 = vector.extract_strided_slice %943 {offsets = [2, 0, 0], sizes = [1, 32, 8], strides = [1, 1, 1]} : vector<4x32x8xf32> to vector<1x32x8xf32>
    %1078 = vector.shape_cast %1077 : vector<1x32x8xf32> to vector<32x8xf32>
    %cst_418 = arith.constant dense<0.000000e+00> : vector<16x8xf32>
    %1079 = tpu.matmul %941, %1078, %cst_418 {dimension_numbers = #tpu.dot_dimension_numbers<[1], [0], [0], [1], [0, 0, 1, 1], [], []>} : vector<16x32xf32>, vector<32x8xf32>, vector<16x8xf32> -> vector<16x8xf32>
    %1080 = vector.extract_strided_slice %945 {offsets = [2, 0, 0], sizes = [1, 1, 8], strides = [1, 1, 1]} : vector<4x1x8xf32> to vector<1x1x8xf32>
    %1081 = vector.shape_cast %1080 : vector<1x1x8xf32> to vector<1x8xf32>
    %1082 = vector.broadcast %1081 : vector<1x8xf32> to vector<16x8xf32>
    %1083 = arith.addf %1079, %1082 : vector<16x8xf32>
    %1084 = vector.extract_strided_slice %947 {offsets = [2, 0, 0], sizes = [1, 32, 8], strides = [1, 1, 1]} : vector<4x32x8xf32> to vector<1x32x8xf32>
    %1085 = vector.shape_cast %1084 : vector<1x32x8xf32> to vector<32x8xf32>
    %cst_419 = arith.constant dense<0.000000e+00> : vector<16x8xf32>
    %1086 = tpu.matmul %653, %1085, %cst_419 {dimension_numbers = #tpu.dot_dimension_numbers<[1], [0], [0], [1], [0, 0, 1, 1], [], []>} : vector<16x32xf32>, vector<32x8xf32>, vector<16x8xf32> -> vector<16x8xf32>
    %1087 = vector.extract_strided_slice %949 {offsets = [2, 0, 0], sizes = [1, 1, 8], strides = [1, 1, 1]} : vector<4x1x8xf32> to vector<1x1x8xf32>
    %1088 = vector.shape_cast %1087 : vector<1x1x8xf32> to vector<1x8xf32>
    %1089 = vector.broadcast %1088 : vector<1x8xf32> to vector<16x8xf32>
    %1090 = arith.addf %1086, %1089 : vector<16x8xf32>
    %1091 = vector.extract_strided_slice %951 {offsets = [2, 0, 0], sizes = [1, 32, 8], strides = [1, 1, 1]} : vector<4x32x8xf32> to vector<1x32x8xf32>
    %1092 = vector.shape_cast %1091 : vector<1x32x8xf32> to vector<32x8xf32>
    %cst_420 = arith.constant dense<0.000000e+00> : vector<16x8xf32>
    %1093 = tpu.matmul %653, %1092, %cst_420 {dimension_numbers = #tpu.dot_dimension_numbers<[1], [0], [0], [1], [0, 0, 1, 1], [], []>} : vector<16x32xf32>, vector<32x8xf32>, vector<16x8xf32> -> vector<16x8xf32>
    %1094 = vector.extract_strided_slice %953 {offsets = [2, 0, 0], sizes = [1, 1, 8], strides = [1, 1, 1]} : vector<4x1x8xf32> to vector<1x1x8xf32>
    %1095 = vector.shape_cast %1094 : vector<1x1x8xf32> to vector<1x8xf32>
    %1096 = vector.broadcast %1095 : vector<1x8xf32> to vector<16x8xf32>
    %1097 = arith.addf %1093, %1096 : vector<16x8xf32>
    %1098 = vector.extract_strided_slice %1083 {offsets = [0, 0], sizes = [8, 8], strides = [1, 1]} : vector<16x8xf32> to vector<8x8xf32>
    %1099 = vector.extract_strided_slice %1090 {offsets = [0, 0], sizes = [8, 8], strides = [1, 1]} : vector<16x8xf32> to vector<8x8xf32>
    %1100 = vector.extract_strided_slice %1097 {offsets = [0, 0], sizes = [8, 8], strides = [1, 1]} : vector<16x8xf32> to vector<8x8xf32>
    %cst_421 = arith.constant dense<0.000000e+00> : vector<8x8xf32>
    %1101 = tpu.matmul %1098, %1099, %cst_421 {dimension_numbers = #tpu.dot_dimension_numbers<[1], [1], [0], [0], [0, 0, 1, 0], [], []>} : vector<8x8xf32>, vector<8x8xf32>, vector<8x8xf32> -> vector<8x8xf32>
    %cst_422 = arith.constant 0.353553385 : f32
    %1102 = vector.broadcast %cst_422 : f32 to vector<8x8xf32>
    %1103 = arith.mulf %1101, %1102 : vector<8x8xf32>
    %cst_423 = arith.constant dense<0xFF800000> : vector<8xf32>
    %1104 = vector.multi_reduction <maximumf>, %1103, %cst_423 [1] : vector<8x8xf32> to vector<8xf32>
    %1105 = vector.shape_cast %1104 : vector<8xf32> to vector<8x1xf32>
    %1106 = vector.broadcast %1105 : vector<8x1xf32> to vector<8x8xf32>
    %1107 = arith.subf %1103, %1106 : vector<8x8xf32>
    %1108 = math.exp %1107 : vector<8x8xf32>
    %cst_424 = arith.constant dense<0.000000e+00> : vector<8xf32>
    %1109 = vector.multi_reduction <add>, %1108, %cst_424 [1] : vector<8x8xf32> to vector<8xf32>
    %1110 = vector.shape_cast %1109 : vector<8xf32> to vector<8x1xf32>
    %1111 = tpu.reciprocal %1110 {approx = true} : vector<8x1xf32> -> vector<8x1xf32>
    %1112 = vector.broadcast %1111 : vector<8x1xf32> to vector<8x8xf32>
    %1113 = arith.mulf %1108, %1112 : vector<8x8xf32>
    %cst_425 = arith.constant dense<0.000000e+00> : vector<8x8xf32>
    %1114 = tpu.matmul %1113, %1100, %cst_425 {dimension_numbers = #tpu.dot_dimension_numbers<[1], [0], [0], [1], [0, 0, 1, 1], [], []>} : vector<8x8xf32>, vector<8x8xf32>, vector<8x8xf32> -> vector<8x8xf32>
    %1115 = vector.extract_strided_slice %1083 {offsets = [8, 0], sizes = [8, 8], strides = [1, 1]} : vector<16x8xf32> to vector<8x8xf32>
    %1116 = vector.extract_strided_slice %1090 {offsets = [8, 0], sizes = [8, 8], strides = [1, 1]} : vector<16x8xf32> to vector<8x8xf32>
    %1117 = vector.extract_strided_slice %1097 {offsets = [8, 0], sizes = [8, 8], strides = [1, 1]} : vector<16x8xf32> to vector<8x8xf32>
    %cst_426 = arith.constant dense<0.000000e+00> : vector<8x8xf32>
    %1118 = tpu.matmul %1115, %1116, %cst_426 {dimension_numbers = #tpu.dot_dimension_numbers<[1], [1], [0], [0], [0, 0, 1, 0], [], []>} : vector<8x8xf32>, vector<8x8xf32>, vector<8x8xf32> -> vector<8x8xf32>
    %cst_427 = arith.constant 0.353553385 : f32
    %1119 = vector.broadcast %cst_427 : f32 to vector<8x8xf32>
    %1120 = arith.mulf %1118, %1119 : vector<8x8xf32>
    %cst_428 = arith.constant dense<0xFF800000> : vector<8xf32>
    %1121 = vector.multi_reduction <maximumf>, %1120, %cst_428 [1] : vector<8x8xf32> to vector<8xf32>
    %1122 = vector.shape_cast %1121 : vector<8xf32> to vector<8x1xf32>
    %1123 = vector.broadcast %1122 : vector<8x1xf32> to vector<8x8xf32>
    %1124 = arith.subf %1120, %1123 : vector<8x8xf32>
    %1125 = math.exp %1124 : vector<8x8xf32>
    %cst_429 = arith.constant dense<0.000000e+00> : vector<8xf32>
    %1126 = vector.multi_reduction <add>, %1125, %cst_429 [1] : vector<8x8xf32> to vector<8xf32>
    %1127 = vector.shape_cast %1126 : vector<8xf32> to vector<8x1xf32>
    %1128 = tpu.reciprocal %1127 {approx = true} : vector<8x1xf32> -> vector<8x1xf32>
    %1129 = vector.broadcast %1128 : vector<8x1xf32> to vector<8x8xf32>
    %1130 = arith.mulf %1125, %1129 : vector<8x8xf32>
    %cst_430 = arith.constant dense<0.000000e+00> : vector<8x8xf32>
    %1131 = tpu.matmul %1130, %1117, %cst_430 {dimension_numbers = #tpu.dot_dimension_numbers<[1], [0], [0], [1], [0, 0, 1, 1], [], []>} : vector<8x8xf32>, vector<8x8xf32>, vector<8x8xf32> -> vector<8x8xf32>
    %1132 = tpu.concatenate %1114, %1131 in 0 : vector<8x8xf32>, vector<8x8xf32> -> vector<16x8xf32>
    %1133 = vector.extract_strided_slice %955 {offsets = [2, 0, 0], sizes = [1, 8, 32], strides = [1, 1, 1]} : vector<4x8x32xf32> to vector<1x8x32xf32>
    %1134 = vector.shape_cast %1133 : vector<1x8x32xf32> to vector<8x32xf32>
    %cst_431 = arith.constant dense<0.000000e+00> : vector<16x32xf32>
    %1135 = tpu.matmul %1132, %1134, %cst_431 {dimension_numbers = #tpu.dot_dimension_numbers<[1], [0], [0], [1], [0, 0, 1, 1], [], []>} : vector<16x8xf32>, vector<8x32xf32>, vector<16x32xf32> -> vector<16x32xf32>
    %1136 = arith.addf %1076, %1135 : vector<16x32xf32>
    %1137 = vector.extract_strided_slice %943 {offsets = [3, 0, 0], sizes = [1, 32, 8], strides = [1, 1, 1]} : vector<4x32x8xf32> to vector<1x32x8xf32>
    %1138 = vector.shape_cast %1137 : vector<1x32x8xf32> to vector<32x8xf32>
    %cst_432 = arith.constant dense<0.000000e+00> : vector<16x8xf32>
    %1139 = tpu.matmul %941, %1138, %cst_432 {dimension_numbers = #tpu.dot_dimension_numbers<[1], [0], [0], [1], [0, 0, 1, 1], [], []>} : vector<16x32xf32>, vector<32x8xf32>, vector<16x8xf32> -> vector<16x8xf32>
    %1140 = vector.extract_strided_slice %945 {offsets = [3, 0, 0], sizes = [1, 1, 8], strides = [1, 1, 1]} : vector<4x1x8xf32> to vector<1x1x8xf32>
    %1141 = vector.shape_cast %1140 : vector<1x1x8xf32> to vector<1x8xf32>
    %1142 = vector.broadcast %1141 : vector<1x8xf32> to vector<16x8xf32>
    %1143 = arith.addf %1139, %1142 : vector<16x8xf32>
    %1144 = vector.extract_strided_slice %947 {offsets = [3, 0, 0], sizes = [1, 32, 8], strides = [1, 1, 1]} : vector<4x32x8xf32> to vector<1x32x8xf32>
    %1145 = vector.shape_cast %1144 : vector<1x32x8xf32> to vector<32x8xf32>
    %cst_433 = arith.constant dense<0.000000e+00> : vector<16x8xf32>
    %1146 = tpu.matmul %653, %1145, %cst_433 {dimension_numbers = #tpu.dot_dimension_numbers<[1], [0], [0], [1], [0, 0, 1, 1], [], []>} : vector<16x32xf32>, vector<32x8xf32>, vector<16x8xf32> -> vector<16x8xf32>
    %1147 = vector.extract_strided_slice %949 {offsets = [3, 0, 0], sizes = [1, 1, 8], strides = [1, 1, 1]} : vector<4x1x8xf32> to vector<1x1x8xf32>
    %1148 = vector.shape_cast %1147 : vector<1x1x8xf32> to vector<1x8xf32>
    %1149 = vector.broadcast %1148 : vector<1x8xf32> to vector<16x8xf32>
    %1150 = arith.addf %1146, %1149 : vector<16x8xf32>
    %1151 = vector.extract_strided_slice %951 {offsets = [3, 0, 0], sizes = [1, 32, 8], strides = [1, 1, 1]} : vector<4x32x8xf32> to vector<1x32x8xf32>
    %1152 = vector.shape_cast %1151 : vector<1x32x8xf32> to vector<32x8xf32>
    %cst_434 = arith.constant dense<0.000000e+00> : vector<16x8xf32>
    %1153 = tpu.matmul %653, %1152, %cst_434 {dimension_numbers = #tpu.dot_dimension_numbers<[1], [0], [0], [1], [0, 0, 1, 1], [], []>} : vector<16x32xf32>, vector<32x8xf32>, vector<16x8xf32> -> vector<16x8xf32>
    %1154 = vector.extract_strided_slice %953 {offsets = [3, 0, 0], sizes = [1, 1, 8], strides = [1, 1, 1]} : vector<4x1x8xf32> to vector<1x1x8xf32>
    %1155 = vector.shape_cast %1154 : vector<1x1x8xf32> to vector<1x8xf32>
    %1156 = vector.broadcast %1155 : vector<1x8xf32> to vector<16x8xf32>
    %1157 = arith.addf %1153, %1156 : vector<16x8xf32>
    %1158 = vector.extract_strided_slice %1143 {offsets = [0, 0], sizes = [8, 8], strides = [1, 1]} : vector<16x8xf32> to vector<8x8xf32>
    %1159 = vector.extract_strided_slice %1150 {offsets = [0, 0], sizes = [8, 8], strides = [1, 1]} : vector<16x8xf32> to vector<8x8xf32>
    %1160 = vector.extract_strided_slice %1157 {offsets = [0, 0], sizes = [8, 8], strides = [1, 1]} : vector<16x8xf32> to vector<8x8xf32>
    %cst_435 = arith.constant dense<0.000000e+00> : vector<8x8xf32>
    %1161 = tpu.matmul %1158, %1159, %cst_435 {dimension_numbers = #tpu.dot_dimension_numbers<[1], [1], [0], [0], [0, 0, 1, 0], [], []>} : vector<8x8xf32>, vector<8x8xf32>, vector<8x8xf32> -> vector<8x8xf32>
    %cst_436 = arith.constant 0.353553385 : f32
    %1162 = vector.broadcast %cst_436 : f32 to vector<8x8xf32>
    %1163 = arith.mulf %1161, %1162 : vector<8x8xf32>
    %cst_437 = arith.constant dense<0xFF800000> : vector<8xf32>
    %1164 = vector.multi_reduction <maximumf>, %1163, %cst_437 [1] : vector<8x8xf32> to vector<8xf32>
    %1165 = vector.shape_cast %1164 : vector<8xf32> to vector<8x1xf32>
    %1166 = vector.broadcast %1165 : vector<8x1xf32> to vector<8x8xf32>
    %1167 = arith.subf %1163, %1166 : vector<8x8xf32>
    %1168 = math.exp %1167 : vector<8x8xf32>
    %cst_438 = arith.constant dense<0.000000e+00> : vector<8xf32>
    %1169 = vector.multi_reduction <add>, %1168, %cst_438 [1] : vector<8x8xf32> to vector<8xf32>
    %1170 = vector.shape_cast %1169 : vector<8xf32> to vector<8x1xf32>
    %1171 = tpu.reciprocal %1170 {approx = true} : vector<8x1xf32> -> vector<8x1xf32>
    %1172 = vector.broadcast %1171 : vector<8x1xf32> to vector<8x8xf32>
    %1173 = arith.mulf %1168, %1172 : vector<8x8xf32>
    %cst_439 = arith.constant dense<0.000000e+00> : vector<8x8xf32>
    %1174 = tpu.matmul %1173, %1160, %cst_439 {dimension_numbers = #tpu.dot_dimension_numbers<[1], [0], [0], [1], [0, 0, 1, 1], [], []>} : vector<8x8xf32>, vector<8x8xf32>, vector<8x8xf32> -> vector<8x8xf32>
    %1175 = vector.extract_strided_slice %1143 {offsets = [8, 0], sizes = [8, 8], strides = [1, 1]} : vector<16x8xf32> to vector<8x8xf32>
    %1176 = vector.extract_strided_slice %1150 {offsets = [8, 0], sizes = [8, 8], strides = [1, 1]} : vector<16x8xf32> to vector<8x8xf32>
    %1177 = vector.extract_strided_slice %1157 {offsets = [8, 0], sizes = [8, 8], strides = [1, 1]} : vector<16x8xf32> to vector<8x8xf32>
    %cst_440 = arith.constant dense<0.000000e+00> : vector<8x8xf32>
    %1178 = tpu.matmul %1175, %1176, %cst_440 {dimension_numbers = #tpu.dot_dimension_numbers<[1], [1], [0], [0], [0, 0, 1, 0], [], []>} : vector<8x8xf32>, vector<8x8xf32>, vector<8x8xf32> -> vector<8x8xf32>
    %cst_441 = arith.constant 0.353553385 : f32
    %1179 = vector.broadcast %cst_441 : f32 to vector<8x8xf32>
    %1180 = arith.mulf %1178, %1179 : vector<8x8xf32>
    %cst_442 = arith.constant dense<0xFF800000> : vector<8xf32>
    %1181 = vector.multi_reduction <maximumf>, %1180, %cst_442 [1] : vector<8x8xf32> to vector<8xf32>
    %1182 = vector.shape_cast %1181 : vector<8xf32> to vector<8x1xf32>
    %1183 = vector.broadcast %1182 : vector<8x1xf32> to vector<8x8xf32>
    %1184 = arith.subf %1180, %1183 : vector<8x8xf32>
    %1185 = math.exp %1184 : vector<8x8xf32>
    %cst_443 = arith.constant dense<0.000000e+00> : vector<8xf32>
    %1186 = vector.multi_reduction <add>, %1185, %cst_443 [1] : vector<8x8xf32> to vector<8xf32>
    %1187 = vector.shape_cast %1186 : vector<8xf32> to vector<8x1xf32>
    %1188 = tpu.reciprocal %1187 {approx = true} : vector<8x1xf32> -> vector<8x1xf32>
    %1189 = vector.broadcast %1188 : vector<8x1xf32> to vector<8x8xf32>
    %1190 = arith.mulf %1185, %1189 : vector<8x8xf32>
    %cst_444 = arith.constant dense<0.000000e+00> : vector<8x8xf32>
    %1191 = tpu.matmul %1190, %1177, %cst_444 {dimension_numbers = #tpu.dot_dimension_numbers<[1], [0], [0], [1], [0, 0, 1, 1], [], []>} : vector<8x8xf32>, vector<8x8xf32>, vector<8x8xf32> -> vector<8x8xf32>
    %1192 = tpu.concatenate %1174, %1191 in 0 : vector<8x8xf32>, vector<8x8xf32> -> vector<16x8xf32>
    %1193 = vector.extract_strided_slice %955 {offsets = [3, 0, 0], sizes = [1, 8, 32], strides = [1, 1, 1]} : vector<4x8x32xf32> to vector<1x8x32xf32>
    %1194 = vector.shape_cast %1193 : vector<1x8x32xf32> to vector<8x32xf32>
    %cst_445 = arith.constant dense<0.000000e+00> : vector<16x32xf32>
    %1195 = tpu.matmul %1192, %1194, %cst_445 {dimension_numbers = #tpu.dot_dimension_numbers<[1], [0], [0], [1], [0, 0, 1, 1], [], []>} : vector<16x8xf32>, vector<8x32xf32>, vector<16x32xf32> -> vector<16x32xf32>
    %1196 = arith.addf %1136, %1195 : vector<16x32xf32>
    %1197 = vector.broadcast %957 : vector<1x32xf32> to vector<16x32xf32>
    %1198 = arith.addf %1196, %1197 : vector<16x32xf32>
    %1199 = arith.addf %941, %1198 : vector<16x32xf32>
    %c0_446 = arith.constant 0 : index
    %c0_447 = arith.constant 0 : index
    %c0_448 = arith.constant 0 : index
    %1200 = vector.load %arg43[%c0_446, %c0_447, %c0_448] : memref<2x1x32xf32, #tpu.memory_space<vmem>>, vector<1x1x32xf32>
    %1201 = vector.shape_cast %1200 : vector<1x1x32xf32> to vector<1x32xf32>
    %c0_449 = arith.constant 0 : index
    %c0_450 = arith.constant 0 : index
    %c0_451 = arith.constant 0 : index
    %1202 = vector.load %arg44[%c0_449, %c0_450, %c0_451] : memref<2x1x32xf32, #tpu.memory_space<vmem>>, vector<1x1x32xf32>
    %1203 = vector.shape_cast %1202 : vector<1x1x32xf32> to vector<1x32xf32>
    %cst_452 = arith.constant dense<0.000000e+00> : vector<16xf32>
    %1204 = vector.multi_reduction <add>, %1199, %cst_452 [1] : vector<16x32xf32> to vector<16xf32>
    %1205 = vector.shape_cast %1204 : vector<16xf32> to vector<16x1xf32>
    %cst_453 = arith.constant 3.200000e+01 : f32
    %1206 = vector.broadcast %cst_453 : f32 to vector<16x1xf32>
    %1207 = arith.divf %1205, %1206 : vector<16x1xf32>
    %1208 = vector.broadcast %1207 : vector<16x1xf32> to vector<16x32xf32>
    %1209 = arith.subf %1199, %1208 : vector<16x32xf32>
    %1210 = arith.mulf %1209, %1209 : vector<16x32xf32>
    %cst_454 = arith.constant dense<0.000000e+00> : vector<16xf32>
    %1211 = vector.multi_reduction <add>, %1210, %cst_454 [1] : vector<16x32xf32> to vector<16xf32>
    %1212 = vector.shape_cast %1211 : vector<16xf32> to vector<16x1xf32>
    %cst_455 = arith.constant 3.200000e+01 : f32
    %1213 = vector.broadcast %cst_455 : f32 to vector<16x1xf32>
    %1214 = arith.divf %1212, %1213 : vector<16x1xf32>
    %cst_456 = arith.constant 9.99999974E-6 : f32
    %1215 = vector.broadcast %cst_456 : f32 to vector<16x1xf32>
    %1216 = arith.addf %1214, %1215 : vector<16x1xf32>
    %1217 = math.rsqrt %1216 : vector<16x1xf32>
    %1218 = vector.broadcast %1217 : vector<16x1xf32> to vector<16x32xf32>
    %1219 = arith.mulf %1209, %1218 : vector<16x32xf32>
    %1220 = vector.broadcast %1201 : vector<1x32xf32> to vector<16x32xf32>
    %1221 = arith.mulf %1219, %1220 : vector<16x32xf32>
    %1222 = vector.broadcast %1203 : vector<1x32xf32> to vector<16x32xf32>
    %1223 = arith.addf %1221, %1222 : vector<16x32xf32>
    %c0_457 = arith.constant 0 : index
    %c0_458 = arith.constant 0 : index
    %c0_459 = arith.constant 0 : index
    %1224 = vector.load %arg45[%c0_457, %c0_458, %c0_459] : memref<2x32x64xf32, #tpu.memory_space<vmem>>, vector<1x32x64xf32>
    %1225 = vector.shape_cast %1224 : vector<1x32x64xf32> to vector<32x64xf32>
    %cst_460 = arith.constant dense<0.000000e+00> : vector<16x64xf32>
    %1226 = tpu.matmul %1223, %1225, %cst_460 {dimension_numbers = #tpu.dot_dimension_numbers<[1], [0], [0], [1], [0, 0, 1, 1], [], []>} : vector<16x32xf32>, vector<32x64xf32>, vector<16x64xf32> -> vector<16x64xf32>
    %c0_461 = arith.constant 0 : index
    %c0_462 = arith.constant 0 : index
    %c0_463 = arith.constant 0 : index
    %1227 = vector.load %arg46[%c0_461, %c0_462, %c0_463] : memref<2x1x64xf32, #tpu.memory_space<vmem>>, vector<1x1x64xf32>
    %1228 = vector.shape_cast %1227 : vector<1x1x64xf32> to vector<1x64xf32>
    %1229 = vector.broadcast %1228 : vector<1x64xf32> to vector<16x64xf32>
    %1230 = arith.addf %1226, %1229 : vector<16x64xf32>
    %cst_464 = arith.constant 0.000000e+00 : f32
    %1231 = vector.broadcast %cst_464 : f32 to vector<16x64xf32>
    %1232 = arith.maximumf %1230, %1231 : vector<16x64xf32>
    %c0_465 = arith.constant 0 : index
    %c0_466 = arith.constant 0 : index
    %c0_467 = arith.constant 0 : index
    %1233 = vector.load %arg47[%c0_465, %c0_466, %c0_467] : memref<2x64x32xf32, #tpu.memory_space<vmem>>, vector<1x64x32xf32>
    %1234 = vector.shape_cast %1233 : vector<1x64x32xf32> to vector<64x32xf32>
    %cst_468 = arith.constant dense<0.000000e+00> : vector<16x32xf32>
    %1235 = tpu.matmul %1232, %1234, %cst_468 {dimension_numbers = #tpu.dot_dimension_numbers<[1], [0], [0], [1], [0, 0, 1, 1], [], []>} : vector<16x64xf32>, vector<64x32xf32>, vector<16x32xf32> -> vector<16x32xf32>
    %c0_469 = arith.constant 0 : index
    %c0_470 = arith.constant 0 : index
    %c0_471 = arith.constant 0 : index
    %1236 = vector.load %arg48[%c0_469, %c0_470, %c0_471] : memref<2x1x32xf32, #tpu.memory_space<vmem>>, vector<1x1x32xf32>
    %1237 = vector.shape_cast %1236 : vector<1x1x32xf32> to vector<1x32xf32>
    %1238 = vector.broadcast %1237 : vector<1x32xf32> to vector<16x32xf32>
    %1239 = arith.addf %1235, %1238 : vector<16x32xf32>
    %1240 = arith.addf %1223, %1239 : vector<16x32xf32>
    %c0_472 = arith.constant 0 : index
    %c0_473 = arith.constant 0 : index
    %c0_474 = arith.constant 0 : index
    %1241 = vector.load %arg49[%c0_472, %c0_473, %c0_474] : memref<2x1x32xf32, #tpu.memory_space<vmem>>, vector<1x1x32xf32>
    %1242 = vector.shape_cast %1241 : vector<1x1x32xf32> to vector<1x32xf32>
    %c0_475 = arith.constant 0 : index
    %c0_476 = arith.constant 0 : index
    %c0_477 = arith.constant 0 : index
    %1243 = vector.load %arg50[%c0_475, %c0_476, %c0_477] : memref<2x1x32xf32, #tpu.memory_space<vmem>>, vector<1x1x32xf32>
    %1244 = vector.shape_cast %1243 : vector<1x1x32xf32> to vector<1x32xf32>
    %cst_478 = arith.constant dense<0.000000e+00> : vector<16xf32>
    %1245 = vector.multi_reduction <add>, %1240, %cst_478 [1] : vector<16x32xf32> to vector<16xf32>
    %1246 = vector.shape_cast %1245 : vector<16xf32> to vector<16x1xf32>
    %cst_479 = arith.constant 3.200000e+01 : f32
    %1247 = vector.broadcast %cst_479 : f32 to vector<16x1xf32>
    %1248 = arith.divf %1246, %1247 : vector<16x1xf32>
    %1249 = vector.broadcast %1248 : vector<16x1xf32> to vector<16x32xf32>
    %1250 = arith.subf %1240, %1249 : vector<16x32xf32>
    %1251 = arith.mulf %1250, %1250 : vector<16x32xf32>
    %cst_480 = arith.constant dense<0.000000e+00> : vector<16xf32>
    %1252 = vector.multi_reduction <add>, %1251, %cst_480 [1] : vector<16x32xf32> to vector<16xf32>
    %1253 = vector.shape_cast %1252 : vector<16xf32> to vector<16x1xf32>
    %cst_481 = arith.constant 3.200000e+01 : f32
    %1254 = vector.broadcast %cst_481 : f32 to vector<16x1xf32>
    %1255 = arith.divf %1253, %1254 : vector<16x1xf32>
    %cst_482 = arith.constant 9.99999974E-6 : f32
    %1256 = vector.broadcast %cst_482 : f32 to vector<16x1xf32>
    %1257 = arith.addf %1255, %1256 : vector<16x1xf32>
    %1258 = math.rsqrt %1257 : vector<16x1xf32>
    %1259 = vector.broadcast %1258 : vector<16x1xf32> to vector<16x32xf32>
    %1260 = arith.mulf %1250, %1259 : vector<16x32xf32>
    %1261 = vector.broadcast %1242 : vector<1x32xf32> to vector<16x32xf32>
    %1262 = arith.mulf %1260, %1261 : vector<16x32xf32>
    %1263 = vector.broadcast %1244 : vector<1x32xf32> to vector<16x32xf32>
    %1264 = arith.addf %1262, %1263 : vector<16x32xf32>
    %c1_483 = arith.constant 1 : index
    %c0_484 = arith.constant 0 : index
    %c0_485 = arith.constant 0 : index
    %c0_486 = arith.constant 0 : index
    %1265 = vector.load %arg25[%c1_483, %c0_484, %c0_485, %c0_486] : memref<2x4x32x8xf32, #tpu.memory_space<vmem>>, vector<1x4x32x8xf32>
    %1266 = vector.shape_cast %1265 : vector<1x4x32x8xf32> to vector<4x32x8xf32>
    %c1_487 = arith.constant 1 : index
    %c0_488 = arith.constant 0 : index
    %c0_489 = arith.constant 0 : index
    %c0_490 = arith.constant 0 : index
    %1267 = vector.load %arg26[%c1_487, %c0_488, %c0_489, %c0_490] : memref<2x4x1x8xf32, #tpu.memory_space<vmem>>, vector<1x4x1x8xf32>
    %1268 = vector.shape_cast %1267 : vector<1x4x1x8xf32> to vector<4x1x8xf32>
    %c1_491 = arith.constant 1 : index
    %c0_492 = arith.constant 0 : index
    %c0_493 = arith.constant 0 : index
    %c0_494 = arith.constant 0 : index
    %1269 = vector.load %arg27[%c1_491, %c0_492, %c0_493, %c0_494] : memref<2x4x32x8xf32, #tpu.memory_space<vmem>>, vector<1x4x32x8xf32>
    %1270 = vector.shape_cast %1269 : vector<1x4x32x8xf32> to vector<4x32x8xf32>
    %c1_495 = arith.constant 1 : index
    %c0_496 = arith.constant 0 : index
    %c0_497 = arith.constant 0 : index
    %c0_498 = arith.constant 0 : index
    %1271 = vector.load %arg28[%c1_495, %c0_496, %c0_497, %c0_498] : memref<2x4x1x8xf32, #tpu.memory_space<vmem>>, vector<1x4x1x8xf32>
    %1272 = vector.shape_cast %1271 : vector<1x4x1x8xf32> to vector<4x1x8xf32>
    %c1_499 = arith.constant 1 : index
    %c0_500 = arith.constant 0 : index
    %c0_501 = arith.constant 0 : index
    %c0_502 = arith.constant 0 : index
    %1273 = vector.load %arg29[%c1_499, %c0_500, %c0_501, %c0_502] : memref<2x4x32x8xf32, #tpu.memory_space<vmem>>, vector<1x4x32x8xf32>
    %1274 = vector.shape_cast %1273 : vector<1x4x32x8xf32> to vector<4x32x8xf32>
    %c1_503 = arith.constant 1 : index
    %c0_504 = arith.constant 0 : index
    %c0_505 = arith.constant 0 : index
    %c0_506 = arith.constant 0 : index
    %1275 = vector.load %arg30[%c1_503, %c0_504, %c0_505, %c0_506] : memref<2x4x1x8xf32, #tpu.memory_space<vmem>>, vector<1x4x1x8xf32>
    %1276 = vector.shape_cast %1275 : vector<1x4x1x8xf32> to vector<4x1x8xf32>
    %c1_507 = arith.constant 1 : index
    %c0_508 = arith.constant 0 : index
    %c0_509 = arith.constant 0 : index
    %c0_510 = arith.constant 0 : index
    %1277 = vector.load %arg31[%c1_507, %c0_508, %c0_509, %c0_510] : memref<2x4x8x32xf32, #tpu.memory_space<vmem>>, vector<1x4x8x32xf32>
    %1278 = vector.shape_cast %1277 : vector<1x4x8x32xf32> to vector<4x8x32xf32>
    %c1_511 = arith.constant 1 : index
    %c0_512 = arith.constant 0 : index
    %c0_513 = arith.constant 0 : index
    %1279 = vector.load %arg32[%c1_511, %c0_512, %c0_513] : memref<2x1x32xf32, #tpu.memory_space<vmem>>, vector<1x1x32xf32>
    %1280 = vector.shape_cast %1279 : vector<1x1x32xf32> to vector<1x32xf32>
    %1281 = vector.extract_strided_slice %1266 {offsets = [0, 0, 0], sizes = [1, 32, 8], strides = [1, 1, 1]} : vector<4x32x8xf32> to vector<1x32x8xf32>
    %1282 = vector.shape_cast %1281 : vector<1x32x8xf32> to vector<32x8xf32>
    %cst_514 = arith.constant dense<0.000000e+00> : vector<16x8xf32>
    %1283 = tpu.matmul %1264, %1282, %cst_514 {dimension_numbers = #tpu.dot_dimension_numbers<[1], [0], [0], [1], [0, 0, 1, 1], [], []>} : vector<16x32xf32>, vector<32x8xf32>, vector<16x8xf32> -> vector<16x8xf32>
    %1284 = vector.extract_strided_slice %1268 {offsets = [0, 0, 0], sizes = [1, 1, 8], strides = [1, 1, 1]} : vector<4x1x8xf32> to vector<1x1x8xf32>
    %1285 = vector.shape_cast %1284 : vector<1x1x8xf32> to vector<1x8xf32>
    %1286 = vector.broadcast %1285 : vector<1x8xf32> to vector<16x8xf32>
    %1287 = arith.addf %1283, %1286 : vector<16x8xf32>
    %1288 = vector.extract_strided_slice %1270 {offsets = [0, 0, 0], sizes = [1, 32, 8], strides = [1, 1, 1]} : vector<4x32x8xf32> to vector<1x32x8xf32>
    %1289 = vector.shape_cast %1288 : vector<1x32x8xf32> to vector<32x8xf32>
    %cst_515 = arith.constant dense<0.000000e+00> : vector<16x8xf32>
    %1290 = tpu.matmul %1264, %1289, %cst_515 {dimension_numbers = #tpu.dot_dimension_numbers<[1], [0], [0], [1], [0, 0, 1, 1], [], []>} : vector<16x32xf32>, vector<32x8xf32>, vector<16x8xf32> -> vector<16x8xf32>
    %1291 = vector.extract_strided_slice %1272 {offsets = [0, 0, 0], sizes = [1, 1, 8], strides = [1, 1, 1]} : vector<4x1x8xf32> to vector<1x1x8xf32>
    %1292 = vector.shape_cast %1291 : vector<1x1x8xf32> to vector<1x8xf32>
    %1293 = vector.broadcast %1292 : vector<1x8xf32> to vector<16x8xf32>
    %1294 = arith.addf %1290, %1293 : vector<16x8xf32>
    %1295 = vector.extract_strided_slice %1274 {offsets = [0, 0, 0], sizes = [1, 32, 8], strides = [1, 1, 1]} : vector<4x32x8xf32> to vector<1x32x8xf32>
    %1296 = vector.shape_cast %1295 : vector<1x32x8xf32> to vector<32x8xf32>
    %cst_516 = arith.constant dense<0.000000e+00> : vector<16x8xf32>
    %1297 = tpu.matmul %1264, %1296, %cst_516 {dimension_numbers = #tpu.dot_dimension_numbers<[1], [0], [0], [1], [0, 0, 1, 1], [], []>} : vector<16x32xf32>, vector<32x8xf32>, vector<16x8xf32> -> vector<16x8xf32>
    %1298 = vector.extract_strided_slice %1276 {offsets = [0, 0, 0], sizes = [1, 1, 8], strides = [1, 1, 1]} : vector<4x1x8xf32> to vector<1x1x8xf32>
    %1299 = vector.shape_cast %1298 : vector<1x1x8xf32> to vector<1x8xf32>
    %1300 = vector.broadcast %1299 : vector<1x8xf32> to vector<16x8xf32>
    %1301 = arith.addf %1297, %1300 : vector<16x8xf32>
    %1302 = vector.extract_strided_slice %1287 {offsets = [0, 0], sizes = [8, 8], strides = [1, 1]} : vector<16x8xf32> to vector<8x8xf32>
    %1303 = vector.extract_strided_slice %1294 {offsets = [0, 0], sizes = [8, 8], strides = [1, 1]} : vector<16x8xf32> to vector<8x8xf32>
    %1304 = vector.extract_strided_slice %1301 {offsets = [0, 0], sizes = [8, 8], strides = [1, 1]} : vector<16x8xf32> to vector<8x8xf32>
    %cst_517 = arith.constant dense<0.000000e+00> : vector<8x8xf32>
    %1305 = tpu.matmul %1302, %1303, %cst_517 {dimension_numbers = #tpu.dot_dimension_numbers<[1], [1], [0], [0], [0, 0, 1, 0], [], []>} : vector<8x8xf32>, vector<8x8xf32>, vector<8x8xf32> -> vector<8x8xf32>
    %cst_518 = arith.constant 0.353553385 : f32
    %1306 = vector.broadcast %cst_518 : f32 to vector<8x8xf32>
    %1307 = arith.mulf %1305, %1306 : vector<8x8xf32>
    %cst_519 = arith.constant dense<0xFF800000> : vector<8xf32>
    %1308 = vector.multi_reduction <maximumf>, %1307, %cst_519 [1] : vector<8x8xf32> to vector<8xf32>
    %1309 = vector.shape_cast %1308 : vector<8xf32> to vector<8x1xf32>
    %1310 = vector.broadcast %1309 : vector<8x1xf32> to vector<8x8xf32>
    %1311 = arith.subf %1307, %1310 : vector<8x8xf32>
    %1312 = math.exp %1311 : vector<8x8xf32>
    %cst_520 = arith.constant dense<0.000000e+00> : vector<8xf32>
    %1313 = vector.multi_reduction <add>, %1312, %cst_520 [1] : vector<8x8xf32> to vector<8xf32>
    %1314 = vector.shape_cast %1313 : vector<8xf32> to vector<8x1xf32>
    %1315 = tpu.reciprocal %1314 {approx = true} : vector<8x1xf32> -> vector<8x1xf32>
    %1316 = vector.broadcast %1315 : vector<8x1xf32> to vector<8x8xf32>
    %1317 = arith.mulf %1312, %1316 : vector<8x8xf32>
    %cst_521 = arith.constant dense<0.000000e+00> : vector<8x8xf32>
    %1318 = tpu.matmul %1317, %1304, %cst_521 {dimension_numbers = #tpu.dot_dimension_numbers<[1], [0], [0], [1], [0, 0, 1, 1], [], []>} : vector<8x8xf32>, vector<8x8xf32>, vector<8x8xf32> -> vector<8x8xf32>
    %1319 = vector.extract_strided_slice %1287 {offsets = [8, 0], sizes = [8, 8], strides = [1, 1]} : vector<16x8xf32> to vector<8x8xf32>
    %1320 = vector.extract_strided_slice %1294 {offsets = [8, 0], sizes = [8, 8], strides = [1, 1]} : vector<16x8xf32> to vector<8x8xf32>
    %1321 = vector.extract_strided_slice %1301 {offsets = [8, 0], sizes = [8, 8], strides = [1, 1]} : vector<16x8xf32> to vector<8x8xf32>
    %cst_522 = arith.constant dense<0.000000e+00> : vector<8x8xf32>
    %1322 = tpu.matmul %1319, %1320, %cst_522 {dimension_numbers = #tpu.dot_dimension_numbers<[1], [1], [0], [0], [0, 0, 1, 0], [], []>} : vector<8x8xf32>, vector<8x8xf32>, vector<8x8xf32> -> vector<8x8xf32>
    %cst_523 = arith.constant 0.353553385 : f32
    %1323 = vector.broadcast %cst_523 : f32 to vector<8x8xf32>
    %1324 = arith.mulf %1322, %1323 : vector<8x8xf32>
    %cst_524 = arith.constant dense<0xFF800000> : vector<8xf32>
    %1325 = vector.multi_reduction <maximumf>, %1324, %cst_524 [1] : vector<8x8xf32> to vector<8xf32>
    %1326 = vector.shape_cast %1325 : vector<8xf32> to vector<8x1xf32>
    %1327 = vector.broadcast %1326 : vector<8x1xf32> to vector<8x8xf32>
    %1328 = arith.subf %1324, %1327 : vector<8x8xf32>
    %1329 = math.exp %1328 : vector<8x8xf32>
    %cst_525 = arith.constant dense<0.000000e+00> : vector<8xf32>
    %1330 = vector.multi_reduction <add>, %1329, %cst_525 [1] : vector<8x8xf32> to vector<8xf32>
    %1331 = vector.shape_cast %1330 : vector<8xf32> to vector<8x1xf32>
    %1332 = tpu.reciprocal %1331 {approx = true} : vector<8x1xf32> -> vector<8x1xf32>
    %1333 = vector.broadcast %1332 : vector<8x1xf32> to vector<8x8xf32>
    %1334 = arith.mulf %1329, %1333 : vector<8x8xf32>
    %cst_526 = arith.constant dense<0.000000e+00> : vector<8x8xf32>
    %1335 = tpu.matmul %1334, %1321, %cst_526 {dimension_numbers = #tpu.dot_dimension_numbers<[1], [0], [0], [1], [0, 0, 1, 1], [], []>} : vector<8x8xf32>, vector<8x8xf32>, vector<8x8xf32> -> vector<8x8xf32>
    %1336 = tpu.concatenate %1318, %1335 in 0 : vector<8x8xf32>, vector<8x8xf32> -> vector<16x8xf32>
    %1337 = vector.extract_strided_slice %1278 {offsets = [0, 0, 0], sizes = [1, 8, 32], strides = [1, 1, 1]} : vector<4x8x32xf32> to vector<1x8x32xf32>
    %1338 = vector.shape_cast %1337 : vector<1x8x32xf32> to vector<8x32xf32>
    %cst_527 = arith.constant dense<0.000000e+00> : vector<16x32xf32>
    %1339 = tpu.matmul %1336, %1338, %cst_527 {dimension_numbers = #tpu.dot_dimension_numbers<[1], [0], [0], [1], [0, 0, 1, 1], [], []>} : vector<16x8xf32>, vector<8x32xf32>, vector<16x32xf32> -> vector<16x32xf32>
    %1340 = vector.extract_strided_slice %1266 {offsets = [1, 0, 0], sizes = [1, 32, 8], strides = [1, 1, 1]} : vector<4x32x8xf32> to vector<1x32x8xf32>
    %1341 = vector.shape_cast %1340 : vector<1x32x8xf32> to vector<32x8xf32>
    %cst_528 = arith.constant dense<0.000000e+00> : vector<16x8xf32>
    %1342 = tpu.matmul %1264, %1341, %cst_528 {dimension_numbers = #tpu.dot_dimension_numbers<[1], [0], [0], [1], [0, 0, 1, 1], [], []>} : vector<16x32xf32>, vector<32x8xf32>, vector<16x8xf32> -> vector<16x8xf32>
    %1343 = vector.extract_strided_slice %1268 {offsets = [1, 0, 0], sizes = [1, 1, 8], strides = [1, 1, 1]} : vector<4x1x8xf32> to vector<1x1x8xf32>
    %1344 = vector.shape_cast %1343 : vector<1x1x8xf32> to vector<1x8xf32>
    %1345 = vector.broadcast %1344 : vector<1x8xf32> to vector<16x8xf32>
    %1346 = arith.addf %1342, %1345 : vector<16x8xf32>
    %1347 = vector.extract_strided_slice %1270 {offsets = [1, 0, 0], sizes = [1, 32, 8], strides = [1, 1, 1]} : vector<4x32x8xf32> to vector<1x32x8xf32>
    %1348 = vector.shape_cast %1347 : vector<1x32x8xf32> to vector<32x8xf32>
    %cst_529 = arith.constant dense<0.000000e+00> : vector<16x8xf32>
    %1349 = tpu.matmul %1264, %1348, %cst_529 {dimension_numbers = #tpu.dot_dimension_numbers<[1], [0], [0], [1], [0, 0, 1, 1], [], []>} : vector<16x32xf32>, vector<32x8xf32>, vector<16x8xf32> -> vector<16x8xf32>
    %1350 = vector.extract_strided_slice %1272 {offsets = [1, 0, 0], sizes = [1, 1, 8], strides = [1, 1, 1]} : vector<4x1x8xf32> to vector<1x1x8xf32>
    %1351 = vector.shape_cast %1350 : vector<1x1x8xf32> to vector<1x8xf32>
    %1352 = vector.broadcast %1351 : vector<1x8xf32> to vector<16x8xf32>
    %1353 = arith.addf %1349, %1352 : vector<16x8xf32>
    %1354 = vector.extract_strided_slice %1274 {offsets = [1, 0, 0], sizes = [1, 32, 8], strides = [1, 1, 1]} : vector<4x32x8xf32> to vector<1x32x8xf32>
    %1355 = vector.shape_cast %1354 : vector<1x32x8xf32> to vector<32x8xf32>
    %cst_530 = arith.constant dense<0.000000e+00> : vector<16x8xf32>
    %1356 = tpu.matmul %1264, %1355, %cst_530 {dimension_numbers = #tpu.dot_dimension_numbers<[1], [0], [0], [1], [0, 0, 1, 1], [], []>} : vector<16x32xf32>, vector<32x8xf32>, vector<16x8xf32> -> vector<16x8xf32>
    %1357 = vector.extract_strided_slice %1276 {offsets = [1, 0, 0], sizes = [1, 1, 8], strides = [1, 1, 1]} : vector<4x1x8xf32> to vector<1x1x8xf32>
    %1358 = vector.shape_cast %1357 : vector<1x1x8xf32> to vector<1x8xf32>
    %1359 = vector.broadcast %1358 : vector<1x8xf32> to vector<16x8xf32>
    %1360 = arith.addf %1356, %1359 : vector<16x8xf32>
    %1361 = vector.extract_strided_slice %1346 {offsets = [0, 0], sizes = [8, 8], strides = [1, 1]} : vector<16x8xf32> to vector<8x8xf32>
    %1362 = vector.extract_strided_slice %1353 {offsets = [0, 0], sizes = [8, 8], strides = [1, 1]} : vector<16x8xf32> to vector<8x8xf32>
    %1363 = vector.extract_strided_slice %1360 {offsets = [0, 0], sizes = [8, 8], strides = [1, 1]} : vector<16x8xf32> to vector<8x8xf32>
    %cst_531 = arith.constant dense<0.000000e+00> : vector<8x8xf32>
    %1364 = tpu.matmul %1361, %1362, %cst_531 {dimension_numbers = #tpu.dot_dimension_numbers<[1], [1], [0], [0], [0, 0, 1, 0], [], []>} : vector<8x8xf32>, vector<8x8xf32>, vector<8x8xf32> -> vector<8x8xf32>
    %cst_532 = arith.constant 0.353553385 : f32
    %1365 = vector.broadcast %cst_532 : f32 to vector<8x8xf32>
    %1366 = arith.mulf %1364, %1365 : vector<8x8xf32>
    %cst_533 = arith.constant dense<0xFF800000> : vector<8xf32>
    %1367 = vector.multi_reduction <maximumf>, %1366, %cst_533 [1] : vector<8x8xf32> to vector<8xf32>
    %1368 = vector.shape_cast %1367 : vector<8xf32> to vector<8x1xf32>
    %1369 = vector.broadcast %1368 : vector<8x1xf32> to vector<8x8xf32>
    %1370 = arith.subf %1366, %1369 : vector<8x8xf32>
    %1371 = math.exp %1370 : vector<8x8xf32>
    %cst_534 = arith.constant dense<0.000000e+00> : vector<8xf32>
    %1372 = vector.multi_reduction <add>, %1371, %cst_534 [1] : vector<8x8xf32> to vector<8xf32>
    %1373 = vector.shape_cast %1372 : vector<8xf32> to vector<8x1xf32>
    %1374 = tpu.reciprocal %1373 {approx = true} : vector<8x1xf32> -> vector<8x1xf32>
    %1375 = vector.broadcast %1374 : vector<8x1xf32> to vector<8x8xf32>
    %1376 = arith.mulf %1371, %1375 : vector<8x8xf32>
    %cst_535 = arith.constant dense<0.000000e+00> : vector<8x8xf32>
    %1377 = tpu.matmul %1376, %1363, %cst_535 {dimension_numbers = #tpu.dot_dimension_numbers<[1], [0], [0], [1], [0, 0, 1, 1], [], []>} : vector<8x8xf32>, vector<8x8xf32>, vector<8x8xf32> -> vector<8x8xf32>
    %1378 = vector.extract_strided_slice %1346 {offsets = [8, 0], sizes = [8, 8], strides = [1, 1]} : vector<16x8xf32> to vector<8x8xf32>
    %1379 = vector.extract_strided_slice %1353 {offsets = [8, 0], sizes = [8, 8], strides = [1, 1]} : vector<16x8xf32> to vector<8x8xf32>
    %1380 = vector.extract_strided_slice %1360 {offsets = [8, 0], sizes = [8, 8], strides = [1, 1]} : vector<16x8xf32> to vector<8x8xf32>
    %cst_536 = arith.constant dense<0.000000e+00> : vector<8x8xf32>
    %1381 = tpu.matmul %1378, %1379, %cst_536 {dimension_numbers = #tpu.dot_dimension_numbers<[1], [1], [0], [0], [0, 0, 1, 0], [], []>} : vector<8x8xf32>, vector<8x8xf32>, vector<8x8xf32> -> vector<8x8xf32>
    %cst_537 = arith.constant 0.353553385 : f32
    %1382 = vector.broadcast %cst_537 : f32 to vector<8x8xf32>
    %1383 = arith.mulf %1381, %1382 : vector<8x8xf32>
    %cst_538 = arith.constant dense<0xFF800000> : vector<8xf32>
    %1384 = vector.multi_reduction <maximumf>, %1383, %cst_538 [1] : vector<8x8xf32> to vector<8xf32>
    %1385 = vector.shape_cast %1384 : vector<8xf32> to vector<8x1xf32>
    %1386 = vector.broadcast %1385 : vector<8x1xf32> to vector<8x8xf32>
    %1387 = arith.subf %1383, %1386 : vector<8x8xf32>
    %1388 = math.exp %1387 : vector<8x8xf32>
    %cst_539 = arith.constant dense<0.000000e+00> : vector<8xf32>
    %1389 = vector.multi_reduction <add>, %1388, %cst_539 [1] : vector<8x8xf32> to vector<8xf32>
    %1390 = vector.shape_cast %1389 : vector<8xf32> to vector<8x1xf32>
    %1391 = tpu.reciprocal %1390 {approx = true} : vector<8x1xf32> -> vector<8x1xf32>
    %1392 = vector.broadcast %1391 : vector<8x1xf32> to vector<8x8xf32>
    %1393 = arith.mulf %1388, %1392 : vector<8x8xf32>
    %cst_540 = arith.constant dense<0.000000e+00> : vector<8x8xf32>
    %1394 = tpu.matmul %1393, %1380, %cst_540 {dimension_numbers = #tpu.dot_dimension_numbers<[1], [0], [0], [1], [0, 0, 1, 1], [], []>} : vector<8x8xf32>, vector<8x8xf32>, vector<8x8xf32> -> vector<8x8xf32>
    %1395 = tpu.concatenate %1377, %1394 in 0 : vector<8x8xf32>, vector<8x8xf32> -> vector<16x8xf32>
    %1396 = vector.extract_strided_slice %1278 {offsets = [1, 0, 0], sizes = [1, 8, 32], strides = [1, 1, 1]} : vector<4x8x32xf32> to vector<1x8x32xf32>
    %1397 = vector.shape_cast %1396 : vector<1x8x32xf32> to vector<8x32xf32>
    %cst_541 = arith.constant dense<0.000000e+00> : vector<16x32xf32>
    %1398 = tpu.matmul %1395, %1397, %cst_541 {dimension_numbers = #tpu.dot_dimension_numbers<[1], [0], [0], [1], [0, 0, 1, 1], [], []>} : vector<16x8xf32>, vector<8x32xf32>, vector<16x32xf32> -> vector<16x32xf32>
    %1399 = arith.addf %1339, %1398 : vector<16x32xf32>
    %1400 = vector.extract_strided_slice %1266 {offsets = [2, 0, 0], sizes = [1, 32, 8], strides = [1, 1, 1]} : vector<4x32x8xf32> to vector<1x32x8xf32>
    %1401 = vector.shape_cast %1400 : vector<1x32x8xf32> to vector<32x8xf32>
    %cst_542 = arith.constant dense<0.000000e+00> : vector<16x8xf32>
    %1402 = tpu.matmul %1264, %1401, %cst_542 {dimension_numbers = #tpu.dot_dimension_numbers<[1], [0], [0], [1], [0, 0, 1, 1], [], []>} : vector<16x32xf32>, vector<32x8xf32>, vector<16x8xf32> -> vector<16x8xf32>
    %1403 = vector.extract_strided_slice %1268 {offsets = [2, 0, 0], sizes = [1, 1, 8], strides = [1, 1, 1]} : vector<4x1x8xf32> to vector<1x1x8xf32>
    %1404 = vector.shape_cast %1403 : vector<1x1x8xf32> to vector<1x8xf32>
    %1405 = vector.broadcast %1404 : vector<1x8xf32> to vector<16x8xf32>
    %1406 = arith.addf %1402, %1405 : vector<16x8xf32>
    %1407 = vector.extract_strided_slice %1270 {offsets = [2, 0, 0], sizes = [1, 32, 8], strides = [1, 1, 1]} : vector<4x32x8xf32> to vector<1x32x8xf32>
    %1408 = vector.shape_cast %1407 : vector<1x32x8xf32> to vector<32x8xf32>
    %cst_543 = arith.constant dense<0.000000e+00> : vector<16x8xf32>
    %1409 = tpu.matmul %1264, %1408, %cst_543 {dimension_numbers = #tpu.dot_dimension_numbers<[1], [0], [0], [1], [0, 0, 1, 1], [], []>} : vector<16x32xf32>, vector<32x8xf32>, vector<16x8xf32> -> vector<16x8xf32>
    %1410 = vector.extract_strided_slice %1272 {offsets = [2, 0, 0], sizes = [1, 1, 8], strides = [1, 1, 1]} : vector<4x1x8xf32> to vector<1x1x8xf32>
    %1411 = vector.shape_cast %1410 : vector<1x1x8xf32> to vector<1x8xf32>
    %1412 = vector.broadcast %1411 : vector<1x8xf32> to vector<16x8xf32>
    %1413 = arith.addf %1409, %1412 : vector<16x8xf32>
    %1414 = vector.extract_strided_slice %1274 {offsets = [2, 0, 0], sizes = [1, 32, 8], strides = [1, 1, 1]} : vector<4x32x8xf32> to vector<1x32x8xf32>
    %1415 = vector.shape_cast %1414 : vector<1x32x8xf32> to vector<32x8xf32>
    %cst_544 = arith.constant dense<0.000000e+00> : vector<16x8xf32>
    %1416 = tpu.matmul %1264, %1415, %cst_544 {dimension_numbers = #tpu.dot_dimension_numbers<[1], [0], [0], [1], [0, 0, 1, 1], [], []>} : vector<16x32xf32>, vector<32x8xf32>, vector<16x8xf32> -> vector<16x8xf32>
    %1417 = vector.extract_strided_slice %1276 {offsets = [2, 0, 0], sizes = [1, 1, 8], strides = [1, 1, 1]} : vector<4x1x8xf32> to vector<1x1x8xf32>
    %1418 = vector.shape_cast %1417 : vector<1x1x8xf32> to vector<1x8xf32>
    %1419 = vector.broadcast %1418 : vector<1x8xf32> to vector<16x8xf32>
    %1420 = arith.addf %1416, %1419 : vector<16x8xf32>
    %1421 = vector.extract_strided_slice %1406 {offsets = [0, 0], sizes = [8, 8], strides = [1, 1]} : vector<16x8xf32> to vector<8x8xf32>
    %1422 = vector.extract_strided_slice %1413 {offsets = [0, 0], sizes = [8, 8], strides = [1, 1]} : vector<16x8xf32> to vector<8x8xf32>
    %1423 = vector.extract_strided_slice %1420 {offsets = [0, 0], sizes = [8, 8], strides = [1, 1]} : vector<16x8xf32> to vector<8x8xf32>
    %cst_545 = arith.constant dense<0.000000e+00> : vector<8x8xf32>
    %1424 = tpu.matmul %1421, %1422, %cst_545 {dimension_numbers = #tpu.dot_dimension_numbers<[1], [1], [0], [0], [0, 0, 1, 0], [], []>} : vector<8x8xf32>, vector<8x8xf32>, vector<8x8xf32> -> vector<8x8xf32>
    %cst_546 = arith.constant 0.353553385 : f32
    %1425 = vector.broadcast %cst_546 : f32 to vector<8x8xf32>
    %1426 = arith.mulf %1424, %1425 : vector<8x8xf32>
    %cst_547 = arith.constant dense<0xFF800000> : vector<8xf32>
    %1427 = vector.multi_reduction <maximumf>, %1426, %cst_547 [1] : vector<8x8xf32> to vector<8xf32>
    %1428 = vector.shape_cast %1427 : vector<8xf32> to vector<8x1xf32>
    %1429 = vector.broadcast %1428 : vector<8x1xf32> to vector<8x8xf32>
    %1430 = arith.subf %1426, %1429 : vector<8x8xf32>
    %1431 = math.exp %1430 : vector<8x8xf32>
    %cst_548 = arith.constant dense<0.000000e+00> : vector<8xf32>
    %1432 = vector.multi_reduction <add>, %1431, %cst_548 [1] : vector<8x8xf32> to vector<8xf32>
    %1433 = vector.shape_cast %1432 : vector<8xf32> to vector<8x1xf32>
    %1434 = tpu.reciprocal %1433 {approx = true} : vector<8x1xf32> -> vector<8x1xf32>
    %1435 = vector.broadcast %1434 : vector<8x1xf32> to vector<8x8xf32>
    %1436 = arith.mulf %1431, %1435 : vector<8x8xf32>
    %cst_549 = arith.constant dense<0.000000e+00> : vector<8x8xf32>
    %1437 = tpu.matmul %1436, %1423, %cst_549 {dimension_numbers = #tpu.dot_dimension_numbers<[1], [0], [0], [1], [0, 0, 1, 1], [], []>} : vector<8x8xf32>, vector<8x8xf32>, vector<8x8xf32> -> vector<8x8xf32>
    %1438 = vector.extract_strided_slice %1406 {offsets = [8, 0], sizes = [8, 8], strides = [1, 1]} : vector<16x8xf32> to vector<8x8xf32>
    %1439 = vector.extract_strided_slice %1413 {offsets = [8, 0], sizes = [8, 8], strides = [1, 1]} : vector<16x8xf32> to vector<8x8xf32>
    %1440 = vector.extract_strided_slice %1420 {offsets = [8, 0], sizes = [8, 8], strides = [1, 1]} : vector<16x8xf32> to vector<8x8xf32>
    %cst_550 = arith.constant dense<0.000000e+00> : vector<8x8xf32>
    %1441 = tpu.matmul %1438, %1439, %cst_550 {dimension_numbers = #tpu.dot_dimension_numbers<[1], [1], [0], [0], [0, 0, 1, 0], [], []>} : vector<8x8xf32>, vector<8x8xf32>, vector<8x8xf32> -> vector<8x8xf32>
    %cst_551 = arith.constant 0.353553385 : f32
    %1442 = vector.broadcast %cst_551 : f32 to vector<8x8xf32>
    %1443 = arith.mulf %1441, %1442 : vector<8x8xf32>
    %cst_552 = arith.constant dense<0xFF800000> : vector<8xf32>
    %1444 = vector.multi_reduction <maximumf>, %1443, %cst_552 [1] : vector<8x8xf32> to vector<8xf32>
    %1445 = vector.shape_cast %1444 : vector<8xf32> to vector<8x1xf32>
    %1446 = vector.broadcast %1445 : vector<8x1xf32> to vector<8x8xf32>
    %1447 = arith.subf %1443, %1446 : vector<8x8xf32>
    %1448 = math.exp %1447 : vector<8x8xf32>
    %cst_553 = arith.constant dense<0.000000e+00> : vector<8xf32>
    %1449 = vector.multi_reduction <add>, %1448, %cst_553 [1] : vector<8x8xf32> to vector<8xf32>
    %1450 = vector.shape_cast %1449 : vector<8xf32> to vector<8x1xf32>
    %1451 = tpu.reciprocal %1450 {approx = true} : vector<8x1xf32> -> vector<8x1xf32>
    %1452 = vector.broadcast %1451 : vector<8x1xf32> to vector<8x8xf32>
    %1453 = arith.mulf %1448, %1452 : vector<8x8xf32>
    %cst_554 = arith.constant dense<0.000000e+00> : vector<8x8xf32>
    %1454 = tpu.matmul %1453, %1440, %cst_554 {dimension_numbers = #tpu.dot_dimension_numbers<[1], [0], [0], [1], [0, 0, 1, 1], [], []>} : vector<8x8xf32>, vector<8x8xf32>, vector<8x8xf32> -> vector<8x8xf32>
    %1455 = tpu.concatenate %1437, %1454 in 0 : vector<8x8xf32>, vector<8x8xf32> -> vector<16x8xf32>
    %1456 = vector.extract_strided_slice %1278 {offsets = [2, 0, 0], sizes = [1, 8, 32], strides = [1, 1, 1]} : vector<4x8x32xf32> to vector<1x8x32xf32>
    %1457 = vector.shape_cast %1456 : vector<1x8x32xf32> to vector<8x32xf32>
    %cst_555 = arith.constant dense<0.000000e+00> : vector<16x32xf32>
    %1458 = tpu.matmul %1455, %1457, %cst_555 {dimension_numbers = #tpu.dot_dimension_numbers<[1], [0], [0], [1], [0, 0, 1, 1], [], []>} : vector<16x8xf32>, vector<8x32xf32>, vector<16x32xf32> -> vector<16x32xf32>
    %1459 = arith.addf %1399, %1458 : vector<16x32xf32>
    %1460 = vector.extract_strided_slice %1266 {offsets = [3, 0, 0], sizes = [1, 32, 8], strides = [1, 1, 1]} : vector<4x32x8xf32> to vector<1x32x8xf32>
    %1461 = vector.shape_cast %1460 : vector<1x32x8xf32> to vector<32x8xf32>
    %cst_556 = arith.constant dense<0.000000e+00> : vector<16x8xf32>
    %1462 = tpu.matmul %1264, %1461, %cst_556 {dimension_numbers = #tpu.dot_dimension_numbers<[1], [0], [0], [1], [0, 0, 1, 1], [], []>} : vector<16x32xf32>, vector<32x8xf32>, vector<16x8xf32> -> vector<16x8xf32>
    %1463 = vector.extract_strided_slice %1268 {offsets = [3, 0, 0], sizes = [1, 1, 8], strides = [1, 1, 1]} : vector<4x1x8xf32> to vector<1x1x8xf32>
    %1464 = vector.shape_cast %1463 : vector<1x1x8xf32> to vector<1x8xf32>
    %1465 = vector.broadcast %1464 : vector<1x8xf32> to vector<16x8xf32>
    %1466 = arith.addf %1462, %1465 : vector<16x8xf32>
    %1467 = vector.extract_strided_slice %1270 {offsets = [3, 0, 0], sizes = [1, 32, 8], strides = [1, 1, 1]} : vector<4x32x8xf32> to vector<1x32x8xf32>
    %1468 = vector.shape_cast %1467 : vector<1x32x8xf32> to vector<32x8xf32>
    %cst_557 = arith.constant dense<0.000000e+00> : vector<16x8xf32>
    %1469 = tpu.matmul %1264, %1468, %cst_557 {dimension_numbers = #tpu.dot_dimension_numbers<[1], [0], [0], [1], [0, 0, 1, 1], [], []>} : vector<16x32xf32>, vector<32x8xf32>, vector<16x8xf32> -> vector<16x8xf32>
    %1470 = vector.extract_strided_slice %1272 {offsets = [3, 0, 0], sizes = [1, 1, 8], strides = [1, 1, 1]} : vector<4x1x8xf32> to vector<1x1x8xf32>
    %1471 = vector.shape_cast %1470 : vector<1x1x8xf32> to vector<1x8xf32>
    %1472 = vector.broadcast %1471 : vector<1x8xf32> to vector<16x8xf32>
    %1473 = arith.addf %1469, %1472 : vector<16x8xf32>
    %1474 = vector.extract_strided_slice %1274 {offsets = [3, 0, 0], sizes = [1, 32, 8], strides = [1, 1, 1]} : vector<4x32x8xf32> to vector<1x32x8xf32>
    %1475 = vector.shape_cast %1474 : vector<1x32x8xf32> to vector<32x8xf32>
    %cst_558 = arith.constant dense<0.000000e+00> : vector<16x8xf32>
    %1476 = tpu.matmul %1264, %1475, %cst_558 {dimension_numbers = #tpu.dot_dimension_numbers<[1], [0], [0], [1], [0, 0, 1, 1], [], []>} : vector<16x32xf32>, vector<32x8xf32>, vector<16x8xf32> -> vector<16x8xf32>
    %1477 = vector.extract_strided_slice %1276 {offsets = [3, 0, 0], sizes = [1, 1, 8], strides = [1, 1, 1]} : vector<4x1x8xf32> to vector<1x1x8xf32>
    %1478 = vector.shape_cast %1477 : vector<1x1x8xf32> to vector<1x8xf32>
    %1479 = vector.broadcast %1478 : vector<1x8xf32> to vector<16x8xf32>
    %1480 = arith.addf %1476, %1479 : vector<16x8xf32>
    %1481 = vector.extract_strided_slice %1466 {offsets = [0, 0], sizes = [8, 8], strides = [1, 1]} : vector<16x8xf32> to vector<8x8xf32>
    %1482 = vector.extract_strided_slice %1473 {offsets = [0, 0], sizes = [8, 8], strides = [1, 1]} : vector<16x8xf32> to vector<8x8xf32>
    %1483 = vector.extract_strided_slice %1480 {offsets = [0, 0], sizes = [8, 8], strides = [1, 1]} : vector<16x8xf32> to vector<8x8xf32>
    %cst_559 = arith.constant dense<0.000000e+00> : vector<8x8xf32>
    %1484 = tpu.matmul %1481, %1482, %cst_559 {dimension_numbers = #tpu.dot_dimension_numbers<[1], [1], [0], [0], [0, 0, 1, 0], [], []>} : vector<8x8xf32>, vector<8x8xf32>, vector<8x8xf32> -> vector<8x8xf32>
    %cst_560 = arith.constant 0.353553385 : f32
    %1485 = vector.broadcast %cst_560 : f32 to vector<8x8xf32>
    %1486 = arith.mulf %1484, %1485 : vector<8x8xf32>
    %cst_561 = arith.constant dense<0xFF800000> : vector<8xf32>
    %1487 = vector.multi_reduction <maximumf>, %1486, %cst_561 [1] : vector<8x8xf32> to vector<8xf32>
    %1488 = vector.shape_cast %1487 : vector<8xf32> to vector<8x1xf32>
    %1489 = vector.broadcast %1488 : vector<8x1xf32> to vector<8x8xf32>
    %1490 = arith.subf %1486, %1489 : vector<8x8xf32>
    %1491 = math.exp %1490 : vector<8x8xf32>
    %cst_562 = arith.constant dense<0.000000e+00> : vector<8xf32>
    %1492 = vector.multi_reduction <add>, %1491, %cst_562 [1] : vector<8x8xf32> to vector<8xf32>
    %1493 = vector.shape_cast %1492 : vector<8xf32> to vector<8x1xf32>
    %1494 = tpu.reciprocal %1493 {approx = true} : vector<8x1xf32> -> vector<8x1xf32>
    %1495 = vector.broadcast %1494 : vector<8x1xf32> to vector<8x8xf32>
    %1496 = arith.mulf %1491, %1495 : vector<8x8xf32>
    %cst_563 = arith.constant dense<0.000000e+00> : vector<8x8xf32>
    %1497 = tpu.matmul %1496, %1483, %cst_563 {dimension_numbers = #tpu.dot_dimension_numbers<[1], [0], [0], [1], [0, 0, 1, 1], [], []>} : vector<8x8xf32>, vector<8x8xf32>, vector<8x8xf32> -> vector<8x8xf32>
    %1498 = vector.extract_strided_slice %1466 {offsets = [8, 0], sizes = [8, 8], strides = [1, 1]} : vector<16x8xf32> to vector<8x8xf32>
    %1499 = vector.extract_strided_slice %1473 {offsets = [8, 0], sizes = [8, 8], strides = [1, 1]} : vector<16x8xf32> to vector<8x8xf32>
    %1500 = vector.extract_strided_slice %1480 {offsets = [8, 0], sizes = [8, 8], strides = [1, 1]} : vector<16x8xf32> to vector<8x8xf32>
    %cst_564 = arith.constant dense<0.000000e+00> : vector<8x8xf32>
    %1501 = tpu.matmul %1498, %1499, %cst_564 {dimension_numbers = #tpu.dot_dimension_numbers<[1], [1], [0], [0], [0, 0, 1, 0], [], []>} : vector<8x8xf32>, vector<8x8xf32>, vector<8x8xf32> -> vector<8x8xf32>
    %cst_565 = arith.constant 0.353553385 : f32
    %1502 = vector.broadcast %cst_565 : f32 to vector<8x8xf32>
    %1503 = arith.mulf %1501, %1502 : vector<8x8xf32>
    %cst_566 = arith.constant dense<0xFF800000> : vector<8xf32>
    %1504 = vector.multi_reduction <maximumf>, %1503, %cst_566 [1] : vector<8x8xf32> to vector<8xf32>
    %1505 = vector.shape_cast %1504 : vector<8xf32> to vector<8x1xf32>
    %1506 = vector.broadcast %1505 : vector<8x1xf32> to vector<8x8xf32>
    %1507 = arith.subf %1503, %1506 : vector<8x8xf32>
    %1508 = math.exp %1507 : vector<8x8xf32>
    %cst_567 = arith.constant dense<0.000000e+00> : vector<8xf32>
    %1509 = vector.multi_reduction <add>, %1508, %cst_567 [1] : vector<8x8xf32> to vector<8xf32>
    %1510 = vector.shape_cast %1509 : vector<8xf32> to vector<8x1xf32>
    %1511 = tpu.reciprocal %1510 {approx = true} : vector<8x1xf32> -> vector<8x1xf32>
    %1512 = vector.broadcast %1511 : vector<8x1xf32> to vector<8x8xf32>
    %1513 = arith.mulf %1508, %1512 : vector<8x8xf32>
    %cst_568 = arith.constant dense<0.000000e+00> : vector<8x8xf32>
    %1514 = tpu.matmul %1513, %1500, %cst_568 {dimension_numbers = #tpu.dot_dimension_numbers<[1], [0], [0], [1], [0, 0, 1, 1], [], []>} : vector<8x8xf32>, vector<8x8xf32>, vector<8x8xf32> -> vector<8x8xf32>
    %1515 = tpu.concatenate %1497, %1514 in 0 : vector<8x8xf32>, vector<8x8xf32> -> vector<16x8xf32>
    %1516 = vector.extract_strided_slice %1278 {offsets = [3, 0, 0], sizes = [1, 8, 32], strides = [1, 1, 1]} : vector<4x8x32xf32> to vector<1x8x32xf32>
    %1517 = vector.shape_cast %1516 : vector<1x8x32xf32> to vector<8x32xf32>
    %cst_569 = arith.constant dense<0.000000e+00> : vector<16x32xf32>
    %1518 = tpu.matmul %1515, %1517, %cst_569 {dimension_numbers = #tpu.dot_dimension_numbers<[1], [0], [0], [1], [0, 0, 1, 1], [], []>} : vector<16x8xf32>, vector<8x32xf32>, vector<16x32xf32> -> vector<16x32xf32>
    %1519 = arith.addf %1459, %1518 : vector<16x32xf32>
    %1520 = vector.broadcast %1280 : vector<1x32xf32> to vector<16x32xf32>
    %1521 = arith.addf %1519, %1520 : vector<16x32xf32>
    %1522 = arith.addf %1264, %1521 : vector<16x32xf32>
    %c1_570 = arith.constant 1 : index
    %c0_571 = arith.constant 0 : index
    %c0_572 = arith.constant 0 : index
    %1523 = vector.load %arg33[%c1_570, %c0_571, %c0_572] : memref<2x1x32xf32, #tpu.memory_space<vmem>>, vector<1x1x32xf32>
    %1524 = vector.shape_cast %1523 : vector<1x1x32xf32> to vector<1x32xf32>
    %c1_573 = arith.constant 1 : index
    %c0_574 = arith.constant 0 : index
    %c0_575 = arith.constant 0 : index
    %1525 = vector.load %arg34[%c1_573, %c0_574, %c0_575] : memref<2x1x32xf32, #tpu.memory_space<vmem>>, vector<1x1x32xf32>
    %1526 = vector.shape_cast %1525 : vector<1x1x32xf32> to vector<1x32xf32>
    %cst_576 = arith.constant dense<0.000000e+00> : vector<16xf32>
    %1527 = vector.multi_reduction <add>, %1522, %cst_576 [1] : vector<16x32xf32> to vector<16xf32>
    %1528 = vector.shape_cast %1527 : vector<16xf32> to vector<16x1xf32>
    %cst_577 = arith.constant 3.200000e+01 : f32
    %1529 = vector.broadcast %cst_577 : f32 to vector<16x1xf32>
    %1530 = arith.divf %1528, %1529 : vector<16x1xf32>
    %1531 = vector.broadcast %1530 : vector<16x1xf32> to vector<16x32xf32>
    %1532 = arith.subf %1522, %1531 : vector<16x32xf32>
    %1533 = arith.mulf %1532, %1532 : vector<16x32xf32>
    %cst_578 = arith.constant dense<0.000000e+00> : vector<16xf32>
    %1534 = vector.multi_reduction <add>, %1533, %cst_578 [1] : vector<16x32xf32> to vector<16xf32>
    %1535 = vector.shape_cast %1534 : vector<16xf32> to vector<16x1xf32>
    %cst_579 = arith.constant 3.200000e+01 : f32
    %1536 = vector.broadcast %cst_579 : f32 to vector<16x1xf32>
    %1537 = arith.divf %1535, %1536 : vector<16x1xf32>
    %cst_580 = arith.constant 9.99999974E-6 : f32
    %1538 = vector.broadcast %cst_580 : f32 to vector<16x1xf32>
    %1539 = arith.addf %1537, %1538 : vector<16x1xf32>
    %1540 = math.rsqrt %1539 : vector<16x1xf32>
    %1541 = vector.broadcast %1540 : vector<16x1xf32> to vector<16x32xf32>
    %1542 = arith.mulf %1532, %1541 : vector<16x32xf32>
    %1543 = vector.broadcast %1524 : vector<1x32xf32> to vector<16x32xf32>
    %1544 = arith.mulf %1542, %1543 : vector<16x32xf32>
    %1545 = vector.broadcast %1526 : vector<1x32xf32> to vector<16x32xf32>
    %1546 = arith.addf %1544, %1545 : vector<16x32xf32>
    %c1_581 = arith.constant 1 : index
    %c0_582 = arith.constant 0 : index
    %c0_583 = arith.constant 0 : index
    %c0_584 = arith.constant 0 : index
    %1547 = vector.load %arg35[%c1_581, %c0_582, %c0_583, %c0_584] : memref<2x4x32x8xf32, #tpu.memory_space<vmem>>, vector<1x4x32x8xf32>
    %1548 = vector.shape_cast %1547 : vector<1x4x32x8xf32> to vector<4x32x8xf32>
    %c1_585 = arith.constant 1 : index
    %c0_586 = arith.constant 0 : index
    %c0_587 = arith.constant 0 : index
    %c0_588 = arith.constant 0 : index
    %1549 = vector.load %arg36[%c1_585, %c0_586, %c0_587, %c0_588] : memref<2x4x1x8xf32, #tpu.memory_space<vmem>>, vector<1x4x1x8xf32>
    %1550 = vector.shape_cast %1549 : vector<1x4x1x8xf32> to vector<4x1x8xf32>
    %c1_589 = arith.constant 1 : index
    %c0_590 = arith.constant 0 : index
    %c0_591 = arith.constant 0 : index
    %c0_592 = arith.constant 0 : index
    %1551 = vector.load %arg37[%c1_589, %c0_590, %c0_591, %c0_592] : memref<2x4x32x8xf32, #tpu.memory_space<vmem>>, vector<1x4x32x8xf32>
    %1552 = vector.shape_cast %1551 : vector<1x4x32x8xf32> to vector<4x32x8xf32>
    %c1_593 = arith.constant 1 : index
    %c0_594 = arith.constant 0 : index
    %c0_595 = arith.constant 0 : index
    %c0_596 = arith.constant 0 : index
    %1553 = vector.load %arg38[%c1_593, %c0_594, %c0_595, %c0_596] : memref<2x4x1x8xf32, #tpu.memory_space<vmem>>, vector<1x4x1x8xf32>
    %1554 = vector.shape_cast %1553 : vector<1x4x1x8xf32> to vector<4x1x8xf32>
    %c1_597 = arith.constant 1 : index
    %c0_598 = arith.constant 0 : index
    %c0_599 = arith.constant 0 : index
    %c0_600 = arith.constant 0 : index
    %1555 = vector.load %arg39[%c1_597, %c0_598, %c0_599, %c0_600] : memref<2x4x32x8xf32, #tpu.memory_space<vmem>>, vector<1x4x32x8xf32>
    %1556 = vector.shape_cast %1555 : vector<1x4x32x8xf32> to vector<4x32x8xf32>
    %c1_601 = arith.constant 1 : index
    %c0_602 = arith.constant 0 : index
    %c0_603 = arith.constant 0 : index
    %c0_604 = arith.constant 0 : index
    %1557 = vector.load %arg40[%c1_601, %c0_602, %c0_603, %c0_604] : memref<2x4x1x8xf32, #tpu.memory_space<vmem>>, vector<1x4x1x8xf32>
    %1558 = vector.shape_cast %1557 : vector<1x4x1x8xf32> to vector<4x1x8xf32>
    %c1_605 = arith.constant 1 : index
    %c0_606 = arith.constant 0 : index
    %c0_607 = arith.constant 0 : index
    %c0_608 = arith.constant 0 : index
    %1559 = vector.load %arg41[%c1_605, %c0_606, %c0_607, %c0_608] : memref<2x4x8x32xf32, #tpu.memory_space<vmem>>, vector<1x4x8x32xf32>
    %1560 = vector.shape_cast %1559 : vector<1x4x8x32xf32> to vector<4x8x32xf32>
    %c1_609 = arith.constant 1 : index
    %c0_610 = arith.constant 0 : index
    %c0_611 = arith.constant 0 : index
    %1561 = vector.load %arg42[%c1_609, %c0_610, %c0_611] : memref<2x1x32xf32, #tpu.memory_space<vmem>>, vector<1x1x32xf32>
    %1562 = vector.shape_cast %1561 : vector<1x1x32xf32> to vector<1x32xf32>
    %1563 = vector.extract_strided_slice %1548 {offsets = [0, 0, 0], sizes = [1, 32, 8], strides = [1, 1, 1]} : vector<4x32x8xf32> to vector<1x32x8xf32>
    %1564 = vector.shape_cast %1563 : vector<1x32x8xf32> to vector<32x8xf32>
    %cst_612 = arith.constant dense<0.000000e+00> : vector<16x8xf32>
    %1565 = tpu.matmul %1546, %1564, %cst_612 {dimension_numbers = #tpu.dot_dimension_numbers<[1], [0], [0], [1], [0, 0, 1, 1], [], []>} : vector<16x32xf32>, vector<32x8xf32>, vector<16x8xf32> -> vector<16x8xf32>
    %1566 = vector.extract_strided_slice %1550 {offsets = [0, 0, 0], sizes = [1, 1, 8], strides = [1, 1, 1]} : vector<4x1x8xf32> to vector<1x1x8xf32>
    %1567 = vector.shape_cast %1566 : vector<1x1x8xf32> to vector<1x8xf32>
    %1568 = vector.broadcast %1567 : vector<1x8xf32> to vector<16x8xf32>
    %1569 = arith.addf %1565, %1568 : vector<16x8xf32>
    %1570 = vector.extract_strided_slice %1552 {offsets = [0, 0, 0], sizes = [1, 32, 8], strides = [1, 1, 1]} : vector<4x32x8xf32> to vector<1x32x8xf32>
    %1571 = vector.shape_cast %1570 : vector<1x32x8xf32> to vector<32x8xf32>
    %cst_613 = arith.constant dense<0.000000e+00> : vector<16x8xf32>
    %1572 = tpu.matmul %653, %1571, %cst_613 {dimension_numbers = #tpu.dot_dimension_numbers<[1], [0], [0], [1], [0, 0, 1, 1], [], []>} : vector<16x32xf32>, vector<32x8xf32>, vector<16x8xf32> -> vector<16x8xf32>
    %1573 = vector.extract_strided_slice %1554 {offsets = [0, 0, 0], sizes = [1, 1, 8], strides = [1, 1, 1]} : vector<4x1x8xf32> to vector<1x1x8xf32>
    %1574 = vector.shape_cast %1573 : vector<1x1x8xf32> to vector<1x8xf32>
    %1575 = vector.broadcast %1574 : vector<1x8xf32> to vector<16x8xf32>
    %1576 = arith.addf %1572, %1575 : vector<16x8xf32>
    %1577 = vector.extract_strided_slice %1556 {offsets = [0, 0, 0], sizes = [1, 32, 8], strides = [1, 1, 1]} : vector<4x32x8xf32> to vector<1x32x8xf32>
    %1578 = vector.shape_cast %1577 : vector<1x32x8xf32> to vector<32x8xf32>
    %cst_614 = arith.constant dense<0.000000e+00> : vector<16x8xf32>
    %1579 = tpu.matmul %653, %1578, %cst_614 {dimension_numbers = #tpu.dot_dimension_numbers<[1], [0], [0], [1], [0, 0, 1, 1], [], []>} : vector<16x32xf32>, vector<32x8xf32>, vector<16x8xf32> -> vector<16x8xf32>
    %1580 = vector.extract_strided_slice %1558 {offsets = [0, 0, 0], sizes = [1, 1, 8], strides = [1, 1, 1]} : vector<4x1x8xf32> to vector<1x1x8xf32>
    %1581 = vector.shape_cast %1580 : vector<1x1x8xf32> to vector<1x8xf32>
    %1582 = vector.broadcast %1581 : vector<1x8xf32> to vector<16x8xf32>
    %1583 = arith.addf %1579, %1582 : vector<16x8xf32>
    %1584 = vector.extract_strided_slice %1569 {offsets = [0, 0], sizes = [8, 8], strides = [1, 1]} : vector<16x8xf32> to vector<8x8xf32>
    %1585 = vector.extract_strided_slice %1576 {offsets = [0, 0], sizes = [8, 8], strides = [1, 1]} : vector<16x8xf32> to vector<8x8xf32>
    %1586 = vector.extract_strided_slice %1583 {offsets = [0, 0], sizes = [8, 8], strides = [1, 1]} : vector<16x8xf32> to vector<8x8xf32>
    %cst_615 = arith.constant dense<0.000000e+00> : vector<8x8xf32>
    %1587 = tpu.matmul %1584, %1585, %cst_615 {dimension_numbers = #tpu.dot_dimension_numbers<[1], [1], [0], [0], [0, 0, 1, 0], [], []>} : vector<8x8xf32>, vector<8x8xf32>, vector<8x8xf32> -> vector<8x8xf32>
    %cst_616 = arith.constant 0.353553385 : f32
    %1588 = vector.broadcast %cst_616 : f32 to vector<8x8xf32>
    %1589 = arith.mulf %1587, %1588 : vector<8x8xf32>
    %cst_617 = arith.constant dense<0xFF800000> : vector<8xf32>
    %1590 = vector.multi_reduction <maximumf>, %1589, %cst_617 [1] : vector<8x8xf32> to vector<8xf32>
    %1591 = vector.shape_cast %1590 : vector<8xf32> to vector<8x1xf32>
    %1592 = vector.broadcast %1591 : vector<8x1xf32> to vector<8x8xf32>
    %1593 = arith.subf %1589, %1592 : vector<8x8xf32>
    %1594 = math.exp %1593 : vector<8x8xf32>
    %cst_618 = arith.constant dense<0.000000e+00> : vector<8xf32>
    %1595 = vector.multi_reduction <add>, %1594, %cst_618 [1] : vector<8x8xf32> to vector<8xf32>
    %1596 = vector.shape_cast %1595 : vector<8xf32> to vector<8x1xf32>
    %1597 = tpu.reciprocal %1596 {approx = true} : vector<8x1xf32> -> vector<8x1xf32>
    %1598 = vector.broadcast %1597 : vector<8x1xf32> to vector<8x8xf32>
    %1599 = arith.mulf %1594, %1598 : vector<8x8xf32>
    %cst_619 = arith.constant dense<0.000000e+00> : vector<8x8xf32>
    %1600 = tpu.matmul %1599, %1586, %cst_619 {dimension_numbers = #tpu.dot_dimension_numbers<[1], [0], [0], [1], [0, 0, 1, 1], [], []>} : vector<8x8xf32>, vector<8x8xf32>, vector<8x8xf32> -> vector<8x8xf32>
    %1601 = vector.extract_strided_slice %1569 {offsets = [8, 0], sizes = [8, 8], strides = [1, 1]} : vector<16x8xf32> to vector<8x8xf32>
    %1602 = vector.extract_strided_slice %1576 {offsets = [8, 0], sizes = [8, 8], strides = [1, 1]} : vector<16x8xf32> to vector<8x8xf32>
    %1603 = vector.extract_strided_slice %1583 {offsets = [8, 0], sizes = [8, 8], strides = [1, 1]} : vector<16x8xf32> to vector<8x8xf32>
    %cst_620 = arith.constant dense<0.000000e+00> : vector<8x8xf32>
    %1604 = tpu.matmul %1601, %1602, %cst_620 {dimension_numbers = #tpu.dot_dimension_numbers<[1], [1], [0], [0], [0, 0, 1, 0], [], []>} : vector<8x8xf32>, vector<8x8xf32>, vector<8x8xf32> -> vector<8x8xf32>
    %cst_621 = arith.constant 0.353553385 : f32
    %1605 = vector.broadcast %cst_621 : f32 to vector<8x8xf32>
    %1606 = arith.mulf %1604, %1605 : vector<8x8xf32>
    %cst_622 = arith.constant dense<0xFF800000> : vector<8xf32>
    %1607 = vector.multi_reduction <maximumf>, %1606, %cst_622 [1] : vector<8x8xf32> to vector<8xf32>
    %1608 = vector.shape_cast %1607 : vector<8xf32> to vector<8x1xf32>
    %1609 = vector.broadcast %1608 : vector<8x1xf32> to vector<8x8xf32>
    %1610 = arith.subf %1606, %1609 : vector<8x8xf32>
    %1611 = math.exp %1610 : vector<8x8xf32>
    %cst_623 = arith.constant dense<0.000000e+00> : vector<8xf32>
    %1612 = vector.multi_reduction <add>, %1611, %cst_623 [1] : vector<8x8xf32> to vector<8xf32>
    %1613 = vector.shape_cast %1612 : vector<8xf32> to vector<8x1xf32>
    %1614 = tpu.reciprocal %1613 {approx = true} : vector<8x1xf32> -> vector<8x1xf32>
    %1615 = vector.broadcast %1614 : vector<8x1xf32> to vector<8x8xf32>
    %1616 = arith.mulf %1611, %1615 : vector<8x8xf32>
    %cst_624 = arith.constant dense<0.000000e+00> : vector<8x8xf32>
    %1617 = tpu.matmul %1616, %1603, %cst_624 {dimension_numbers = #tpu.dot_dimension_numbers<[1], [0], [0], [1], [0, 0, 1, 1], [], []>} : vector<8x8xf32>, vector<8x8xf32>, vector<8x8xf32> -> vector<8x8xf32>
    %1618 = tpu.concatenate %1600, %1617 in 0 : vector<8x8xf32>, vector<8x8xf32> -> vector<16x8xf32>
    %1619 = vector.extract_strided_slice %1560 {offsets = [0, 0, 0], sizes = [1, 8, 32], strides = [1, 1, 1]} : vector<4x8x32xf32> to vector<1x8x32xf32>
    %1620 = vector.shape_cast %1619 : vector<1x8x32xf32> to vector<8x32xf32>
    %cst_625 = arith.constant dense<0.000000e+00> : vector<16x32xf32>
    %1621 = tpu.matmul %1618, %1620, %cst_625 {dimension_numbers = #tpu.dot_dimension_numbers<[1], [0], [0], [1], [0, 0, 1, 1], [], []>} : vector<16x8xf32>, vector<8x32xf32>, vector<16x32xf32> -> vector<16x32xf32>
    %1622 = vector.extract_strided_slice %1548 {offsets = [1, 0, 0], sizes = [1, 32, 8], strides = [1, 1, 1]} : vector<4x32x8xf32> to vector<1x32x8xf32>
    %1623 = vector.shape_cast %1622 : vector<1x32x8xf32> to vector<32x8xf32>
    %cst_626 = arith.constant dense<0.000000e+00> : vector<16x8xf32>
    %1624 = tpu.matmul %1546, %1623, %cst_626 {dimension_numbers = #tpu.dot_dimension_numbers<[1], [0], [0], [1], [0, 0, 1, 1], [], []>} : vector<16x32xf32>, vector<32x8xf32>, vector<16x8xf32> -> vector<16x8xf32>
    %1625 = vector.extract_strided_slice %1550 {offsets = [1, 0, 0], sizes = [1, 1, 8], strides = [1, 1, 1]} : vector<4x1x8xf32> to vector<1x1x8xf32>
    %1626 = vector.shape_cast %1625 : vector<1x1x8xf32> to vector<1x8xf32>
    %1627 = vector.broadcast %1626 : vector<1x8xf32> to vector<16x8xf32>
    %1628 = arith.addf %1624, %1627 : vector<16x8xf32>
    %1629 = vector.extract_strided_slice %1552 {offsets = [1, 0, 0], sizes = [1, 32, 8], strides = [1, 1, 1]} : vector<4x32x8xf32> to vector<1x32x8xf32>
    %1630 = vector.shape_cast %1629 : vector<1x32x8xf32> to vector<32x8xf32>
    %cst_627 = arith.constant dense<0.000000e+00> : vector<16x8xf32>
    %1631 = tpu.matmul %653, %1630, %cst_627 {dimension_numbers = #tpu.dot_dimension_numbers<[1], [0], [0], [1], [0, 0, 1, 1], [], []>} : vector<16x32xf32>, vector<32x8xf32>, vector<16x8xf32> -> vector<16x8xf32>
    %1632 = vector.extract_strided_slice %1554 {offsets = [1, 0, 0], sizes = [1, 1, 8], strides = [1, 1, 1]} : vector<4x1x8xf32> to vector<1x1x8xf32>
    %1633 = vector.shape_cast %1632 : vector<1x1x8xf32> to vector<1x8xf32>
    %1634 = vector.broadcast %1633 : vector<1x8xf32> to vector<16x8xf32>
    %1635 = arith.addf %1631, %1634 : vector<16x8xf32>
    %1636 = vector.extract_strided_slice %1556 {offsets = [1, 0, 0], sizes = [1, 32, 8], strides = [1, 1, 1]} : vector<4x32x8xf32> to vector<1x32x8xf32>
    %1637 = vector.shape_cast %1636 : vector<1x32x8xf32> to vector<32x8xf32>
    %cst_628 = arith.constant dense<0.000000e+00> : vector<16x8xf32>
    %1638 = tpu.matmul %653, %1637, %cst_628 {dimension_numbers = #tpu.dot_dimension_numbers<[1], [0], [0], [1], [0, 0, 1, 1], [], []>} : vector<16x32xf32>, vector<32x8xf32>, vector<16x8xf32> -> vector<16x8xf32>
    %1639 = vector.extract_strided_slice %1558 {offsets = [1, 0, 0], sizes = [1, 1, 8], strides = [1, 1, 1]} : vector<4x1x8xf32> to vector<1x1x8xf32>
    %1640 = vector.shape_cast %1639 : vector<1x1x8xf32> to vector<1x8xf32>
    %1641 = vector.broadcast %1640 : vector<1x8xf32> to vector<16x8xf32>
    %1642 = arith.addf %1638, %1641 : vector<16x8xf32>
    %1643 = vector.extract_strided_slice %1628 {offsets = [0, 0], sizes = [8, 8], strides = [1, 1]} : vector<16x8xf32> to vector<8x8xf32>
    %1644 = vector.extract_strided_slice %1635 {offsets = [0, 0], sizes = [8, 8], strides = [1, 1]} : vector<16x8xf32> to vector<8x8xf32>
    %1645 = vector.extract_strided_slice %1642 {offsets = [0, 0], sizes = [8, 8], strides = [1, 1]} : vector<16x8xf32> to vector<8x8xf32>
    %cst_629 = arith.constant dense<0.000000e+00> : vector<8x8xf32>
    %1646 = tpu.matmul %1643, %1644, %cst_629 {dimension_numbers = #tpu.dot_dimension_numbers<[1], [1], [0], [0], [0, 0, 1, 0], [], []>} : vector<8x8xf32>, vector<8x8xf32>, vector<8x8xf32> -> vector<8x8xf32>
    %cst_630 = arith.constant 0.353553385 : f32
    %1647 = vector.broadcast %cst_630 : f32 to vector<8x8xf32>
    %1648 = arith.mulf %1646, %1647 : vector<8x8xf32>
    %cst_631 = arith.constant dense<0xFF800000> : vector<8xf32>
    %1649 = vector.multi_reduction <maximumf>, %1648, %cst_631 [1] : vector<8x8xf32> to vector<8xf32>
    %1650 = vector.shape_cast %1649 : vector<8xf32> to vector<8x1xf32>
    %1651 = vector.broadcast %1650 : vector<8x1xf32> to vector<8x8xf32>
    %1652 = arith.subf %1648, %1651 : vector<8x8xf32>
    %1653 = math.exp %1652 : vector<8x8xf32>
    %cst_632 = arith.constant dense<0.000000e+00> : vector<8xf32>
    %1654 = vector.multi_reduction <add>, %1653, %cst_632 [1] : vector<8x8xf32> to vector<8xf32>
    %1655 = vector.shape_cast %1654 : vector<8xf32> to vector<8x1xf32>
    %1656 = tpu.reciprocal %1655 {approx = true} : vector<8x1xf32> -> vector<8x1xf32>
    %1657 = vector.broadcast %1656 : vector<8x1xf32> to vector<8x8xf32>
    %1658 = arith.mulf %1653, %1657 : vector<8x8xf32>
    %cst_633 = arith.constant dense<0.000000e+00> : vector<8x8xf32>
    %1659 = tpu.matmul %1658, %1645, %cst_633 {dimension_numbers = #tpu.dot_dimension_numbers<[1], [0], [0], [1], [0, 0, 1, 1], [], []>} : vector<8x8xf32>, vector<8x8xf32>, vector<8x8xf32> -> vector<8x8xf32>
    %1660 = vector.extract_strided_slice %1628 {offsets = [8, 0], sizes = [8, 8], strides = [1, 1]} : vector<16x8xf32> to vector<8x8xf32>
    %1661 = vector.extract_strided_slice %1635 {offsets = [8, 0], sizes = [8, 8], strides = [1, 1]} : vector<16x8xf32> to vector<8x8xf32>
    %1662 = vector.extract_strided_slice %1642 {offsets = [8, 0], sizes = [8, 8], strides = [1, 1]} : vector<16x8xf32> to vector<8x8xf32>
    %cst_634 = arith.constant dense<0.000000e+00> : vector<8x8xf32>
    %1663 = tpu.matmul %1660, %1661, %cst_634 {dimension_numbers = #tpu.dot_dimension_numbers<[1], [1], [0], [0], [0, 0, 1, 0], [], []>} : vector<8x8xf32>, vector<8x8xf32>, vector<8x8xf32> -> vector<8x8xf32>
    %cst_635 = arith.constant 0.353553385 : f32
    %1664 = vector.broadcast %cst_635 : f32 to vector<8x8xf32>
    %1665 = arith.mulf %1663, %1664 : vector<8x8xf32>
    %cst_636 = arith.constant dense<0xFF800000> : vector<8xf32>
    %1666 = vector.multi_reduction <maximumf>, %1665, %cst_636 [1] : vector<8x8xf32> to vector<8xf32>
    %1667 = vector.shape_cast %1666 : vector<8xf32> to vector<8x1xf32>
    %1668 = vector.broadcast %1667 : vector<8x1xf32> to vector<8x8xf32>
    %1669 = arith.subf %1665, %1668 : vector<8x8xf32>
    %1670 = math.exp %1669 : vector<8x8xf32>
    %cst_637 = arith.constant dense<0.000000e+00> : vector<8xf32>
    %1671 = vector.multi_reduction <add>, %1670, %cst_637 [1] : vector<8x8xf32> to vector<8xf32>
    %1672 = vector.shape_cast %1671 : vector<8xf32> to vector<8x1xf32>
    %1673 = tpu.reciprocal %1672 {approx = true} : vector<8x1xf32> -> vector<8x1xf32>
    %1674 = vector.broadcast %1673 : vector<8x1xf32> to vector<8x8xf32>
    %1675 = arith.mulf %1670, %1674 : vector<8x8xf32>
    %cst_638 = arith.constant dense<0.000000e+00> : vector<8x8xf32>
    %1676 = tpu.matmul %1675, %1662, %cst_638 {dimension_numbers = #tpu.dot_dimension_numbers<[1], [0], [0], [1], [0, 0, 1, 1], [], []>} : vector<8x8xf32>, vector<8x8xf32>, vector<8x8xf32> -> vector<8x8xf32>
    %1677 = tpu.concatenate %1659, %1676 in 0 : vector<8x8xf32>, vector<8x8xf32> -> vector<16x8xf32>
    %1678 = vector.extract_strided_slice %1560 {offsets = [1, 0, 0], sizes = [1, 8, 32], strides = [1, 1, 1]} : vector<4x8x32xf32> to vector<1x8x32xf32>
    %1679 = vector.shape_cast %1678 : vector<1x8x32xf32> to vector<8x32xf32>
    %cst_639 = arith.constant dense<0.000000e+00> : vector<16x32xf32>
    %1680 = tpu.matmul %1677, %1679, %cst_639 {dimension_numbers = #tpu.dot_dimension_numbers<[1], [0], [0], [1], [0, 0, 1, 1], [], []>} : vector<16x8xf32>, vector<8x32xf32>, vector<16x32xf32> -> vector<16x32xf32>
    %1681 = arith.addf %1621, %1680 : vector<16x32xf32>
    %1682 = vector.extract_strided_slice %1548 {offsets = [2, 0, 0], sizes = [1, 32, 8], strides = [1, 1, 1]} : vector<4x32x8xf32> to vector<1x32x8xf32>
    %1683 = vector.shape_cast %1682 : vector<1x32x8xf32> to vector<32x8xf32>
    %cst_640 = arith.constant dense<0.000000e+00> : vector<16x8xf32>
    %1684 = tpu.matmul %1546, %1683, %cst_640 {dimension_numbers = #tpu.dot_dimension_numbers<[1], [0], [0], [1], [0, 0, 1, 1], [], []>} : vector<16x32xf32>, vector<32x8xf32>, vector<16x8xf32> -> vector<16x8xf32>
    %1685 = vector.extract_strided_slice %1550 {offsets = [2, 0, 0], sizes = [1, 1, 8], strides = [1, 1, 1]} : vector<4x1x8xf32> to vector<1x1x8xf32>
    %1686 = vector.shape_cast %1685 : vector<1x1x8xf32> to vector<1x8xf32>
    %1687 = vector.broadcast %1686 : vector<1x8xf32> to vector<16x8xf32>
    %1688 = arith.addf %1684, %1687 : vector<16x8xf32>
    %1689 = vector.extract_strided_slice %1552 {offsets = [2, 0, 0], sizes = [1, 32, 8], strides = [1, 1, 1]} : vector<4x32x8xf32> to vector<1x32x8xf32>
    %1690 = vector.shape_cast %1689 : vector<1x32x8xf32> to vector<32x8xf32>
    %cst_641 = arith.constant dense<0.000000e+00> : vector<16x8xf32>
    %1691 = tpu.matmul %653, %1690, %cst_641 {dimension_numbers = #tpu.dot_dimension_numbers<[1], [0], [0], [1], [0, 0, 1, 1], [], []>} : vector<16x32xf32>, vector<32x8xf32>, vector<16x8xf32> -> vector<16x8xf32>
    %1692 = vector.extract_strided_slice %1554 {offsets = [2, 0, 0], sizes = [1, 1, 8], strides = [1, 1, 1]} : vector<4x1x8xf32> to vector<1x1x8xf32>
    %1693 = vector.shape_cast %1692 : vector<1x1x8xf32> to vector<1x8xf32>
    %1694 = vector.broadcast %1693 : vector<1x8xf32> to vector<16x8xf32>
    %1695 = arith.addf %1691, %1694 : vector<16x8xf32>
    %1696 = vector.extract_strided_slice %1556 {offsets = [2, 0, 0], sizes = [1, 32, 8], strides = [1, 1, 1]} : vector<4x32x8xf32> to vector<1x32x8xf32>
    %1697 = vector.shape_cast %1696 : vector<1x32x8xf32> to vector<32x8xf32>
    %cst_642 = arith.constant dense<0.000000e+00> : vector<16x8xf32>
    %1698 = tpu.matmul %653, %1697, %cst_642 {dimension_numbers = #tpu.dot_dimension_numbers<[1], [0], [0], [1], [0, 0, 1, 1], [], []>} : vector<16x32xf32>, vector<32x8xf32>, vector<16x8xf32> -> vector<16x8xf32>
    %1699 = vector.extract_strided_slice %1558 {offsets = [2, 0, 0], sizes = [1, 1, 8], strides = [1, 1, 1]} : vector<4x1x8xf32> to vector<1x1x8xf32>
    %1700 = vector.shape_cast %1699 : vector<1x1x8xf32> to vector<1x8xf32>
    %1701 = vector.broadcast %1700 : vector<1x8xf32> to vector<16x8xf32>
    %1702 = arith.addf %1698, %1701 : vector<16x8xf32>
    %1703 = vector.extract_strided_slice %1688 {offsets = [0, 0], sizes = [8, 8], strides = [1, 1]} : vector<16x8xf32> to vector<8x8xf32>
    %1704 = vector.extract_strided_slice %1695 {offsets = [0, 0], sizes = [8, 8], strides = [1, 1]} : vector<16x8xf32> to vector<8x8xf32>
    %1705 = vector.extract_strided_slice %1702 {offsets = [0, 0], sizes = [8, 8], strides = [1, 1]} : vector<16x8xf32> to vector<8x8xf32>
    %cst_643 = arith.constant dense<0.000000e+00> : vector<8x8xf32>
    %1706 = tpu.matmul %1703, %1704, %cst_643 {dimension_numbers = #tpu.dot_dimension_numbers<[1], [1], [0], [0], [0, 0, 1, 0], [], []>} : vector<8x8xf32>, vector<8x8xf32>, vector<8x8xf32> -> vector<8x8xf32>
    %cst_644 = arith.constant 0.353553385 : f32
    %1707 = vector.broadcast %cst_644 : f32 to vector<8x8xf32>
    %1708 = arith.mulf %1706, %1707 : vector<8x8xf32>
    %cst_645 = arith.constant dense<0xFF800000> : vector<8xf32>
    %1709 = vector.multi_reduction <maximumf>, %1708, %cst_645 [1] : vector<8x8xf32> to vector<8xf32>
    %1710 = vector.shape_cast %1709 : vector<8xf32> to vector<8x1xf32>
    %1711 = vector.broadcast %1710 : vector<8x1xf32> to vector<8x8xf32>
    %1712 = arith.subf %1708, %1711 : vector<8x8xf32>
    %1713 = math.exp %1712 : vector<8x8xf32>
    %cst_646 = arith.constant dense<0.000000e+00> : vector<8xf32>
    %1714 = vector.multi_reduction <add>, %1713, %cst_646 [1] : vector<8x8xf32> to vector<8xf32>
    %1715 = vector.shape_cast %1714 : vector<8xf32> to vector<8x1xf32>
    %1716 = tpu.reciprocal %1715 {approx = true} : vector<8x1xf32> -> vector<8x1xf32>
    %1717 = vector.broadcast %1716 : vector<8x1xf32> to vector<8x8xf32>
    %1718 = arith.mulf %1713, %1717 : vector<8x8xf32>
    %cst_647 = arith.constant dense<0.000000e+00> : vector<8x8xf32>
    %1719 = tpu.matmul %1718, %1705, %cst_647 {dimension_numbers = #tpu.dot_dimension_numbers<[1], [0], [0], [1], [0, 0, 1, 1], [], []>} : vector<8x8xf32>, vector<8x8xf32>, vector<8x8xf32> -> vector<8x8xf32>
    %1720 = vector.extract_strided_slice %1688 {offsets = [8, 0], sizes = [8, 8], strides = [1, 1]} : vector<16x8xf32> to vector<8x8xf32>
    %1721 = vector.extract_strided_slice %1695 {offsets = [8, 0], sizes = [8, 8], strides = [1, 1]} : vector<16x8xf32> to vector<8x8xf32>
    %1722 = vector.extract_strided_slice %1702 {offsets = [8, 0], sizes = [8, 8], strides = [1, 1]} : vector<16x8xf32> to vector<8x8xf32>
    %cst_648 = arith.constant dense<0.000000e+00> : vector<8x8xf32>
    %1723 = tpu.matmul %1720, %1721, %cst_648 {dimension_numbers = #tpu.dot_dimension_numbers<[1], [1], [0], [0], [0, 0, 1, 0], [], []>} : vector<8x8xf32>, vector<8x8xf32>, vector<8x8xf32> -> vector<8x8xf32>
    %cst_649 = arith.constant 0.353553385 : f32
    %1724 = vector.broadcast %cst_649 : f32 to vector<8x8xf32>
    %1725 = arith.mulf %1723, %1724 : vector<8x8xf32>
    %cst_650 = arith.constant dense<0xFF800000> : vector<8xf32>
    %1726 = vector.multi_reduction <maximumf>, %1725, %cst_650 [1] : vector<8x8xf32> to vector<8xf32>
    %1727 = vector.shape_cast %1726 : vector<8xf32> to vector<8x1xf32>
    %1728 = vector.broadcast %1727 : vector<8x1xf32> to vector<8x8xf32>
    %1729 = arith.subf %1725, %1728 : vector<8x8xf32>
    %1730 = math.exp %1729 : vector<8x8xf32>
    %cst_651 = arith.constant dense<0.000000e+00> : vector<8xf32>
    %1731 = vector.multi_reduction <add>, %1730, %cst_651 [1] : vector<8x8xf32> to vector<8xf32>
    %1732 = vector.shape_cast %1731 : vector<8xf32> to vector<8x1xf32>
    %1733 = tpu.reciprocal %1732 {approx = true} : vector<8x1xf32> -> vector<8x1xf32>
    %1734 = vector.broadcast %1733 : vector<8x1xf32> to vector<8x8xf32>
    %1735 = arith.mulf %1730, %1734 : vector<8x8xf32>
    %cst_652 = arith.constant dense<0.000000e+00> : vector<8x8xf32>
    %1736 = tpu.matmul %1735, %1722, %cst_652 {dimension_numbers = #tpu.dot_dimension_numbers<[1], [0], [0], [1], [0, 0, 1, 1], [], []>} : vector<8x8xf32>, vector<8x8xf32>, vector<8x8xf32> -> vector<8x8xf32>
    %1737 = tpu.concatenate %1719, %1736 in 0 : vector<8x8xf32>, vector<8x8xf32> -> vector<16x8xf32>
    %1738 = vector.extract_strided_slice %1560 {offsets = [2, 0, 0], sizes = [1, 8, 32], strides = [1, 1, 1]} : vector<4x8x32xf32> to vector<1x8x32xf32>
    %1739 = vector.shape_cast %1738 : vector<1x8x32xf32> to vector<8x32xf32>
    %cst_653 = arith.constant dense<0.000000e+00> : vector<16x32xf32>
    %1740 = tpu.matmul %1737, %1739, %cst_653 {dimension_numbers = #tpu.dot_dimension_numbers<[1], [0], [0], [1], [0, 0, 1, 1], [], []>} : vector<16x8xf32>, vector<8x32xf32>, vector<16x32xf32> -> vector<16x32xf32>
    %1741 = arith.addf %1681, %1740 : vector<16x32xf32>
    %1742 = vector.extract_strided_slice %1548 {offsets = [3, 0, 0], sizes = [1, 32, 8], strides = [1, 1, 1]} : vector<4x32x8xf32> to vector<1x32x8xf32>
    %1743 = vector.shape_cast %1742 : vector<1x32x8xf32> to vector<32x8xf32>
    %cst_654 = arith.constant dense<0.000000e+00> : vector<16x8xf32>
    %1744 = tpu.matmul %1546, %1743, %cst_654 {dimension_numbers = #tpu.dot_dimension_numbers<[1], [0], [0], [1], [0, 0, 1, 1], [], []>} : vector<16x32xf32>, vector<32x8xf32>, vector<16x8xf32> -> vector<16x8xf32>
    %1745 = vector.extract_strided_slice %1550 {offsets = [3, 0, 0], sizes = [1, 1, 8], strides = [1, 1, 1]} : vector<4x1x8xf32> to vector<1x1x8xf32>
    %1746 = vector.shape_cast %1745 : vector<1x1x8xf32> to vector<1x8xf32>
    %1747 = vector.broadcast %1746 : vector<1x8xf32> to vector<16x8xf32>
    %1748 = arith.addf %1744, %1747 : vector<16x8xf32>
    %1749 = vector.extract_strided_slice %1552 {offsets = [3, 0, 0], sizes = [1, 32, 8], strides = [1, 1, 1]} : vector<4x32x8xf32> to vector<1x32x8xf32>
    %1750 = vector.shape_cast %1749 : vector<1x32x8xf32> to vector<32x8xf32>
    %cst_655 = arith.constant dense<0.000000e+00> : vector<16x8xf32>
    %1751 = tpu.matmul %653, %1750, %cst_655 {dimension_numbers = #tpu.dot_dimension_numbers<[1], [0], [0], [1], [0, 0, 1, 1], [], []>} : vector<16x32xf32>, vector<32x8xf32>, vector<16x8xf32> -> vector<16x8xf32>
    %1752 = vector.extract_strided_slice %1554 {offsets = [3, 0, 0], sizes = [1, 1, 8], strides = [1, 1, 1]} : vector<4x1x8xf32> to vector<1x1x8xf32>
    %1753 = vector.shape_cast %1752 : vector<1x1x8xf32> to vector<1x8xf32>
    %1754 = vector.broadcast %1753 : vector<1x8xf32> to vector<16x8xf32>
    %1755 = arith.addf %1751, %1754 : vector<16x8xf32>
    %1756 = vector.extract_strided_slice %1556 {offsets = [3, 0, 0], sizes = [1, 32, 8], strides = [1, 1, 1]} : vector<4x32x8xf32> to vector<1x32x8xf32>
    %1757 = vector.shape_cast %1756 : vector<1x32x8xf32> to vector<32x8xf32>
    %cst_656 = arith.constant dense<0.000000e+00> : vector<16x8xf32>
    %1758 = tpu.matmul %653, %1757, %cst_656 {dimension_numbers = #tpu.dot_dimension_numbers<[1], [0], [0], [1], [0, 0, 1, 1], [], []>} : vector<16x32xf32>, vector<32x8xf32>, vector<16x8xf32> -> vector<16x8xf32>
    %1759 = vector.extract_strided_slice %1558 {offsets = [3, 0, 0], sizes = [1, 1, 8], strides = [1, 1, 1]} : vector<4x1x8xf32> to vector<1x1x8xf32>
    %1760 = vector.shape_cast %1759 : vector<1x1x8xf32> to vector<1x8xf32>
    %1761 = vector.broadcast %1760 : vector<1x8xf32> to vector<16x8xf32>
    %1762 = arith.addf %1758, %1761 : vector<16x8xf32>
    %1763 = vector.extract_strided_slice %1748 {offsets = [0, 0], sizes = [8, 8], strides = [1, 1]} : vector<16x8xf32> to vector<8x8xf32>
    %1764 = vector.extract_strided_slice %1755 {offsets = [0, 0], sizes = [8, 8], strides = [1, 1]} : vector<16x8xf32> to vector<8x8xf32>
    %1765 = vector.extract_strided_slice %1762 {offsets = [0, 0], sizes = [8, 8], strides = [1, 1]} : vector<16x8xf32> to vector<8x8xf32>
    %cst_657 = arith.constant dense<0.000000e+00> : vector<8x8xf32>
    %1766 = tpu.matmul %1763, %1764, %cst_657 {dimension_numbers = #tpu.dot_dimension_numbers<[1], [1], [0], [0], [0, 0, 1, 0], [], []>} : vector<8x8xf32>, vector<8x8xf32>, vector<8x8xf32> -> vector<8x8xf32>
    %cst_658 = arith.constant 0.353553385 : f32
    %1767 = vector.broadcast %cst_658 : f32 to vector<8x8xf32>
    %1768 = arith.mulf %1766, %1767 : vector<8x8xf32>
    %cst_659 = arith.constant dense<0xFF800000> : vector<8xf32>
    %1769 = vector.multi_reduction <maximumf>, %1768, %cst_659 [1] : vector<8x8xf32> to vector<8xf32>
    %1770 = vector.shape_cast %1769 : vector<8xf32> to vector<8x1xf32>
    %1771 = vector.broadcast %1770 : vector<8x1xf32> to vector<8x8xf32>
    %1772 = arith.subf %1768, %1771 : vector<8x8xf32>
    %1773 = math.exp %1772 : vector<8x8xf32>
    %cst_660 = arith.constant dense<0.000000e+00> : vector<8xf32>
    %1774 = vector.multi_reduction <add>, %1773, %cst_660 [1] : vector<8x8xf32> to vector<8xf32>
    %1775 = vector.shape_cast %1774 : vector<8xf32> to vector<8x1xf32>
    %1776 = tpu.reciprocal %1775 {approx = true} : vector<8x1xf32> -> vector<8x1xf32>
    %1777 = vector.broadcast %1776 : vector<8x1xf32> to vector<8x8xf32>
    %1778 = arith.mulf %1773, %1777 : vector<8x8xf32>
    %cst_661 = arith.constant dense<0.000000e+00> : vector<8x8xf32>
    %1779 = tpu.matmul %1778, %1765, %cst_661 {dimension_numbers = #tpu.dot_dimension_numbers<[1], [0], [0], [1], [0, 0, 1, 1], [], []>} : vector<8x8xf32>, vector<8x8xf32>, vector<8x8xf32> -> vector<8x8xf32>
    %1780 = vector.extract_strided_slice %1748 {offsets = [8, 0], sizes = [8, 8], strides = [1, 1]} : vector<16x8xf32> to vector<8x8xf32>
    %1781 = vector.extract_strided_slice %1755 {offsets = [8, 0], sizes = [8, 8], strides = [1, 1]} : vector<16x8xf32> to vector<8x8xf32>
    %1782 = vector.extract_strided_slice %1762 {offsets = [8, 0], sizes = [8, 8], strides = [1, 1]} : vector<16x8xf32> to vector<8x8xf32>
    %cst_662 = arith.constant dense<0.000000e+00> : vector<8x8xf32>
    %1783 = tpu.matmul %1780, %1781, %cst_662 {dimension_numbers = #tpu.dot_dimension_numbers<[1], [1], [0], [0], [0, 0, 1, 0], [], []>} : vector<8x8xf32>, vector<8x8xf32>, vector<8x8xf32> -> vector<8x8xf32>
    %cst_663 = arith.constant 0.353553385 : f32
    %1784 = vector.broadcast %cst_663 : f32 to vector<8x8xf32>
    %1785 = arith.mulf %1783, %1784 : vector<8x8xf32>
    %cst_664 = arith.constant dense<0xFF800000> : vector<8xf32>
    %1786 = vector.multi_reduction <maximumf>, %1785, %cst_664 [1] : vector<8x8xf32> to vector<8xf32>
    %1787 = vector.shape_cast %1786 : vector<8xf32> to vector<8x1xf32>
    %1788 = vector.broadcast %1787 : vector<8x1xf32> to vector<8x8xf32>
    %1789 = arith.subf %1785, %1788 : vector<8x8xf32>
    %1790 = math.exp %1789 : vector<8x8xf32>
    %cst_665 = arith.constant dense<0.000000e+00> : vector<8xf32>
    %1791 = vector.multi_reduction <add>, %1790, %cst_665 [1] : vector<8x8xf32> to vector<8xf32>
    %1792 = vector.shape_cast %1791 : vector<8xf32> to vector<8x1xf32>
    %1793 = tpu.reciprocal %1792 {approx = true} : vector<8x1xf32> -> vector<8x1xf32>
    %1794 = vector.broadcast %1793 : vector<8x1xf32> to vector<8x8xf32>
    %1795 = arith.mulf %1790, %1794 : vector<8x8xf32>
    %cst_666 = arith.constant dense<0.000000e+00> : vector<8x8xf32>
    %1796 = tpu.matmul %1795, %1782, %cst_666 {dimension_numbers = #tpu.dot_dimension_numbers<[1], [0], [0], [1], [0, 0, 1, 1], [], []>} : vector<8x8xf32>, vector<8x8xf32>, vector<8x8xf32> -> vector<8x8xf32>
    %1797 = tpu.concatenate %1779, %1796 in 0 : vector<8x8xf32>, vector<8x8xf32> -> vector<16x8xf32>
    %1798 = vector.extract_strided_slice %1560 {offsets = [3, 0, 0], sizes = [1, 8, 32], strides = [1, 1, 1]} : vector<4x8x32xf32> to vector<1x8x32xf32>
    %1799 = vector.shape_cast %1798 : vector<1x8x32xf32> to vector<8x32xf32>
    %cst_667 = arith.constant dense<0.000000e+00> : vector<16x32xf32>
    %1800 = tpu.matmul %1797, %1799, %cst_667 {dimension_numbers = #tpu.dot_dimension_numbers<[1], [0], [0], [1], [0, 0, 1, 1], [], []>} : vector<16x8xf32>, vector<8x32xf32>, vector<16x32xf32> -> vector<16x32xf32>
    %1801 = arith.addf %1741, %1800 : vector<16x32xf32>
    %1802 = vector.broadcast %1562 : vector<1x32xf32> to vector<16x32xf32>
    %1803 = arith.addf %1801, %1802 : vector<16x32xf32>
    %1804 = arith.addf %1546, %1803 : vector<16x32xf32>
    %c1_668 = arith.constant 1 : index
    %c0_669 = arith.constant 0 : index
    %c0_670 = arith.constant 0 : index
    %1805 = vector.load %arg43[%c1_668, %c0_669, %c0_670] : memref<2x1x32xf32, #tpu.memory_space<vmem>>, vector<1x1x32xf32>
    %1806 = vector.shape_cast %1805 : vector<1x1x32xf32> to vector<1x32xf32>
    %c1_671 = arith.constant 1 : index
    %c0_672 = arith.constant 0 : index
    %c0_673 = arith.constant 0 : index
    %1807 = vector.load %arg44[%c1_671, %c0_672, %c0_673] : memref<2x1x32xf32, #tpu.memory_space<vmem>>, vector<1x1x32xf32>
    %1808 = vector.shape_cast %1807 : vector<1x1x32xf32> to vector<1x32xf32>
    %cst_674 = arith.constant dense<0.000000e+00> : vector<16xf32>
    %1809 = vector.multi_reduction <add>, %1804, %cst_674 [1] : vector<16x32xf32> to vector<16xf32>
    %1810 = vector.shape_cast %1809 : vector<16xf32> to vector<16x1xf32>
    %cst_675 = arith.constant 3.200000e+01 : f32
    %1811 = vector.broadcast %cst_675 : f32 to vector<16x1xf32>
    %1812 = arith.divf %1810, %1811 : vector<16x1xf32>
    %1813 = vector.broadcast %1812 : vector<16x1xf32> to vector<16x32xf32>
    %1814 = arith.subf %1804, %1813 : vector<16x32xf32>
    %1815 = arith.mulf %1814, %1814 : vector<16x32xf32>
    %cst_676 = arith.constant dense<0.000000e+00> : vector<16xf32>
    %1816 = vector.multi_reduction <add>, %1815, %cst_676 [1] : vector<16x32xf32> to vector<16xf32>
    %1817 = vector.shape_cast %1816 : vector<16xf32> to vector<16x1xf32>
    %cst_677 = arith.constant 3.200000e+01 : f32
    %1818 = vector.broadcast %cst_677 : f32 to vector<16x1xf32>
    %1819 = arith.divf %1817, %1818 : vector<16x1xf32>
    %cst_678 = arith.constant 9.99999974E-6 : f32
    %1820 = vector.broadcast %cst_678 : f32 to vector<16x1xf32>
    %1821 = arith.addf %1819, %1820 : vector<16x1xf32>
    %1822 = math.rsqrt %1821 : vector<16x1xf32>
    %1823 = vector.broadcast %1822 : vector<16x1xf32> to vector<16x32xf32>
    %1824 = arith.mulf %1814, %1823 : vector<16x32xf32>
    %1825 = vector.broadcast %1806 : vector<1x32xf32> to vector<16x32xf32>
    %1826 = arith.mulf %1824, %1825 : vector<16x32xf32>
    %1827 = vector.broadcast %1808 : vector<1x32xf32> to vector<16x32xf32>
    %1828 = arith.addf %1826, %1827 : vector<16x32xf32>
    %c1_679 = arith.constant 1 : index
    %c0_680 = arith.constant 0 : index
    %c0_681 = arith.constant 0 : index
    %1829 = vector.load %arg45[%c1_679, %c0_680, %c0_681] : memref<2x32x64xf32, #tpu.memory_space<vmem>>, vector<1x32x64xf32>
    %1830 = vector.shape_cast %1829 : vector<1x32x64xf32> to vector<32x64xf32>
    %cst_682 = arith.constant dense<0.000000e+00> : vector<16x64xf32>
    %1831 = tpu.matmul %1828, %1830, %cst_682 {dimension_numbers = #tpu.dot_dimension_numbers<[1], [0], [0], [1], [0, 0, 1, 1], [], []>} : vector<16x32xf32>, vector<32x64xf32>, vector<16x64xf32> -> vector<16x64xf32>
    %c1_683 = arith.constant 1 : index
    %c0_684 = arith.constant 0 : index
    %c0_685 = arith.constant 0 : index
    %1832 = vector.load %arg46[%c1_683, %c0_684, %c0_685] : memref<2x1x64xf32, #tpu.memory_space<vmem>>, vector<1x1x64xf32>
    %1833 = vector.shape_cast %1832 : vector<1x1x64xf32> to vector<1x64xf32>
    %1834 = vector.broadcast %1833 : vector<1x64xf32> to vector<16x64xf32>
    %1835 = arith.addf %1831, %1834 : vector<16x64xf32>
    %cst_686 = arith.constant 0.000000e+00 : f32
    %1836 = vector.broadcast %cst_686 : f32 to vector<16x64xf32>
    %1837 = arith.maximumf %1835, %1836 : vector<16x64xf32>
    %c1_687 = arith.constant 1 : index
    %c0_688 = arith.constant 0 : index
    %c0_689 = arith.constant 0 : index
    %1838 = vector.load %arg47[%c1_687, %c0_688, %c0_689] : memref<2x64x32xf32, #tpu.memory_space<vmem>>, vector<1x64x32xf32>
    %1839 = vector.shape_cast %1838 : vector<1x64x32xf32> to vector<64x32xf32>
    %cst_690 = arith.constant dense<0.000000e+00> : vector<16x32xf32>
    %1840 = tpu.matmul %1837, %1839, %cst_690 {dimension_numbers = #tpu.dot_dimension_numbers<[1], [0], [0], [1], [0, 0, 1, 1], [], []>} : vector<16x64xf32>, vector<64x32xf32>, vector<16x32xf32> -> vector<16x32xf32>
    %c1_691 = arith.constant 1 : index
    %c0_692 = arith.constant 0 : index
    %c0_693 = arith.constant 0 : index
    %1841 = vector.load %arg48[%c1_691, %c0_692, %c0_693] : memref<2x1x32xf32, #tpu.memory_space<vmem>>, vector<1x1x32xf32>
    %1842 = vector.shape_cast %1841 : vector<1x1x32xf32> to vector<1x32xf32>
    %1843 = vector.broadcast %1842 : vector<1x32xf32> to vector<16x32xf32>
    %1844 = arith.addf %1840, %1843 : vector<16x32xf32>
    %1845 = arith.addf %1828, %1844 : vector<16x32xf32>
    %c1_694 = arith.constant 1 : index
    %c0_695 = arith.constant 0 : index
    %c0_696 = arith.constant 0 : index
    %1846 = vector.load %arg49[%c1_694, %c0_695, %c0_696] : memref<2x1x32xf32, #tpu.memory_space<vmem>>, vector<1x1x32xf32>
    %1847 = vector.shape_cast %1846 : vector<1x1x32xf32> to vector<1x32xf32>
    %c1_697 = arith.constant 1 : index
    %c0_698 = arith.constant 0 : index
    %c0_699 = arith.constant 0 : index
    %1848 = vector.load %arg50[%c1_697, %c0_698, %c0_699] : memref<2x1x32xf32, #tpu.memory_space<vmem>>, vector<1x1x32xf32>
    %1849 = vector.shape_cast %1848 : vector<1x1x32xf32> to vector<1x32xf32>
    %cst_700 = arith.constant dense<0.000000e+00> : vector<16xf32>
    %1850 = vector.multi_reduction <add>, %1845, %cst_700 [1] : vector<16x32xf32> to vector<16xf32>
    %1851 = vector.shape_cast %1850 : vector<16xf32> to vector<16x1xf32>
    %cst_701 = arith.constant 3.200000e+01 : f32
    %1852 = vector.broadcast %cst_701 : f32 to vector<16x1xf32>
    %1853 = arith.divf %1851, %1852 : vector<16x1xf32>
    %1854 = vector.broadcast %1853 : vector<16x1xf32> to vector<16x32xf32>
    %1855 = arith.subf %1845, %1854 : vector<16x32xf32>
    %1856 = arith.mulf %1855, %1855 : vector<16x32xf32>
    %cst_702 = arith.constant dense<0.000000e+00> : vector<16xf32>
    %1857 = vector.multi_reduction <add>, %1856, %cst_702 [1] : vector<16x32xf32> to vector<16xf32>
    %1858 = vector.shape_cast %1857 : vector<16xf32> to vector<16x1xf32>
    %cst_703 = arith.constant 3.200000e+01 : f32
    %1859 = vector.broadcast %cst_703 : f32 to vector<16x1xf32>
    %1860 = arith.divf %1858, %1859 : vector<16x1xf32>
    %cst_704 = arith.constant 9.99999974E-6 : f32
    %1861 = vector.broadcast %cst_704 : f32 to vector<16x1xf32>
    %1862 = arith.addf %1860, %1861 : vector<16x1xf32>
    %1863 = math.rsqrt %1862 : vector<16x1xf32>
    %1864 = vector.broadcast %1863 : vector<16x1xf32> to vector<16x32xf32>
    %1865 = arith.mulf %1855, %1864 : vector<16x32xf32>
    %1866 = vector.broadcast %1847 : vector<1x32xf32> to vector<16x32xf32>
    %1867 = arith.mulf %1865, %1866 : vector<16x32xf32>
    %1868 = vector.broadcast %1849 : vector<1x32xf32> to vector<16x32xf32>
    %1869 = arith.addf %1867, %1868 : vector<16x32xf32>
    %c0_705 = arith.constant 0 : index
    %c0_706 = arith.constant 0 : index
    %1870 = vector.load %arg7[%c0_705, %c0_706] : memref<32x1xf32, #tpu.memory_space<vmem>>, vector<32x1xf32>
    %cst_707 = arith.constant dense<0.000000e+00> : vector<16x1xf32>
    %1871 = tpu.matmul %1869, %1870, %cst_707 {dimension_numbers = #tpu.dot_dimension_numbers<[1], [0], [0], [1], [0, 0, 1, 1], [], []>} : vector<16x32xf32>, vector<32x1xf32>, vector<16x1xf32> -> vector<16x1xf32>
    %c0_708 = arith.constant 0 : index
    %c0_709 = arith.constant 0 : index
    %1872 = vector.load %arg8[%c0_708, %c0_709] : memref<1x1xf32, #tpu.memory_space<vmem>>, vector<1x1xf32>
    %1873 = vector.broadcast %1872 : vector<1x1xf32> to vector<16x1xf32>
    %1874 = arith.addf %1871, %1873 : vector<16x1xf32>
    %c0_710 = arith.constant 0 : index
    %c0_711 = arith.constant 0 : index
    %1875 = vector.load %arg51[%c0_710, %c0_711] : memref<16x1xf32, #tpu.memory_space<vmem>>, vector<16x1xf32>
    tpu.vector_store %arg51[%c0_710, %c0_711], %1874 {strides = array<i32>} : memref<16x1xf32, #tpu.memory_space<vmem>>, vector<16x1xf32>,
    return
  }
}

</mosaic_0001>

<bundles_post_ra>
// kernel: time_series_transformer_forward.1
= control target key start
LH: loop header
LB: loop body
LE: loop exit
PB: predicated region body
PF: predicated region fallthrough
CT: control target
= control target key end

     0   :  { %s21839_s3 = smov 3   ;;  %s21840_s10 = smov 9   ;;  %vm229_vm0 = vcmask 1043456   ;;  %vm222_vm1 = vcmask 31744   ;;  %vm383_vm2 = vcmask 261120   ;;  %v21845_v30 = vmov 0.0   ;;  %s23657_s0 = inlined_call_operand.smem [shape: u32[52], index: -1, kind: input, shape index: {}] }
   0x1   :  { %s17782_s6 = sld [smem:[%s23657_s0 + %s21839_s3]]   ;;  %s21841_s14 = smov 11   ;;  %vm21846_vm3 = vmmov 0   ;;  %vm627_vm4 = vcmask 64512   ;;  %vm3137_vm5 = vcmask 523264   ;;  %vm6247_vm6 = vcmask 1040384  }
   0x2   :  { %s1_s9 = sld [smem:[%s23657_s0]]   ;;  %s21842_s18 = smov 13   ;;  %vm6240_vm7 = vcmask 7168  }
   0x3   :  { %s21906_s13 = sld [smem:[%s23657_s0 + %s21840_s10]]   ;;  %s21843_s22 = smov 4  }
   0x4   :  { %s21911_s17 = sld [smem:[%s23657_s0 + %s21841_s14]]   ;;  %s21844_s26 = smov 1  }
   0x5   :  { %s21920_s21 = sld [smem:[%s23657_s0 + %s21842_s18]]   ;;  %s21847_s30 = smov 12  }
   0x6   :  { %s17783_s25 = sld [smem:[%s23657_s0 + %s21843_s22]]   ;;  %s21848_s4 = smov 10  }
   0x7   :  { %v214_v0 = vld [vmem:[%s17782_s6] sm:$0xf]  ;;  %s17780_s29 = sld [smem:[%s23657_s0 + %s21844_s26]]   ;;  %s21849_s8 = smov 14  }
   0x8   :  { %v212_v1 = vld [vmem:[%s1_s9] sm:$0xff]  ;;  %v213_v2 = vld [vmem:[%s1_s9 + $0x8] sm:$0xff]  ;;  %19305 = vmatprep.subr.msk.mxu1 %vm229_vm0, %v214_v0  ;;  %s21961_s3 = sld [smem:[%s23657_s0 + %s21847_s30]]   ;;  %s21850_s12 = smov 15  }
   0x9   :  { %19307 = vmatprep.mubr.msk.f32.mxu1 %vm222_vm1, %v212_v1  ;;  %v312_v3 = vld [vmem:[%s21906_s13] sm:$0xff]  ;;  %v313_v4 = vld [vmem:[%s21906_s13 + $0x8] sm:$0xff]  ;;  %19306 = vmatpush3.msk.msra.mxu1 %vm229_vm0, %v214_v0  ;;  %v314_v9 = vld [vmem:[%s21906_s13 + $0x10] sm:$0xff]  ;;  %s21966_s7 = sld [smem:[%s23657_s0 + %s21848_s4]]   ;;  %s21851_s18 = smov 16  }
   0xa   :  { %v20838_v5 = vpack.c.bf16 %v313_v4, %v312_v3  ;;  %v332_v6 = vld [vmem:[%s21911_s17] sm:$0xff]  ;;  %v333_v7 = vld [vmem:[%s21911_s17 + $0x8] sm:$0xff]  ;;  %19308 = vmatmul.mubr.msk.f32.vlgmr.msra.gmra.mrb[0].mxu1 %vm222_vm1, %v213_v2  ;;  %v315_v10 = vld [vmem:[%s21906_s13 + $0x18] sm:$0xff]  ;;  %s21974_s11 = sld [smem:[%s23657_s0 + %s21849_s8]]   ;;  %s21852_s23 = smov 19  }
   0xb   :  { %v20846_v8 = vpack.c.bf16 %v333_v7, %v332_v6  ;;  %v20842_v11 = vpack.c.bf16 %v315_v10, %v314_v9  ;;  %v334_v12 = vld [vmem:[%s21911_s17 + $0x10] sm:$0xff]  ;;  %v335_v13 = vld [vmem:[%s21911_s17 + $0x18] sm:$0xff]  ;;  %v352_v15 = vld [vmem:[%s21920_s21] sm:$0xff]  ;;  %s22070_s16 = sld [smem:[%s23657_s0 + %s21850_s12]]   ;;  %s21853_s27 = smov 21  }
   0xc   :  { %20839 = vmatprep.subr.bf16.mxu1 %v20838_v5  ;;  %v20850_v14 = vpack.c.bf16 %v335_v13, %v334_v12  ;;  %v353_v16 = vld [vmem:[%s21920_s21 + $0x8] sm:$0xff]  ;;  %v17831_v18 = vld [vmem:[%s17783_s25] ss:$0 sm:$0xff]  ;;  %v354_v25 = vld [vmem:[%s21920_s21 + $0x10] sm:$0xff]  ;;  %s22168_s22 = sld [smem:[%s23657_s0 + %s21851_s18]]   ;;  %s21854_s1 = smov 17  }
   0xd   :  { %20841 = vmatpush3.bf16.msra.mxu1 %v20838_v5  ;;  %20847 = vmatprep.subr.bf16.mxu0 %v20846_v8  ;;  %v20854_v17 = vpack.c.bf16 %v353_v16, %v352_v15  ;;  %v308_v22 = vld [vmem:[%s17780_s29] sm:$0xff]  ;;  %v309_v23 = vld [vmem:[%s17780_s29 + $0x8] sm:$0xff]  ;;  %v355_v26 = vld [vmem:[%s21920_s21 + $0x18] sm:$0xff]  ;;  %s22180_s26 = sld [smem:[%s23657_s0 + %s21852_s23]]   ;;  %s21855_s6 = smov 18  }
   0xe   :  { %20849 = vmatpush3.bf16.msra.mxu0 %v20846_v8  ;;  %20843 = vmatprep.subr.bf16.mxu1 %v20842_v11  ;;  %v20858_v29 = vpack.c.bf16 %v355_v26, %v354_v25  ;;  %v316_v31 = vld [vmem:[%s21906_s13 + $0x20] sm:$0xff]  ;;  %v317_v32 = vld [vmem:[%s21906_s13 + $0x28] sm:$0xff]  ;;  %v318_v41 = vld [vmem:[%s21906_s13 + $0x30] sm:$0xff]  ;;  %s22189_s30 = sld [smem:[%s23657_s0 + %s21853_s27]]   ;;  %s21856_s12 = smov 20  }
   0xf   :  { %20851 = vmatprep.subr.bf16.mxu0 %v20850_v14  ;;  %v17838_v33 = vld [vmem:[%s21961_s3] ss:$0 sm:$0xff]  ;;  %v20862_v36 = vpack.c.bf16 %v317_v32, %v316_v31  ;;  %v319_v42 = vld [vmem:[%s21906_s13 + $0x38] sm:$0xff]  ;;  %v357_v48 = vld [vmem:[%s21920_s21 + $0x28] sm:$0xff]  ;;  %s22200_s5 = sld [smem:[%s23657_s0 + %s21854_s1]]   ;;  %s21857_s19 = smov 22  }
  0x10   :  { %v17835_v37 = vld [vmem:[%s21966_s7] ss:$0 sm:$0xff]  ;;  %v20866_v45 = vpack.c.bf16 %v319_v42, %v318_v41  ;;  %v358_v54 = vld [vmem:[%s21920_s21 + $0x30] sm:$0xff]  ;;  %v359_v55 = vld [vmem:[%s21920_s21 + $0x38] sm:$0xff]  ;;  %s22205_s10 = sld [smem:[%s23657_s0 + %s21855_s6]]   ;;  %s21858_s25 = smov 23  }
  0x11   :  { %20845 = vmatpush3.bf16.msra.mxu1 %v20842_v11  ;;  %v356_v47 = vld [vmem:[%s21920_s21 + $0x20] sm:$0xff]  ;;  %v20882_v57 = vpack.c.bf16 %v359_v55, %v358_v54  ;;  %v338_v25 = vld [vmem:[%s21911_s17 + $0x30] sm:$0xff]  ;;  %v339_v26 = vld [vmem:[%s21911_s17 + $0x38] sm:$0xff]  ;;  %s22216_s18 = sld [smem:[%s23657_s0 + %s21856_s12]]   ;;  %s21859_s1 = smov 24  }
  0x12   :  { %20853 = vmatpush3.bf16.msra.mxu0 %v20850_v14  ;;  %20855 = vmatprep.subr.bf16.mxu1 %v20854_v17  ;;  %v17841_v49 = vld [vmem:[%s21974_s11] ss:$0 sm:$0xff]  ;;  %v20878_v51 = vpack.c.bf16 %v357_v48, %v356_v47  ;;  %v17856_v4 = vld [vmem:[%s21974_s11 + $0x1] ss:$0 sm:$0xff]  ;;  %v20874_v32 = vpack.c.bf16 %v339_v26, %v338_v25  ;;  %s22224_s24 = sld [smem:[%s23657_s0 + %s21857_s19]]   ;;  %s21864_s19 = smov 27  }
  0x13   :  { %19343 = vmatprep.subr.mxu0 %v21845_v30  ;;  %s22245_s29 = sld [smem:[%s23657_s0 + %s21858_s25]]   ;;  %s21871_s23 = smov 37  }
  0x14   :  { %s22250_s6 = sld [smem:[%s23657_s0 + %s21859_s1]]   ;;  %s21876_s14 = smov 38  }
  0x15   :  { %s22521_s25 = sld [smem:[%s23657_s0 + %s21864_s19]]   ;;  %s21877_s27 = smov 36  }
  0x16   :  { %s22797_s28 = sld [smem:[%s23657_s0 + %s21871_s23]]   ;;  %s21882_s4 = smov 47  }
  0x17   :  { %s22874_s2 = sld [smem:[%s23657_s0 + %s21877_s27]]   ;;  %s21881_s27 = smov 45  }
  0xdd   :  { %v19309_v19 = vpop.f32.mrb[0].mxu1 }
  0xde   :  { %v305_v20 = vadd.f32 %v19309_v19, %v17831_v18  ;;  %v299_v21 = vpop.f32.mrb[1].mxu1 }
  0xdf   :  { %v300_v24 = vadd.f32 %v17831_v18, %v299_v21  ;;  %v337_v21 = vld [vmem:[%s21911_s17 + $0x28] sm:$0xff] }
  0xe0   :  { %v21938_v28 = vadd.f32 %v309_v23, %v305_v20  ;;  %v336_v20 = vld [vmem:[%s21911_s17 + $0x20] sm:$0xff] }
  0xe1   :  { %v21936_v27 = vadd.f32 %v308_v22, %v300_v24  ;;  %v20870_v24 = vpack.c.bf16 %v337_v21, %v336_v20  ;;  %v340_v21 = vld [vmem:[%s21911_s17 + $0x40] sm:$0xff] }
  0xe3   :  { %19318 = vmatprep.mubr.msk.f32.mxu1 %vm383_vm2, %v21936_v27  ;;  %19329 = vmatprep.mubr.msk.f32.mxu0 %vm383_vm2, %v21936_v27 }
  0xe4   :  { %19319 = vmatmul.mubr.msk.f32.vlgmr.msra.gmra.mrb[2].mxu1 %vm383_vm2, %v21938_v28  ;;  %19330 = vmatmul.mubr.msk.f32.vlgmr.msra.gmra.mrb[0].mxu0 %vm383_vm2, %v21938_v28 }
  0xe5   :  { %20857 = vmatpush3.bf16.msra.mxu1 %v20854_v17  ;;  %19340 = vmatprep.mubr.msk.f32.mxu1 %vm383_vm2, %v21936_v27 }
  0xe6   :  { %20859 = vmatprep.subr.bf16.mxu1 %v20858_v29  ;;  %19345 = vmatprep.mubr.msk.f32.mxu0 %vm21846_vm3, %v21845_v30 }
  0xe9   :  { %20861 = vmatpush3.bf16.msra.mxu1 %v20858_v29 }
  0xea   :  { %19353 = vmatprep.subr.mxu1 %v21845_v30 }
  0xec   :  { %19341 = vmatmul.mubr.msk.f32.vlgmr.msra.gmra.mrb[4].mxu1 %vm383_vm2, %v21938_v28 }
  0xed   :  { %19355 = vmatprep.mubr.msk.f32.mxu1 %vm21846_vm3, %v21845_v30 }
 0x1b7   :  { %v19320_v34 = vpop.f32.mrb[2].mxu1  ;;  %v19331_v35 = vpop.f32.mrb[0].mxu0 }
 0x1b8   :  { %v543_v38 = vadd.f32 %v19331_v35, %v17838_v33  ;;  %v456_v39 = vpop.f32.mrb[3].mxu1  ;;  %v537_v40 = vpop.f32.mrb[1].mxu0  ;;  %v462_v44 = vadd.f32 %v19320_v34, %v17835_v37 }
 0x1b9   :  { %v538_v43 = vadd.f32 %v17838_v33, %v537_v40  ;;  %v457_v46 = vadd.f32 %v17835_v37, %v456_v39  ;;  %v17853_v37 = vld [vmem:[%s21961_s3 + $0x1] ss:$0 sm:$0xff] }
 0x1ba   :  { %19354 = vmatpush3.xpose.msk.msra.mxu1 %vm627_vm4, %v543_v38  ;;  %v17850_v39 = vld [vmem:[%s21966_s7 + $0x1] ss:$0 sm:$0xff] }
 0x1bb   :  { %19344 = vmatpush3.xpose.msk.msra.mxu0 %vm627_vm4, %v538_v43  ;;  %20863 = vmatprep.subr.bf16.mxu1 %v20862_v36 }
 0x1bc   :  { %19348 = vmatprep.subr.mxu0 %v21845_v30 }
 0x1bd   :  { %19356 = vmatmul.mubr.msk.f32.vlgmr.msra.gmra.mrb[6].mxu1 %vm627_vm4, %v462_v44 }
 0x1be   :  { %19346 = vmatmul.mubr.msk.f32.vlgmr.msra.gmra.mrb[2].mxu0 %vm627_vm4, %v457_v46  ;;  %20865 = vmatpush3.bf16.msra.mxu1 %v20862_v36 }
 0x1bf   :  { %v19342_v50 = vpop.f32.mrb[4].mxu1  ;;  %19371 = vmatprep.mubr.msk.f32.mxu1 %vm383_vm2, %v21936_v27  ;;  %20867 = vmatprep.subr.bf16.mxu1 %v20866_v45 }
 0x1c0   :  { %v624_v52 = vadd.f32 %v19342_v50, %v17841_v49  ;;  %v618_v53 = vpop.f32.mrb[5].mxu1  ;;  %19350 = vmatprep.mubr.msk.f32.mxu0 %vm21846_vm3, %v21845_v30 }
 0x1c1   :  { %v619_v56 = vadd.f32 %v17841_v49, %v618_v53 }
 0x1c2   :  { %20869 = vmatpush3.bf16.msra.mxu1 %v20866_v45 }
 0x1c3   :  { %19349 = vmatpush3.msra.mxu0 %v619_v56  ;;  %20879 = vmatprep.subr.bf16.mxu1 %v20878_v51 }
 0x1c4   :  { %19358 = vmatprep.subr.mxu0 %v21845_v30 }
 0x1c5   :  { %19372 = vmatmul.mubr.msk.f32.vlgmr.msra.gmra.mrb[8].mxu1 %vm383_vm2, %v21938_v28 }
 0x1c6   :  { %20881 = vmatpush3.bf16.msra.mxu1 %v20878_v51  ;;  %19393 = vmatprep.mubr.msk.f32.mxu1 %vm383_vm2, %v21936_v27 }
 0x1c7   :  { %20883 = vmatprep.subr.bf16.mxu1 %v20882_v57 }
 0x1ca   :  { %20885 = vmatpush3.bf16.msra.mxu1 %v20882_v57 }
 0x1cb   :  { %19406 = vmatprep.subr.mxu1 %v21845_v30 }
 0x1cd   :  { %19394 = vmatmul.mubr.msk.f32.vlgmr.msra.gmra.mrb[10].mxu1 %vm383_vm2, %v21938_v28 }
 0x1ce   :  { %19408 = vmatprep.mubr.msk.f32.mxu1 %vm21846_vm3, %v21845_v30 }
 0x290   :  { %v861_v58 = vpop.f32.mrb[6].mxu1 }
 0x291   :  { %v700_v59 = vpop.f32.mrb[2].mxu0  ;;  %v19357_v60 = vpop.f32.mrb[7].mxu1  ;;  %v865_v63 = vmul.f32 0.35355338, %v861_v58 }
 0x292   :  { %v704_v61 = vmul.f32 0.35355338, %v700_v59  ;;  %v19347_v62 = vpop.f32.mrb[3].mxu0 }
 0x293   :  { %v866_v2 = vsel %vm627_vm4, %v865_v63, -inf }
 0x294   :  { %v705_v0 = vsel %vm627_vm4, %v704_v61, -inf }
 0x295   :  { %706 = vmax.xlane.f32.xlu0 %v705_v0 }
 0x298   :  { %v19373_v1 = vpop.f32.mrb[8].mxu1 }
 0x299   :  { %v1022_v3 = vpop.f32.mrb[9].mxu1  ;;  %867 = vmax.xlane.f32.xlu0 %v866_v2  ;;  %v1028_v43 = vadd.f32 %v19373_v1, %v17850_v39  ;;  %v320_v2 = vld [vmem:[%s21906_s13 + $0x40] sm:$0xff] }
 0x29a   :  { %v1023_v44 = vadd.f32 %v17850_v39, %v1022_v3  ;;  %v321_v3 = vld [vmem:[%s21906_s13 + $0x48] sm:$0xff] }
 0x2a0   :  { %v19395_v5 = vpop.f32.mrb[10].mxu1 }
 0x2a1   :  { %v22006_v6 = vadd.f32 %v19395_v5, %v17856_v4  ;;  %v1184_v7 = vpop.f32.mrb[11].mxu1 }
 0x2a2   :  { %v1185_v45 = vadd.f32 %v17856_v4, %v1184_v7  ;;  %v20886_v7 = vpack.c.bf16 %v321_v3, %v320_v2 }
 0x322   :  { %v707_v8 = vpop.xlane.xlu0 %706 }
 0x323   :  { %v708_v9 = vsub.f32 %v704_v61, %v707_v8 }
 0x325   :  { %v709_v10 = vmul.f32 1.442695, %v708_v9  ;;  %v322_v9 = vld [vmem:[%s21906_s13 + $0x50] sm:$0xff] }
 0x326   :  { %v868_v11 = vpop.xlane.xlu0 %867 }
 0x327   :  { %21607 = vpow2.f32 %v709_v10  ;;  %v869_v12 = vsub.f32 %v865_v63, %v868_v11  ;;  %v323_v10 = vld [vmem:[%s21906_s13 + $0x58] sm:$0xff] }
 0x329   :  { %v870_v13 = vmul.f32 1.442695, %v869_v12  ;;  %v20890_v12 = vpack.c.bf16 %v323_v10, %v322_v9  ;;  %v326_v10 = vld [vmem:[%s21906_s13 + $0x70] sm:$0xff] }
 0x32b   :  { %21609 = vpow2.f32 %v870_v13  ;;  %v360_v13 = vld [vmem:[%s21920_s21 + $0x40] sm:$0xff] }
 0x331   :  { %v21608_v14 = vpop.eup %21607 }
 0x332   :  { %v711_v15 = vsel %vm627_vm4, %v21608_v14, 0.0 }
 0x333   :  { %712 = vadd.xlane.f32.xlu1 %v711_v15 }
 0x335   :  { %v21610_v16 = vpop.eup %21609 }
 0x336   :  { %v872_v17 = vsel %vm627_vm4, %v21610_v16, 0.0 }
 0x337   :  { %873 = vadd.xlane.f32.xlu1 %v872_v17  ;;  %v363_v17 = vld [vmem:[%s21920_s21 + $0x58] sm:$0xff] }
 0x3c0   :  { %v713_v18 = vpop.xlane.xlu1 %712 }
 0x3c1   :  { %21611 = vrcp.f32 %v713_v18  ;;  %v373_v18 = vld [vmem:[%s22070_s16 + $0x8] sm:$0xff] }
 0x3c4   :  { %v874_v19 = vpop.xlane.xlu1 %873 }
 0x3c5   :  { %21613 = vrcp.f32 %v874_v19  ;;  %v372_v19 = vld [vmem:[%s22070_s16] sm:$0xff] }
 0x3cb   :  { %v21612_v22 = vpop.eup %21611 }
 0x3cc   :  { %v715_v23 = vmul.f32 %v21612_v22, %v21608_v14  ;;  %v361_v14 = vld [vmem:[%s21920_s21 + $0x48] sm:$0xff] }
 0x3cd   :  { %v20902_v15 = vpack.c.bf16 %v361_v14, %v360_v13  ;;  %v341_v22 = vld [vmem:[%s21911_s17 + $0x48] sm:$0xff] }
 0x3ce   :  { %19351 = vmatmul.mubr.msk.f32.vlgmr.msra.gmra.mrb[4].mxu0 %vm627_vm4, %v715_v23 }
 0x3cf   :  { %v21614_v29 = vpop.eup %21613  ;;  %19359 = vmatpush3.msra.mxu0 %v624_v52  ;;  %19360 = vmatprep.mubr.msk.f32.mxu0 %vm21846_vm3, %v21845_v30 }
 0x3d0   :  { %20871 = vmatprep.subr.bf16.mxu0 %v20870_v24  ;;  %v876_v31 = vmul.f32 %v21614_v29, %v21610_v16  ;;  %v362_v16 = vld [vmem:[%s21920_s21 + $0x50] sm:$0xff] }
 0x3d1   :  { %v342_v29 = vld [vmem:[%s21911_s17 + $0x50] sm:$0xff] }
 0x3d2   :  { %19361 = vmatmul.mubr.msk.f32.vlgmr.msra.gmra.mrb[6].mxu0 %vm627_vm4, %v876_v31  ;;  %v343_v31 = vld [vmem:[%s21911_s17 + $0x58] sm:$0xff] }
 0x3d3   :  { %20873 = vmatpush3.bf16.msra.mxu0 %v20870_v24  ;;  %19382 = vmatprep.mubr.msk.f32.mxu0 %vm383_vm2, %v21936_v27  ;;  %v20894_v24 = vpack.c.bf16 %v341_v22, %v340_v21  ;;  %v344_v21 = vld [vmem:[%s21911_s17 + $0x60] sm:$0xff]  ;;  %v345_v22 = vld [vmem:[%s21911_s17 + $0x68] sm:$0xff] }
 0x3d4   :  { %20875 = vmatprep.subr.bf16.mxu0 %v20874_v32 }
 0x3d7   :  { %20877 = vmatpush3.bf16.msra.mxu0 %v20874_v32  ;;  %v20898_v32 = vpack.c.bf16 %v343_v31, %v342_v29 }
 0x3d8   :  { %19396 = vmatprep.subr.mxu0 %v21845_v30 }
 0x3da   :  { %19383 = vmatmul.mubr.msk.f32.vlgmr.msra.gmra.mrb[8].mxu0 %vm383_vm2, %v21938_v28 }
 0x3db   :  { %19398 = vmatprep.mubr.msk.f32.mxu0 %vm21846_vm3, %v21845_v30 }
 0x4a1   :  { %v22025_v33 = vpop.f32.mrb[4].mxu0 }
 0x4a2   :  { %v19352_v34 = vpop.f32.mrb[5].mxu0 }
 0x4a5   :  { %v22027_v35 = vpop.f32.mrb[6].mxu0 }
 0x4a6   :  { %v19362_v36 = vpop.f32.mrb[7].mxu0 }
 0x4ad   :  { %v19384_v38 = vpop.f32.mrb[8].mxu0 }
 0x4ae   :  { %v1109_v40 = vadd.f32 %v19384_v38, %v17853_v37  ;;  %v1103_v41 = vpop.f32.mrb[9].mxu0 }
 0x4af   :  { %v1104_v42 = vadd.f32 %v17853_v37, %v1103_v41  ;;  %v17875_v37 = vld [vmem:[%s21974_s11 + $0x2] ss:$0 sm:$0xff] }
 0x4b0   :  { %19407 = vmatpush3.xpose.msk.msra.mxu1 %vm627_vm4, %v1109_v40 }
 0x4b1   :  { %19397 = vmatpush3.xpose.msk.msra.mxu0 %vm627_vm4, %v1104_v42  ;;  %19416 = vmatprep.subr.mxu1 %v373_v18 }
 0x4b2   :  { %19401 = vmatprep.subr.mxu0 %v21845_v30 }
 0x4b3   :  { %19409 = vmatmul.mubr.msk.f32.vlgmr.msra.gmra.mrb[12].mxu1 %vm627_vm4, %v1028_v43  ;;  %v17869_v43 = vld [vmem:[%s21966_s7 + $0x2] ss:$0 sm:$0xff] }
 0x4b4   :  { %19399 = vmatmul.mubr.msk.f32.vlgmr.msra.gmra.mrb[10].mxu0 %vm627_vm4, %v1023_v44  ;;  %19417 = vmatpush3.msra.mxu1 %v373_v18  ;;  %v367_v18 = vld [vmem:[%s21920_s21 + $0x78] sm:$0xff] }
 0x4b5   :  { %19402 = vmatpush3.msra.mxu0 %v1185_v45  ;;  %19403 = vmatprep.mubr.msk.f32.mxu0 %vm21846_vm3, %v21845_v30 }
 0x4b6   :  { %19411 = vmatprep.subr.mxu0 %v21845_v30  ;;  %19421 = vmatprep.subr.mxu1 %v372_v19 }
 0x586   :  { %v1426_v46 = vpop.f32.mrb[12].mxu1 }
 0x587   :  { %v1430_v47 = vmul.f32 0.35355338, %v1426_v46  ;;  %v1265_v48 = vpop.f32.mrb[10].mxu0  ;;  %v19410_v49 = vpop.f32.mrb[13].mxu1 }
 0x588   :  { %v1269_v50 = vmul.f32 0.35355338, %v1265_v48  ;;  %v19400_v51 = vpop.f32.mrb[11].mxu0 }
 0x589   :  { %v1431_v52 = vsel %vm627_vm4, %v1430_v47, -inf }
 0x58a   :  { %1432 = vmax.xlane.f32.xlu1 %v1431_v52  ;;  %v1270_v53 = vsel %vm627_vm4, %v1269_v50, -inf }
 0x58b   :  { %1271 = vmax.xlane.f32.xlu0 %v1270_v53 }
 0x617   :  { %v1433_v54 = vpop.xlane.xlu1 %1432 }
 0x618   :  { %v1434_v55 = vsub.f32 %v1430_v47, %v1433_v54  ;;  %v1272_v56 = vpop.xlane.xlu0 %1271 }
 0x619   :  { %v1273_v57 = vsub.f32 %v1269_v50, %v1272_v56 }
 0x61a   :  { %v1435_v58 = vmul.f32 1.442695, %v1434_v55 }
 0x61b   :  { %v1274_v59 = vmul.f32 1.442695, %v1273_v57 }
 0x61c   :  { %21615 = vpow2.f32 %v1435_v58 }
 0x61d   :  { %21617 = vpow2.f32 %v1274_v59 }
 0x626   :  { %v21616_v60 = vpop.eup %21615 }
 0x627   :  { %v21618_v61 = vpop.eup %21617  ;;  %v1437_v62 = vsel %vm627_vm4, %v21616_v60, 0.0 }
 0x628   :  { %1438 = vadd.xlane.f32.xlu1 %v1437_v62  ;;  %v1276_v63 = vsel %vm627_vm4, %v21618_v61, 0.0 }
 0x629   :  { %1277 = vadd.xlane.f32.xlu0 %v1276_v63 }
 0x6b5   :  { %v1439_v0 = vpop.xlane.xlu1 %1438 }
 0x6b6   :  { %v1278_v1 = vpop.xlane.xlu0 %1277 }
 0x6b7   :  { %21619 = vrcp.f32 %v1278_v1 }
 0x6b8   :  { %21621 = vrcp.f32 %v1439_v0 }
 0x6c1   :  { %v21620_v4 = vpop.eup %21619 }
 0x6c2   :  { %v1280_v5 = vmul.f32 %v21620_v4, %v21618_v61  ;;  %v21622_v8 = vpop.eup %21621  ;;  %v324_v4 = vld [vmem:[%s21906_s13 + $0x60] sm:$0xff] }
 0x6c3   :  { %v1441_v11 = vmul.f32 %v21622_v8, %v21616_v60 }
 0x6c4   :  { %19404 = vmatmul.mubr.msk.f32.vlgmr.msra.gmra.mrb[12].mxu0 %vm627_vm4, %v1280_v5  ;;  %v325_v5 = vld [vmem:[%s21906_s13 + $0x68] sm:$0xff] }
 0x6c5   :  { %19412 = vmatpush3.msra.mxu0 %v22006_v6  ;;  %19413 = vmatprep.mubr.msk.f32.mxu0 %vm21846_vm3, %v21845_v30  ;;  %v20906_v6 = vpack.c.bf16 %v363_v17, %v362_v16  ;;  %v20910_v9 = vpack.c.bf16 %v325_v5, %v324_v4  ;;  %v365_v16 = vld [vmem:[%s21920_s21 + $0x68] sm:$0xff] }
 0x6c6   :  { %20887 = vmatprep.subr.bf16.mxu0 %v20886_v7 }
 0x6c8   :  { %19414 = vmatmul.mubr.msk.f32.vlgmr.msra.gmra.mrb[14].mxu0 %vm627_vm4, %v1441_v11  ;;  %v327_v11 = vld [vmem:[%s21906_s13 + $0x78] sm:$0xff] }
 0x6c9   :  { %20889 = vmatpush3.bf16.msra.mxu0 %v20886_v7  ;;  %19434 = vmatprep.mubr.msk.f32.mxu0 %vm383_vm2, %v21936_v27  ;;  %v20914_v14 = vpack.c.bf16 %v327_v11, %v326_v10  ;;  %v375_v10 = vld [vmem:[%s22070_s16 + $0x18] sm:$0xff] }
 0x6ca   :  { %20891 = vmatprep.subr.bf16.mxu0 %v20890_v12 }
 0x6cd   :  { %20893 = vmatpush3.bf16.msra.mxu0 %v20890_v12 }
 0x6ce   :  { %20903 = vmatprep.subr.bf16.mxu0 %v20902_v15 }
 0x6d0   :  { %19435 = vmatmul.mubr.msk.f32.vlgmr.msra.gmra.mrb[16].mxu0 %vm383_vm2, %v21938_v28 }
 0x6d1   :  { %20905 = vmatpush3.bf16.msra.mxu0 %v20902_v15  ;;  %19456 = vmatprep.mubr.msk.f32.mxu0 %vm383_vm2, %v21936_v27  ;;  %v364_v15 = vld [vmem:[%s21920_s21 + $0x60] sm:$0xff] }
 0x6d2   :  { %20907 = vmatprep.subr.bf16.mxu0 %v20906_v6  ;;  %v20926_v17 = vpack.c.bf16 %v365_v16, %v364_v15  ;;  %v17903_v15 = vld [vmem:[%s22168_s22] ss:$0 sm:$0xff] }
 0x6d5   :  { %20909 = vmatpush3.bf16.msra.mxu0 %v20906_v6  ;;  %v366_v6 = vld [vmem:[%s21920_s21 + $0x70] sm:$0xff] }
 0x6d6   :  { %19464 = vmatprep.subr.mxu0 %v21845_v30 }
 0x6d8   :  { %19457 = vmatmul.mubr.msk.f32.vlgmr.msra.gmra.mrb[18].mxu0 %vm383_vm2, %v21938_v28 }
 0x6d9   :  { %19466 = vmatprep.mubr.msk.f32.mxu0 %vm21846_vm3, %v21845_v30 }
 0x797   :  { %v1350_v20 = vpop.f32.mrb[12].mxu0 }
 0x798   :  { %v19405_v23 = vpop.f32.mrb[13].mxu0  ;;  %19418 = vmatprep.mubr.msk.f32.mxu1 %vm627_vm4, %v1350_v20  ;;  %v374_v20 = vld [vmem:[%s22070_s16 + $0x10] sm:$0xff] }
 0x799   :  { %v20918_v23 = vpack.c.bf16 %v345_v22, %v344_v21 }
 0x79b   :  { %v1511_v25 = vpop.f32.mrb[14].mxu0 }
 0x79c   :  { %v19415_v26 = vpop.f32.mrb[15].mxu0  ;;  %19419 = vmatmul.mubr.msk.f32.vlgmr.msra.gmra.mrb[14].mxu1 %vm627_vm4, %v1511_v25  ;;  %v346_v25 = vld [vmem:[%s21911_s17 + $0x70] sm:$0xff] }
 0x79d   :  { %19422 = vmatpush3.msra.mxu1 %v372_v19  ;;  %19423 = vmatprep.mubr.msk.f32.mxu1 %vm627_vm4, %v22025_v33  ;;  %v20930_v19 = vpack.c.bf16 %v367_v18, %v366_v6  ;;  %v347_v26 = vld [vmem:[%s21911_s17 + $0x78] sm:$0xff] }
 0x79e   :  { %20895 = vmatprep.subr.bf16.mxu1 %v20894_v24  ;;  %v20922_v31 = vpack.c.bf16 %v347_v26, %v346_v25 }
 0x7a3   :  { %v19436_v34 = vpop.f32.mrb[16].mxu0 }
 0x7a4   :  { %v1749_v36 = vpop.f32.mrb[17].mxu0  ;;  %19424 = vmatmul.mubr.msk.f32.vlgmr.msra.gmra.mrb[14].mxu1 %vm627_vm4, %v22027_v35  ;;  %v17872_v35 = vld [vmem:[%s21961_s3 + $0x2] ss:$0 sm:$0xff]  ;;  %v1755_v47 = vadd.f32 %v19436_v34, %v17869_v43 }
 0x7a5   :  { %20897 = vmatpush3.bf16.msra.mxu1 %v20894_v24  ;;  %19445 = vmatprep.mubr.msk.f32.mxu1 %vm383_vm2, %v21936_v27  ;;  %v1750_v45 = vadd.f32 %v17869_v43, %v1749_v36 }
 0x7a6   :  { %20899 = vmatprep.subr.bf16.mxu1 %v20898_v32 }
 0x7a9   :  { %20901 = vmatpush3.bf16.msra.mxu1 %v20898_v32 }
 0x7aa   :  { %19459 = vmatprep.subr.mxu1 %v21845_v30 }
 0x7ab   :  { %v19458_v33 = vpop.f32.mrb[18].mxu0 }
 0x7ac   :  { %v1917_v38 = vadd.f32 %v19458_v33, %v17875_v37  ;;  %19446 = vmatmul.mubr.msk.f32.vlgmr.msra.gmra.mrb[16].mxu1 %vm383_vm2, %v21938_v28  ;;  %v1911_v39 = vpop.f32.mrb[19].mxu0  ;;  %v17892_v33 = vld [vmem:[%s21974_s11 + $0x3] ss:$0 sm:$0xff] }
 0x7ad   :  { %v1912_v40 = vadd.f32 %v17875_v37, %v1911_v39  ;;  %19461 = vmatprep.mubr.msk.f32.mxu1 %vm21846_vm3, %v21845_v30 }
 0x7af   :  { %19465 = vmatpush3.msra.mxu0 %v1912_v40 }
 0x7b0   :  { %19474 = vmatprep.subr.mxu0 %v21845_v30 }
 0x87f   :  { %v19447_v41 = vpop.f32.mrb[16].mxu1 }
 0x880   :  { %v1830_v42 = vpop.f32.mrb[17].mxu1  ;;  %v1836_v46 = vadd.f32 %v19447_v41, %v17872_v35 }
 0x881   :  { %v1831_v44 = vadd.f32 %v17872_v35, %v1830_v42  ;;  %v17889_v35 = vld [vmem:[%s21961_s3 + $0x3] ss:$0 sm:$0xff] }
 0x882   :  { %v17886_v42 = vld [vmem:[%s21966_s7 + $0x3] ss:$0 sm:$0xff] }
 0x883   :  { %19460 = vmatpush3.xpose.msk.msra.mxu1 %vm627_vm4, %v1831_v44 }
 0x884   :  { %19469 = vmatprep.subr.mxu1 %v21845_v30 }
 0x886   :  { %19462 = vmatmul.mubr.msk.f32.vlgmr.msra.gmra.mrb[18].mxu1 %vm627_vm4, %v1750_v45 }
 0x887   :  { %19470 = vmatpush3.xpose.msk.msra.mxu1 %vm627_vm4, %v1836_v46  ;;  %19471 = vmatprep.mubr.msk.f32.mxu1 %vm21846_vm3, %v21845_v30 }
 0x888   :  { %19479 = vmatprep.subr.mxu1 %v374_v20 }
 0x88a   :  { %19472 = vmatmul.mubr.msk.f32.vlgmr.msra.gmra.mrb[20].mxu1 %vm627_vm4, %v1755_v47 }
 0x88b   :  { %19480 = vmatpush3.msra.mxu1 %v374_v20 }
 0x88c   :  { %20919 = vmatprep.subr.bf16.mxu1 %v20918_v23 }
 0x959   :  { %v1992_v48 = vpop.f32.mrb[18].mxu1 }
 0x95a   :  { %v1996_v49 = vmul.f32 0.35355338, %v1992_v48  ;;  %v19463_v50 = vpop.f32.mrb[19].mxu1 }
 0x95c   :  { %v1997_v51 = vsel %vm627_vm4, %v1996_v49, -inf }
 0x95d   :  { %1998 = vmax.xlane.f32.xlu0 %v1997_v51  ;;  %v2153_v52 = vpop.f32.mrb[20].mxu1 }
 0x95e   :  { %v2157_v53 = vmul.f32 0.35355338, %v2153_v52  ;;  %v19473_v54 = vpop.f32.mrb[21].mxu1 }
 0x960   :  { %v2158_v55 = vsel %vm627_vm4, %v2157_v53, -inf }
 0x961   :  { %2159 = vmax.xlane.f32.xlu1 %v2158_v55 }
 0x9ea   :  { %v1999_v56 = vpop.xlane.xlu0 %1998 }
 0x9eb   :  { %v2000_v57 = vsub.f32 %v1996_v49, %v1999_v56 }
 0x9ed   :  { %v2001_v58 = vmul.f32 1.442695, %v2000_v57 }
 0x9ee   :  { %v2160_v59 = vpop.xlane.xlu1 %2159 }
 0x9ef   :  { %21623 = vpow2.f32 %v2001_v58  ;;  %v2161_v60 = vsub.f32 %v2157_v53, %v2160_v59 }
 0x9f1   :  { %v2162_v61 = vmul.f32 1.442695, %v2161_v60 }
 0x9f3   :  { %21625 = vpow2.f32 %v2162_v61 }
 0x9f9   :  { %v21624_v62 = vpop.eup %21623 }
 0x9fa   :  { %v2003_v63 = vsel %vm627_vm4, %v21624_v62, 0.0 }
 0x9fb   :  { %2004 = vadd.xlane.f32.xlu0 %v2003_v63 }
 0x9fd   :  { %v21626_v0 = vpop.eup %21625 }
 0x9fe   :  { %v2164_v1 = vsel %vm627_vm4, %v21626_v0, 0.0 }
 0x9ff   :  { %2165 = vadd.xlane.f32.xlu1 %v2164_v1 }
 0xa88   :  { %v2005_v2 = vpop.xlane.xlu0 %2004 }
 0xa89   :  { %21627 = vrcp.f32 %v2005_v2 }
 0xa8c   :  { %v2166_v3 = vpop.xlane.xlu1 %2165 }
 0xa8d   :  { %21629 = vrcp.f32 %v2166_v3 }
 0xa93   :  { %v21628_v7 = vpop.eup %21627 }
 0xa94   :  { %v2007_v8 = vmul.f32 %v21628_v7, %v21624_v62 }
 0xa96   :  { %19467 = vmatmul.mubr.msk.f32.vlgmr.msra.gmra.mrb[20].mxu0 %vm627_vm4, %v2007_v8 }
 0xa97   :  { %v21630_v12 = vpop.eup %21629  ;;  %19475 = vmatpush3.msra.mxu0 %v1917_v38  ;;  %19476 = vmatprep.mubr.msk.f32.mxu0 %vm21846_vm3, %v21845_v30 }
 0xa98   :  { %20911 = vmatprep.subr.bf16.mxu0 %v20910_v9  ;;  %v2168_v13 = vmul.f32 %v21630_v12, %v21626_v0 }
 0xa9a   :  { %19477 = vmatmul.mubr.msk.f32.vlgmr.msra.gmra.mrb[22].mxu0 %vm627_vm4, %v2168_v13 }
 0xa9b   :  { %20913 = vmatpush3.bf16.msra.mxu0 %v20910_v9  ;;  %19492 = vmatprep.mubr.msk.f32.mxu0 %vm383_vm2, %v21936_v27 }
 0xa9c   :  { %20915 = vmatprep.subr.bf16.mxu0 %v20914_v14 }
 0xa9f   :  { %20917 = vmatpush3.bf16.msra.mxu0 %v20914_v14 }
 0xaa0   :  { %20927 = vmatprep.subr.bf16.mxu0 %v20926_v17 }
 0xaa2   :  { %19493 = vmatmul.mubr.msk.f32.vlgmr.msra.gmra.mrb[24].mxu0 %vm383_vm2, %v21938_v28 }
 0xaa3   :  { %20929 = vmatpush3.bf16.msra.mxu0 %v20926_v17  ;;  %19514 = vmatprep.mubr.msk.f32.mxu0 %vm383_vm2, %v21936_v27 }
 0xaa4   :  { %20931 = vmatprep.subr.bf16.mxu0 %v20930_v19 }
 0xaa7   :  { %20933 = vmatpush3.bf16.msra.mxu0 %v20930_v19 }
 0xaa8   :  { %19527 = vmatprep.subr.mxu0 %v21845_v30 }
 0xaaa   :  { %19515 = vmatmul.mubr.msk.f32.vlgmr.msra.gmra.mrb[26].mxu0 %vm383_vm2, %v21938_v28 }
 0xaab   :  { %19529 = vmatprep.mubr.msk.f32.mxu0 %vm21846_vm3, %v21845_v30 }
 0xb69   :  { %v2077_v24 = vpop.f32.mrb[20].mxu0 }
 0xb6a   :  { %v19468_v29 = vpop.f32.mrb[21].mxu0  ;;  %19481 = vmatprep.mubr.msk.f32.mxu1 %vm627_vm4, %v2077_v24 }
 0xb6d   :  { %v2238_v32 = vpop.f32.mrb[22].mxu0 }
 0xb6e   :  { %v19478_v34 = vpop.f32.mrb[23].mxu0  ;;  %19482 = vmatmul.mubr.msk.f32.vlgmr.msra.gmra.mrb[14].mxu1 %vm627_vm4, %v2238_v32 }
 0xb6f   :  { %20921 = vmatpush3.bf16.msra.mxu1 %v20918_v23  ;;  %19503 = vmatprep.mubr.msk.f32.mxu1 %vm383_vm2, %v21936_v27 }
 0xb70   :  { %20923 = vmatprep.subr.bf16.mxu1 %v20922_v31 }
 0xb73   :  { %20925 = vmatpush3.bf16.msra.mxu1 %v20922_v31 }
 0xb74   :  { %19517 = vmatprep.subr.mxu1 %v21845_v30 }
 0xb75   :  { %v19494_v36 = vpop.f32.mrb[24].mxu0 }
 0xb76   :  { %v2397_v37 = vpop.f32.mrb[25].mxu0  ;;  %19504 = vmatmul.mubr.msk.f32.vlgmr.msra.gmra.mrb[22].mxu1 %vm383_vm2, %v21938_v28  ;;  %v2403_v46 = vadd.f32 %v19494_v36, %v17886_v42 }
 0xb77   :  { %19519 = vmatprep.mubr.msk.f32.mxu1 %vm21846_vm3, %v21845_v30  ;;  %v2398_v47 = vadd.f32 %v17886_v42, %v2397_v37  ;;  %v3029_v37 = vld [vmem:[%s22180_s26 + $0x8] sm:$0xff]  ;;  %v3124_v42 = vld [vmem:[%s22189_s30 + $0x10] sm:$0xff] }
 0xb7d   :  { %v19516_v38 = vpop.f32.mrb[26].mxu0 }
 0xb7e   :  { %v2565_v39 = vadd.f32 %v19516_v38, %v17892_v33  ;;  %v2559_v40 = vpop.f32.mrb[27].mxu0 }
 0xb7f   :  { %v2560_v48 = vadd.f32 %v17892_v33, %v2559_v40  ;;  %v3030_v33 = vld [vmem:[%s22180_s26 + $0x10] sm:$0xff] }
 0xc49   :  { %v19505_v41 = vpop.f32.mrb[22].mxu1 }
 0xc4a   :  { %v2484_v43 = vadd.f32 %v19505_v41, %v17889_v35  ;;  %v2478_v44 = vpop.f32.mrb[23].mxu1  ;;  %v3123_v41 = vld [vmem:[%s22189_s30 + $0x8] sm:$0xff] }
 0xc4b   :  { %v2479_v45 = vadd.f32 %v17889_v35, %v2478_v44  ;;  %v3122_v35 = vld [vmem:[%s22189_s30] sm:$0xff]  ;;  %v3125_v44 = vld [vmem:[%s22189_s30 + $0x18] sm:$0xff] }
 0xc4c   :  { %19528 = vmatpush3.xpose.msk.msra.mxu0 %vm627_vm4, %v2484_v43  ;;  %v20942_v43 = vpack.c.bf16 %v3123_v41, %v3122_v35  ;;  %v17956_v35 = vld [vmem:[%s21920_s21 + $0x90] sm:$0xff]  ;;  %v17957_v41 = vld [vmem:[%s21920_s21 + $0x98] sm:$0xff] }
 0xc4d   :  { %19518 = vmatpush3.xpose.msk.msra.mxu1 %vm627_vm4, %v2479_v45  ;;  %v20946_v45 = vpack.c.bf16 %v3125_v44, %v3124_v42  ;;  %v20978_v42 = vpack.c.bf16 %v17957_v41, %v17956_v35  ;;  %v17935_v44 = vld [vmem:[%s21911_s17 + $0x88] sm:$0xff] }
 0xc4e   :  { %19522 = vmatprep.subr.mxu1 %v21845_v30 }
 0xc4f   :  { %19530 = vmatmul.mubr.msk.f32.vlgmr.msra.gmra.mrb[28].mxu0 %vm627_vm4, %v2403_v46  ;;  %v3126_v46 = vld [vmem:[%s22189_s30 + $0x20] sm:$0xff] }
 0xc50   :  { %19520 = vmatmul.mubr.msk.f32.vlgmr.msra.gmra.mrb[24].mxu1 %vm627_vm4, %v2398_v47  ;;  %v3127_v47 = vld [vmem:[%s22189_s30 + $0x28] sm:$0xff] }
 0xc51   :  { %19523 = vmatpush3.msra.mxu1 %v2560_v48  ;;  %19524 = vmatprep.mubr.msk.f32.mxu1 %vm21846_vm3, %v21845_v30  ;;  %v20950_v48 = vpack.c.bf16 %v3127_v47, %v3126_v46 }
 0xc52   :  { %19532 = vmatprep.subr.mxu1 %v21845_v30 }
 0xd22   :  { %v2801_v49 = vpop.f32.mrb[28].mxu0 }
 0xd23   :  { %v2805_v50 = vmul.f32 0.35355338, %v2801_v49  ;;  %v2640_v51 = vpop.f32.mrb[24].mxu1  ;;  %v19531_v52 = vpop.f32.mrb[29].mxu0 }
 0xd24   :  { %v2644_v53 = vmul.f32 0.35355338, %v2640_v51  ;;  %v19521_v54 = vpop.f32.mrb[25].mxu1 }
 0xd25   :  { %v2806_v55 = vsel %vm627_vm4, %v2805_v50, -inf }
 0xd26   :  { %2807 = vmax.xlane.f32.xlu1 %v2806_v55  ;;  %v2645_v56 = vsel %vm627_vm4, %v2644_v53, -inf }
 0xd27   :  { %2646 = vmax.xlane.f32.xlu0 %v2645_v56  ;;  %v17904_v56 = vld [vmem:[%s22200_s5] ss:$0 sm:$0xff] }
 0xdb3   :  { %v2808_v57 = vpop.xlane.xlu1 %2807 }
 0xdb4   :  { %v2809_v58 = vsub.f32 %v2805_v50, %v2808_v57  ;;  %v2647_v59 = vpop.xlane.xlu0 %2646 }
 0xdb5   :  { %v2648_v60 = vsub.f32 %v2644_v53, %v2647_v59 }
 0xdb6   :  { %v2810_v61 = vmul.f32 1.442695, %v2809_v58 }
 0xdb7   :  { %v2649_v62 = vmul.f32 1.442695, %v2648_v60  ;;  %v17905_v60 = vld [vmem:[%s22205_s10] ss:$0 sm:$0xff] }
 0xdb8   :  { %21631 = vpow2.f32 %v2810_v61 }
 0xdb9   :  { %21633 = vpow2.f32 %v2649_v62 }
 0xdc2   :  { %v21632_v63 = vpop.eup %21631 }
 0xdc3   :  { %v21634_v0 = vpop.eup %21633  ;;  %v2812_v1 = vsel %vm627_vm4, %v21632_v63, 0.0 }
 0xdc4   :  { %2813 = vadd.xlane.f32.xlu1 %v2812_v1  ;;  %v2651_v2 = vsel %vm627_vm4, %v21634_v0, 0.0  ;;  %v3128_v1 = vld [vmem:[%s22189_s30 + $0x30] sm:$0xff] }
 0xdc5   :  { %2652 = vadd.xlane.f32.xlu0 %v2651_v2  ;;  %v3129_v2 = vld [vmem:[%s22189_s30 + $0x38] sm:$0xff] }
 0xe51   :  { %v2814_v3 = vpop.xlane.xlu1 %2813 }
 0xe52   :  { %v2653_v4 = vpop.xlane.xlu0 %2652 }
 0xe53   :  { %21635 = vrcp.f32 %v2653_v4  ;;  %v17906_v4 = vld [vmem:[%s22216_s18] ss:$0 sm:$0xff] }
 0xe54   :  { %21637 = vrcp.f32 %v2814_v3  ;;  %v20954_v3 = vpack.c.bf16 %v3129_v2, %v3128_v1  ;;  %v17985_v1 = vld [vmem:[%s21974_s11 + $0x4] ss:$0 sm:$0xff] }
 0xe5d   :  { %v21636_v5 = vpop.eup %21635 }
 0xe5e   :  { %v2655_v7 = vmul.f32 %v21636_v5, %v21634_v0  ;;  %v21638_v8 = vpop.eup %21637 }
 0xe5f   :  { %v2816_v9 = vmul.f32 %v21638_v8, %v21632_v63 }
 0xe60   :  { %19525 = vmatmul.mubr.msk.f32.vlgmr.msra.gmra.mrb[26].mxu1 %vm627_vm4, %v2655_v7 }
 0xe61   :  { %19533 = vmatpush3.msra.mxu1 %v2565_v39  ;;  %19534 = vmatprep.mubr.msk.f32.mxu1 %vm21846_vm3, %v21845_v30  ;;  %v3031_v39 = vld [vmem:[%s22180_s26 + $0x18] sm:$0xff] }
 0xe62   :  { %19537 = vmatprep.subr.mxu1 %v375_v10  ;;  %v20938_v40 = vpack.c.bf16 %v3031_v39, %v3030_v33  ;;  %v17917_v39 = vld [vmem:[%s21906_s13 + $0x98] sm:$0xff] }
 0xe64   :  { %19535 = vmatmul.mubr.msk.f32.vlgmr.msra.gmra.mrb[28].mxu1 %vm627_vm4, %v2816_v9 }
 0xe65   :  { %19538 = vmatpush3.msra.mxu1 %v375_v10 }
 0xe66   :  { %20943 = vmatprep.subr.bf16.mxu1 %v20942_v43 }
 0xf33   :  { %v2725_v11 = vpop.f32.mrb[26].mxu1 }
 0xf34   :  { %v19526_v12 = vpop.f32.mrb[27].mxu1  ;;  %19539 = vmatprep.mubr.msk.f32.mxu1 %vm627_vm4, %v2725_v11 }
 0xf35   :  { %v17909_v12 = vld [vmem:[%s22224_s24] ss:$0 sm:$0xff] }
 0xf37   :  { %v2886_v13 = vpop.f32.mrb[28].mxu1 }
 0xf38   :  { %v19536_v14 = vpop.f32.mrb[29].mxu1  ;;  %19540 = vmatmul.mubr.msk.f32.vlgmr.msra.gmra.mrb[14].mxu1 %vm627_vm4, %v2886_v13 }
 0xf39   :  { %20945 = vmatpush3.bf16.msra.mxu1 %v20942_v43  ;;  %v17934_v43 = vld [vmem:[%s21911_s17 + $0x80] sm:$0xff] }
 0xf3a   :  { %20947 = vmatprep.subr.bf16.mxu1 %v20946_v45 }
 0xf3d   :  { %20949 = vmatpush3.bf16.msra.mxu1 %v20946_v45  ;;  %v20966_v45 = vpack.c.bf16 %v17935_v44, %v17934_v43 }
 0xf3e   :  { %20951 = vmatprep.subr.bf16.mxu1 %v20950_v48 }
 0xf41   :  { %20953 = vmatpush3.bf16.msra.mxu1 %v20950_v48 }
 0xf42   :  { %20955 = vmatprep.subr.bf16.mxu1 %v20954_v3 }
 0xf45   :  { %20957 = vmatpush3.bf16.msra.mxu1 %v20954_v3 }
0x100b   :  { %v19541_v16 = vpop.f32.mrb[14].mxu1 }
0x100c   :  { %v2980_v17 = vadd.f32 %v19541_v16, %v17903_v15  ;;  %v2962_v6 = vpop.f32.mrb[15].mxu1 }
0x100d   :  { %v2979_v18 = vadd.f32 %v17903_v15, %v2962_v6 }
0x100e   :  { %v2982_v19 = vadd.f32 %v2980_v17, %v21938_v28 }
0x100f   :  { %v2981_v20 = vadd.f32 %v2979_v18, %v21936_v27  ;;  %v3028_v27 = vld [vmem:[%s22180_s26] sm:$0xff] }
0x1010   :  { %v2988_v21 = vsel %vm383_vm2, %v2982_v19, 0.0  ;;  %v20934_v38 = vpack.c.bf16 %v3029_v37, %v3028_v27  ;;  %v17954_v27 = vld [vmem:[%s21920_s21 + $0x80] sm:$0xff]  ;;  %v17955_v37 = vld [vmem:[%s21920_s21 + $0x88] sm:$0xff] }
0x1011   :  { %2989 = vadd.xlane.f32.xlu1 %v2988_v21  ;;  %v2985_v22 = vsel %vm383_vm2, %v2981_v20, 0.0  ;;  %v20974_v33 = vpack.c.bf16 %v17955_v37, %v17954_v27 }
0x1012   :  { %2986 = vadd.xlane.f32.xlu0 %v2985_v22  ;;  %20935 = vmatprep.subr.bf16.mxu0 %v20934_v38 }
0x1013   :  { %20937 = vmatpush3.bf16.msra.mxu0 %v20934_v38  ;;  %20975 = vmatprep.subr.bf16.mxu1 %v20974_v33  ;;  %v17916_v38 = vld [vmem:[%s21906_s13 + $0x90] sm:$0xff] }
0x1014   :  { %20939 = vmatprep.subr.bf16.mxu0 %v20938_v40 }
0x1017   :  { %20941 = vmatpush3.bf16.msra.mxu0 %v20938_v40  ;;  %v20962_v40 = vpack.c.bf16 %v17917_v39, %v17916_v38 }
0x109e   :  { %v2990_v23 = vpop.xlane.xlu1 %2989 }
0x109f   :  { %v2993_v24 = vmul.f32 0.03125, %v2990_v23  ;;  %v2987_v25 = vpop.xlane.xlu0 %2986 }
0x10a0   :  { %v2992_v26 = vmul.f32 0.03125, %v2987_v25 }
0x10a1   :  { %v2995_v29 = vsub.f32 %v2982_v19, %v2993_v24 }
0x10a2   :  { %v2994_v31 = vsub.f32 %v2981_v20, %v2992_v26 }
0x10a3   :  { %v2997_v32 = vmul.f32 %v2995_v29, %v2995_v29 }
0x10a4   :  { %v2996_v34 = vmul.f32 %v2994_v31, %v2994_v31 }
0x10a5   :  { %v3001_v36 = vsel %vm383_vm2, %v2997_v32, 0.0 }
0x10a6   :  { %3002 = vadd.xlane.f32.xlu1 %v3001_v36  ;;  %v2998_v28 = vsel %vm383_vm2, %v2996_v34, 0.0  ;;  %v17914_v34 = vld [vmem:[%s21906_s13 + $0x80] sm:$0xff]  ;;  %v17915_v36 = vld [vmem:[%s21906_s13 + $0x88] sm:$0xff] }
0x10a7   :  { %2999 = vadd.xlane.f32.xlu0 %v2998_v28  ;;  %v20958_v28 = vpack.c.bf16 %v17915_v36, %v17914_v34 }
0x10a9   :  { %20959 = vmatprep.subr.bf16.mxu0 %v20958_v28 }
0x1133   :  { %v3003_v49 = vpop.xlane.xlu1 %3002 }
0x1134   :  { %v3005_v50 = vmul.f32 0.03125, %v3003_v49  ;;  %v3000_v51 = vpop.xlane.xlu0 %2999 }
0x1135   :  { %v3004_v52 = vmul.f32 0.03125, %v3000_v51 }
0x1136   :  { %v3007_v53 = vadd.f32 1e-05, %v3005_v50 }
0x1137   :  { %v3006_v54 = vadd.f32 1e-05, %v3004_v52 }
0x1138   :  { %21639 = vrsqrt.f32 %v3007_v53  ;;  %v17912_v53 = vld [vmem:[%s22245_s29] ss:$0 sm:$0xff] }
0x1139   :  { %21641 = vrsqrt.f32 %v3006_v54 }
0x1142   :  { %v21640_v55 = vpop.eup %21639 }
0x1143   :  { %v21642_v57 = vpop.eup %21641  ;;  %v3011_v58 = vmul.f32 %v21640_v55, %v2995_v29 }
0x1144   :  { %v3010_v59 = vmul.f32 %v21642_v57, %v2994_v31  ;;  %v17913_v57 = vld [vmem:[%s22250_s6] ss:$0 sm:$0xff] }
0x1145   :  { %v3019_v61 = vmul.f32 %v17904_v56, %v3011_v58 }
0x1146   :  { %v3018_v62 = vmul.f32 %v17904_v56, %v3010_v59 }
0x1147   :  { %v3027_v0 = vadd.f32 %v17905_v60, %v3019_v61  ;;  %v17937_v61 = vld [vmem:[%s21911_s17 + $0x98] sm:$0xff] }
0x1148   :  { %v3026_v63 = vadd.f32 %v17905_v60, %v3018_v62  ;;  %v17936_v60 = vld [vmem:[%s21911_s17 + $0x90] sm:$0xff] }
0x114a   :  { %19550 = vmatprep.mubr.msk.f32.mxu0 %vm383_vm2, %v3026_v63 }
0x114b   :  { %19551 = vmatmul.mubr.msk.f32.vlgmr.msra.gmra.mrb[30].mxu0 %vm383_vm2, %v3027_v0 }
0x114c   :  { %20961 = vmatpush3.bf16.msra.mxu0 %v20958_v28 }
0x114d   :  { %20963 = vmatprep.subr.bf16.mxu0 %v20962_v40 }
0x1150   :  { %20965 = vmatpush3.bf16.msra.mxu0 %v20962_v40  ;;  %v18000_v40 = vld [vmem:[%s21974_s11 + $0x5] ss:$0 sm:$0xff] }
0x1151   :  { %20967 = vmatprep.subr.bf16.mxu0 %v20966_v45 }
0x121e   :  { %v19552_v5 = vpop.f32.mrb[30].mxu0 }
0x121f   :  { %v3117_v7 = vadd.f32 %v19552_v5, %v17906_v4  ;;  %v3111_v8 = vpop.f32.mrb[31].mxu0 }
0x1220   :  { %v3112_v9 = vadd.f32 %v17906_v4, %v3111_v8  ;;  %v17918_v8 = vld [vmem:[%s21906_s13 + $0xa0] sm:$0xff] }
0x1221   :  { %v3121_v11 = vmax.f32 %v3117_v7, 0.0 }
0x1222   :  { %v3120_v10 = vmax.f32 %v3112_v9, 0.0  ;;  %v17919_v9 = vld [vmem:[%s21906_s13 + $0xa8] sm:$0xff] }
0x1224   :  { %19569 = vmatprep.mubr.msk.f32.mxu1 %vm3137_vm5, %v3120_v10  ;;  %v17982_v10 = vld [vmem:[%s21961_s3 + $0x4] ss:$0 sm:$0xff] }
0x1225   :  { %19570 = vmatmul.mubr.msk.f32.vlgmr.msra.gmra.mrb[30].mxu1 %vm3137_vm5, %v3121_v11 }
0x1226   :  { %20977 = vmatpush3.bf16.msra.mxu1 %v20974_v33 }
0x1227   :  { %20979 = vmatprep.subr.bf16.mxu1 %v20978_v42 }
0x122a   :  { %20981 = vmatpush3.bf16.msra.mxu1 %v20978_v42 }
0x122b   :  { %19615 = vmatprep.subr.mxu1 %v21845_v30 }
0x12f8   :  { %v19571_v13 = vpop.f32.mrb[30].mxu1 }
0x12f9   :  { %v3216_v14 = vadd.f32 %v19571_v13, %v17909_v12  ;;  %v3210_v15 = vpop.f32.mrb[31].mxu1  ;;  %v17979_v13 = vld [vmem:[%s21966_s7 + $0x4] ss:$0 sm:$0xff] }
0x12fa   :  { %v3211_v16 = vadd.f32 %v17909_v12, %v3210_v15  ;;  %v20982_v12 = vpack.c.bf16 %v17919_v9, %v17918_v8  ;;  %v17997_v8 = vld [vmem:[%s21961_s3 + $0x5] ss:$0 sm:$0xff] }
0x12fb   :  { %v3220_v17 = vadd.f32 %v3216_v14, %v3027_v0  ;;  %v20970_v0 = vpack.c.bf16 %v17937_v61, %v17936_v60  ;;  %v17940_v61 = vld [vmem:[%s21911_s17 + $0xb0] sm:$0xff] }
0x12fc   :  { %v3219_v6 = vadd.f32 %v3211_v16, %v3026_v63 }
0x12fd   :  { %v3226_v18 = vsel %vm383_vm2, %v3220_v17, 0.0 }
0x12fe   :  { %3227 = vadd.xlane.f32.xlu1 %v3226_v18  ;;  %v3223_v19 = vsel %vm383_vm2, %v3219_v6, 0.0 }
0x12ff   :  { %3224 = vadd.xlane.f32.xlu0 %v3223_v19 }
0x138b   :  { %v3228_v20 = vpop.xlane.xlu1 %3227 }
0x138c   :  { %v3230_v21 = vmul.f32 0.03125, %v3228_v20  ;;  %v3225_v22 = vpop.xlane.xlu0 %3224 }
0x138d   :  { %v3229_v23 = vmul.f32 0.03125, %v3225_v22  ;;  %v17959_v22 = vld [vmem:[%s21920_s21 + $0xa8] sm:$0xff] }
0x138e   :  { %v3232_v24 = vsub.f32 %v3220_v17, %v3230_v21  ;;  %v17920_v17 = vld [vmem:[%s21906_s13 + $0xb0] sm:$0xff]  ;;  %v17958_v21 = vld [vmem:[%s21920_s21 + $0xa0] sm:$0xff] }
0x138f   :  { %v3231_v25 = vsub.f32 %v3219_v6, %v3229_v23  ;;  %v17921_v6 = vld [vmem:[%s21906_s13 + $0xb8] sm:$0xff] }
0x1390   :  { %v3234_v26 = vmul.f32 %v3232_v24, %v3232_v24  ;;  %v20986_v20 = vpack.c.bf16 %v17921_v6, %v17920_v17 }
0x1391   :  { %v3233_v29 = vmul.f32 %v3231_v25, %v3231_v25 }
0x1392   :  { %v3238_v31 = vsel %vm383_vm2, %v3234_v26, 0.0  ;;  %v17961_v26 = vld [vmem:[%s21920_s21 + $0xb8] sm:$0xff] }
0x1393   :  { %3239 = vadd.xlane.f32.xlu1 %v3238_v31  ;;  %v3235_v32 = vsel %vm383_vm2, %v3233_v29, 0.0 }
0x1394   :  { %3236 = vadd.xlane.f32.xlu0 %v3235_v32 }
0x1420   :  { %v3240_v46 = vpop.xlane.xlu1 %3239 }
0x1421   :  { %v3242_v47 = vmul.f32 0.03125, %v3240_v46  ;;  %v3237_v48 = vpop.xlane.xlu0 %3236 }
0x1422   :  { %v3241_v49 = vmul.f32 0.03125, %v3237_v48 }
0x1423   :  { %v3244_v50 = vadd.f32 1e-05, %v3242_v47 }
0x1424   :  { %v3243_v51 = vadd.f32 1e-05, %v3241_v49 }
0x1425   :  { %21643 = vrsqrt.f32 %v3244_v50 }
0x1426   :  { %21645 = vrsqrt.f32 %v3243_v51 }
0x142f   :  { %v21644_v52 = vpop.eup %21643 }
0x1430   :  { %v21646_v54 = vpop.eup %21645  ;;  %v3248_v55 = vmul.f32 %v21644_v52, %v3232_v24  ;;  %v20998_v24 = vpack.c.bf16 %v17959_v22, %v17958_v21 }
0x1431   :  { %v3247_v56 = vmul.f32 %v21646_v54, %v3231_v25  ;;  %v17960_v25 = vld [vmem:[%s21920_s21 + $0xb0] sm:$0xff] }
0x1432   :  { %v3256_v58 = vmul.f32 %v17912_v53, %v3248_v55  ;;  %v21002_v29 = vpack.c.bf16 %v17961_v26, %v17960_v25  ;;  %v17938_v55 = vld [vmem:[%s21911_s17 + $0xa0] sm:$0xff] }
0x1433   :  { %v3255_v59 = vmul.f32 %v17912_v53, %v3247_v56  ;;  %v17939_v56 = vld [vmem:[%s21911_s17 + $0xa8] sm:$0xff] }
0x1434   :  { %v22258_v63 = vadd.f32 %v17913_v57, %v3256_v58 }
0x1435   :  { %v22256_v62 = vadd.f32 %v17913_v57, %v3255_v59  ;;  %v20990_v59 = vpack.c.bf16 %v17939_v56, %v17938_v55  ;;  %v17942_v56 = vld [vmem:[%s21911_s17 + $0xc0] sm:$0xff] }
0x1437   :  { %19580 = vmatprep.mubr.msk.f32.mxu0 %vm383_vm2, %v22256_v62  ;;  %19602 = vmatprep.mubr.msk.f32.mxu1 %vm383_vm2, %v22256_v62 }
0x1438   :  { %19581 = vmatmul.mubr.msk.f32.vlgmr.msra.gmra.mrb[32].mxu0 %vm383_vm2, %v22258_v63  ;;  %19603 = vmatmul.mubr.msk.f32.vlgmr.msra.gmra.mrb[32].mxu1 %vm383_vm2, %v22258_v63 }
0x1439   :  { %20969 = vmatpush3.bf16.msra.mxu0 %v20966_v45  ;;  %19591 = vmatprep.mubr.msk.f32.mxu0 %vm383_vm2, %v22256_v62 }
0x143a   :  { %20971 = vmatprep.subr.bf16.mxu0 %v20970_v0  ;;  %19617 = vmatprep.mubr.msk.f32.mxu1 %vm21846_vm3, %v21845_v30 }
0x143d   :  { %20973 = vmatpush3.bf16.msra.mxu0 %v20970_v0  ;;  %v17941_v0 = vld [vmem:[%s21911_s17 + $0xb8] sm:$0xff] }
0x143e   :  { %19605 = vmatprep.subr.mxu0 %v21845_v30 }
0x1440   :  { %19592 = vmatmul.mubr.msk.f32.vlgmr.msra.gmra.mrb[34].mxu0 %vm383_vm2, %v22258_v63 }
0x1441   :  { %19607 = vmatprep.mubr.msk.f32.mxu0 %vm21846_vm3, %v21845_v30 }
0x150b   :  { %v19582_v2 = vpop.f32.mrb[32].mxu0  ;;  %v19604_v3 = vpop.f32.mrb[32].mxu1 }
0x150c   :  { %v22278_v4 = vadd.f32 %v19604_v3, %v17985_v1  ;;  %v3416_v5 = vpop.f32.mrb[33].mxu0  ;;  %v3578_v7 = vpop.f32.mrb[33].mxu1  ;;  %v3422_v18 = vadd.f32 %v19582_v2, %v17979_v13  ;;  %v20994_v2 = vpack.c.bf16 %v17941_v0, %v17940_v61  ;;  %v17944_v0 = vld [vmem:[%s21911_s17 + $0xd0] sm:$0xff] }
0x150d   :  { %v3417_v19 = vadd.f32 %v17979_v13, %v3416_v5  ;;  %v3579_v23 = vadd.f32 %v17985_v1, %v3578_v7 }
0x1513   :  { %v19593_v11 = vpop.f32.mrb[34].mxu0 }
0x1514   :  { %v3503_v14 = vadd.f32 %v19593_v11, %v17982_v10  ;;  %v3497_v15 = vpop.f32.mrb[35].mxu0 }
0x1515   :  { %v3498_v16 = vadd.f32 %v17982_v10, %v3497_v15  ;;  %v17994_v10 = vld [vmem:[%s21966_s7 + $0x5] ss:$0 sm:$0xff] }
0x1516   :  { %19616 = vmatpush3.xpose.msk.msra.mxu1 %vm627_vm4, %v3503_v14 }
0x1517   :  { %19606 = vmatpush3.xpose.msk.msra.mxu0 %vm627_vm4, %v3498_v16  ;;  %20983 = vmatprep.subr.bf16.mxu1 %v20982_v12 }
0x1518   :  { %19610 = vmatprep.subr.mxu0 %v21845_v30 }
0x1519   :  { %19618 = vmatmul.mubr.msk.f32.vlgmr.msra.gmra.mrb[34].mxu1 %vm627_vm4, %v3422_v18 }
0x151a   :  { %19608 = vmatmul.mubr.msk.f32.vlgmr.msra.gmra.mrb[36].mxu0 %vm627_vm4, %v3417_v19  ;;  %20985 = vmatpush3.bf16.msra.mxu1 %v20982_v12 }
0x151b   :  { %19633 = vmatprep.mubr.msk.f32.mxu1 %vm383_vm2, %v22256_v62  ;;  %19611 = vmatpush3.msra.mxu0 %v3579_v23 }
0x151c   :  { %20987 = vmatprep.subr.bf16.mxu1 %v20986_v20  ;;  %19612 = vmatprep.mubr.msk.f32.mxu0 %vm21846_vm3, %v21845_v30 }
0x151d   :  { %19620 = vmatprep.subr.mxu0 %v21845_v30 }
0x151e   :  { %20989 = vmatpush3.bf16.msra.mxu1 %v20986_v20 }
0x151f   :  { %20999 = vmatprep.subr.bf16.mxu1 %v20998_v24 }
0x1521   :  { %19634 = vmatmul.mubr.msk.f32.vlgmr.msra.gmra.mrb[36].mxu1 %vm383_vm2, %v22258_v63 }
0x1522   :  { %21001 = vmatpush3.bf16.msra.mxu1 %v20998_v24  ;;  %19655 = vmatprep.mubr.msk.f32.mxu1 %vm383_vm2, %v22256_v62 }
0x1523   :  { %21003 = vmatprep.subr.bf16.mxu1 %v21002_v29 }
0x1526   :  { %21005 = vmatpush3.bf16.msra.mxu1 %v21002_v29 }
0x1527   :  { %19668 = vmatprep.subr.mxu1 %v21845_v30 }
0x1529   :  { %19656 = vmatmul.mubr.msk.f32.vlgmr.msra.gmra.mrb[38].mxu1 %vm383_vm2, %v22258_v63 }
0x152a   :  { %19670 = vmatprep.mubr.msk.f32.mxu1 %vm21846_vm3, %v21845_v30 }
0x15ec   :  { %v3820_v31 = vpop.f32.mrb[34].mxu1 }
0x15ed   :  { %v3824_v32 = vmul.f32 0.35355338, %v3820_v31  ;;  %v3659_v34 = vpop.f32.mrb[36].mxu0  ;;  %v19619_v36 = vpop.f32.mrb[35].mxu1 }
0x15ee   :  { %v3663_v28 = vmul.f32 0.35355338, %v3659_v34  ;;  %v19609_v27 = vpop.f32.mrb[37].mxu0 }
0x15ef   :  { %v3825_v37 = vsel %vm627_vm4, %v3824_v32, -inf }
0x15f0   :  { %3826 = vmax.xlane.f32.xlu1 %v3825_v37  ;;  %v3664_v33 = vsel %vm627_vm4, %v3663_v28, -inf }
0x15f1   :  { %3665 = vmax.xlane.f32.xlu0 %v3664_v33 }
0x15f4   :  { %v19635_v38 = vpop.f32.mrb[36].mxu1 }
0x15f5   :  { %v3981_v39 = vpop.f32.mrb[37].mxu1  ;;  %v3987_v14 = vadd.f32 %v19635_v38, %v17994_v10  ;;  %v17922_v38 = vld [vmem:[%s21906_s13 + $0xc0] sm:$0xff] }
0x15f6   :  { %v3982_v15 = vadd.f32 %v17994_v10, %v3981_v39  ;;  %v17923_v39 = vld [vmem:[%s21906_s13 + $0xc8] sm:$0xff] }
0x15fc   :  { %v19657_v35 = vpop.f32.mrb[38].mxu1 }
0x15fd   :  { %v22312_v41 = vadd.f32 %v19657_v35, %v18000_v40  ;;  %v4143_v42 = vpop.f32.mrb[39].mxu1 }
0x15fe   :  { %v4144_v16 = vadd.f32 %v18000_v40, %v4143_v42  ;;  %v21006_v42 = vpack.c.bf16 %v17923_v39, %v17922_v38 }
0x167d   :  { %v3827_v43 = vpop.xlane.xlu1 %3826 }
0x167e   :  { %v3828_v44 = vsub.f32 %v3824_v32, %v3827_v43  ;;  %v3666_v45 = vpop.xlane.xlu0 %3665 }
0x167f   :  { %v3667_v46 = vsub.f32 %v3663_v28, %v3666_v45  ;;  %v17925_v45 = vld [vmem:[%s21906_s13 + $0xd8] sm:$0xff] }
0x1680   :  { %v3829_v47 = vmul.f32 1.442695, %v3828_v44  ;;  %v17924_v44 = vld [vmem:[%s21906_s13 + $0xd0] sm:$0xff] }
0x1681   :  { %v3668_v48 = vmul.f32 1.442695, %v3667_v46 }
0x1682   :  { %21647 = vpow2.f32 %v3829_v47  ;;  %v21010_v47 = vpack.c.bf16 %v17925_v45, %v17924_v44  ;;  %v17928_v45 = vld [vmem:[%s21906_s13 + $0xf0] sm:$0xff] }
0x1683   :  { %21649 = vpow2.f32 %v3668_v48  ;;  %v17962_v48 = vld [vmem:[%s21920_s21 + $0xc0] sm:$0xff] }
0x168c   :  { %v21648_v49 = vpop.eup %21647 }
0x168d   :  { %v21650_v50 = vpop.eup %21649  ;;  %v3831_v51 = vsel %vm627_vm4, %v21648_v49, 0.0 }
0x168e   :  { %3832 = vadd.xlane.f32.xlu1 %v3831_v51  ;;  %v3670_v52 = vsel %vm627_vm4, %v21650_v50, 0.0  ;;  %v17964_v51 = vld [vmem:[%s21920_s21 + $0xd0] sm:$0xff] }
0x168f   :  { %3671 = vadd.xlane.f32.xlu0 %v3670_v52 }
0x171b   :  { %v3833_v53 = vpop.xlane.xlu1 %3832 }
0x171c   :  { %v3672_v54 = vpop.xlane.xlu0 %3671 }
0x171d   :  { %21651 = vrcp.f32 %v3672_v54  ;;  %v17974_v54 = vld [vmem:[%s22070_s16 + $0x20] sm:$0xff] }
0x171e   :  { %21653 = vrcp.f32 %v3833_v53  ;;  %v17975_v53 = vld [vmem:[%s22070_s16 + $0x28] sm:$0xff] }
0x1727   :  { %v21652_v57 = vpop.eup %21651 }
0x1728   :  { %v3674_v58 = vmul.f32 %v21652_v57, %v21650_v50  ;;  %v21654_v60 = vpop.eup %21653  ;;  %v17943_v57 = vld [vmem:[%s21911_s17 + $0xc8] sm:$0xff] }
0x1729   :  { %v3835_v1 = vmul.f32 %v21654_v60, %v21648_v49  ;;  %v17963_v49 = vld [vmem:[%s21920_s21 + $0xc8] sm:$0xff] }
0x172a   :  { %19613 = vmatmul.mubr.msk.f32.vlgmr.msra.gmra.mrb[38].mxu0 %vm627_vm4, %v3674_v58  ;;  %v21022_v50 = vpack.c.bf16 %v17963_v49, %v17962_v48 }
0x172b   :  { %19621 = vmatpush3.msra.mxu0 %v22278_v4  ;;  %19622 = vmatprep.mubr.msk.f32.mxu0 %vm21846_vm3, %v21845_v30 }
0x172c   :  { %20991 = vmatprep.subr.bf16.mxu0 %v20990_v59 }
0x172e   :  { %19623 = vmatmul.mubr.msk.f32.vlgmr.msra.gmra.mrb[40].mxu0 %vm627_vm4, %v3835_v1  ;;  %v17945_v1 = vld [vmem:[%s21911_s17 + $0xd8] sm:$0xff] }
0x172f   :  { %20993 = vmatpush3.bf16.msra.mxu0 %v20990_v59  ;;  %19644 = vmatprep.mubr.msk.f32.mxu0 %vm383_vm2, %v22256_v62  ;;  %v21014_v59 = vpack.c.bf16 %v17943_v57, %v17942_v56  ;;  %v17946_v56 = vld [vmem:[%s21911_s17 + $0xe0] sm:$0xff]  ;;  %v17947_v57 = vld [vmem:[%s21911_s17 + $0xe8] sm:$0xff] }
0x1730   :  { %20995 = vmatprep.subr.bf16.mxu0 %v20994_v2 }
0x1733   :  { %20997 = vmatpush3.bf16.msra.mxu0 %v20994_v2  ;;  %v21018_v2 = vpack.c.bf16 %v17945_v1, %v17944_v0 }
0x1734   :  { %19658 = vmatprep.subr.mxu0 %v21845_v30 }
0x1736   :  { %19645 = vmatmul.mubr.msk.f32.vlgmr.msra.gmra.mrb[42].mxu0 %vm383_vm2, %v22258_v63 }
0x1737   :  { %19660 = vmatprep.mubr.msk.f32.mxu0 %vm21846_vm3, %v21845_v30 }
0x17fd   :  { %v22332_v3 = vpop.f32.mrb[38].mxu0 }
0x17fe   :  { %v19614_v4 = vpop.f32.mrb[39].mxu0 }
0x1801   :  { %v22334_v5 = vpop.f32.mrb[40].mxu0 }
0x1802   :  { %v19624_v7 = vpop.f32.mrb[41].mxu0 }
0x1809   :  { %v19646_v9 = vpop.f32.mrb[42].mxu0 }
0x180a   :  { %v4068_v11 = vadd.f32 %v19646_v9, %v17997_v8  ;;  %v4062_v12 = vpop.f32.mrb[43].mxu0 }
0x180b   :  { %v4063_v13 = vadd.f32 %v17997_v8, %v4062_v12  ;;  %v18019_v8 = vld [vmem:[%s21974_s11 + $0x6] ss:$0 sm:$0xff] }
0x180c   :  { %19669 = vmatpush3.xpose.msk.msra.mxu1 %vm627_vm4, %v4068_v11 }
0x180d   :  { %19659 = vmatpush3.xpose.msk.msra.mxu0 %vm627_vm4, %v4063_v13  ;;  %19678 = vmatprep.subr.mxu1 %v17975_v53 }
0x180e   :  { %19663 = vmatprep.subr.mxu0 %v21845_v30 }
0x180f   :  { %19671 = vmatmul.mubr.msk.f32.vlgmr.msra.gmra.mrb[40].mxu1 %vm627_vm4, %v3987_v14  ;;  %v18013_v14 = vld [vmem:[%s21966_s7 + $0x6] ss:$0 sm:$0xff] }
0x1810   :  { %19661 = vmatmul.mubr.msk.f32.vlgmr.msra.gmra.mrb[44].mxu0 %vm627_vm4, %v3982_v15  ;;  %19679 = vmatpush3.msra.mxu1 %v17975_v53  ;;  %v17969_v53 = vld [vmem:[%s21920_s21 + $0xf8] sm:$0xff] }
0x1811   :  { %19664 = vmatpush3.msra.mxu0 %v4144_v16  ;;  %19665 = vmatprep.mubr.msk.f32.mxu0 %vm21846_vm3, %v21845_v30 }
0x1812   :  { %19673 = vmatprep.subr.mxu0 %v21845_v30  ;;  %19683 = vmatprep.subr.mxu1 %v17974_v54 }
0x18e2   :  { %v4385_v17 = vpop.f32.mrb[40].mxu1 }
0x18e3   :  { %v4389_v6 = vmul.f32 0.35355338, %v4385_v17  ;;  %v4224_v18 = vpop.f32.mrb[44].mxu0  ;;  %v19672_v19 = vpop.f32.mrb[41].mxu1 }
0x18e4   :  { %v4228_v20 = vmul.f32 0.35355338, %v4224_v18  ;;  %v19662_v21 = vpop.f32.mrb[45].mxu0 }
0x18e5   :  { %v4390_v22 = vsel %vm627_vm4, %v4389_v6, -inf }
0x18e6   :  { %4391 = vmax.xlane.f32.xlu1 %v4390_v22  ;;  %v4229_v23 = vsel %vm627_vm4, %v4228_v20, -inf }
0x18e7   :  { %4230 = vmax.xlane.f32.xlu0 %v4229_v23 }
0x1973   :  { %v4392_v24 = vpop.xlane.xlu1 %4391 }
0x1974   :  { %v4393_v25 = vsub.f32 %v4389_v6, %v4392_v24  ;;  %v4231_v26 = vpop.xlane.xlu0 %4230 }
0x1975   :  { %v4232_v29 = vsub.f32 %v4228_v20, %v4231_v26 }
0x1976   :  { %v4394_v31 = vmul.f32 1.442695, %v4393_v25 }
0x1977   :  { %v4233_v32 = vmul.f32 1.442695, %v4232_v29 }
0x1978   :  { %21655 = vpow2.f32 %v4394_v31 }
0x1979   :  { %21657 = vpow2.f32 %v4233_v32 }
0x1982   :  { %v21656_v34 = vpop.eup %21655 }
0x1983   :  { %v21658_v36 = vpop.eup %21657  ;;  %v4396_v28 = vsel %vm627_vm4, %v21656_v34, 0.0 }
0x1984   :  { %4397 = vadd.xlane.f32.xlu1 %v4396_v28  ;;  %v4235_v27 = vsel %vm627_vm4, %v21658_v36, 0.0 }
0x1985   :  { %4236 = vadd.xlane.f32.xlu0 %v4235_v27 }
0x1a11   :  { %v4398_v37 = vpop.xlane.xlu1 %4397 }
0x1a12   :  { %v4237_v33 = vpop.xlane.xlu0 %4236 }
0x1a13   :  { %21659 = vrcp.f32 %v4237_v33 }
0x1a14   :  { %21661 = vrcp.f32 %v4398_v37 }
0x1a1d   :  { %v21660_v40 = vpop.eup %21659 }
0x1a1e   :  { %v4239_v35 = vmul.f32 %v21660_v40, %v21658_v36  ;;  %v21662_v43 = vpop.eup %21661  ;;  %v17926_v40 = vld [vmem:[%s21906_s13 + $0xe0] sm:$0xff] }
0x1a1f   :  { %v4400_v46 = vmul.f32 %v21662_v43, %v21656_v34 }
0x1a20   :  { %19666 = vmatmul.mubr.msk.f32.vlgmr.msra.gmra.mrb[46].mxu0 %vm627_vm4, %v4239_v35  ;;  %v17927_v35 = vld [vmem:[%s21906_s13 + $0xe8] sm:$0xff] }
0x1a21   :  { %19674 = vmatpush3.msra.mxu0 %v22312_v41  ;;  %19675 = vmatprep.mubr.msk.f32.mxu0 %vm21846_vm3, %v21845_v30  ;;  %v17965_v41 = vld [vmem:[%s21920_s21 + $0xd8] sm:$0xff]  ;;  %v21030_v44 = vpack.c.bf16 %v17927_v35, %v17926_v40 }
0x1a22   :  { %21007 = vmatprep.subr.bf16.mxu0 %v21006_v42  ;;  %v21026_v52 = vpack.c.bf16 %v17965_v41, %v17964_v51  ;;  %v17967_v51 = vld [vmem:[%s21920_s21 + $0xe8] sm:$0xff] }
0x1a24   :  { %19676 = vmatmul.mubr.msk.f32.vlgmr.msra.gmra.mrb[48].mxu0 %vm627_vm4, %v4400_v46  ;;  %v17929_v46 = vld [vmem:[%s21906_s13 + $0xf8] sm:$0xff]  ;;  %s21860_s13 = smov 5  }
0x1a25   :  { %21009 = vmatpush3.bf16.msra.mxu0 %v21006_v42  ;;  %19696 = vmatprep.mubr.msk.f32.mxu0 %vm383_vm2, %v22256_v62  ;;  %v21034_v49 = vpack.c.bf16 %v17929_v46, %v17928_v45  ;;  %v17977_v45 = vld [vmem:[%s22070_s16 + $0x38] sm:$0xff] }
0x1a26   :  { %21011 = vmatprep.subr.bf16.mxu0 %v21010_v47 }
0x1a29   :  { %21013 = vmatpush3.bf16.msra.mxu0 %v21010_v47 }
0x1a2a   :  { %21023 = vmatprep.subr.bf16.mxu0 %v21022_v50 }
0x1a2c   :  { %19697 = vmatmul.mubr.msk.f32.vlgmr.msra.gmra.mrb[50].mxu0 %vm383_vm2, %v22258_v63 }
0x1a2d   :  { %21025 = vmatpush3.bf16.msra.mxu0 %v21022_v50  ;;  %19718 = vmatprep.mubr.msk.f32.mxu0 %vm383_vm2, %v22256_v62  ;;  %v17966_v50 = vld [vmem:[%s21920_s21 + $0xe0] sm:$0xff] }
0x1a2e   :  { %21027 = vmatprep.subr.bf16.mxu0 %v21026_v52  ;;  %v21046_v41 = vpack.c.bf16 %v17967_v51, %v17966_v50  ;;  %v18047_v50 = vld [vmem:[%s22168_s22 + $0x1] ss:$0 sm:$0xff] }
0x1a31   :  { %21029 = vmatpush3.bf16.msra.mxu0 %v21026_v52  ;;  %v17968_v52 = vld [vmem:[%s21920_s21 + $0xf0] sm:$0xff] }
0x1a32   :  { %19726 = vmatprep.subr.mxu0 %v21845_v30 }
0x1a34   :  { %19719 = vmatmul.mubr.msk.f32.vlgmr.msra.gmra.mrb[52].mxu0 %vm383_vm2, %v22258_v63 }
0x1a35   :  { %19728 = vmatprep.mubr.msk.f32.mxu0 %vm21846_vm3, %v21845_v30 }
0x1af3   :  { %v4309_v55 = vpop.f32.mrb[46].mxu0 }
0x1af4   :  { %v19667_v58 = vpop.f32.mrb[47].mxu0  ;;  %19680 = vmatprep.mubr.msk.f32.mxu1 %vm627_vm4, %v4309_v55  ;;  %v17976_v55 = vld [vmem:[%s22070_s16 + $0x30] sm:$0xff]  ;;  %s23097_s16 = sld [smem:[%s23657_s0 + %s21882_s4]]  }
0x1af5   :  { %v21038_v58 = vpack.c.bf16 %v17947_v57, %v17946_v56 }
0x1af7   :  { %v4470_v60 = vpop.f32.mrb[48].mxu0 }
0x1af8   :  { %v19677_v61 = vpop.f32.mrb[49].mxu0  ;;  %19681 = vmatmul.mubr.msk.f32.vlgmr.msra.gmra.mrb[42].mxu1 %vm627_vm4, %v4470_v60  ;;  %v17948_v60 = vld [vmem:[%s21911_s17 + $0xf0] sm:$0xff] }
0x1af9   :  { %19684 = vmatpush3.msra.mxu1 %v17974_v54  ;;  %19685 = vmatprep.mubr.msk.f32.mxu1 %vm627_vm4, %v22332_v3  ;;  %v21050_v54 = vpack.c.bf16 %v17969_v53, %v17968_v52  ;;  %v17949_v61 = vld [vmem:[%s21911_s17 + $0xf8] sm:$0xff]  ;;  %s21867_s17 = smov 28  }
0x1afa   :  { %21015 = vmatprep.subr.bf16.mxu1 %v21014_v59  ;;  %v21042_v1 = vpack.c.bf16 %v17949_v61, %v17948_v60 }
0x1aff   :  { %v19698_v4 = vpop.f32.mrb[50].mxu0 }
0x1b00   :  { %v4708_v7 = vpop.f32.mrb[51].mxu0  ;;  %19686 = vmatmul.mubr.msk.f32.vlgmr.msra.gmra.mrb[42].mxu1 %vm627_vm4, %v22334_v5  ;;  %v18016_v5 = vld [vmem:[%s21961_s3 + $0x6] ss:$0 sm:$0xff]  ;;  %v4714_v6 = vadd.f32 %v19698_v4, %v18013_v14 }
0x1b01   :  { %21017 = vmatpush3.bf16.msra.mxu1 %v21014_v59  ;;  %19707 = vmatprep.mubr.msk.f32.mxu1 %vm383_vm2, %v22256_v62  ;;  %v4709_v16 = vadd.f32 %v18013_v14, %v4708_v7 }
0x1b02   :  { %21019 = vmatprep.subr.bf16.mxu1 %v21018_v2 }
0x1b05   :  { %21021 = vmatpush3.bf16.msra.mxu1 %v21018_v2 }
0x1b06   :  { %19721 = vmatprep.subr.mxu1 %v21845_v30 }
0x1b07   :  { %v19720_v3 = vpop.f32.mrb[52].mxu0 }
0x1b08   :  { %v4876_v9 = vadd.f32 %v19720_v3, %v18019_v8  ;;  %19708 = vmatmul.mubr.msk.f32.vlgmr.msra.gmra.mrb[44].mxu1 %vm383_vm2, %v22258_v63  ;;  %v4870_v10 = vpop.f32.mrb[53].mxu0  ;;  %v18036_v3 = vld [vmem:[%s21974_s11 + $0x7] ss:$0 sm:$0xff]  ;;  %s21868_s11 = smov 26  }
0x1b09   :  { %v4871_v11 = vadd.f32 %v18019_v8, %v4870_v10  ;;  %19723 = vmatprep.mubr.msk.f32.mxu1 %vm21846_vm3, %v21845_v30 }
0x1b0b   :  { %19727 = vmatpush3.msra.mxu0 %v4871_v11 }
0x1b0c   :  { %19736 = vmatprep.subr.mxu0 %v21845_v30 }
0x1bdb   :  { %v19709_v12 = vpop.f32.mrb[44].mxu1 }
0x1bdc   :  { %v4789_v13 = vpop.f32.mrb[45].mxu1  ;;  %v4795_v17 = vadd.f32 %v19709_v12, %v18016_v5 }
0x1bdd   :  { %v4790_v15 = vadd.f32 %v18016_v5, %v4789_v13  ;;  %v18033_v5 = vld [vmem:[%s21961_s3 + $0x7] ss:$0 sm:$0xff]  ;;  %s17784_s3 = sld [smem:[%s23657_s0 + %s21860_s13]]  }
0x1bde   :  { %v18030_v13 = vld [vmem:[%s21966_s7 + $0x7] ss:$0 sm:$0xff]  ;;  %s21861_s7 = smov 2  }
0x1bdf   :  { %19722 = vmatpush3.xpose.msk.msra.mxu1 %vm627_vm4, %v4790_v15  ;;  %s17781_s22 = sld [smem:[%s23657_s0 + %s21861_s7]]  }
0x1be0   :  { %19731 = vmatprep.subr.mxu1 %v21845_v30  ;;  %s22573_s7 = sld [smem:[%s23657_s0 + %s21867_s17]]   ;;  %s21885_s17 = smov 46  }
0x1be2   :  { %19724 = vmatmul.mubr.msk.f32.vlgmr.msra.gmra.mrb[46].mxu1 %vm627_vm4, %v4709_v16 }
0x1be3   :  { %19732 = vmatpush3.xpose.msk.msra.mxu1 %vm627_vm4, %v4795_v17  ;;  %19733 = vmatprep.mubr.msk.f32.mxu1 %vm21846_vm3, %v21845_v30 }
0x1be4   :  { %19741 = vmatprep.subr.mxu1 %v17976_v55 }
0x1be6   :  { %19734 = vmatmul.mubr.msk.f32.vlgmr.msra.gmra.mrb[48].mxu1 %vm627_vm4, %v4714_v6 }
0x1be7   :  { %19742 = vmatpush3.msra.mxu1 %v17976_v55 }
0x1be8   :  { %21039 = vmatprep.subr.bf16.mxu1 %v21038_v58 }
0x1cb5   :  { %v4951_v18 = vpop.f32.mrb[46].mxu1 }
0x1cb6   :  { %v4955_v19 = vmul.f32 0.35355338, %v4951_v18  ;;  %v19725_v20 = vpop.f32.mrb[47].mxu1 }
0x1cb8   :  { %v4956_v21 = vsel %vm627_vm4, %v4955_v19, -inf }
0x1cb9   :  { %4957 = vmax.xlane.f32.xlu0 %v4956_v21  ;;  %v5112_v22 = vpop.f32.mrb[48].mxu1 }
0x1cba   :  { %v5116_v23 = vmul.f32 0.35355338, %v5112_v22  ;;  %v19735_v24 = vpop.f32.mrb[49].mxu1 }
0x1cbc   :  { %v5117_v25 = vsel %vm627_vm4, %v5116_v23, -inf }
0x1cbd   :  { %5118 = vmax.xlane.f32.xlu1 %v5117_v25 }
0x1d46   :  { %v4958_v26 = vpop.xlane.xlu0 %4957 }
0x1d47   :  { %v4959_v29 = vsub.f32 %v4955_v19, %v4958_v26 }
0x1d49   :  { %v4960_v31 = vmul.f32 1.442695, %v4959_v29 }
0x1d4a   :  { %v5119_v32 = vpop.xlane.xlu1 %5118 }
0x1d4b   :  { %21663 = vpow2.f32 %v4960_v31  ;;  %v5120_v34 = vsub.f32 %v5116_v23, %v5119_v32 }
0x1d4d   :  { %v5121_v36 = vmul.f32 1.442695, %v5120_v34 }
0x1d4f   :  { %21665 = vpow2.f32 %v5121_v36 }
0x1d55   :  { %v21664_v28 = vpop.eup %21663 }
0x1d56   :  { %v4962_v27 = vsel %vm627_vm4, %v21664_v28, 0.0 }
0x1d57   :  { %4963 = vadd.xlane.f32.xlu0 %v4962_v27 }
0x1d59   :  { %v21666_v37 = vpop.eup %21665 }
0x1d5a   :  { %v5123_v33 = vsel %vm627_vm4, %v21666_v37, 0.0 }
0x1d5b   :  { %5124 = vadd.xlane.f32.xlu1 %v5123_v33 }
0x1de4   :  { %v4964_v38 = vpop.xlane.xlu0 %4963 }
0x1de5   :  { %21667 = vrcp.f32 %v4964_v38 }
0x1de8   :  { %v5125_v39 = vpop.xlane.xlu1 %5124 }
0x1de9   :  { %21669 = vrcp.f32 %v5125_v39 }
0x1def   :  { %v21668_v42 = vpop.eup %21667 }
0x1df0   :  { %v4966_v43 = vmul.f32 %v21668_v42, %v21664_v28 }
0x1df2   :  { %19729 = vmatmul.mubr.msk.f32.vlgmr.msra.gmra.mrb[54].mxu0 %vm627_vm4, %v4966_v43 }
0x1df3   :  { %v21670_v47 = vpop.eup %21669  ;;  %19737 = vmatpush3.msra.mxu0 %v4876_v9  ;;  %19738 = vmatprep.mubr.msk.f32.mxu0 %vm21846_vm3, %v21845_v30 }
0x1df4   :  { %21031 = vmatprep.subr.bf16.mxu0 %v21030_v44  ;;  %v5127_v48 = vmul.f32 %v21670_v47, %v21666_v37 }
0x1df6   :  { %19739 = vmatmul.mubr.msk.f32.vlgmr.msra.gmra.mrb[56].mxu0 %vm627_vm4, %v5127_v48 }
0x1df7   :  { %21033 = vmatpush3.bf16.msra.mxu0 %v21030_v44  ;;  %19754 = vmatprep.mubr.msk.f32.mxu0 %vm383_vm2, %v22256_v62 }
0x1df8   :  { %21035 = vmatprep.subr.bf16.mxu0 %v21034_v49 }
0x1dfb   :  { %21037 = vmatpush3.bf16.msra.mxu0 %v21034_v49 }
0x1dfc   :  { %21047 = vmatprep.subr.bf16.mxu0 %v21046_v41 }
0x1dfe   :  { %19755 = vmatmul.mubr.msk.f32.vlgmr.msra.gmra.mrb[58].mxu0 %vm383_vm2, %v22258_v63 }
0x1dff   :  { %21049 = vmatpush3.bf16.msra.mxu0 %v21046_v41  ;;  %19776 = vmatprep.mubr.msk.f32.mxu0 %vm383_vm2, %v22256_v62 }
0x1e00   :  { %21051 = vmatprep.subr.bf16.mxu0 %v21050_v54 }
0x1e03   :  { %21053 = vmatpush3.bf16.msra.mxu0 %v21050_v54 }
0x1e04   :  { %19789 = vmatprep.subr.mxu0 %v21845_v30 }
0x1e06   :  { %19777 = vmatmul.mubr.msk.f32.vlgmr.msra.gmra.mrb[60].mxu0 %vm383_vm2, %v22258_v63 }
0x1e07   :  { %19791 = vmatprep.mubr.msk.f32.mxu0 %vm21846_vm3, %v21845_v30 }
0x1ec5   :  { %v5036_v59 = vpop.f32.mrb[54].mxu0 }
0x1ec6   :  { %v19730_v0 = vpop.f32.mrb[55].mxu0  ;;  %19743 = vmatprep.mubr.msk.f32.mxu1 %vm627_vm4, %v5036_v59 }
0x1ec9   :  { %v5197_v2 = vpop.f32.mrb[56].mxu0 }
0x1eca   :  { %v19740_v4 = vpop.f32.mrb[57].mxu0  ;;  %19744 = vmatmul.mubr.msk.f32.vlgmr.msra.gmra.mrb[42].mxu1 %vm627_vm4, %v5197_v2 }
0x1ecb   :  { %21041 = vmatpush3.bf16.msra.mxu1 %v21038_v58  ;;  %19765 = vmatprep.mubr.msk.f32.mxu1 %vm383_vm2, %v22256_v62 }
0x1ecc   :  { %21043 = vmatprep.subr.bf16.mxu1 %v21042_v1 }
0x1ecf   :  { %21045 = vmatpush3.bf16.msra.mxu1 %v21042_v1 }
0x1ed0   :  { %19779 = vmatprep.subr.mxu1 %v21845_v30 }
0x1ed1   :  { %v19756_v7 = vpop.f32.mrb[58].mxu0 }
0x1ed2   :  { %v5356_v8 = vpop.f32.mrb[59].mxu0  ;;  %19766 = vmatmul.mubr.msk.f32.vlgmr.msra.gmra.mrb[50].mxu1 %vm383_vm2, %v22258_v63  ;;  %v5362_v17 = vadd.f32 %v19756_v7, %v18030_v13  ;;  %v18052_v7 = vld [vmem:[%s22180_s26 + $0x20] sm:$0xff] }
0x1ed3   :  { %19781 = vmatprep.mubr.msk.f32.mxu1 %vm21846_vm3, %v21845_v30  ;;  %v5357_v6 = vadd.f32 %v18030_v13, %v5356_v8  ;;  %v18053_v8 = vld [vmem:[%s22180_s26 + $0x28] sm:$0xff] }
0x1ed4   :  { %v18061_v13 = vld [vmem:[%s22189_s30 + $0x48] sm:$0xff] }
0x1ed9   :  { %v19778_v9 = vpop.f32.mrb[60].mxu0 }
0x1eda   :  { %v5524_v10 = vadd.f32 %v19778_v9, %v18036_v3  ;;  %v5518_v11 = vpop.f32.mrb[61].mxu0  ;;  %v18054_v9 = vld [vmem:[%s22180_s26 + $0x30] sm:$0xff] }
0x1edb   :  { %v5519_v18 = vadd.f32 %v18036_v3, %v5518_v11  ;;  %v21054_v3 = vpack.c.bf16 %v18053_v8, %v18052_v7 }
0x1fa5   :  { %v19767_v12 = vpop.f32.mrb[50].mxu1 }
0x1fa6   :  { %v5443_v14 = vadd.f32 %v19767_v12, %v18033_v5  ;;  %v5437_v15 = vpop.f32.mrb[51].mxu1  ;;  %v18060_v12 = vld [vmem:[%s22189_s30 + $0x40] sm:$0xff] }
0x1fa7   :  { %v5438_v16 = vadd.f32 %v18033_v5, %v5437_v15  ;;  %v6232_v5 = vld [vmem:[%s17784_s3] sm:$0x1]  ;;  %v21062_v15 = vpack.c.bf16 %v18061_v13, %v18060_v12  ;;  %s21874_s3 = smov 33  }
0x1fa8   :  { %19790 = vmatpush3.xpose.msk.msra.mxu0 %vm627_vm4, %v5443_v14  ;;  %v18062_v14 = vld [vmem:[%s22189_s30 + $0x50] sm:$0xff] }
0x1fa9   :  { %19780 = vmatpush3.xpose.msk.msra.mxu1 %vm627_vm4, %v5438_v16  ;;  %21055 = vmatprep.subr.bf16.mxu0 %v21054_v3  ;;  %v18063_v16 = vld [vmem:[%s22189_s30 + $0x58] sm:$0xff] }
0x1faa   :  { %19784 = vmatprep.subr.mxu1 %v21845_v30 }
0x1fab   :  { %19792 = vmatmul.mubr.msk.f32.vlgmr.msra.gmra.mrb[62].mxu0 %vm627_vm4, %v5362_v17  ;;  %v21066_v17 = vpack.c.bf16 %v18063_v16, %v18062_v14 }
0x1fac   :  { %19782 = vmatmul.mubr.msk.f32.vlgmr.msra.gmra.mrb[52].mxu1 %vm627_vm4, %v5357_v6  ;;  %21057 = vmatpush3.bf16.msra.mxu0 %v21054_v3  ;;  %v18064_v6 = vld [vmem:[%s22189_s30 + $0x60] sm:$0xff] }
0x1fad   :  { %19785 = vmatpush3.msra.mxu1 %v5519_v18  ;;  %19786 = vmatprep.mubr.msk.f32.mxu1 %vm21846_vm3, %v21845_v30  ;;  %v18065_v18 = vld [vmem:[%s22189_s30 + $0x68] sm:$0xff] }
0x1fae   :  { %19794 = vmatprep.subr.mxu1 %v21845_v30 }
0x207e   :  { %v5760_v19 = vpop.f32.mrb[62].mxu0 }
0x207f   :  { %v5764_v20 = vmul.f32 0.35355338, %v5760_v19  ;;  %v5599_v21 = vpop.f32.mrb[52].mxu1  ;;  %v19793_v22 = vpop.f32.mrb[63].mxu0  ;;  %v21070_v19 = vpack.c.bf16 %v18065_v18, %v18064_v6 }
0x2080   :  { %v5603_v23 = vmul.f32 0.35355338, %v5599_v21  ;;  %v19783_v24 = vpop.f32.mrb[53].mxu1 }
0x2081   :  { %v5765_v25 = vsel %vm627_vm4, %v5764_v20, -inf }
0x2082   :  { %5766 = vmax.xlane.f32.xlu1 %v5765_v25  ;;  %v5604_v26 = vsel %vm627_vm4, %v5603_v23, -inf }
0x2083   :  { %5605 = vmax.xlane.f32.xlu0 %v5604_v26 }
0x210f   :  { %v5767_v29 = vpop.xlane.xlu1 %5766 }
0x2110   :  { %v5768_v31 = vsub.f32 %v5764_v20, %v5767_v29  ;;  %v5606_v32 = vpop.xlane.xlu0 %5605  ;;  %v18050_v29 = vld [vmem:[%s22200_s5 + $0x1] ss:$0 sm:$0xff]  ;;  %s21869_s5 = smov 31  }
0x2111   :  { %v5607_v34 = vsub.f32 %v5603_v23, %v5606_v32  ;;  %s22680_s12 = sld [smem:[%s23657_s0 + %s21869_s5]]   ;;  %s21875_s5 = smov 34  }
0x2112   :  { %v5769_v36 = vmul.f32 1.442695, %v5768_v31 }
0x2113   :  { %v5608_v28 = vmul.f32 1.442695, %v5607_v34 }
0x2114   :  { %21671 = vpow2.f32 %v5769_v36  ;;  %v18051_v36 = vld [vmem:[%s22205_s10 + $0x1] ss:$0 sm:$0xff]  ;;  %s21863_s10 = smov 29  }
0x2115   :  { %21673 = vpow2.f32 %v5608_v28  ;;  %s22514_s15 = sld [smem:[%s23657_s0 + %s21863_s10]]   ;;  %s21880_s10 = smov 42  }
0x2116   :  { %s23076_s23 = sld [smem:[%s23657_s0 + %s21880_s10]]  }
0x2117   :  { %s23124_s10 = sld [smem:[%s23657_s0 + %s21885_s17]]   ;;  %s21887_s17 = smov 49  }
0x211d   :  { %23660 = sst [smem:[#allocation3_spill]] %s23124_s10 }
0x211e   :  { %v21672_v27 = vpop.eup %21671 }
0x211f   :  { %v21674_v37 = vpop.eup %21673  ;;  %v5771_v33 = vsel %vm627_vm4, %v21672_v27, 0.0 }
0x2120   :  { %5772 = vadd.xlane.f32.xlu1 %v5771_v33  ;;  %v5610_v38 = vsel %vm627_vm4, %v21674_v37, 0.0 }
0x2121   :  { %5611 = vadd.xlane.f32.xlu0 %v5610_v38  ;;  %v6230_v38 = vld [vmem:[%s17781_s22] sm:$0xff] }
0x21ad   :  { %v5773_v39 = vpop.xlane.xlu1 %5772 }
0x21ae   :  { %v5612_v40 = vpop.xlane.xlu0 %5611 }
0x21af   :  { %21675 = vrcp.f32 %v5612_v40 }
0x21b0   :  { %21677 = vrcp.f32 %v5773_v39  ;;  %v6231_v39 = vld [vmem:[%s17781_s22 + $0x8] sm:$0xff]  ;;  %s22837_s22 = sld [smem:[%s23657_s0 + %s21874_s3]]  }
0x21b9   :  { %v21676_v35 = vpop.eup %21675 }
0x21ba   :  { %v5614_v42 = vmul.f32 %v21676_v35, %v21674_v37  ;;  %v21678_v43 = vpop.eup %21677 }
0x21bb   :  { %v5775_v44 = vmul.f32 %v21678_v43, %v21672_v27  ;;  %v18066_v43 = vld [vmem:[%s22189_s30 + $0x70] sm:$0xff] }
0x21bc   :  { %19787 = vmatmul.mubr.msk.f32.vlgmr.msra.gmra.mrb[54].mxu1 %vm627_vm4, %v5614_v42 }
0x21bd   :  { %19795 = vmatpush3.msra.mxu1 %v5524_v10  ;;  %19796 = vmatprep.mubr.msk.f32.mxu1 %vm21846_vm3, %v21845_v30  ;;  %v18055_v10 = vld [vmem:[%s22180_s26 + $0x38] sm:$0xff]  ;;  %s21862_s26 = smov 25  }
0x21be   :  { %19799 = vmatprep.subr.mxu1 %v17977_v45  ;;  %v21058_v11 = vpack.c.bf16 %v18055_v10, %v18054_v9  ;;  %s22507_s9 = sld [smem:[%s23657_s0 + %s21862_s26]]  }
0x21bf   :  { %s22578_s26 = sld [smem:[%s23657_s0 + %s21868_s11]]   ;;  %s21879_s11 = smov 41  }
0x21c0   :  { %19797 = vmatmul.mubr.msk.f32.vlgmr.msra.gmra.mrb[56].mxu1 %vm627_vm4, %v5775_v44  ;;  %21059 = vmatprep.subr.bf16.mxu0 %v21058_v11  ;;  %v18067_v44 = vld [vmem:[%s22189_s30 + $0x78] sm:$0xff]  ;;  %s21865_s30 = smov 6   ;;  %s22978_s8 = sld [smem:[%s23657_s0 + %s21879_s11]]  }
0x21c1   :  { %19800 = vmatpush3.msra.mxu1 %v17977_v45  ;;  %21061 = vmatpush3.bf16.msra.mxu0 %v21058_v11  ;;  %v21074_v45 = vpack.c.bf16 %v18067_v44, %v18066_v43  ;;  %s17785_s1 = sld [smem:[%s23657_s0 + %s21865_s30]]  }
0x21c2   :  { %19834 = vmatprep.subr.msk.mxu0 %vm6247_vm6, %v6232_v5  ;;  %21063 = vmatprep.subr.bf16.mxu1 %v21062_v15  ;;  %s22866_s30 = sld [smem:[%s23657_s0 + %s21876_s14]]   ;;  %s21886_s14 = smov 48  }
0x21c4   :  { %v6326_v40 = vld [vmem:[%s22507_s9] sm:$0xff]  ;;  %v6327_v35 = vld [vmem:[%s22507_s9 + $0x8] sm:$0xff] }
0x21c5   :  { %v21078_v42 = vpack.c.bf16 %v6327_v35, %v6326_v40 }
0x228f   :  { %v5684_v46 = vpop.f32.mrb[54].mxu1 }
0x2290   :  { %v19788_v47 = vpop.f32.mrb[55].mxu1  ;;  %19801 = vmatprep.mubr.msk.f32.mxu1 %vm627_vm4, %v5684_v46  ;;  %v6328_v46 = vld [vmem:[%s22507_s9 + $0x10] sm:$0xff] }
0x2291   :  { %v6329_v47 = vld [vmem:[%s22507_s9 + $0x18] sm:$0xff] }
0x2293   :  { %v5845_v48 = vpop.f32.mrb[56].mxu1 }
0x2294   :  { %v19798_v49 = vpop.f32.mrb[57].mxu1  ;;  %19802 = vmatmul.mubr.msk.f32.vlgmr.msra.gmra.mrb[42].mxu1 %vm627_vm4, %v5845_v48  ;;  %v21082_v48 = vpack.c.bf16 %v6329_v47, %v6328_v46 }
0x2295   :  { %21065 = vmatpush3.bf16.msra.mxu1 %v21062_v15  ;;  %v6366_v49 = vld [vmem:[%s22514_s15] sm:$0xff] }
0x2296   :  { %21067 = vmatprep.subr.bf16.mxu1 %v21066_v17 }
0x2299   :  { %21069 = vmatpush3.bf16.msra.mxu1 %v21066_v17  ;;  %v18083_v17 = vld [vmem:[%s22573_s7] ss:$0 sm:$0xff] }
0x229a   :  { %21071 = vmatprep.subr.bf16.mxu1 %v21070_v19 }
0x229d   :  { %21073 = vmatpush3.bf16.msra.mxu1 %v21070_v19 }
0x229e   :  { %21075 = vmatprep.subr.bf16.mxu1 %v21074_v45 }
0x22a1   :  { %21077 = vmatpush3.bf16.msra.mxu1 %v21074_v45 }
0x2367   :  { %v19803_v51 = vpop.f32.mrb[42].mxu1 }
0x2368   :  { %v5939_v41 = vadd.f32 %v19803_v51, %v18047_v50  ;;  %v5921_v52 = vpop.f32.mrb[43].mxu1 }
0x2369   :  { %v5938_v53 = vadd.f32 %v18047_v50, %v5921_v52  ;;  %v6367_v50 = vld [vmem:[%s22514_s15 + $0x8] sm:$0xff] }
0x236a   :  { %v5941_v54 = vadd.f32 %v5939_v41, %v22258_v63  ;;  %v21094_v51 = vpack.c.bf16 %v6367_v50, %v6366_v49  ;;  %v6346_v41 = vld [vmem:[%s22521_s25] sm:$0xff]  ;;  %v6347_v52 = vld [vmem:[%s22521_s25 + $0x8] sm:$0xff] }
0x236b   :  { %v5940_v55 = vadd.f32 %v5938_v53, %v22256_v62  ;;  %v21086_v53 = vpack.c.bf16 %v6347_v52, %v6346_v41 }
0x236c   :  { %v5949_v56 = vsel %vm383_vm2, %v5941_v54, 0.0  ;;  %21095 = vmatprep.subr.bf16.mxu1 %v21094_v51 }
0x236d   :  { %5950 = vadd.xlane.f32.xlu1 %v5949_v56  ;;  %v5946_v57 = vsel %vm383_vm2, %v5940_v55, 0.0 }
0x236e   :  { %5947 = vadd.xlane.f32.xlu0 %v5946_v57 }
0x23fa   :  { %v5951_v58 = vpop.xlane.xlu1 %5950 }
0x23fb   :  { %v5953_v59 = vmul.f32 0.03125, %v5951_v58  ;;  %v5948_v60 = vpop.xlane.xlu0 %5947 }
0x23fc   :  { %v5952_v61 = vmul.f32 0.03125, %v5948_v60  ;;  %v6368_v60 = vld [vmem:[%s22514_s15 + $0x10] sm:$0xff] }
0x23fd   :  { %v5955_v0 = vsub.f32 %v5941_v54, %v5953_v59  ;;  %v18057_v54 = vld [vmem:[%s22216_s18 + $0x1] ss:$0 sm:$0xff]  ;;  %v18076_v59 = vld [vmem:[%s17785_s1] ss:$0 sm:$0xff]  ;;  %s21866_s18 = smov 30   ;;  %s21872_s1 = smov 35  }
0x23fe   :  { %v5954_v1 = vsub.f32 %v5940_v55, %v5952_v61  ;;  %s22564_s13 = sld [smem:[%s23657_s0 + %s21866_s18]]  }
0x23ff   :  { %v5957_v2 = vmul.f32 %v5955_v0, %v5955_v0  ;;  %s23132_s18 = sld [smem:[%s23657_s0 + %s21886_s14]]  }
0x2400   :  { %v5956_v63 = vmul.f32 %v5954_v1, %v5954_v1  ;;  %s23153_s14 = sld [smem:[%s23657_s0 + %s21887_s17]]  }
0x2401   :  { %v5961_v62 = vsel %vm383_vm2, %v5957_v2, 0.0  ;;  %v6348_v2 = vld [vmem:[%s22521_s25 + $0x10] sm:$0xff] }
0x2402   :  { %5962 = vadd.xlane.f32.xlu1 %v5961_v62  ;;  %v5958_v4 = vsel %vm383_vm2, %v5956_v63, 0.0  ;;  %v6349_v63 = vld [vmem:[%s22521_s25 + $0x18] sm:$0xff] }
0x2403   :  { %5959 = vadd.xlane.f32.xlu0 %v5958_v4  ;;  %v21090_v9 = vpack.c.bf16 %v6349_v63, %v6348_v2 }
0x2404   :  { %v18086_v13 = vld [vmem:[%s22564_s13] ss:$0 sm:$0xff] }
0x2405   :  { %23661 = sst [smem:[#allocation4_spill]] %s23132_s18 }
0x248f   :  { %v5963_v20 = vpop.xlane.xlu1 %5962 }
0x2490   :  { %v5965_v21 = vmul.f32 0.03125, %v5963_v20  ;;  %v5960_v22 = vpop.xlane.xlu0 %5959  ;;  %v18080_v20 = vld [vmem:[%s22578_s26] ss:$0 sm:$0xff] }
0x2491   :  { %v5964_v23 = vmul.f32 0.03125, %v5960_v22  ;;  %v6330_v22 = vld [vmem:[%s22507_s9 + $0x20] sm:$0xff] }
0x2492   :  { %v5967_v24 = vadd.f32 1e-05, %v5965_v21 }
0x2493   :  { %v5966_v25 = vadd.f32 1e-05, %v5964_v23  ;;  %v6331_v23 = vld [vmem:[%s22507_s9 + $0x28] sm:$0xff] }
0x2494   :  { %21679 = vrsqrt.f32 %v5967_v24 }
0x2495   :  { %21681 = vrsqrt.f32 %v5966_v25  ;;  %v21102_v25 = vpack.c.bf16 %v6331_v23, %v6330_v22  ;;  %v18095_v22 = vld [vmem:[%s22578_s26 + $0x1] ss:$0 sm:$0xff] }
0x249e   :  { %v21680_v26 = vpop.eup %21679 }
0x249f   :  { %v21682_v31 = vpop.eup %21681  ;;  %v5971_v32 = vmul.f32 %v21680_v26, %v5955_v0 }
0x24a0   :  { %v5970_v34 = vmul.f32 %v21682_v31, %v5954_v1  ;;  %v6369_v1 = vld [vmem:[%s22514_s15 + $0x18] sm:$0xff] }
0x24a1   :  { %v5979_v28 = vmul.f32 %v18050_v29, %v5971_v32  ;;  %v21098_v3 = vpack.c.bf16 %v6369_v1, %v6368_v60  ;;  %v6333_v31 = vld [vmem:[%s22507_s9 + $0x38] sm:$0xff] }
0x24a2   :  { %v5978_v27 = vmul.f32 %v18050_v29, %v5970_v34  ;;  %v6332_v29 = vld [vmem:[%s22507_s9 + $0x30] sm:$0xff] }
0x24a3   :  { %v22495_v33 = vadd.f32 %v18051_v36, %v5979_v28  ;;  %v21106_v34 = vpack.c.bf16 %v6333_v31, %v6332_v29  ;;  %v6371_v28 = vld [vmem:[%s22514_s15 + $0x28] sm:$0xff] }
0x24a4   :  { %v22493_v37 = vadd.f32 %v18051_v36, %v5978_v27  ;;  %v6370_v36 = vld [vmem:[%s22514_s15 + $0x20] sm:$0xff] }
0x24a5   :  { %v21118_v27 = vpack.c.bf16 %v6371_v28, %v6370_v36 }
0x24a6   :  { %19812 = vmatprep.mubr.msk.f32.mxu0 %vm383_vm2, %v22493_v37 }
0x24a7   :  { %19813 = vmatmul.mubr.msk.f32.vlgmr.msra.gmra.mrb[64].mxu0 %vm383_vm2, %v22495_v33 }
0x24a8   :  { %19835 = vmatpush3.msk.msra.mxu0 %vm6247_vm6, %v6232_v5  ;;  %19836 = vmatprep.mubr.msk.f32.mxu0 %vm6240_vm7, %v6230_v38  ;;  %v6372_v38 = vld [vmem:[%s22514_s15 + $0x30] sm:$0xff] }
0x24a9   :  { %21079 = vmatprep.subr.bf16.mxu0 %v21078_v42 }
0x24ab   :  { %19837 = vmatmul.mubr.msk.f32.vlgmr.msra.gmra.mrb[66].mxu0 %vm6240_vm7, %v6231_v39  ;;  %v6373_v39 = vld [vmem:[%s22514_s15 + $0x38] sm:$0xff] }
0x24ac   :  { %21081 = vmatpush3.bf16.msra.mxu0 %v21078_v42  ;;  %v21122_v40 = vpack.c.bf16 %v6373_v39, %v6372_v38 }
0x24ad   :  { %21083 = vmatprep.subr.bf16.mxu0 %v21082_v48 }
0x24b0   :  { %21085 = vmatpush3.bf16.msra.mxu0 %v21082_v48 }
0x24b1   :  { %21087 = vmatprep.subr.bf16.mxu0 %v21086_v53 }
0x257a   :  { %v19814_v55 = vpop.f32.mrb[64].mxu0 }
0x257b   :  { %v6079_v56 = vadd.f32 %v19814_v55, %v18057_v54  ;;  %v6073_v57 = vpop.f32.mrb[65].mxu0 }
0x257c   :  { %v6074_v58 = vadd.f32 %v18057_v54, %v6073_v57 }
0x257d   :  { %v6083_v62 = vmax.f32 %v6079_v56, 0.0 }
0x257e   :  { %v6082_v61 = vmax.f32 %v6074_v58, 0.0  ;;  %v19838_v0 = vpop.f32.mrb[66].mxu0 }
0x257f   :  { %v6317_v4 = vpop.f32.mrb[67].mxu0  ;;  %v22540_v8 = vadd.f32 %v19838_v0, %v18076_v59 }
0x2580   :  { %v22537_v7 = vadd.f32 %v18076_v59, %v6317_v4  ;;  %19831 = vmatprep.mubr.msk.f32.mxu1 %vm3137_vm5, %v6082_v61  ;;  %v6351_v4 = vld [vmem:[%s22521_s25 + $0x28] sm:$0xff] }
0x2581   :  { %19832 = vmatmul.mubr.msk.f32.vlgmr.msra.gmra.mrb[58].mxu1 %vm3137_vm5, %v6083_v62  ;;  %v6350_v62 = vld [vmem:[%s22521_s25 + $0x20] sm:$0xff] }
0x2582   :  { %21097 = vmatpush3.bf16.msra.mxu1 %v21094_v51  ;;  %19847 = vmatprep.mubr.msk.f32.mxu0 %vm383_vm2, %v22537_v7  ;;  %v18101_v51 = vld [vmem:[%s22564_s13 + $0x1] ss:$0 sm:$0xff] }
0x2583   :  { %19869 = vmatprep.mubr.msk.f32.mxu1 %vm383_vm2, %v22537_v7  ;;  %19848 = vmatmul.mubr.msk.f32.vlgmr.msra.gmra.mrb[68].mxu0 %vm383_vm2, %v22540_v8 }
0x2584   :  { %21089 = vmatpush3.bf16.msra.mxu0 %v21086_v53  ;;  %19858 = vmatprep.mubr.msk.f32.mxu0 %vm383_vm2, %v22537_v7 }
0x2585   :  { %21099 = vmatprep.subr.bf16.mxu1 %v21098_v3  ;;  %21091 = vmatprep.subr.bf16.mxu0 %v21090_v9 }
0x2586   :  { %21101 = vmatpush3.bf16.msra.mxu1 %v21098_v3 }
0x2587   :  { %19877 = vmatprep.subr.mxu1 %v21845_v30 }
0x2588   :  { %21093 = vmatpush3.bf16.msra.mxu0 %v21090_v9 }
0x2589   :  { %19870 = vmatmul.mubr.msk.f32.vlgmr.msra.gmra.mrb[60].mxu1 %vm383_vm2, %v22540_v8  ;;  %19872 = vmatprep.subr.mxu0 %v21845_v30 }
0x258a   :  { %19879 = vmatprep.mubr.msk.f32.mxu1 %vm21846_vm3, %v21845_v30 }
0x258b   :  { %19859 = vmatmul.mubr.msk.f32.vlgmr.msra.gmra.mrb[70].mxu0 %vm383_vm2, %v22540_v8 }
0x258c   :  { %19874 = vmatprep.mubr.msk.f32.mxu0 %vm21846_vm3, %v21845_v30 }
0x2654   :  { %v22566_v10 = vpop.f32.mrb[58].mxu1 }
0x2655   :  { %v22568_v11 = vpop.f32.mrb[59].mxu1 }
0x2656   :  { %v19849_v5 = vpop.f32.mrb[68].mxu0 }
0x2657   :  { %v6469_v12 = vpop.f32.mrb[69].mxu0  ;;  %v6475_v32 = vadd.f32 %v19849_v5, %v18080_v20  ;;  %v21110_v5 = vpack.c.bf16 %v6351_v4, %v6350_v62  ;;  %v6376_v62 = vld [vmem:[%s22514_s15 + $0x50] sm:$0xff]  ;;  %v6377_v4 = vld [vmem:[%s22514_s15 + $0x58] sm:$0xff] }
0x2658   :  { %v6470_v24 = vadd.f32 %v18080_v20, %v6469_v12  ;;  %v6352_v12 = vld [vmem:[%s22521_s25 + $0x30] sm:$0xff]  ;;  %v18098_v20 = vld [vmem:[%s22573_s7 + $0x1] ss:$0 sm:$0xff] }
0x265c   :  { %v19871_v14 = vpop.f32.mrb[60].mxu1 }
0x265d   :  { %v22581_v15 = vadd.f32 %v19871_v14, %v18086_v13  ;;  %v6631_v16 = vpop.f32.mrb[61].mxu1 }
0x265e   :  { %v6632_v6 = vadd.f32 %v18086_v13, %v6631_v16  ;;  %v19860_v18 = vpop.f32.mrb[70].mxu0  ;;  %v6353_v13 = vld [vmem:[%s22521_s25 + $0x38] sm:$0xff] }
0x265f   :  { %v6550_v19 = vpop.f32.mrb[71].mxu0  ;;  %v6556_v26 = vadd.f32 %v19860_v18, %v18083_v17 }
0x2660   :  { %v6551_v21 = vadd.f32 %v18083_v17, %v6550_v19  ;;  %19878 = vmatpush3.msra.mxu1 %v6632_v6  ;;  %v21114_v17 = vpack.c.bf16 %v6353_v13, %v6352_v12  ;;  %v6354_v12 = vld [vmem:[%s22521_s25 + $0x40] sm:$0xff]  ;;  %v6355_v13 = vld [vmem:[%s22521_s25 + $0x48] sm:$0xff] }
0x2661   :  { %19887 = vmatprep.subr.mxu1 %v21845_v30 }
0x2662   :  { %19873 = vmatpush3.xpose.msk.msra.mxu0 %vm627_vm4, %v6551_v21 }
0x2663   :  { %19882 = vmatprep.subr.mxu0 %v21845_v30 }
0x2665   :  { %19875 = vmatmul.mubr.msk.f32.vlgmr.msra.gmra.mrb[72].mxu0 %vm627_vm4, %v6470_v24 }
0x2666   :  { %19883 = vmatpush3.xpose.msk.msra.mxu0 %vm627_vm4, %v6556_v26  ;;  %19884 = vmatprep.mubr.msk.f32.mxu0 %vm21846_vm3, %v21845_v30 }
0x2667   :  { %21103 = vmatprep.subr.bf16.mxu0 %v21102_v25 }
0x2669   :  { %19885 = vmatmul.mubr.msk.f32.vlgmr.msra.gmra.mrb[74].mxu0 %vm627_vm4, %v6475_v32 }
0x266a   :  { %21105 = vmatpush3.bf16.msra.mxu0 %v21102_v25  ;;  %19900 = vmatprep.mubr.msk.f32.mxu0 %vm383_vm2, %v22537_v7 }
0x266b   :  { %21107 = vmatprep.subr.bf16.mxu0 %v21106_v34 }
0x266e   :  { %21109 = vmatpush3.bf16.msra.mxu0 %v21106_v34 }
0x266f   :  { %21119 = vmatprep.subr.bf16.mxu0 %v21118_v27 }
0x2671   :  { %19901 = vmatmul.mubr.msk.f32.vlgmr.msra.gmra.mrb[76].mxu0 %vm383_vm2, %v22540_v8 }
0x2672   :  { %21121 = vmatpush3.bf16.msra.mxu0 %v21118_v27  ;;  %19922 = vmatprep.mubr.msk.f32.mxu0 %vm383_vm2, %v22537_v7 }
0x2673   :  { %21123 = vmatprep.subr.bf16.mxu0 %v21122_v40 }
0x2676   :  { %21125 = vmatpush3.bf16.msra.mxu0 %v21122_v40 }
0x2677   :  { %19935 = vmatprep.subr.mxu0 %v21845_v30 }
0x2679   :  { %19923 = vmatmul.mubr.msk.f32.vlgmr.msra.gmra.mrb[78].mxu0 %vm383_vm2, %v22540_v8 }
0x267a   :  { %19937 = vmatprep.mubr.msk.f32.mxu0 %vm21846_vm3, %v21845_v30 }
0x2738   :  { %v6712_v35 = vpop.f32.mrb[72].mxu0 }
0x2739   :  { %v6716_v42 = vmul.f32 0.35355338, %v6712_v35  ;;  %v19876_v43 = vpop.f32.mrb[73].mxu0 }
0x273b   :  { %v6717_v44 = vsel %vm627_vm4, %v6716_v42, -inf }
0x273c   :  { %6718 = vmax.xlane.f32.xlu0 %v6717_v44  ;;  %v6873_v45 = vpop.f32.mrb[74].mxu0 }
0x273d   :  { %v6877_v46 = vmul.f32 0.35355338, %v6873_v45  ;;  %v19886_v47 = vpop.f32.mrb[75].mxu0 }
0x273f   :  { %v6878_v48 = vsel %vm627_vm4, %v6877_v46, -inf }
0x2740   :  { %6879 = vmax.xlane.f32.xlu1 %v6878_v48 }
0x2744   :  { %v19902_v49 = vpop.f32.mrb[76].mxu0 }
0x2745   :  { %v7034_v50 = vpop.f32.mrb[77].mxu0  ;;  %v7040_v26 = vadd.f32 %v19902_v49, %v18095_v22 }
0x2746   :  { %v7035_v29 = vadd.f32 %v18095_v22, %v7034_v50 }
0x274c   :  { %v19924_v41 = vpop.f32.mrb[78].mxu0 }
0x274d   :  { %v22615_v52 = vadd.f32 %v19924_v41, %v18101_v51  ;;  %v7196_v53 = vpop.f32.mrb[79].mxu0 }
0x274e   :  { %v7197_v31 = vadd.f32 %v18101_v51, %v7196_v53  ;;  %v6334_v53 = vld [vmem:[%s22507_s9 + $0x40] sm:$0xff] }
0x27c9   :  { %v6719_v54 = vpop.xlane.xlu0 %6718 }
0x27ca   :  { %v6720_v55 = vsub.f32 %v6716_v42, %v6719_v54  ;;  %v6335_v54 = vld [vmem:[%s22507_s9 + $0x48] sm:$0xff] }
0x27cc   :  { %v6721_v56 = vmul.f32 1.442695, %v6720_v55 }
0x27cd   :  { %v6880_v57 = vpop.xlane.xlu1 %6879 }
0x27ce   :  { %21683 = vpow2.f32 %v6721_v56  ;;  %v6881_v58 = vsub.f32 %v6877_v46, %v6880_v57  ;;  %v21126_v57 = vpack.c.bf16 %v6335_v54, %v6334_v53 }
0x27d0   :  { %v6882_v59 = vmul.f32 1.442695, %v6881_v58 }
0x27d2   :  { %21685 = vpow2.f32 %v6882_v59  ;;  %v6336_v59 = vld [vmem:[%s22507_s9 + $0x50] sm:$0xff] }
0x27d8   :  { %v21684_v60 = vpop.eup %21683 }
0x27d9   :  { %v6723_v61 = vsel %vm627_vm4, %v21684_v60, 0.0 }
0x27da   :  { %6724 = vadd.xlane.f32.xlu0 %v6723_v61 }
0x27dc   :  { %v21686_v0 = vpop.eup %21685 }
0x27dd   :  { %v6884_v1 = vsel %vm627_vm4, %v21686_v0, 0.0 }
0x27de   :  { %6885 = vadd.xlane.f32.xlu1 %v6884_v1  ;;  %v6374_v1 = vld [vmem:[%s22514_s15 + $0x40] sm:$0xff] }
0x2867   :  { %v6725_v2 = vpop.xlane.xlu0 %6724 }
0x2868   :  { %21687 = vrcp.f32 %v6725_v2  ;;  %v6375_v2 = vld [vmem:[%s22514_s15 + $0x48] sm:$0xff] }
0x286b   :  { %v6886_v63 = vpop.xlane.xlu1 %6885 }
0x286c   :  { %21689 = vrcp.f32 %v6886_v63  ;;  %v21142_v63 = vpack.c.bf16 %v6375_v2, %v6374_v1  ;;  %v6340_v2 = vld [vmem:[%s22507_s9 + $0x70] sm:$0xff] }
0x2872   :  { %v21688_v3 = vpop.eup %21687 }
0x2873   :  { %v6727_v9 = vmul.f32 %v21688_v3, %v21684_v60  ;;  %v6337_v60 = vld [vmem:[%s22507_s9 + $0x58] sm:$0xff]  ;;  %v6387_v3 = vld [vmem:[%s22680_s12 + $0x8] sm:$0xff] }
0x2875   :  { %19880 = vmatmul.mubr.msk.f32.vlgmr.msra.gmra.mrb[62].mxu1 %vm627_vm4, %v6727_v9  ;;  %v6386_v9 = vld [vmem:[%s22680_s12] sm:$0xff] }
0x2876   :  { %v21690_v14 = vpop.eup %21689  ;;  %19888 = vmatpush3.msra.mxu1 %v22581_v15  ;;  %19889 = vmatprep.mubr.msk.f32.mxu1 %vm21846_vm3, %v21845_v30 }
0x2877   :  { %v6888_v16 = vmul.f32 %v21690_v14, %v21686_v0  ;;  %21111 = vmatprep.subr.bf16.mxu1 %v21110_v5  ;;  %v21130_v0 = vpack.c.bf16 %v6337_v60, %v6336_v59  ;;  %v6338_v59 = vld [vmem:[%s22507_s9 + $0x60] sm:$0xff]  ;;  %v6339_v60 = vld [vmem:[%s22507_s9 + $0x68] sm:$0xff] }
0x2878   :  { %v21150_v1 = vpack.c.bf16 %v6339_v60, %v6338_v59 }
0x2879   :  { %19890 = vmatmul.mubr.msk.f32.vlgmr.msra.gmra.mrb[64].mxu1 %vm627_vm4, %v6888_v16  ;;  %v21134_v16 = vpack.c.bf16 %v6355_v13, %v6354_v12  ;;  %v6380_v12 = vld [vmem:[%s22514_s15 + $0x70] sm:$0xff]  ;;  %v6381_v13 = vld [vmem:[%s22514_s15 + $0x78] sm:$0xff] }
0x287a   :  { %21113 = vmatpush3.bf16.msra.mxu1 %v21110_v5  ;;  %19911 = vmatprep.mubr.msk.f32.mxu1 %vm383_vm2, %v22537_v7 }
0x287b   :  { %21115 = vmatprep.subr.bf16.mxu1 %v21114_v17 }
0x287e   :  { %21117 = vmatpush3.bf16.msra.mxu1 %v21114_v17 }
0x287f   :  { %19925 = vmatprep.subr.mxu1 %v21845_v30 }
0x2881   :  { %19912 = vmatmul.mubr.msk.f32.vlgmr.msra.gmra.mrb[66].mxu1 %vm383_vm2, %v22540_v8 }
0x2882   :  { %19927 = vmatprep.mubr.msk.f32.mxu1 %vm21846_vm3, %v21845_v30 }
0x2948   :  { %v22635_v15 = vpop.f32.mrb[62].mxu1 }
0x2949   :  { %v19881_v6 = vpop.f32.mrb[63].mxu1 }
0x294c   :  { %v22637_v18 = vpop.f32.mrb[64].mxu1 }
0x294d   :  { %v19891_v19 = vpop.f32.mrb[65].mxu1 }
0x294e   :  { %v6356_v19 = vld [vmem:[%s22521_s25 + $0x50] sm:$0xff] }
0x2954   :  { %v19913_v21 = vpop.f32.mrb[66].mxu1 }
0x2955   :  { %v7121_v23 = vadd.f32 %v19913_v21, %v18098_v20  ;;  %v7115_v24 = vpop.f32.mrb[67].mxu1 }
0x2956   :  { %v7116_v25 = vadd.f32 %v18098_v20, %v7115_v24  ;;  %v6357_v20 = vld [vmem:[%s22521_s25 + $0x58] sm:$0xff]  ;;  %v18120_v24 = vld [vmem:[%s22564_s13 + $0x2] ss:$0 sm:$0xff] }
0x2957   :  { %19936 = vmatpush3.xpose.msk.msra.mxu0 %vm627_vm4, %v7121_v23  ;;  %v21138_v21 = vpack.c.bf16 %v6357_v20, %v6356_v19 }
0x2958   :  { %19926 = vmatpush3.xpose.msk.msra.mxu1 %vm627_vm4, %v7116_v25  ;;  %19945 = vmatprep.subr.mxu0 %v6387_v3 }
0x2959   :  { %19930 = vmatprep.subr.mxu1 %v21845_v30 }
0x295a   :  { %19938 = vmatmul.mubr.msk.f32.vlgmr.msra.gmra.mrb[80].mxu0 %vm627_vm4, %v7040_v26 }
0x295b   :  { %19928 = vmatmul.mubr.msk.f32.vlgmr.msra.gmra.mrb[68].mxu1 %vm627_vm4, %v7035_v29  ;;  %19946 = vmatpush3.msra.mxu0 %v6387_v3  ;;  %v6378_v3 = vld [vmem:[%s22514_s15 + $0x60] sm:$0xff] }
0x295c   :  { %19931 = vmatpush3.msra.mxu1 %v7197_v31  ;;  %19932 = vmatprep.mubr.msk.f32.mxu1 %vm21846_vm3, %v21845_v30 }
0x295d   :  { %19940 = vmatprep.subr.mxu1 %v21845_v30  ;;  %19950 = vmatprep.subr.mxu0 %v6386_v9 }
0x2a2d   :  { %v7438_v32 = vpop.f32.mrb[80].mxu0 }
0x2a2e   :  { %v7442_v34 = vmul.f32 0.35355338, %v7438_v32  ;;  %v7277_v36 = vpop.f32.mrb[68].mxu1  ;;  %v19939_v28 = vpop.f32.mrb[81].mxu0 }
0x2a2f   :  { %v7281_v27 = vmul.f32 0.35355338, %v7277_v36  ;;  %v19929_v38 = vpop.f32.mrb[69].mxu1 }
0x2a30   :  { %v7443_v39 = vsel %vm627_vm4, %v7442_v34, -inf }
0x2a31   :  { %7444 = vmax.xlane.f32.xlu1 %v7443_v39  ;;  %v7282_v40 = vsel %vm627_vm4, %v7281_v27, -inf }
0x2a32   :  { %7283 = vmax.xlane.f32.xlu0 %v7282_v40 }
0x2abe   :  { %v7445_v35 = vpop.xlane.xlu1 %7444 }
0x2abf   :  { %v7446_v42 = vsub.f32 %v7442_v34, %v7445_v35  ;;  %v7284_v43 = vpop.xlane.xlu0 %7283  ;;  %v18114_v34 = vld [vmem:[%s22578_s26 + $0x2] ss:$0 sm:$0xff] }
0x2ac0   :  { %v7285_v44 = vsub.f32 %v7281_v27, %v7284_v43 }
0x2ac1   :  { %v7447_v45 = vmul.f32 1.442695, %v7446_v42 }
0x2ac2   :  { %v7286_v46 = vmul.f32 1.442695, %v7285_v44 }
0x2ac3   :  { %21691 = vpow2.f32 %v7447_v45 }
0x2ac4   :  { %21693 = vpow2.f32 %v7286_v46 }
0x2acd   :  { %v21692_v47 = vpop.eup %21691 }
0x2ace   :  { %v21694_v48 = vpop.eup %21693  ;;  %v7449_v49 = vsel %vm627_vm4, %v21692_v47, 0.0 }
0x2acf   :  { %7450 = vadd.xlane.f32.xlu1 %v7449_v49  ;;  %v7288_v50 = vsel %vm627_vm4, %v21694_v48, 0.0 }
0x2ad0   :  { %7289 = vadd.xlane.f32.xlu0 %v7288_v50 }
0x2b5c   :  { %v7451_v51 = vpop.xlane.xlu1 %7450 }
0x2b5d   :  { %v7290_v41 = vpop.xlane.xlu0 %7289 }
0x2b5e   :  { %21695 = vrcp.f32 %v7290_v41 }
0x2b5f   :  { %21697 = vrcp.f32 %v7451_v51 }
0x2b68   :  { %v21696_v55 = vpop.eup %21695 }
0x2b69   :  { %v7292_v56 = vmul.f32 %v21696_v55, %v21694_v48  ;;  %v21698_v58 = vpop.eup %21697 }
0x2b6a   :  { %v7453_v61 = vmul.f32 %v21698_v58, %v21692_v47 }
0x2b6b   :  { %19933 = vmatmul.mubr.msk.f32.vlgmr.msra.gmra.mrb[70].mxu1 %vm627_vm4, %v7292_v56 }
0x2b6c   :  { %19941 = vmatpush3.msra.mxu1 %v22615_v52  ;;  %19942 = vmatprep.mubr.msk.f32.mxu1 %vm21846_vm3, %v21845_v30  ;;  %v21146_v52 = vpack.c.bf16 %v6377_v4, %v6376_v62 }
0x2b6d   :  { %21127 = vmatprep.subr.bf16.mxu1 %v21126_v57 }
0x2b6f   :  { %19943 = vmatmul.mubr.msk.f32.vlgmr.msra.gmra.mrb[72].mxu1 %vm627_vm4, %v7453_v61 }
0x2b70   :  { %21129 = vmatpush3.bf16.msra.mxu1 %v21126_v57  ;;  %19963 = vmatprep.mubr.msk.f32.mxu1 %vm383_vm2, %v22537_v7 }
0x2b71   :  { %21131 = vmatprep.subr.bf16.mxu1 %v21130_v0 }
0x2b74   :  { %21133 = vmatpush3.bf16.msra.mxu1 %v21130_v0 }
0x2b75   :  { %21143 = vmatprep.subr.bf16.mxu1 %v21142_v63 }
0x2b77   :  { %19964 = vmatmul.mubr.msk.f32.vlgmr.msra.gmra.mrb[74].mxu1 %vm383_vm2, %v22540_v8 }
0x2b78   :  { %21145 = vmatpush3.bf16.msra.mxu1 %v21142_v63  ;;  %19985 = vmatprep.mubr.msk.f32.mxu1 %vm383_vm2, %v22537_v7  ;;  %v6341_v63 = vld [vmem:[%s22507_s9 + $0x78] sm:$0xff] }
0x2b79   :  { %21147 = vmatprep.subr.bf16.mxu1 %v21146_v52 }
0x2b7c   :  { %21149 = vmatpush3.bf16.msra.mxu1 %v21146_v52  ;;  %v21154_v52 = vpack.c.bf16 %v6341_v63, %v6340_v2 }
0x2b7d   :  { %19993 = vmatprep.subr.mxu1 %v21845_v30 }
0x2b7f   :  { %19986 = vmatmul.mubr.msk.f32.vlgmr.msra.gmra.mrb[76].mxu1 %vm383_vm2, %v22540_v8 }
0x2b80   :  { %19995 = vmatprep.mubr.msk.f32.mxu1 %vm21846_vm3, %v21845_v30 }
0x2c3e   :  { %v7362_v5 = vpop.f32.mrb[70].mxu1 }
0x2c3f   :  { %v19934_v14 = vpop.f32.mrb[71].mxu1  ;;  %19947 = vmatprep.mubr.msk.f32.mxu0 %vm627_vm4, %v7362_v5 }
0x2c40   :  { %v21170_v14 = vpack.c.bf16 %v6381_v13, %v6380_v12 }
0x2c42   :  { %v7523_v17 = vpop.f32.mrb[72].mxu1 }
0x2c43   :  { %v19944_v6 = vpop.f32.mrb[73].mxu1  ;;  %19948 = vmatmul.mubr.msk.f32.vlgmr.msra.gmra.mrb[82].mxu0 %vm627_vm4, %v7523_v17  ;;  %v6358_v17 = vld [vmem:[%s22521_s25 + $0x60] sm:$0xff] }
0x2c44   :  { %19951 = vmatpush3.msra.mxu0 %v6386_v9  ;;  %19952 = vmatprep.mubr.msk.f32.mxu0 %vm627_vm4, %v22635_v15  ;;  %v6379_v9 = vld [vmem:[%s22514_s15 + $0x68] sm:$0xff] }
0x2c45   :  { %21135 = vmatprep.subr.bf16.mxu0 %v21134_v16  ;;  %v21166_v5 = vpack.c.bf16 %v6379_v9, %v6378_v3  ;;  %v6359_v6 = vld [vmem:[%s22521_s25 + $0x68] sm:$0xff] }
0x2c46   :  { %v21158_v19 = vpack.c.bf16 %v6359_v6, %v6358_v17 }
0x2c4a   :  { %v19965_v22 = vpop.f32.mrb[74].mxu1 }
0x2c4b   :  { %v7761_v23 = vpop.f32.mrb[75].mxu1  ;;  %19953 = vmatmul.mubr.msk.f32.vlgmr.msra.gmra.mrb[82].mxu0 %vm627_vm4, %v22637_v18  ;;  %v18117_v18 = vld [vmem:[%s22573_s7 + $0x2] ss:$0 sm:$0xff]  ;;  %v7767_v38 = vadd.f32 %v19965_v22, %v18114_v34  ;;  %v6361_v22 = vld [vmem:[%s22521_s25 + $0x78] sm:$0xff] }
0x2c4c   :  { %21137 = vmatpush3.bf16.msra.mxu0 %v21134_v16  ;;  %19974 = vmatprep.mubr.msk.f32.mxu0 %vm383_vm2, %v22537_v7  ;;  %v7762_v28 = vadd.f32 %v18114_v34, %v7761_v23  ;;  %v6388_v16 = vld [vmem:[%s22680_s12 + $0x10] sm:$0xff] }
0x2c4d   :  { %21139 = vmatprep.subr.bf16.mxu0 %v21138_v21 }
0x2c50   :  { %21141 = vmatpush3.bf16.msra.mxu0 %v21138_v21  ;;  %v6360_v21 = vld [vmem:[%s22521_s25 + $0x70] sm:$0xff] }
0x2c51   :  { %19988 = vmatprep.subr.mxu0 %v21845_v30 }
0x2c52   :  { %v19987_v15 = vpop.f32.mrb[76].mxu1 }
0x2c53   :  { %v7929_v25 = vadd.f32 %v19987_v15, %v18120_v24  ;;  %19975 = vmatmul.mubr.msk.f32.vlgmr.msra.gmra.mrb[84].mxu0 %vm383_vm2, %v22540_v8  ;;  %v7923_v26 = vpop.f32.mrb[77].mxu1 }
0x2c54   :  { %v7924_v29 = vadd.f32 %v18120_v24, %v7923_v26  ;;  %19990 = vmatprep.mubr.msk.f32.mxu0 %vm21846_vm3, %v21845_v30  ;;  %v21162_v24 = vpack.c.bf16 %v6361_v22, %v6360_v21 }
0x2c56   :  { %19994 = vmatpush3.msra.mxu1 %v7924_v29 }
0x2c57   :  { %20003 = vmatprep.subr.mxu1 %v21845_v30 }
0x2d26   :  { %v19976_v31 = vpop.f32.mrb[84].mxu0 }
0x2d27   :  { %v7842_v32 = vpop.f32.mrb[85].mxu0  ;;  %v7848_v27 = vadd.f32 %v19976_v31, %v18117_v18 }
0x2d28   :  { %v7843_v36 = vadd.f32 %v18117_v18, %v7842_v32  ;;  %v18137_v18 = vld [vmem:[%s22564_s13 + $0x3] ss:$0 sm:$0xff] }
0x2d2a   :  { %19989 = vmatpush3.xpose.msk.msra.mxu0 %vm627_vm4, %v7843_v36  ;;  %v18134_v36 = vld [vmem:[%s22573_s7 + $0x3] ss:$0 sm:$0xff] }
0x2d2b   :  { %19998 = vmatprep.subr.mxu0 %v21845_v30 }
0x2d2d   :  { %19991 = vmatmul.mubr.msk.f32.vlgmr.msra.gmra.mrb[86].mxu0 %vm627_vm4, %v7762_v28 }
0x2d2e   :  { %19999 = vmatpush3.xpose.msk.msra.mxu0 %vm627_vm4, %v7848_v27  ;;  %20000 = vmatprep.mubr.msk.f32.mxu0 %vm21846_vm3, %v21845_v30  ;;  %v18131_v27 = vld [vmem:[%s22578_s26 + $0x3] ss:$0 sm:$0xff] }
0x2d2f   :  { %20008 = vmatprep.subr.mxu0 %v6388_v16 }
0x2d31   :  { %20001 = vmatmul.mubr.msk.f32.vlgmr.msra.gmra.mrb[88].mxu0 %vm627_vm4, %v7767_v38 }
0x2d32   :  { %20009 = vmatpush3.msra.mxu0 %v6388_v16 }
0x2d33   :  { %21159 = vmatprep.subr.bf16.mxu0 %v21158_v19 }
0x2e00   :  { %v8004_v39 = vpop.f32.mrb[86].mxu0 }
0x2e01   :  { %v8008_v40 = vmul.f32 0.35355338, %v8004_v39  ;;  %v19992_v35 = vpop.f32.mrb[87].mxu0 }
0x2e03   :  { %v8009_v42 = vsel %vm627_vm4, %v8008_v40, -inf }
0x2e04   :  { %8010 = vmax.xlane.f32.xlu0 %v8009_v42  ;;  %v8165_v43 = vpop.f32.mrb[88].mxu0 }
0x2e05   :  { %v8169_v44 = vmul.f32 0.35355338, %v8165_v43  ;;  %v20002_v45 = vpop.f32.mrb[89].mxu0 }
0x2e07   :  { %v8170_v46 = vsel %vm627_vm4, %v8169_v44, -inf }
0x2e08   :  { %8171 = vmax.xlane.f32.xlu1 %v8170_v46 }
0x2e91   :  { %v8011_v47 = vpop.xlane.xlu0 %8010 }
0x2e92   :  { %v8012_v48 = vsub.f32 %v8008_v40, %v8011_v47 }
0x2e94   :  { %v8013_v49 = vmul.f32 1.442695, %v8012_v48 }
0x2e95   :  { %v8172_v50 = vpop.xlane.xlu1 %8171 }
0x2e96   :  { %21699 = vpow2.f32 %v8013_v49  ;;  %v8173_v51 = vsub.f32 %v8169_v44, %v8172_v50 }
0x2e98   :  { %v8174_v41 = vmul.f32 1.442695, %v8173_v51 }
0x2e9a   :  { %21701 = vpow2.f32 %v8174_v41 }
0x2ea0   :  { %v21700_v53 = vpop.eup %21699 }
0x2ea1   :  { %v8015_v54 = vsel %vm627_vm4, %v21700_v53, 0.0 }
0x2ea2   :  { %8016 = vadd.xlane.f32.xlu0 %v8015_v54 }
0x2ea4   :  { %v21702_v55 = vpop.eup %21701 }
0x2ea5   :  { %v8176_v56 = vsel %vm627_vm4, %v21702_v55, 0.0 }
0x2ea6   :  { %8177 = vadd.xlane.f32.xlu1 %v8176_v56 }
0x2f2f   :  { %v8017_v57 = vpop.xlane.xlu0 %8016 }
0x2f30   :  { %21703 = vrcp.f32 %v8017_v57 }
0x2f33   :  { %v8178_v58 = vpop.xlane.xlu1 %8177 }
0x2f34   :  { %21705 = vrcp.f32 %v8178_v58  ;;  %v18069_v58 = vld [vmem:[%s22224_s24 + $0x1] ss:$0 sm:$0xff]  ;;  %s21870_s24 = smov 32  }
0x2f35   :  { %v6179_v59 = vadd.f32 %v22566_v10, %v18069_v58  ;;  %v6174_v60 = vadd.f32 %v18069_v58, %v22568_v11  ;;  %s22785_s20 = sld [smem:[%s23657_s0 + %s21870_s24]]  }
0x2f36   :  { %s22842_s24 = sld [smem:[%s23657_s0 + %s21875_s5]]   ;;  %s21883_s5 = smov 43  }
0x2f37   :  { %v6183_v2 = vadd.f32 %v6179_v59, %v22495_v33  ;;  %v18074_v59 = vld [vmem:[%s22245_s29 + $0x1] ss:$0 sm:$0xff]  ;;  %s22819_s29 = sld [smem:[%s23657_s0 + %s21872_s1]]  }
0x2f38   :  { %s23108_s19 = sld [smem:[%s23657_s0 + %s21883_s5]]  }
0x2f3a   :  { %v21704_v61 = vpop.eup %21703 }
0x2f3b   :  { %v8019_v0 = vmul.f32 %v21704_v61, %v21700_v53  ;;  %v18148_v21 = vld [vmem:[%s22785_s20] ss:$0 sm:$0xff] }
0x2f3d   :  { %19996 = vmatmul.mubr.msk.f32.vlgmr.msra.gmra.mrb[78].mxu1 %vm627_vm4, %v8019_v0 }
0x2f3e   :  { %v21706_v62 = vpop.eup %21705  ;;  %20004 = vmatpush3.msra.mxu1 %v7929_v25  ;;  %20005 = vmatprep.mubr.msk.f32.mxu1 %vm21846_vm3, %v21845_v30 }
0x2f3f   :  { %v8180_v4 = vmul.f32 %v21706_v62, %v21702_v55  ;;  %21151 = vmatprep.subr.bf16.mxu1 %v21150_v1  ;;  %v6182_v62 = vadd.f32 %v6174_v60, %v22493_v37 }
0x2f41   :  { %20006 = vmatmul.mubr.msk.f32.vlgmr.msra.gmra.mrb[80].mxu1 %vm627_vm4, %v8180_v4  ;;  %v6191_v4 = vsel %vm383_vm2, %v6183_v2, 0.0  ;;  %v6188_v10 = vsel %vm383_vm2, %v6182_v62, 0.0 }
0x2f42   :  { %21153 = vmatpush3.bf16.msra.mxu1 %v21150_v1  ;;  %20021 = vmatprep.mubr.msk.f32.mxu1 %vm383_vm2, %v22537_v7 }
0x2f43   :  { %21155 = vmatprep.subr.bf16.mxu1 %v21154_v52 }
0x2f46   :  { %21157 = vmatpush3.bf16.msra.mxu1 %v21154_v52 }
0x2f47   :  { %21167 = vmatprep.subr.bf16.mxu1 %v21166_v5 }
0x2f49   :  { %20022 = vmatmul.mubr.msk.f32.vlgmr.msra.gmra.mrb[82].mxu1 %vm383_vm2, %v22540_v8 }
0x2f4a   :  { %21169 = vmatpush3.bf16.msra.mxu1 %v21166_v5  ;;  %20043 = vmatprep.mubr.msk.f32.mxu1 %vm383_vm2, %v22537_v7  ;;  %v6389_v5 = vld [vmem:[%s22680_s12 + $0x18] sm:$0xff] }
0x2f4b   :  { %21171 = vmatprep.subr.bf16.mxu1 %v21170_v14 }
0x2f4e   :  { %21173 = vmatpush3.bf16.msra.mxu1 %v21170_v14 }
0x2f4f   :  { %20056 = vmatprep.subr.mxu1 %v21845_v30 }
0x2f51   :  { %20044 = vmatmul.mubr.msk.f32.vlgmr.msra.gmra.mrb[84].mxu1 %vm383_vm2, %v22540_v8 }
0x2f52   :  { %20058 = vmatprep.mubr.msk.f32.mxu1 %vm21846_vm3, %v21845_v30 }
0x3010   :  { %v8089_v20 = vpop.f32.mrb[78].mxu1 }
0x3011   :  { %v19997_v23 = vpop.f32.mrb[79].mxu1  ;;  %20010 = vmatprep.mubr.msk.f32.mxu0 %vm627_vm4, %v8089_v20 }
0x3014   :  { %v8250_v15 = vpop.f32.mrb[80].mxu1 }
0x3015   :  { %v20007_v25 = vpop.f32.mrb[81].mxu1  ;;  %20011 = vmatmul.mubr.msk.f32.vlgmr.msra.gmra.mrb[82].mxu0 %vm627_vm4, %v8250_v15 }
0x3016   :  { %21161 = vmatpush3.bf16.msra.mxu0 %v21158_v19  ;;  %20032 = vmatprep.mubr.msk.f32.mxu0 %vm383_vm2, %v22537_v7 }
0x3017   :  { %21163 = vmatprep.subr.bf16.mxu0 %v21162_v24 }
0x301a   :  { %21165 = vmatpush3.bf16.msra.mxu0 %v21162_v24 }
0x301b   :  { %20046 = vmatprep.subr.mxu0 %v21845_v30 }
0x301c   :  { %v20023_v26 = vpop.f32.mrb[82].mxu1 }
0x301d   :  { %v8409_v29 = vpop.f32.mrb[83].mxu1  ;;  %20033 = vmatmul.mubr.msk.f32.vlgmr.msra.gmra.mrb[90].mxu0 %vm383_vm2, %v22540_v8  ;;  %v8415_v35 = vadd.f32 %v20023_v26, %v18131_v27 }
0x301e   :  { %20048 = vmatprep.mubr.msk.f32.mxu0 %vm21846_vm3, %v21845_v30  ;;  %v8410_v42 = vadd.f32 %v18131_v27, %v8409_v29 }
0x3024   :  { %v20045_v31 = vpop.f32.mrb[84].mxu1 }
0x3025   :  { %v8577_v32 = vadd.f32 %v20045_v31, %v18137_v18  ;;  %v8571_v34 = vpop.f32.mrb[85].mxu1 }
0x3026   :  { %v8572_v43 = vadd.f32 %v18137_v18, %v8571_v34 }
0x30f0   :  { %v20034_v28 = vpop.f32.mrb[90].mxu0 }
0x30f1   :  { %v8496_v38 = vadd.f32 %v20034_v28, %v18134_v36  ;;  %v8490_v39 = vpop.f32.mrb[91].mxu0 }
0x30f2   :  { %v8491_v40 = vadd.f32 %v18134_v36, %v8490_v39  ;;  %v9061_v39 = vld [vmem:[%s22797_s28 + $0x10] sm:$0xff] }
0x30f3   :  { %20057 = vmatpush3.xpose.msk.msra.mxu1 %vm627_vm4, %v8496_v38 }
0x30f4   :  { %20047 = vmatpush3.xpose.msk.msra.mxu0 %vm627_vm4, %v8491_v40  ;;  %v9062_v40 = vld [vmem:[%s22797_s28 + $0x18] sm:$0xff] }
0x30f5   :  { %20051 = vmatprep.subr.mxu0 %v21845_v30 }
0x30f6   :  { %20059 = vmatmul.mubr.msk.f32.vlgmr.msra.gmra.mrb[86].mxu1 %vm627_vm4, %v8415_v35  ;;  %v21186_v35 = vpack.c.bf16 %v9062_v40, %v9061_v39  ;;  %v9043_v39 = vld [vmem:[%s22819_s29 + $0x20] sm:$0xff]  ;;  %v9044_v40 = vld [vmem:[%s22819_s29 + $0x28] sm:$0xff] }
0x30f7   :  { %20049 = vmatmul.mubr.msk.f32.vlgmr.msra.gmra.mrb[92].mxu0 %vm627_vm4, %v8410_v42 }
0x30f8   :  { %20052 = vmatpush3.msra.mxu0 %v8572_v43  ;;  %20053 = vmatprep.mubr.msk.f32.mxu0 %vm21846_vm3, %v21845_v30 }
0x30f9   :  { %20061 = vmatprep.subr.mxu0 %v21845_v30 }
0x31c9   :  { %v8813_v44 = vpop.f32.mrb[86].mxu1 }
0x31ca   :  { %v8817_v45 = vmul.f32 0.35355338, %v8813_v44  ;;  %v8652_v46 = vpop.f32.mrb[92].mxu0  ;;  %v20060_v47 = vpop.f32.mrb[87].mxu1 }
0x31cb   :  { %v8656_v48 = vmul.f32 0.35355338, %v8652_v46  ;;  %v20050_v49 = vpop.f32.mrb[93].mxu0 }
0x31cc   :  { %v8818_v50 = vsel %vm627_vm4, %v8817_v45, -inf }
0x31cd   :  { %8819 = vmax.xlane.f32.xlu1 %v8818_v50  ;;  %v8657_v51 = vsel %vm627_vm4, %v8656_v48, -inf }
0x31ce   :  { %8658 = vmax.xlane.f32.xlu0 %v8657_v51 }
0x325a   :  { %v8820_v41 = vpop.xlane.xlu1 %8819 }
0x325b   :  { %v8821_v53 = vsub.f32 %v8817_v45, %v8820_v41  ;;  %v8659_v54 = vpop.xlane.xlu0 %8658 }
0x325c   :  { %v8660_v55 = vsub.f32 %v8656_v48, %v8659_v54 }
0x325d   :  { %v8822_v56 = vmul.f32 1.442695, %v8821_v53 }
0x325e   :  { %v8661_v57 = vmul.f32 1.442695, %v8660_v55 }
0x325f   :  { %21707 = vpow2.f32 %v8822_v56 }
0x3260   :  { %21709 = vpow2.f32 %v8661_v57 }
0x3269   :  { %v21708_v61 = vpop.eup %21707 }
0x326a   :  { %v21710_v0 = vpop.eup %21709  ;;  %v8824_v1 = vsel %vm627_vm4, %v21708_v61, 0.0 }
0x326b   :  { %8825 = vadd.xlane.f32.xlu1 %v8824_v1  ;;  %v8663_v63 = vsel %vm627_vm4, %v21710_v0, 0.0  ;;  %v18075_v1 = vld [vmem:[%s22250_s6 + $0x1] ss:$0 sm:$0xff]  ;;  %s21873_s6 = smov 39  }
0x326c   :  { %8664 = vadd.xlane.f32.xlu0 %v8663_v63  ;;  %s22828_s21 = sld [smem:[%s23657_s0 + %s21873_s6]]   ;;  %s21878_s6 = smov 40  }
0x326d   :  { %s22879_s3 = sld [smem:[%s23657_s0 + %s21878_s6]]  }
0x326e   :  { %s23088_s6 = sld [smem:[%s23657_s0 + %s21881_s27]]   ;;  %s21884_s27 = smov 44  }
0x326f   :  { %6192 = vadd.xlane.f32.xlu1 %v6191_v4  ;;  %s23113_s4 = sld [smem:[%s23657_s0 + %s21884_s27]]   ;;  %s21888_s27 = smov 50  }
0x3270   :  { %6189 = vadd.xlane.f32.xlu0 %v6188_v10  ;;  %v9039_v10 = vld [vmem:[%s22819_s29] sm:$0xff] }
0x32f8   :  { %v8826_v11 = vpop.xlane.xlu1 %8825 }
0x32f9   :  { %v8665_v52 = vpop.xlane.xlu0 %8664 }
0x32fa   :  { %21711 = vrcp.f32 %v8665_v52 }
0x32fb   :  { %21713 = vrcp.f32 %v8826_v11  ;;  %v9040_v11 = vld [vmem:[%s22819_s29 + $0x8] sm:$0xff] }
0x32fc   :  { %v6193_v17 = vpop.xlane.xlu1 %6192  ;;  %v21174_v52 = vpack.c.bf16 %v9040_v11, %v9039_v10 }
0x32fd   :  { %v6190_v6 = vpop.xlane.xlu0 %6189  ;;  %v6195_v19 = vmul.f32 0.03125, %v6193_v17 }
0x32fe   :  { %v6194_v20 = vmul.f32 0.03125, %v6190_v6  ;;  %21175 = vmatprep.subr.bf16.mxu1 %v21174_v52 }
0x32ff   :  { %v6197_v23 = vsub.f32 %v6183_v2, %v6195_v19  ;;  %21177 = vmatpush3.bf16.msra.mxu1 %v21174_v52 }
0x3300   :  { %v6196_v25 = vsub.f32 %v6182_v62, %v6194_v20 }
0x3302   :  { %v6198_v36 = vmul.f32 %v6196_v25, %v6196_v25 }
0x3304   :  { %v21712_v3 = vpop.eup %21711  ;;  %v6200_v27 = vsel %vm383_vm2, %v6198_v36, 0.0  ;;  %v18154_v36 = vld [vmem:[%s22866_s30] ss:$0 sm:$0xff] }
0x3305   :  { %v8667_v9 = vmul.f32 %v21712_v3, %v21710_v0  ;;  %v21714_v33 = vpop.eup %21713  ;;  %v9041_v3 = vld [vmem:[%s22819_s29 + $0x10] sm:$0xff] }
0x3306   :  { %v8828_v37 = vmul.f32 %v21714_v33, %v21708_v61 }
0x3307   :  { %20054 = vmatmul.mubr.msk.f32.vlgmr.msra.gmra.mrb[94].mxu0 %vm627_vm4, %v8667_v9  ;;  %v9042_v9 = vld [vmem:[%s22819_s29 + $0x18] sm:$0xff] }
0x3308   :  { %20062 = vmatpush3.msra.mxu0 %v8577_v32  ;;  %20063 = vmatprep.mubr.msk.f32.mxu0 %vm21846_vm3, %v21845_v30  ;;  %v6199_v32 = vmul.f32 %v6197_v23, %v6197_v23  ;;  %v21178_v33 = vpack.c.bf16 %v9042_v9, %v9041_v3  ;;  %v18172_v9 = vld [vmem:[%s22879_s3 + $0x1] ss:$0 sm:$0xff] }
0x3309   :  { %20066 = vmatprep.subr.mxu0 %v6389_v5 }
0x330a   :  { %v6203_v28 = vsel %vm383_vm2, %v6199_v32, 0.0  ;;  %21179 = vmatprep.subr.bf16.mxu1 %v21178_v33 }
0x330b   :  { %20064 = vmatmul.mubr.msk.f32.vlgmr.msra.gmra.mrb[96].mxu0 %vm627_vm4, %v8828_v37  ;;  %21181 = vmatpush3.bf16.msra.mxu1 %v21178_v33  ;;  %v9079_v37 = vld [vmem:[%s22828_s21] sm:$0xff] }
0x330c   :  { %20067 = vmatpush3.msra.mxu0 %v6389_v5  ;;  %v9080_v5 = vld [vmem:[%s22828_s21 + $0x8] sm:$0xff] }
0x33da   :  { %v8737_v12 = vpop.f32.mrb[94].mxu0 }
0x33db   :  { %v20055_v13 = vpop.f32.mrb[95].mxu0  ;;  %20068 = vmatprep.mubr.msk.f32.mxu0 %vm627_vm4, %v8737_v12  ;;  %v21190_v12 = vpack.c.bf16 %v9080_v5, %v9079_v37 }
0x33dd   :  { %21191 = vmatprep.subr.bf16.mxu1 %v21190_v12 }
0x33de   :  { %v8898_v14 = vpop.f32.mrb[96].mxu0 }
0x33df   :  { %v20065_v16 = vpop.f32.mrb[97].mxu0  ;;  %20069 = vmatmul.mubr.msk.f32.vlgmr.msra.gmra.mrb[82].mxu0 %vm627_vm4, %v8898_v14 }
0x34b2   :  { %v20070_v22 = vpop.f32.mrb[82].mxu0 }
0x34b3   :  { %v8992_v24 = vadd.f32 %v20070_v22, %v18148_v21  ;;  %v8974_v15 = vpop.f32.mrb[83].mxu0 }
0x34b4   :  { %v8991_v26 = vadd.f32 %v18148_v21, %v8974_v15  ;;  %v18149_v21 = vld [vmem:[%s22837_s22] ss:$0 sm:$0xff] }
0x34b5   :  { %v8994_v29 = vadd.f32 %v8992_v24, %v22540_v8  ;;  %v9060_v8 = vld [vmem:[%s22797_s28 + $0x8] sm:$0xff]  ;;  %v18150_v15 = vld [vmem:[%s22842_s24] ss:$0 sm:$0xff] }
0x34b6   :  { %v8993_v18 = vadd.f32 %v8991_v26, %v22537_v7  ;;  %v9059_v7 = vld [vmem:[%s22797_s28] sm:$0xff] }
0x34b7   :  { %v9000_v31 = vsel %vm383_vm2, %v8994_v29, 0.0  ;;  %v21182_v38 = vpack.c.bf16 %v9060_v8, %v9059_v7 }
0x34b8   :  { %9001 = vadd.xlane.f32.xlu1 %v9000_v31  ;;  %v8997_v34 = vsel %vm383_vm2, %v8993_v18, 0.0 }
0x34b9   :  { %8998 = vadd.xlane.f32.xlu0 %v8997_v34  ;;  %21183 = vmatprep.subr.bf16.mxu0 %v21182_v38 }
0x34ba   :  { %21185 = vmatpush3.bf16.msra.mxu0 %v21182_v38  ;;  %v18151_v38 = vld [vmem:[%s22874_s2] ss:$0 sm:$0xff] }
0x34bb   :  { %21187 = vmatprep.subr.bf16.mxu0 %v21186_v35 }
0x34bc   :  { %6204 = vadd.xlane.f32.xlu1 %v6203_v28 }
0x34bd   :  { %6201 = vadd.xlane.f32.xlu0 %v6200_v27 }
0x34be   :  { %21189 = vmatpush3.bf16.msra.mxu0 %v21186_v35 }
0x34bf   :  { %20104 = vmatprep.subr.mxu0 %v21845_v30 }
0x3545   :  { %v9002_v42 = vpop.xlane.xlu1 %9001 }
0x3546   :  { %v9004_v43 = vmul.f32 0.03125, %v9002_v42  ;;  %v8999_v44 = vpop.xlane.xlu0 %8998 }
0x3547   :  { %v9003_v45 = vmul.f32 0.03125, %v8999_v44  ;;  %v21198_v44 = vpack.c.bf16 %v9044_v40, %v9043_v39 }
0x3548   :  { %v9006_v46 = vsub.f32 %v8994_v29, %v9004_v43  ;;  %v9081_v29 = vld [vmem:[%s22828_s21 + $0x10] sm:$0xff] }
0x3549   :  { %v9005_v47 = vsub.f32 %v8993_v18, %v9003_v45  ;;  %v6205_v48 = vpop.xlane.xlu1 %6204  ;;  %v9082_v18 = vld [vmem:[%s22828_s21 + $0x18] sm:$0xff]  ;;  %v9045_v45 = vld [vmem:[%s22819_s29 + $0x30] sm:$0xff] }
0x354a   :  { %v6207_v49 = vmul.f32 0.03125, %v6205_v48  ;;  %v6202_v50 = vpop.xlane.xlu0 %6201  ;;  %v9008_v51 = vmul.f32 %v9006_v46, %v9006_v46  ;;  %v21194_v34 = vpack.c.bf16 %v9082_v18, %v9081_v29  ;;  %v18157_v48 = vld [vmem:[%s22879_s3] ss:$0 sm:$0xff] }
0x354b   :  { %v6206_v41 = vmul.f32 0.03125, %v6202_v50  ;;  %v9007_v53 = vmul.f32 %v9005_v47, %v9005_v47  ;;  %v9083_v50 = vld [vmem:[%s22828_s21 + $0x20] sm:$0xff] }
0x354c   :  { %v6209_v54 = vadd.f32 1e-05, %v6207_v49  ;;  %v9012_v55 = vsel %vm383_vm2, %v9008_v51, 0.0  ;;  %v9084_v51 = vld [vmem:[%s22828_s21 + $0x28] sm:$0xff] }
0x354d   :  { %v6208_v56 = vadd.f32 1e-05, %v6206_v41  ;;  %9013 = vadd.xlane.f32.xlu1 %v9012_v55  ;;  %v9009_v57 = vsel %vm383_vm2, %v9007_v53, 0.0 }
0x354e   :  { %21715 = vrsqrt.f32 %v6209_v54  ;;  %9010 = vadd.xlane.f32.xlu0 %v9009_v57  ;;  %v9085_v57 = vld [vmem:[%s22828_s21 + $0x30] sm:$0xff] }
0x354f   :  { %21717 = vrsqrt.f32 %v6208_v56  ;;  %v21214_v56 = vpack.c.bf16 %v9084_v51, %v9083_v50 }
0x3558   :  { %v21716_v58 = vpop.eup %21715 }
0x3559   :  { %v21718_v60 = vpop.eup %21717  ;;  %v6213_v61 = vmul.f32 %v21716_v58, %v6197_v23  ;;  %v9086_v58 = vld [vmem:[%s22828_s21 + $0x38] sm:$0xff] }
0x355a   :  { %v6212_v0 = vmul.f32 %v21718_v60, %v6196_v25 }
0x355b   :  { %v6221_v2 = vmul.f32 %v18074_v59, %v6213_v61 }
0x355c   :  { %v6220_v63 = vmul.f32 %v18074_v59, %v6212_v0  ;;  %v21218_v59 = vpack.c.bf16 %v9086_v58, %v9085_v57 }
0x355d   :  { %v22810_v4 = vadd.f32 %v18075_v1, %v6221_v2 }
0x355e   :  { %v22808_v62 = vadd.f32 %v18075_v1, %v6220_v63 }
0x3560   :  { %20090 = vmatprep.mubr.msk.f32.mxu0 %vm383_vm2, %v22808_v62 }
0x3561   :  { %20091 = vmatmul.mubr.msk.f32.vlgmr.msra.gmra.mrb[98].mxu0 %vm383_vm2, %v22810_v4 }
0x3562   :  { %20106 = vmatprep.mubr.msk.f32.mxu0 %vm21846_vm3, %v21845_v30 }
0x35da   :  { %v9014_v13 = vpop.xlane.xlu1 %9013 }
0x35db   :  { %v9016_v14 = vmul.f32 0.03125, %v9014_v13  ;;  %v9011_v16 = vpop.xlane.xlu0 %9010 }
0x35dc   :  { %v9015_v17 = vmul.f32 0.03125, %v9011_v16 }
0x35dd   :  { %v9018_v6 = vadd.f32 1e-05, %v9016_v14 }
0x35de   :  { %v9017_v19 = vadd.f32 1e-05, %v9015_v17 }
0x35df   :  { %21719 = vrsqrt.f32 %v9018_v6 }
0x35e0   :  { %21721 = vrsqrt.f32 %v9017_v19 }
0x35e9   :  { %v21720_v20 = vpop.eup %21719 }
0x35ea   :  { %v21722_v22 = vpop.eup %21721  ;;  %v9022_v23 = vmul.f32 %v21720_v20, %v9006_v46  ;;  %v9046_v46 = vld [vmem:[%s22819_s29 + $0x38] sm:$0xff] }
0x35eb   :  { %v9021_v24 = vmul.f32 %v21722_v22, %v9005_v47  ;;  %v21202_v49 = vpack.c.bf16 %v9046_v46, %v9045_v45 }
0x35ec   :  { %v9030_v25 = vmul.f32 %v18149_v21, %v9022_v23 }
0x35ed   :  { %v9029_v26 = vmul.f32 %v18149_v21, %v9021_v24 }
0x35ee   :  { %v22850_v32 = vadd.f32 %v18150_v15, %v9030_v25  ;;  %v9064_v25 = vld [vmem:[%s22797_s28 + $0x28] sm:$0xff] }
0x35ef   :  { %v22848_v31 = vadd.f32 %v18150_v15, %v9029_v26  ;;  %v9063_v15 = vld [vmem:[%s22797_s28 + $0x20] sm:$0xff] }
0x35f0   :  { %v21206_v18 = vpack.c.bf16 %v9064_v25, %v9063_v15  ;;  %v9100_v15 = vld [vmem:[%s22978_s8 + $0x8] sm:$0xff]  ;;  %v9099_v25 = vld [vmem:[%s22978_s8] sm:$0xff] }
0x35f1   :  { %20079 = vmatprep.mubr.msk.f32.mxu1 %vm383_vm2, %v22848_v31 }
0x35f2   :  { %20080 = vmatmul.mubr.msk.f32.vlgmr.msra.gmra.mrb[88].mxu1 %vm383_vm2, %v22850_v32 }
0x35f3   :  { %21193 = vmatpush3.bf16.msra.mxu1 %v21190_v12  ;;  %20101 = vmatprep.mubr.msk.f32.mxu1 %vm383_vm2, %v22808_v62 }
0x35f4   :  { %21195 = vmatprep.subr.bf16.mxu1 %v21194_v34 }
0x35f7   :  { %21197 = vmatpush3.bf16.msra.mxu1 %v21194_v34  ;;  %v9065_v34 = vld [vmem:[%s22797_s28 + $0x30] sm:$0xff] }
0x35f8   :  { %20109 = vmatprep.subr.mxu1 %v21845_v30 }
0x35fa   :  { %20102 = vmatmul.mubr.msk.f32.vlgmr.msra.gmra.mrb[90].mxu1 %vm383_vm2, %v22810_v4 }
0x35fb   :  { %20111 = vmatprep.mubr.msk.f32.mxu1 %vm21846_vm3, %v21845_v30 }
0x3634   :  { %v20092_v28 = vpop.f32.mrb[98].mxu0 }
0x3635   :  { %v9275_v27 = vadd.f32 %v20092_v28, %v18154_v36  ;;  %v9269_v7 = vpop.f32.mrb[99].mxu0 }
0x3636   :  { %v9270_v8 = vadd.f32 %v18154_v36, %v9269_v7  ;;  %v9066_v36 = vld [vmem:[%s22797_s28 + $0x38] sm:$0xff] }
0x3637   :  { %v21210_v7 = vpack.c.bf16 %v9066_v36, %v9065_v34 }
0x3638   :  { %20105 = vmatpush3.xpose.msk.msra.mxu0 %vm627_vm4, %v9270_v8 }
0x3639   :  { %20114 = vmatprep.subr.mxu0 %v21845_v30 }
0x36c5   :  { %v20081_v35 = vpop.f32.mrb[88].mxu1 }
0x36c6   :  { %v9182_v42 = vpop.f32.mrb[89].mxu1  ;;  %v9188_v47 = vadd.f32 %v20081_v35, %v18151_v38  ;;  %v18169_v35 = vld [vmem:[%s22866_s30 + $0x1] ss:$0 sm:$0xff] }
0x36c7   :  { %v9183_v43 = vadd.f32 %v18151_v38, %v9182_v42 }
0x36c9   :  { %20107 = vmatmul.mubr.msk.f32.vlgmr.msra.gmra.mrb[100].mxu0 %vm627_vm4, %v9183_v43  ;;  %v18166_v43 = vld [vmem:[%s22874_s2 + $0x1] ss:$0 sm:$0xff] }
0x36ca   :  { %20115 = vmatpush3.xpose.msk.msra.mxu0 %vm627_vm4, %v9275_v27  ;;  %20116 = vmatprep.mubr.msk.f32.mxu0 %vm21846_vm3, %v21845_v30 }
0x36cb   :  { %21199 = vmatprep.subr.bf16.mxu0 %v21198_v44 }
0x36cd   :  { %v20103_v41 = vpop.f32.mrb[90].mxu1  ;;  %20117 = vmatmul.mubr.msk.f32.vlgmr.msra.gmra.mrb[102].mxu0 %vm627_vm4, %v9188_v47 }
0x36ce   :  { %v22894_v53 = vadd.f32 %v20103_v41, %v18157_v48  ;;  %v9350_v54 = vpop.f32.mrb[91].mxu1  ;;  %21201 = vmatpush3.bf16.msra.mxu0 %v21198_v44  ;;  %20132 = vmatprep.mubr.msk.f32.mxu0 %vm383_vm2, %v22848_v31 }
0x36cf   :  { %v9351_v55 = vadd.f32 %v18157_v48, %v9350_v54  ;;  %21203 = vmatprep.subr.bf16.mxu0 %v21202_v49 }
0x36d1   :  { %20110 = vmatpush3.msra.mxu1 %v9351_v55 }
0x36d2   :  { %21205 = vmatpush3.bf16.msra.mxu0 %v21202_v49  ;;  %20119 = vmatprep.subr.mxu1 %v21845_v30 }
0x36d3   :  { %21215 = vmatprep.subr.bf16.mxu0 %v21214_v56 }
0x36d5   :  { %20133 = vmatmul.mubr.msk.f32.vlgmr.msra.gmra.mrb[104].mxu0 %vm383_vm2, %v22850_v32 }
0x36d6   :  { %21217 = vmatpush3.bf16.msra.mxu0 %v21214_v56  ;;  %20154 = vmatprep.mubr.msk.f32.mxu0 %vm383_vm2, %v22808_v62 }
0x36d7   :  { %21219 = vmatprep.subr.bf16.mxu0 %v21218_v59 }
0x36da   :  { %21221 = vmatpush3.bf16.msra.mxu0 %v21218_v59 }
0x36db   :  { %20167 = vmatprep.subr.mxu0 %v21845_v30 }
0x36dd   :  { %20155 = vmatmul.mubr.msk.f32.vlgmr.msra.gmra.mrb[106].mxu0 %vm383_vm2, %v22810_v4 }
0x36de   :  { %20169 = vmatprep.mubr.msk.f32.mxu0 %vm21846_vm3, %v21845_v30 }
0x379c   :  { %v9431_v60 = vpop.f32.mrb[100].mxu0 }
0x379d   :  { %v9435_v61 = vmul.f32 0.35355338, %v9431_v60  ;;  %v20108_v0 = vpop.f32.mrb[101].mxu0 }
0x379f   :  { %v9436_v1 = vsel %vm627_vm4, %v9435_v61, -inf }
0x37a0   :  { %9437 = vmax.xlane.f32.xlu0 %v9436_v1  ;;  %v9592_v2 = vpop.f32.mrb[102].mxu0 }
0x37a1   :  { %v9596_v63 = vmul.f32 0.35355338, %v9592_v2  ;;  %v20118_v10 = vpop.f32.mrb[103].mxu0 }
0x37a3   :  { %v9597_v11 = vsel %vm627_vm4, %v9596_v63, -inf }
0x37a4   :  { %9598 = vmax.xlane.f32.xlu1 %v9597_v11 }
0x37a8   :  { %v20134_v52 = vpop.f32.mrb[104].mxu0 }
0x37a9   :  { %v9753_v3 = vpop.f32.mrb[105].mxu0  ;;  %v9759_v47 = vadd.f32 %v20134_v52, %v18166_v43 }
0x37aa   :  { %v9754_v48 = vadd.f32 %v18166_v43, %v9753_v3  ;;  %v18191_v43 = vld [vmem:[%s22879_s3 + $0x2] ss:$0 sm:$0xff] }
0x37b0   :  { %v20156_v33 = vpop.f32.mrb[106].mxu0 }
0x37b1   :  { %v22913_v37 = vadd.f32 %v20156_v33, %v18172_v9  ;;  %v9915_v5 = vpop.f32.mrb[107].mxu0  ;;  %v9048_v33 = vld [vmem:[%s22819_s29 + $0x48] sm:$0xff] }
0x37b2   :  { %v9916_v49 = vadd.f32 %v18172_v9, %v9915_v5  ;;  %v9047_v9 = vld [vmem:[%s22819_s29 + $0x40] sm:$0xff] }
0x382d   :  { %v9438_v12 = vpop.xlane.xlu0 %9437 }
0x382e   :  { %v9439_v13 = vsub.f32 %v9435_v61, %v9438_v12 }
0x3830   :  { %v9440_v14 = vmul.f32 1.442695, %v9439_v13  ;;  %v21222_v13 = vpack.c.bf16 %v9048_v33, %v9047_v9 }
0x3831   :  { %v9599_v16 = vpop.xlane.xlu1 %9598 }
0x3832   :  { %21723 = vpow2.f32 %v9440_v14  ;;  %v9600_v17 = vsub.f32 %v9596_v63, %v9599_v16  ;;  %v9049_v16 = vld [vmem:[%s22819_s29 + $0x50] sm:$0xff] }
0x3834   :  { %v9601_v6 = vmul.f32 1.442695, %v9600_v17  ;;  %v9050_v17 = vld [vmem:[%s22819_s29 + $0x58] sm:$0xff] }
0x3836   :  { %21725 = vpow2.f32 %v9601_v6 }
0x383c   :  { %v21724_v19 = vpop.eup %21723 }
0x383d   :  { %v9442_v20 = vsel %vm627_vm4, %v21724_v19, 0.0 }
0x383e   :  { %9443 = vadd.xlane.f32.xlu0 %v9442_v20  ;;  %v9087_v20 = vld [vmem:[%s22828_s21 + $0x40] sm:$0xff] }
0x3840   :  { %v21726_v21 = vpop.eup %21725 }
0x3841   :  { %v9603_v22 = vsel %vm627_vm4, %v21726_v21, 0.0 }
0x3842   :  { %9604 = vadd.xlane.f32.xlu1 %v9603_v22 }
0x38cb   :  { %v9444_v23 = vpop.xlane.xlu0 %9443 }
0x38cc   :  { %21727 = vrcp.f32 %v9444_v23  ;;  %v9089_v23 = vld [vmem:[%s22828_s21 + $0x50] sm:$0xff] }
0x38cf   :  { %v9605_v24 = vpop.xlane.xlu1 %9604 }
0x38d0   :  { %21729 = vrcp.f32 %v9605_v24  ;;  %v9090_v24 = vld [vmem:[%s22828_s21 + $0x58] sm:$0xff] }
0x38d6   :  { %v21728_v26 = vpop.eup %21727 }
0x38d7   :  { %v9446_v29 = vmul.f32 %v21728_v26, %v21724_v19  ;;  %v21226_v19 = vpack.c.bf16 %v9050_v17, %v9049_v16 }
0x38d9   :  { %20112 = vmatmul.mubr.msk.f32.vlgmr.msra.gmra.mrb[92].mxu1 %vm627_vm4, %v9446_v29  ;;  %v9067_v29 = vld [vmem:[%s22797_s28 + $0x40] sm:$0xff] }
0x38da   :  { %v21730_v28 = vpop.eup %21729  ;;  %20120 = vmatpush3.msra.mxu1 %v22894_v53  ;;  %20121 = vmatprep.mubr.msk.f32.mxu1 %vm21846_vm3, %v21845_v30 }
0x38db   :  { %v9607_v27 = vmul.f32 %v21730_v28, %v21726_v21  ;;  %21207 = vmatprep.subr.bf16.mxu1 %v21206_v18  ;;  %v9088_v21 = vld [vmem:[%s22828_s21 + $0x48] sm:$0xff] }
0x38dc   :  { %v21238_v22 = vpack.c.bf16 %v9088_v21, %v9087_v20  ;;  %v9054_v20 = vld [vmem:[%s22819_s29 + $0x78] sm:$0xff] }
0x38dd   :  { %20122 = vmatmul.mubr.msk.f32.vlgmr.msra.gmra.mrb[94].mxu1 %vm627_vm4, %v9607_v27 }
0x38de   :  { %21209 = vmatpush3.bf16.msra.mxu1 %v21206_v18  ;;  %20143 = vmatprep.mubr.msk.f32.mxu1 %vm383_vm2, %v22808_v62  ;;  %v9068_v18 = vld [vmem:[%s22797_s28 + $0x48] sm:$0xff] }
0x38df   :  { %21211 = vmatprep.subr.bf16.mxu1 %v21210_v7  ;;  %v21230_v36 = vpack.c.bf16 %v9068_v18, %v9067_v29  ;;  %v9101_v18 = vld [vmem:[%s22978_s8 + $0x10] sm:$0xff] }
0x38e2   :  { %21213 = vmatpush3.bf16.msra.mxu1 %v21210_v7  ;;  %v9069_v7 = vld [vmem:[%s22797_s28 + $0x50] sm:$0xff] }
0x38e3   :  { %20157 = vmatprep.subr.mxu1 %v21845_v30 }
0x38e5   :  { %20144 = vmatmul.mubr.msk.f32.vlgmr.msra.gmra.mrb[96].mxu1 %vm383_vm2, %v22810_v4 }
0x38e6   :  { %20159 = vmatprep.mubr.msk.f32.mxu1 %vm21846_vm3, %v21845_v30 }
0x39ac   :  { %v22933_v8 = vpop.f32.mrb[92].mxu1 }
0x39ad   :  { %v20113_v38 = vpop.f32.mrb[93].mxu1 }
0x39ae   :  { %v9070_v38 = vld [vmem:[%s22797_s28 + $0x58] sm:$0xff] }
0x39b0   :  { %v22935_v39 = vpop.f32.mrb[94].mxu1 }
0x39b1   :  { %v20123_v40 = vpop.f32.mrb[95].mxu1 }
0x39b2   :  { %v21234_v40 = vpack.c.bf16 %v9070_v38, %v9069_v7  ;;  %v9073_v7 = vld [vmem:[%s22797_s28 + $0x70] sm:$0xff]  ;;  %v9074_v38 = vld [vmem:[%s22797_s28 + $0x78] sm:$0xff] }
0x39b8   :  { %v20145_v42 = vpop.f32.mrb[96].mxu1 }
0x39b9   :  { %v9840_v44 = vadd.f32 %v20145_v42, %v18169_v35  ;;  %v9834_v45 = vpop.f32.mrb[97].mxu1 }
0x39ba   :  { %v9835_v46 = vadd.f32 %v18169_v35, %v9834_v45 }
0x39bb   :  { %20168 = vmatpush3.xpose.msk.msra.mxu0 %vm627_vm4, %v9840_v44 }
0x39bc   :  { %20158 = vmatpush3.xpose.msk.msra.mxu1 %vm627_vm4, %v9835_v46  ;;  %20177 = vmatprep.subr.mxu0 %v9100_v15 }
0x39bd   :  { %20162 = vmatprep.subr.mxu1 %v21845_v30 }
0x39be   :  { %20170 = vmatmul.mubr.msk.f32.vlgmr.msra.gmra.mrb[108].mxu0 %vm627_vm4, %v9759_v47 }
0x39bf   :  { %20160 = vmatmul.mubr.msk.f32.vlgmr.msra.gmra.mrb[98].mxu1 %vm627_vm4, %v9754_v48  ;;  %20178 = vmatpush3.msra.mxu0 %v9100_v15 }
0x39c0   :  { %20163 = vmatpush3.msra.mxu1 %v9916_v49  ;;  %20164 = vmatprep.mubr.msk.f32.mxu1 %vm21846_vm3, %v21845_v30  ;;  %v18185_v49 = vld [vmem:[%s22874_s2 + $0x2] ss:$0 sm:$0xff] }
0x39c1   :  { %20172 = vmatprep.subr.mxu1 %v21845_v30  ;;  %20182 = vmatprep.subr.mxu0 %v9099_v25 }
0x3a91   :  { %v10157_v50 = vpop.f32.mrb[108].mxu0 }
0x3a92   :  { %v10161_v51 = vmul.f32 0.35355338, %v10157_v50  ;;  %v9996_v41 = vpop.f32.mrb[98].mxu1  ;;  %v20171_v53 = vpop.f32.mrb[109].mxu0 }
0x3a93   :  { %v10000_v54 = vmul.f32 0.35355338, %v9996_v41  ;;  %v20161_v55 = vpop.f32.mrb[99].mxu1 }
0x3a94   :  { %v10162_v56 = vsel %vm627_vm4, %v10161_v51, -inf }
0x3a95   :  { %10163 = vmax.xlane.f32.xlu1 %v10162_v56  ;;  %v10001_v57 = vsel %vm627_vm4, %v10000_v54, -inf }
0x3a96   :  { %10002 = vmax.xlane.f32.xlu0 %v10001_v57 }
0x3b22   :  { %v10164_v58 = vpop.xlane.xlu1 %10163 }
0x3b23   :  { %v10165_v59 = vsub.f32 %v10161_v51, %v10164_v58  ;;  %v10003_v60 = vpop.xlane.xlu0 %10002 }
0x3b24   :  { %v10004_v61 = vsub.f32 %v10000_v54, %v10003_v60 }
0x3b25   :  { %v10166_v0 = vmul.f32 1.442695, %v10165_v59 }
0x3b26   :  { %v10005_v1 = vmul.f32 1.442695, %v10004_v61 }
0x3b27   :  { %21731 = vpow2.f32 %v10166_v0 }
0x3b28   :  { %21733 = vpow2.f32 %v10005_v1 }
0x3b31   :  { %v21732_v2 = vpop.eup %21731 }
0x3b32   :  { %v21734_v63 = vpop.eup %21733  ;;  %v10168_v10 = vsel %vm627_vm4, %v21732_v2, 0.0 }
0x3b33   :  { %10169 = vadd.xlane.f32.xlu1 %v10168_v10  ;;  %v10007_v11 = vsel %vm627_vm4, %v21734_v63, 0.0 }
0x3b34   :  { %10008 = vadd.xlane.f32.xlu0 %v10007_v11 }
0x3bc0   :  { %v10170_v52 = vpop.xlane.xlu1 %10169 }
0x3bc1   :  { %v10009_v3 = vpop.xlane.xlu0 %10008 }
0x3bc2   :  { %21735 = vrcp.f32 %v10009_v3 }
0x3bc3   :  { %21737 = vrcp.f32 %v10170_v52 }
0x3bcc   :  { %v21736_v5 = vpop.eup %21735 }
0x3bcd   :  { %v10011_v12 = vmul.f32 %v21736_v5, %v21734_v63  ;;  %v21738_v14 = vpop.eup %21737 }
0x3bce   :  { %v10172_v6 = vmul.f32 %v21738_v14, %v21732_v2  ;;  %v9052_v14 = vld [vmem:[%s22819_s29 + $0x68] sm:$0xff] }
0x3bcf   :  { %20165 = vmatmul.mubr.msk.f32.vlgmr.msra.gmra.mrb[100].mxu1 %vm627_vm4, %v10011_v12 }
0x3bd0   :  { %20173 = vmatpush3.msra.mxu1 %v22913_v37  ;;  %20174 = vmatprep.mubr.msk.f32.mxu1 %vm21846_vm3, %v21845_v30  ;;  %v21242_v37 = vpack.c.bf16 %v9090_v24, %v9089_v23  ;;  %v9091_v24 = vld [vmem:[%s22828_s21 + $0x60] sm:$0xff] }
0x3bd1   :  { %21223 = vmatprep.subr.bf16.mxu1 %v21222_v13 }
0x3bd3   :  { %20175 = vmatmul.mubr.msk.f32.vlgmr.msra.gmra.mrb[102].mxu1 %vm627_vm4, %v10172_v6 }
0x3bd4   :  { %21225 = vmatpush3.bf16.msra.mxu1 %v21222_v13  ;;  %20195 = vmatprep.mubr.msk.f32.mxu1 %vm383_vm2, %v22848_v31  ;;  %v9051_v13 = vld [vmem:[%s22819_s29 + $0x60] sm:$0xff] }
0x3bd5   :  { %21227 = vmatprep.subr.bf16.mxu1 %v21226_v19  ;;  %v21246_v6 = vpack.c.bf16 %v9052_v14, %v9051_v13 }
0x3bd8   :  { %21229 = vmatpush3.bf16.msra.mxu1 %v21226_v19  ;;  %v9053_v19 = vld [vmem:[%s22819_s29 + $0x70] sm:$0xff] }
0x3bd9   :  { %21239 = vmatprep.subr.bf16.mxu1 %v21238_v22  ;;  %v21250_v23 = vpack.c.bf16 %v9054_v20, %v9053_v19 }
0x3bdb   :  { %20196 = vmatmul.mubr.msk.f32.vlgmr.msra.gmra.mrb[104].mxu1 %vm383_vm2, %v22850_v32 }
0x3bdc   :  { %21241 = vmatpush3.bf16.msra.mxu1 %v21238_v22  ;;  %20217 = vmatprep.mubr.msk.f32.mxu1 %vm383_vm2, %v22808_v62 }
0x3bdd   :  { %21243 = vmatprep.subr.bf16.mxu1 %v21242_v37 }
0x3be0   :  { %21245 = vmatpush3.bf16.msra.mxu1 %v21242_v37  ;;  %v9092_v37 = vld [vmem:[%s22828_s21 + $0x68] sm:$0xff] }
0x3be1   :  { %20225 = vmatprep.subr.mxu1 %v21845_v30  ;;  %v21262_v15 = vpack.c.bf16 %v9092_v37, %v9091_v24 }
0x3be3   :  { %20218 = vmatmul.mubr.msk.f32.vlgmr.msra.gmra.mrb[106].mxu1 %vm383_vm2, %v22810_v4 }
0x3be4   :  { %20227 = vmatprep.mubr.msk.f32.mxu1 %vm21846_vm3, %v21845_v30 }
0x3ca2   :  { %v10081_v26 = vpop.f32.mrb[100].mxu1 }
0x3ca3   :  { %v20166_v34 = vpop.f32.mrb[101].mxu1  ;;  %20179 = vmatprep.mubr.msk.f32.mxu0 %vm627_vm4, %v10081_v26  ;;  %v9094_v26 = vld [vmem:[%s22828_s21 + $0x78] sm:$0xff] }
0x3ca4   :  { %v9071_v34 = vld [vmem:[%s22797_s28 + $0x60] sm:$0xff] }
0x3ca6   :  { %v10242_v28 = vpop.f32.mrb[102].mxu1 }
0x3ca7   :  { %v20176_v27 = vpop.f32.mrb[103].mxu1  ;;  %20180 = vmatmul.mubr.msk.f32.vlgmr.msra.gmra.mrb[110].mxu0 %vm627_vm4, %v10242_v28 }
0x3ca8   :  { %20183 = vmatpush3.msra.mxu0 %v9099_v25  ;;  %20184 = vmatprep.mubr.msk.f32.mxu0 %vm627_vm4, %v22933_v8  ;;  %v9093_v25 = vld [vmem:[%s22828_s21 + $0x70] sm:$0xff] }
0x3ca9   :  { %21231 = vmatprep.subr.bf16.mxu0 %v21230_v36  ;;  %v21266_v29 = vpack.c.bf16 %v9094_v26, %v9093_v25 }
0x3cae   :  { %v20197_v35 = vpop.f32.mrb[104].mxu1 }
0x3caf   :  { %v10480_v42 = vpop.f32.mrb[105].mxu1  ;;  %20185 = vmatmul.mubr.msk.f32.vlgmr.msra.gmra.mrb[110].mxu0 %vm627_vm4, %v22935_v39  ;;  %v18188_v39 = vld [vmem:[%s22866_s30 + $0x2] ss:$0 sm:$0xff]  ;;  %v10486_v53 = vadd.f32 %v20197_v35, %v18185_v49  ;;  %v21258_v35 = vpack.c.bf16 %v9074_v38, %v9073_v7 }
0x3cb0   :  { %21233 = vmatpush3.bf16.msra.mxu0 %v21230_v36  ;;  %20206 = vmatprep.mubr.msk.f32.mxu0 %vm383_vm2, %v22808_v62  ;;  %v10481_v51 = vadd.f32 %v18185_v49, %v10480_v42  ;;  %v9072_v36 = vld [vmem:[%s22797_s28 + $0x68] sm:$0xff] }
0x3cb1   :  { %21235 = vmatprep.subr.bf16.mxu0 %v21234_v40  ;;  %v21254_v28 = vpack.c.bf16 %v9072_v36, %v9071_v34 }
0x3cb4   :  { %21237 = vmatpush3.bf16.msra.mxu0 %v21234_v40 }
0x3cb5   :  { %20220 = vmatprep.subr.mxu0 %v21845_v30 }
0x3cb6   :  { %v20219_v8 = vpop.f32.mrb[106].mxu1 }
0x3cb7   :  { %v10648_v44 = vadd.f32 %v20219_v8, %v18191_v43  ;;  %20207 = vmatmul.mubr.msk.f32.vlgmr.msra.gmra.mrb[112].mxu0 %vm383_vm2, %v22810_v4  ;;  %v10642_v45 = vpop.f32.mrb[107].mxu1 }
0x3cb8   :  { %v10643_v46 = vadd.f32 %v18191_v43, %v10642_v45  ;;  %20222 = vmatprep.mubr.msk.f32.mxu0 %vm21846_vm3, %v21845_v30  ;;  %v18208_v45 = vld [vmem:[%s22879_s3 + $0x3] ss:$0 sm:$0xff] }
0x3cba   :  { %20226 = vmatpush3.msra.mxu1 %v10643_v46 }
0x3cbb   :  { %20235 = vmatprep.subr.mxu1 %v21845_v30 }
0x3d8a   :  { %v20208_v47 = vpop.f32.mrb[112].mxu0 }
0x3d8b   :  { %v10561_v48 = vpop.f32.mrb[113].mxu0  ;;  %v10567_v41 = vadd.f32 %v20208_v47, %v18188_v39 }
0x3d8c   :  { %v10562_v50 = vadd.f32 %v18188_v39, %v10561_v48  ;;  %v18205_v48 = vld [vmem:[%s22866_s30 + $0x3] ss:$0 sm:$0xff] }
0x3d8e   :  { %20221 = vmatpush3.xpose.msk.msra.mxu0 %vm627_vm4, %v10562_v50  ;;  %v18202_v50 = vld [vmem:[%s22874_s2 + $0x3] ss:$0 sm:$0xff] }
0x3d8f   :  { %20230 = vmatprep.subr.mxu0 %v21845_v30 }
0x3d91   :  { %20223 = vmatmul.mubr.msk.f32.vlgmr.msra.gmra.mrb[114].mxu0 %vm627_vm4, %v10481_v51 }
0x3d92   :  { %20231 = vmatpush3.xpose.msk.msra.mxu0 %vm627_vm4, %v10567_v41  ;;  %20232 = vmatprep.mubr.msk.f32.mxu0 %vm21846_vm3, %v21845_v30 }
0x3d93   :  { %20240 = vmatprep.subr.mxu0 %v9101_v18 }
0x3d95   :  { %20233 = vmatmul.mubr.msk.f32.vlgmr.msra.gmra.mrb[116].mxu0 %vm627_vm4, %v10486_v53 }
0x3d96   :  { %20241 = vmatpush3.msra.mxu0 %v9101_v18 }
0x3d97   :  { %21255 = vmatprep.subr.bf16.mxu0 %v21254_v28 }
0x3e64   :  { %v10723_v54 = vpop.f32.mrb[114].mxu0 }
0x3e65   :  { %v10727_v55 = vmul.f32 0.35355338, %v10723_v54  ;;  %v20224_v56 = vpop.f32.mrb[115].mxu0 }
0x3e67   :  { %v10728_v57 = vsel %vm627_vm4, %v10727_v55, -inf }
0x3e68   :  { %10729 = vmax.xlane.f32.xlu0 %v10728_v57  ;;  %v10884_v58 = vpop.f32.mrb[116].mxu0 }
0x3e69   :  { %v10888_v59 = vmul.f32 0.35355338, %v10884_v58  ;;  %v20234_v60 = vpop.f32.mrb[117].mxu0 }
0x3e6b   :  { %v10889_v61 = vsel %vm627_vm4, %v10888_v59, -inf }
0x3e6c   :  { %10890 = vmax.xlane.f32.xlu1 %v10889_v61 }
0x3ef5   :  { %v10730_v0 = vpop.xlane.xlu0 %10729 }
0x3ef6   :  { %v10731_v1 = vsub.f32 %v10727_v55, %v10730_v0 }
0x3ef8   :  { %v10732_v2 = vmul.f32 1.442695, %v10731_v1 }
0x3ef9   :  { %v10891_v63 = vpop.xlane.xlu1 %10890 }
0x3efa   :  { %21739 = vpow2.f32 %v10732_v2  ;;  %v10892_v10 = vsub.f32 %v10888_v59, %v10891_v63 }
0x3efc   :  { %v10893_v11 = vmul.f32 1.442695, %v10892_v10 }
0x3efe   :  { %21741 = vpow2.f32 %v10893_v11 }
0x3f04   :  { %v21740_v52 = vpop.eup %21739 }
0x3f05   :  { %v10734_v3 = vsel %vm627_vm4, %v21740_v52, 0.0 }
0x3f06   :  { %10735 = vadd.xlane.f32.xlu0 %v10734_v3 }
0x3f08   :  { %v21742_v9 = vpop.eup %21741 }
0x3f09   :  { %v10895_v33 = vsel %vm627_vm4, %v21742_v9, 0.0 }
0x3f0a   :  { %10896 = vadd.xlane.f32.xlu1 %v10895_v33 }
0x3f93   :  { %v10736_v5 = vpop.xlane.xlu0 %10735 }
0x3f94   :  { %21743 = vrcp.f32 %v10736_v5 }
0x3f97   :  { %v10897_v12 = vpop.xlane.xlu1 %10896 }
0x3f98   :  { %21745 = vrcp.f32 %v10897_v12 }
0x3f9e   :  { %v21744_v16 = vpop.eup %21743 }
0x3f9f   :  { %v10738_v17 = vmul.f32 %v21744_v16, %v21740_v52 }
0x3fa1   :  { %20228 = vmatmul.mubr.msk.f32.vlgmr.msra.gmra.mrb[108].mxu1 %vm627_vm4, %v10738_v17 }
0x3fa2   :  { %v21746_v21 = vpop.eup %21745  ;;  %20236 = vmatpush3.msra.mxu1 %v10648_v44  ;;  %20237 = vmatprep.mubr.msk.f32.mxu1 %vm21846_vm3, %v21845_v30 }
0x3fa3   :  { %v10899_v22 = vmul.f32 %v21746_v21, %v21742_v9  ;;  %21247 = vmatprep.subr.bf16.mxu1 %v21246_v6  ;;  %v9102_v21 = vld [vmem:[%s22978_s8 + $0x18] sm:$0xff] }
0x3fa5   :  { %20238 = vmatmul.mubr.msk.f32.vlgmr.msra.gmra.mrb[110].mxu1 %vm627_vm4, %v10899_v22 }
0x3fa6   :  { %21249 = vmatpush3.bf16.msra.mxu1 %v21246_v6  ;;  %20253 = vmatprep.mubr.msk.f32.mxu1 %vm383_vm2, %v22848_v31 }
0x3fa7   :  { %21251 = vmatprep.subr.bf16.mxu1 %v21250_v23 }
0x3faa   :  { %21253 = vmatpush3.bf16.msra.mxu1 %v21250_v23 }
0x3fab   :  { %21263 = vmatprep.subr.bf16.mxu1 %v21262_v15 }
0x3fad   :  { %20254 = vmatmul.mubr.msk.f32.vlgmr.msra.gmra.mrb[112].mxu1 %vm383_vm2, %v22850_v32 }
0x3fae   :  { %21265 = vmatpush3.bf16.msra.mxu1 %v21262_v15  ;;  %20275 = vmatprep.mubr.msk.f32.mxu1 %vm383_vm2, %v22808_v62  ;;  %v18219_v15 = vld [vmem:[%s23076_s23] ss:$0 sm:$0xff] }
0x3faf   :  { %21267 = vmatprep.subr.bf16.mxu1 %v21266_v29 }
0x3fb2   :  { %21269 = vmatpush3.bf16.msra.mxu1 %v21266_v29 }
0x3fb3   :  { %20288 = vmatprep.subr.mxu1 %v21845_v30 }
0x3fb5   :  { %20276 = vmatmul.mubr.msk.f32.vlgmr.msra.gmra.mrb[114].mxu1 %vm383_vm2, %v22810_v4 }
0x3fb6   :  { %20290 = vmatprep.mubr.msk.f32.mxu1 %vm21846_vm3, %v21845_v30 }
0x4074   :  { %v10808_v27 = vpop.f32.mrb[108].mxu1 }
0x4075   :  { %v20229_v40 = vpop.f32.mrb[109].mxu1  ;;  %20242 = vmatprep.mubr.msk.f32.mxu0 %vm627_vm4, %v10808_v27 }
0x4078   :  { %v10969_v42 = vpop.f32.mrb[110].mxu1 }
0x4079   :  { %v20239_v43 = vpop.f32.mrb[111].mxu1  ;;  %20243 = vmatmul.mubr.msk.f32.vlgmr.msra.gmra.mrb[110].mxu0 %vm627_vm4, %v10969_v42 }
0x407a   :  { %21257 = vmatpush3.bf16.msra.mxu0 %v21254_v28  ;;  %20264 = vmatprep.mubr.msk.f32.mxu0 %vm383_vm2, %v22808_v62 }
0x407b   :  { %21259 = vmatprep.subr.bf16.mxu0 %v21258_v35 }
0x407e   :  { %21261 = vmatpush3.bf16.msra.mxu0 %v21258_v35 }
0x407f   :  { %20278 = vmatprep.subr.mxu0 %v21845_v30 }
0x4080   :  { %v20255_v8 = vpop.f32.mrb[112].mxu1 }
0x4081   :  { %v11128_v44 = vpop.f32.mrb[113].mxu1  ;;  %20265 = vmatmul.mubr.msk.f32.vlgmr.msra.gmra.mrb[118].mxu0 %vm383_vm2, %v22810_v4  ;;  %v11134_v54 = vadd.f32 %v20255_v8, %v18202_v50 }
0x4082   :  { %20280 = vmatprep.mubr.msk.f32.mxu0 %vm21846_vm3, %v21845_v30  ;;  %v11129_v55 = vadd.f32 %v18202_v50, %v11128_v44  ;;  %v11852_v50 = vld [vmem:[%s23097_s16] sm:$0xff] }
0x4088   :  { %v20277_v46 = vpop.f32.mrb[114].mxu1 }
0x4089   :  { %v11296_v39 = vadd.f32 %v20277_v46, %v18208_v45  ;;  %v11290_v47 = vpop.f32.mrb[115].mxu1  ;;  %v11759_v46 = vld [vmem:[%s23088_s6 + $0x8] sm:$0xff] }
0x408a   :  { %v11291_v56 = vadd.f32 %v18208_v45, %v11290_v47  ;;  %v11760_v47 = vld [vmem:[%s23088_s6 + $0x10] sm:$0xff] }
0x4154   :  { %v20266_v49 = vpop.f32.mrb[118].mxu0 }
0x4155   :  { %v11215_v51 = vadd.f32 %v20266_v49, %v18205_v48  ;;  %v11209_v41 = vpop.f32.mrb[119].mxu0 }
0x4156   :  { %v11210_v53 = vadd.f32 %v18205_v48, %v11209_v41  ;;  %v11761_v48 = vld [vmem:[%s23088_s6 + $0x18] sm:$0xff]  ;;  %v11854_v41 = vld [vmem:[%s23097_s16 + $0x10] sm:$0xff] }
0x4157   :  { %20289 = vmatpush3.xpose.msk.msra.mxu1 %vm627_vm4, %v11215_v51  ;;  %v21274_v49 = vpack.c.bf16 %v11761_v48, %v11760_v47  ;;  %v11853_v51 = vld [vmem:[%s23097_s16 + $0x8] sm:$0xff] }
0x4158   :  { %20279 = vmatpush3.xpose.msk.msra.mxu0 %vm627_vm4, %v11210_v53  ;;  %v21278_v53 = vpack.c.bf16 %v11853_v51, %v11852_v50  ;;  %v18271_v47 = vld [vmem:[%s22514_s15 + $0x88] sm:$0xff]  ;;  %v18233_v50 = vld [vmem:[%s22507_s9 + $0x98] sm:$0xff] }
0x4159   :  { %20283 = vmatprep.subr.mxu0 %v21845_v30 }
0x415a   :  { %20291 = vmatmul.mubr.msk.f32.vlgmr.msra.gmra.mrb[116].mxu1 %vm627_vm4, %v11134_v54  ;;  %v11855_v54 = vld [vmem:[%s23097_s16 + $0x18] sm:$0xff] }
0x415b   :  { %20281 = vmatmul.mubr.msk.f32.vlgmr.msra.gmra.mrb[120].mxu0 %vm627_vm4, %v11129_v55  ;;  %v21282_v55 = vpack.c.bf16 %v11855_v54, %v11854_v41  ;;  %v18272_v41 = vld [vmem:[%s22514_s15 + $0x90] sm:$0xff] }
0x415c   :  { %20284 = vmatpush3.msra.mxu0 %v11291_v56  ;;  %20285 = vmatprep.mubr.msk.f32.mxu0 %vm21846_vm3, %v21845_v30  ;;  %v11856_v56 = vld [vmem:[%s23097_s16 + $0x20] sm:$0xff] }
0x415d   :  { %20293 = vmatprep.subr.mxu0 %v21845_v30 }
0x422d   :  { %v11532_v57 = vpop.f32.mrb[116].mxu1 }
0x422e   :  { %v11536_v58 = vmul.f32 0.35355338, %v11532_v57  ;;  %v11371_v59 = vpop.f32.mrb[120].mxu0  ;;  %v20292_v60 = vpop.f32.mrb[117].mxu1  ;;  %v11857_v57 = vld [vmem:[%s23097_s16 + $0x28] sm:$0xff] }
0x422f   :  { %v11375_v61 = vmul.f32 0.35355338, %v11371_v59  ;;  %v20282_v0 = vpop.f32.mrb[121].mxu0 }
0x4230   :  { %v11537_v1 = vsel %vm627_vm4, %v11536_v58, -inf }
0x4231   :  { %11538 = vmax.xlane.f32.xlu1 %v11537_v1  ;;  %v11376_v2 = vsel %vm627_vm4, %v11375_v61, -inf }
0x4232   :  { %11377 = vmax.xlane.f32.xlu0 %v11376_v2 }
0x42be   :  { %v11539_v63 = vpop.xlane.xlu1 %11538 }
0x42bf   :  { %v11540_v10 = vsub.f32 %v11536_v58, %v11539_v63  ;;  %v11378_v11 = vpop.xlane.xlu0 %11377  ;;  %v21286_v58 = vpack.c.bf16 %v11857_v57, %v11856_v56  ;;  %v18251_v56 = vld [vmem:[%s22521_s25 + $0x88] sm:$0xff] }
0x42c0   :  { %v11379_v52 = vsub.f32 %v11375_v61, %v11378_v11 }
0x42c1   :  { %v11541_v3 = vmul.f32 1.442695, %v11540_v10  ;;  %v18220_v10 = vld [vmem:[%s23108_s19] ss:$0 sm:$0xff] }
0x42c2   :  { %v11380_v9 = vmul.f32 1.442695, %v11379_v52 }
0x42c3   :  { %21747 = vpow2.f32 %v11541_v3 }
0x42c4   :  { %21749 = vpow2.f32 %v11380_v9  ;;  %v18221_v9 = vld [vmem:[%s23113_s4] ss:$0 sm:$0xff] }
0x42cd   :  { %v21748_v33 = vpop.eup %21747 }
0x42ce   :  { %v21750_v5 = vpop.eup %21749  ;;  %v11543_v12 = vsel %vm627_vm4, %v21748_v33, 0.0 }
0x42cf   :  { %11544 = vadd.xlane.f32.xlu1 %v11543_v12  ;;  %v11382_v13 = vsel %vm627_vm4, %v21750_v5, 0.0 }
0x42d0   :  { %11383 = vadd.xlane.f32.xlu0 %v11382_v13 }
0x435c   :  { %v11545_v14 = vpop.xlane.xlu1 %11544 }
0x435d   :  { %v11384_v16 = vpop.xlane.xlu0 %11383 }
0x435e   :  { %21751 = vrcp.f32 %v11384_v16  ;;  %v11859_v16 = vld [vmem:[%s23097_s16 + $0x38] sm:$0xff] }
0x435f   :  { %21753 = vrcp.f32 %v11545_v14  ;;  %v11858_v14 = vld [vmem:[%s23097_s16 + $0x30] sm:$0xff] }
0x4368   :  { %v21752_v17 = vpop.eup %21751 }
0x4369   :  { %v11386_v6 = vmul.f32 %v21752_v17, %v21750_v5  ;;  %v21754_v19 = vpop.eup %21753  ;;  %v21290_v17 = vpack.c.bf16 %v11859_v16, %v11858_v14 }
0x436a   :  { %v11547_v20 = vmul.f32 %v21754_v19, %v21748_v33 }
0x436b   :  { %20286 = vmatmul.mubr.msk.f32.vlgmr.msra.gmra.mrb[122].mxu0 %vm627_vm4, %v11386_v6  ;;  %v18222_v6 = vld [vmem:[%s23124_s10] ss:$0 sm:$0xff]  ;;  %s23158_s10 = sld [smem:[%s23657_s0 + %s21888_s27]]  }
0x436c   :  { %20294 = vmatpush3.msra.mxu0 %v11296_v39  ;;  %20295 = vmatprep.mubr.msk.f32.mxu0 %vm21846_vm3, %v21845_v30 }
0x436d   :  { %20298 = vmatprep.subr.mxu0 %v9102_v21 }
0x436f   :  { %20296 = vmatmul.mubr.msk.f32.vlgmr.msra.gmra.mrb[124].mxu0 %vm627_vm4, %v11547_v20 }
0x4370   :  { %20299 = vmatpush3.msra.mxu0 %v9102_v21 }
0x4371   :  { %21279 = vmatprep.subr.bf16.mxu0 %v21278_v53 }
0x443e   :  { %v11456_v22 = vpop.f32.mrb[122].mxu0 }
0x443f   :  { %v20287_v23 = vpop.f32.mrb[123].mxu0  ;;  %20300 = vmatprep.mubr.msk.f32.mxu0 %vm627_vm4, %v11456_v22 }
0x4442   :  { %v11617_v24 = vpop.f32.mrb[124].mxu0 }
0x4443   :  { %v20297_v37 = vpop.f32.mrb[125].mxu0  ;;  %20301 = vmatmul.mubr.msk.f32.vlgmr.msra.gmra.mrb[110].mxu0 %vm627_vm4, %v11617_v24 }
0x4444   :  { %21281 = vmatpush3.bf16.msra.mxu0 %v21278_v53  ;;  %v18225_v37 = vld [vmem:[%s23132_s18] ss:$0 sm:$0xff]  ;;  %v18273_v53 = vld [vmem:[%s22514_s15 + $0x98] sm:$0xff] }
0x4445   :  { %21283 = vmatprep.subr.bf16.mxu0 %v21282_v55  ;;  %v21314_v54 = vpack.c.bf16 %v18273_v53, %v18272_v41  ;;  %v18316_v53 = vld [vmem:[%s22564_s13 + $0x5] ss:$0 sm:$0xff] }
0x4448   :  { %21285 = vmatpush3.bf16.msra.mxu0 %v21282_v55  ;;  %v18250_v55 = vld [vmem:[%s22521_s25 + $0x80] sm:$0xff] }
0x4449   :  { %21287 = vmatprep.subr.bf16.mxu0 %v21286_v58  ;;  %v21302_v57 = vpack.c.bf16 %v18251_v56, %v18250_v55 }
0x444c   :  { %21289 = vmatpush3.bf16.msra.mxu0 %v21286_v58 }
0x444d   :  { %21291 = vmatprep.subr.bf16.mxu0 %v21290_v17 }
0x4450   :  { %21293 = vmatpush3.bf16.msra.mxu0 %v21290_v17  ;;  %v18301_v17 = vld [vmem:[%s22564_s13 + $0x4] ss:$0 sm:$0xff] }
0x4516   :  { %v20302_v25 = vpop.f32.mrb[110].mxu0 }
0x4517   :  { %v11711_v26 = vadd.f32 %v20302_v25, %v18219_v15  ;;  %v11693_v29 = vpop.f32.mrb[111].mxu0 }
0x4518   :  { %v11710_v18 = vadd.f32 %v18219_v15, %v11693_v29 }
0x4519   :  { %v11713_v34 = vadd.f32 %v11711_v26, %v22850_v32 }
0x451a   :  { %v11712_v36 = vadd.f32 %v11710_v18, %v22848_v31  ;;  %v11758_v31 = vld [vmem:[%s23088_s6] sm:$0xff] }
0x451b   :  { %v11719_v28 = vsel %vm383_vm2, %v11713_v34, 0.0  ;;  %v21270_v39 = vpack.c.bf16 %v11759_v46, %v11758_v31  ;;  %v18231_v31 = vld [vmem:[%s22507_s9 + $0x88] sm:$0xff] }
0x451c   :  { %11720 = vadd.xlane.f32.xlu1 %v11719_v28  ;;  %v11716_v27 = vsel %vm383_vm2, %v11712_v36, 0.0 }
0x451d   :  { %11717 = vadd.xlane.f32.xlu0 %v11716_v27  ;;  %21271 = vmatprep.subr.bf16.mxu1 %v21270_v39 }
0x451e   :  { %21273 = vmatpush3.bf16.msra.mxu1 %v21270_v39  ;;  %v18270_v39 = vld [vmem:[%s22514_s15 + $0x80] sm:$0xff] }
0x451f   :  { %21275 = vmatprep.subr.bf16.mxu1 %v21274_v49  ;;  %v21310_v48 = vpack.c.bf16 %v18271_v47, %v18270_v39 }
0x4521   :  { %21311 = vmatprep.subr.bf16.mxu0 %v21310_v48 }
0x4522   :  { %21277 = vmatpush3.bf16.msra.mxu1 %v21274_v49  ;;  %v18232_v49 = vld [vmem:[%s22507_s9 + $0x90] sm:$0xff] }
0x4523   :  { %v21298_v51 = vpack.c.bf16 %v18233_v50, %v18232_v49 }
0x45a9   :  { %v11721_v7 = vpop.xlane.xlu1 %11720 }
0x45aa   :  { %v11723_v38 = vmul.f32 0.03125, %v11721_v7  ;;  %v11718_v40 = vpop.xlane.xlu0 %11717 }
0x45ab   :  { %v11722_v35 = vmul.f32 0.03125, %v11718_v40 }
0x45ac   :  { %v11725_v42 = vsub.f32 %v11713_v34, %v11723_v38 }
0x45ad   :  { %v11724_v43 = vsub.f32 %v11712_v36, %v11722_v35 }
0x45ae   :  { %v11727_v8 = vmul.f32 %v11725_v42, %v11725_v42 }
0x45af   :  { %v11726_v44 = vmul.f32 %v11724_v43, %v11724_v43 }
0x45b0   :  { %v11731_v45 = vsel %vm383_vm2, %v11727_v8, 0.0 }
0x45b1   :  { %11732 = vadd.xlane.f32.xlu1 %v11731_v45  ;;  %v11728_v32 = vsel %vm383_vm2, %v11726_v44, 0.0 }
0x45b2   :  { %11729 = vadd.xlane.f32.xlu0 %v11728_v32  ;;  %v18230_v32 = vld [vmem:[%s22507_s9 + $0x80] sm:$0xff] }
0x45b3   :  { %v21294_v46 = vpack.c.bf16 %v18231_v31, %v18230_v32 }
0x45b5   :  { %21295 = vmatprep.subr.bf16.mxu1 %v21294_v46 }
0x463e   :  { %v11733_v59 = vpop.xlane.xlu1 %11732 }
0x463f   :  { %v11735_v60 = vmul.f32 0.03125, %v11733_v59  ;;  %v11730_v61 = vpop.xlane.xlu0 %11729 }
0x4640   :  { %v11734_v0 = vmul.f32 0.03125, %v11730_v61 }
0x4641   :  { %v11737_v1 = vadd.f32 1e-05, %v11735_v60 }
0x4642   :  { %v11736_v2 = vadd.f32 1e-05, %v11734_v0 }
0x4643   :  { %21755 = vrsqrt.f32 %v11737_v1 }
0x4644   :  { %21757 = vrsqrt.f32 %v11736_v2 }
0x464d   :  { %v21756_v63 = vpop.eup %21755 }
0x464e   :  { %v21758_v11 = vpop.eup %21757  ;;  %v11741_v52 = vmul.f32 %v21756_v63, %v11725_v42  ;;  %v18228_v63 = vld [vmem:[%s23153_s14] ss:$0 sm:$0xff] }
0x464f   :  { %v11740_v3 = vmul.f32 %v21758_v11, %v11724_v43 }
0x4650   :  { %v11749_v33 = vmul.f32 %v18220_v10, %v11741_v52 }
0x4651   :  { %v11748_v5 = vmul.f32 %v18220_v10, %v11740_v3  ;;  %v18229_v3 = vld [vmem:[%s23158_s10] ss:$0 sm:$0xff] }
0x4652   :  { %v11757_v13 = vadd.f32 %v18221_v9, %v11749_v33 }
0x4653   :  { %v11756_v12 = vadd.f32 %v18221_v9, %v11748_v5  ;;  %v18252_v5 = vld [vmem:[%s22521_s25 + $0x90] sm:$0xff] }
0x4655   :  { %20311 = vmatprep.mubr.msk.f32.mxu1 %vm383_vm2, %v11756_v12 }
0x4656   :  { %20312 = vmatmul.mubr.msk.f32.vlgmr.msra.gmra.mrb[118].mxu1 %vm383_vm2, %v11757_v13 }
0x4657   :  { %21297 = vmatpush3.bf16.msra.mxu1 %v21294_v46 }
0x4658   :  { %21299 = vmatprep.subr.bf16.mxu1 %v21298_v51 }
0x465b   :  { %21301 = vmatpush3.bf16.msra.mxu1 %v21298_v51 }
0x465c   :  { %21303 = vmatprep.subr.bf16.mxu1 %v21302_v57 }
0x4729   :  { %v20313_v19 = vpop.f32.mrb[118].mxu1 }
0x472a   :  { %v11847_v20 = vadd.f32 %v20313_v19, %v18222_v6  ;;  %v11841_v21 = vpop.f32.mrb[119].mxu1 }
0x472b   :  { %v11842_v22 = vadd.f32 %v18222_v6, %v11841_v21 }
0x472c   :  { %v11851_v24 = vmax.f32 %v11847_v20, 0.0 }
0x472d   :  { %v11850_v23 = vmax.f32 %v11842_v22, 0.0 }
0x472f   :  { %20330 = vmatprep.mubr.msk.f32.mxu0 %vm3137_vm5, %v11850_v23  ;;  %v18234_v23 = vld [vmem:[%s22507_s9 + $0xa0] sm:$0xff] }
0x4730   :  { %20331 = vmatmul.mubr.msk.f32.vlgmr.msra.gmra.mrb[126].mxu0 %vm3137_vm5, %v11851_v24  ;;  %v18235_v24 = vld [vmem:[%s22507_s9 + $0xa8] sm:$0xff] }
0x4731   :  { %21313 = vmatpush3.bf16.msra.mxu0 %v21310_v48 }
0x4732   :  { %21315 = vmatprep.subr.bf16.mxu0 %v21314_v54 }
0x4735   :  { %21317 = vmatpush3.bf16.msra.mxu0 %v21314_v54 }
0x4736   :  { %20376 = vmatprep.subr.mxu0 %v21845_v30 }
0x4803   :  { %v20332_v15 = vpop.f32.mrb[126].mxu0 }
0x4804   :  { %v11945_v25 = vadd.f32 %v20332_v15, %v18225_v37  ;;  %v11939_v26 = vpop.f32.mrb[127].mxu0 }
0x4805   :  { %v11940_v29 = vadd.f32 %v18225_v37, %v11939_v26  ;;  %v18298_v37 = vld [vmem:[%s22573_s7 + $0x4] ss:$0 sm:$0xff] }
0x4806   :  { %v11949_v18 = vadd.f32 %v11945_v25, %v11757_v13  ;;  %v21318_v25 = vpack.c.bf16 %v18235_v24, %v18234_v23  ;;  %v18295_v26 = vld [vmem:[%s22578_s26 + $0x4] ss:$0 sm:$0xff] }
0x4807   :  { %v11948_v34 = vadd.f32 %v11940_v29, %v11756_v12  ;;  %v18253_v12 = vld [vmem:[%s22521_s25 + $0x98] sm:$0xff] }
0x4808   :  { %v11955_v36 = vsel %vm383_vm2, %v11949_v18, 0.0  ;;  %v21306_v16 = vpack.c.bf16 %v18253_v12, %v18252_v5 }
0x4809   :  { %11956 = vadd.xlane.f32.xlu1 %v11955_v36  ;;  %v11952_v28 = vsel %vm383_vm2, %v11948_v34, 0.0  ;;  %v18236_v36 = vld [vmem:[%s22507_s9 + $0xb0] sm:$0xff] }
0x480a   :  { %11953 = vadd.xlane.f32.xlu0 %v11952_v28  ;;  %v18237_v28 = vld [vmem:[%s22507_s9 + $0xb8] sm:$0xff] }
0x4896   :  { %v11957_v27 = vpop.xlane.xlu1 %11956 }
0x4897   :  { %v11959_v7 = vmul.f32 0.03125, %v11957_v27  ;;  %v11954_v38 = vpop.xlane.xlu0 %11953 }
0x4898   :  { %v11958_v40 = vmul.f32 0.03125, %v11954_v38  ;;  %v21322_v38 = vpack.c.bf16 %v18237_v28, %v18236_v36 }
0x4899   :  { %v11961_v35 = vsub.f32 %v11949_v18, %v11959_v7 }
0x489a   :  { %v11960_v42 = vsub.f32 %v11948_v34, %v11958_v40  ;;  %v18274_v40 = vld [vmem:[%s22514_s15 + $0xa0] sm:$0xff] }
0x489b   :  { %v11963_v43 = vmul.f32 %v11961_v35, %v11961_v35 }
0x489c   :  { %v11962_v8 = vmul.f32 %v11960_v42, %v11960_v42 }
0x489d   :  { %v11967_v44 = vsel %vm383_vm2, %v11963_v43, 0.0 }
0x489e   :  { %11968 = vadd.xlane.f32.xlu1 %v11967_v44  ;;  %v11964_v45 = vsel %vm383_vm2, %v11962_v8, 0.0  ;;  %v18276_v8 = vld [vmem:[%s22514_s15 + $0xb0] sm:$0xff]  ;;  %v18277_v44 = vld [vmem:[%s22514_s15 + $0xb8] sm:$0xff] }
0x489f   :  { %11965 = vadd.xlane.f32.xlu0 %v11964_v45  ;;  %v21338_v45 = vpack.c.bf16 %v18277_v44, %v18276_v8 }
0x492b   :  { %v11969_v58 = vpop.xlane.xlu1 %11968 }
0x492c   :  { %v11971_v59 = vmul.f32 0.03125, %v11969_v58  ;;  %v11966_v60 = vpop.xlane.xlu0 %11965 }
0x492d   :  { %v11970_v61 = vmul.f32 0.03125, %v11966_v60 }
0x492e   :  { %v11973_v0 = vadd.f32 1e-05, %v11971_v59 }
0x492f   :  { %v11972_v1 = vadd.f32 1e-05, %v11970_v61 }
0x4930   :  { %21759 = vrsqrt.f32 %v11973_v0 }
0x4931   :  { %21761 = vrsqrt.f32 %v11972_v1 }
0x493a   :  { %v21760_v2 = vpop.eup %21759 }
0x493b   :  { %v21762_v10 = vpop.eup %21761  ;;  %v11977_v11 = vmul.f32 %v21760_v2, %v11961_v35  ;;  %v18275_v35 = vld [vmem:[%s22514_s15 + $0xa8] sm:$0xff] }
0x493c   :  { %v11976_v52 = vmul.f32 %v21762_v10, %v11960_v42  ;;  %v21334_v43 = vpack.c.bf16 %v18275_v35, %v18274_v40 }
0x493d   :  { %v11985_v9 = vmul.f32 %v18228_v63, %v11977_v11 }
0x493e   :  { %v11984_v33 = vmul.f32 %v18228_v63, %v11976_v52 }
0x493f   :  { %v23166_v14 = vadd.f32 %v18229_v3, %v11985_v9  ;;  %v18255_v9 = vld [vmem:[%s22521_s25 + $0xa8] sm:$0xff] }
0x4940   :  { %v23164_v13 = vadd.f32 %v18229_v3, %v11984_v33  ;;  %v18254_v3 = vld [vmem:[%s22521_s25 + $0xa0] sm:$0xff] }
0x4941   :  { %v21326_v12 = vpack.c.bf16 %v18255_v9, %v18254_v3  ;;  %v18291_v3 = vld [vmem:[%s22680_s12 + $0x28] sm:$0xff]  ;;  %v18290_v9 = vld [vmem:[%s22680_s12 + $0x20] sm:$0xff] }
0x4942   :  { %20341 = vmatprep.mubr.msk.f32.mxu1 %vm383_vm2, %v23164_v13  ;;  %20363 = vmatprep.mubr.msk.f32.mxu0 %vm383_vm2, %v23164_v13 }
0x4943   :  { %20342 = vmatmul.mubr.msk.f32.vlgmr.msra.gmra.mrb[120].mxu1 %vm383_vm2, %v23166_v14  ;;  %20364 = vmatmul.mubr.msk.f32.vlgmr.msra.gmra.mrb[128].mxu0 %vm383_vm2, %v23166_v14 }
0x4944   :  { %21305 = vmatpush3.bf16.msra.mxu1 %v21302_v57  ;;  %20352 = vmatprep.mubr.msk.f32.mxu1 %vm383_vm2, %v23164_v13 }
0x4945   :  { %21307 = vmatprep.subr.bf16.mxu1 %v21306_v16  ;;  %20378 = vmatprep.mubr.msk.f32.mxu0 %vm21846_vm3, %v21845_v30 }
0x4948   :  { %21309 = vmatpush3.bf16.msra.mxu1 %v21306_v16 }
0x4949   :  { %20366 = vmatprep.subr.mxu1 %v21845_v30 }
0x494b   :  { %20353 = vmatmul.mubr.msk.f32.vlgmr.msra.gmra.mrb[122].mxu1 %vm383_vm2, %v23166_v14 }
0x494c   :  { %20368 = vmatprep.mubr.msk.f32.mxu1 %vm21846_vm3, %v21845_v30 }
0x4a16   :  { %v20343_v6 = vpop.f32.mrb[120].mxu1  ;;  %v20365_v19 = vpop.f32.mrb[128].mxu0 }
0x4a17   :  { %v23186_v20 = vadd.f32 %v20365_v19, %v18301_v17  ;;  %v12145_v21 = vpop.f32.mrb[121].mxu1  ;;  %v12307_v22 = vpop.f32.mrb[129].mxu0  ;;  %v12151_v27 = vadd.f32 %v20343_v6, %v18295_v26  ;;  %v18257_v6 = vld [vmem:[%s22521_s25 + $0xb8] sm:$0xff] }
0x4a18   :  { %v12146_v7 = vadd.f32 %v18295_v26, %v12145_v21  ;;  %v12308_v42 = vadd.f32 %v18301_v17, %v12307_v22  ;;  %v18256_v17 = vld [vmem:[%s22521_s25 + $0xb0] sm:$0xff] }
0x4a19   :  { %v21330_v21 = vpack.c.bf16 %v18257_v6, %v18256_v17 }
0x4a1e   :  { %v20354_v15 = vpop.f32.mrb[122].mxu1 }
0x4a1f   :  { %v12232_v29 = vadd.f32 %v20354_v15, %v18298_v37  ;;  %v12226_v18 = vpop.f32.mrb[123].mxu1 }
0x4a20   :  { %v12227_v34 = vadd.f32 %v18298_v37, %v12226_v18  ;;  %v18313_v37 = vld [vmem:[%s22573_s7 + $0x5] ss:$0 sm:$0xff] }
0x4a21   :  { %20377 = vmatpush3.xpose.msk.msra.mxu0 %vm627_vm4, %v12232_v29 }
0x4a22   :  { %20367 = vmatpush3.xpose.msk.msra.mxu1 %vm627_vm4, %v12227_v34  ;;  %21319 = vmatprep.subr.bf16.mxu0 %v21318_v25 }
0x4a23   :  { %20371 = vmatprep.subr.mxu1 %v21845_v30 }
0x4a24   :  { %20379 = vmatmul.mubr.msk.f32.vlgmr.msra.gmra.mrb[130].mxu0 %vm627_vm4, %v12151_v27 }
0x4a25   :  { %20369 = vmatmul.mubr.msk.f32.vlgmr.msra.gmra.mrb[124].mxu1 %vm627_vm4, %v12146_v7  ;;  %21321 = vmatpush3.bf16.msra.mxu0 %v21318_v25  ;;  %v18310_v25 = vld [vmem:[%s22578_s26 + $0x5] ss:$0 sm:$0xff] }
0x4a26   :  { %20394 = vmatprep.mubr.msk.f32.mxu0 %vm383_vm2, %v23164_v13  ;;  %20372 = vmatpush3.msra.mxu1 %v12308_v42 }
0x4a27   :  { %21323 = vmatprep.subr.bf16.mxu0 %v21322_v38  ;;  %20373 = vmatprep.mubr.msk.f32.mxu1 %vm21846_vm3, %v21845_v30 }
0x4a28   :  { %20381 = vmatprep.subr.mxu1 %v21845_v30 }
0x4a29   :  { %21325 = vmatpush3.bf16.msra.mxu0 %v21322_v38 }
0x4a2a   :  { %21335 = vmatprep.subr.bf16.mxu0 %v21334_v43 }
0x4a2c   :  { %20395 = vmatmul.mubr.msk.f32.vlgmr.msra.gmra.mrb[132].mxu0 %vm383_vm2, %v23166_v14 }
0x4a2d   :  { %21337 = vmatpush3.bf16.msra.mxu0 %v21334_v43  ;;  %20416 = vmatprep.mubr.msk.f32.mxu0 %vm383_vm2, %v23164_v13 }
0x4a2e   :  { %21339 = vmatprep.subr.bf16.mxu0 %v21338_v45 }
0x4a31   :  { %21341 = vmatpush3.bf16.msra.mxu0 %v21338_v45 }
0x4a32   :  { %20429 = vmatprep.subr.mxu0 %v21845_v30 }
0x4a34   :  { %20417 = vmatmul.mubr.msk.f32.vlgmr.msra.gmra.mrb[134].mxu0 %vm383_vm2, %v23166_v14 }
0x4a35   :  { %20431 = vmatprep.mubr.msk.f32.mxu0 %vm21846_vm3, %v21845_v30 }
0x4af7   :  { %v12549_v32 = vpop.f32.mrb[130].mxu0 }
0x4af8   :  { %v12553_v31 = vmul.f32 0.35355338, %v12549_v32  ;;  %v12388_v46 = vpop.f32.mrb[124].mxu1  ;;  %v20380_v39 = vpop.f32.mrb[131].mxu0 }
0x4af9   :  { %v12392_v47 = vmul.f32 0.35355338, %v12388_v46  ;;  %v20370_v48 = vpop.f32.mrb[125].mxu1 }
0x4afa   :  { %v12554_v49 = vsel %vm627_vm4, %v12553_v31, -inf }
0x4afb   :  { %12555 = vmax.xlane.f32.xlu1 %v12554_v49  ;;  %v12393_v50 = vsel %vm627_vm4, %v12392_v47, -inf }
0x4afc   :  { %12394 = vmax.xlane.f32.xlu0 %v12393_v50 }
0x4aff   :  { %v20396_v51 = vpop.f32.mrb[132].mxu0 }
0x4b00   :  { %v12710_v41 = vpop.f32.mrb[133].mxu0  ;;  %v12716_v34 = vadd.f32 %v20396_v51, %v18310_v25 }
0x4b01   :  { %v12711_v36 = vadd.f32 %v18310_v25, %v12710_v41  ;;  %v18335_v25 = vld [vmem:[%s22564_s13 + $0x6] ss:$0 sm:$0xff] }
0x4b07   :  { %v20418_v54 = vpop.f32.mrb[134].mxu0 }
0x4b08   :  { %v23220_v55 = vadd.f32 %v20418_v54, %v18316_v53  ;;  %v12872_v56 = vpop.f32.mrb[135].mxu0  ;;  %v18239_v54 = vld [vmem:[%s22507_s9 + $0xc8] sm:$0xff] }
0x4b09   :  { %v12873_v28 = vadd.f32 %v18316_v53, %v12872_v56  ;;  %v18238_v53 = vld [vmem:[%s22507_s9 + $0xc0] sm:$0xff] }
0x4b88   :  { %v12556_v57 = vpop.xlane.xlu1 %12555 }
0x4b89   :  { %v12557_v58 = vsub.f32 %v12553_v31, %v12556_v57  ;;  %v12395_v59 = vpop.xlane.xlu0 %12394 }
0x4b8a   :  { %v12396_v60 = vsub.f32 %v12392_v47, %v12395_v59 }
0x4b8b   :  { %v12558_v61 = vmul.f32 1.442695, %v12557_v58  ;;  %v21342_v58 = vpack.c.bf16 %v18239_v54, %v18238_v53 }
0x4b8c   :  { %v12397_v0 = vmul.f32 1.442695, %v12396_v60  ;;  %v18240_v60 = vld [vmem:[%s22507_s9 + $0xd0] sm:$0xff] }
0x4b8d   :  { %21763 = vpow2.f32 %v12558_v61  ;;  %v18241_v61 = vld [vmem:[%s22507_s9 + $0xd8] sm:$0xff] }
0x4b8e   :  { %21765 = vpow2.f32 %v12397_v0 }
0x4b97   :  { %v21764_v1 = vpop.eup %21763 }
0x4b98   :  { %v21766_v2 = vpop.eup %21765  ;;  %v12560_v63 = vsel %vm627_vm4, %v21764_v1, 0.0 }
0x4b99   :  { %12561 = vadd.xlane.f32.xlu1 %v12560_v63  ;;  %v12399_v10 = vsel %vm627_vm4, %v21766_v2, 0.0  ;;  %v18279_v63 = vld [vmem:[%s22514_s15 + $0xc8] sm:$0xff] }
0x4b9a   :  { %12400 = vadd.xlane.f32.xlu0 %v12399_v10 }
0x4c26   :  { %v12562_v11 = vpop.xlane.xlu1 %12561 }
0x4c27   :  { %v12401_v52 = vpop.xlane.xlu0 %12400 }
0x4c28   :  { %21767 = vrcp.f32 %v12401_v52 }
0x4c29   :  { %21769 = vrcp.f32 %v12562_v11  ;;  %v18280_v11 = vld [vmem:[%s22514_s15 + $0xd0] sm:$0xff] }
0x4c32   :  { %v21768_v33 = vpop.eup %21767 }
0x4c33   :  { %v12403_v5 = vmul.f32 %v21768_v33, %v21766_v2  ;;  %v21770_v16 = vpop.eup %21769  ;;  %v18278_v2 = vld [vmem:[%s22514_s15 + $0xc0] sm:$0xff] }
0x4c34   :  { %v12564_v19 = vmul.f32 %v21770_v16, %v21764_v1  ;;  %v21346_v1 = vpack.c.bf16 %v18241_v61, %v18240_v60  ;;  %v21358_v10 = vpack.c.bf16 %v18279_v63, %v18278_v2  ;;  %v18245_v2 = vld [vmem:[%s22507_s9 + $0xf8] sm:$0xff] }
0x4c35   :  { %20374 = vmatmul.mubr.msk.f32.vlgmr.msra.gmra.mrb[126].mxu1 %vm627_vm4, %v12403_v5  ;;  %v18258_v5 = vld [vmem:[%s22521_s25 + $0xc0] sm:$0xff] }
0x4c36   :  { %20382 = vmatpush3.msra.mxu1 %v23186_v20  ;;  %20383 = vmatprep.mubr.msk.f32.mxu1 %vm21846_vm3, %v21845_v30 }
0x4c37   :  { %21327 = vmatprep.subr.bf16.mxu1 %v21326_v12 }
0x4c39   :  { %20384 = vmatmul.mubr.msk.f32.vlgmr.msra.gmra.mrb[128].mxu1 %vm627_vm4, %v12564_v19 }
0x4c3a   :  { %21329 = vmatpush3.bf16.msra.mxu1 %v21326_v12  ;;  %20405 = vmatprep.mubr.msk.f32.mxu1 %vm383_vm2, %v23164_v13  ;;  %v18259_v12 = vld [vmem:[%s22521_s25 + $0xc8] sm:$0xff] }
0x4c3b   :  { %21331 = vmatprep.subr.bf16.mxu1 %v21330_v21  ;;  %v21350_v17 = vpack.c.bf16 %v18259_v12, %v18258_v5  ;;  %v18292_v12 = vld [vmem:[%s22680_s12 + $0x30] sm:$0xff] }
0x4c3e   :  { %21333 = vmatpush3.bf16.msra.mxu1 %v21330_v21  ;;  %v18260_v21 = vld [vmem:[%s22521_s25 + $0xd0] sm:$0xff] }
0x4c3f   :  { %20419 = vmatprep.subr.mxu1 %v21845_v30 }
0x4c41   :  { %20406 = vmatmul.mubr.msk.f32.vlgmr.msra.gmra.mrb[130].mxu1 %vm383_vm2, %v23166_v14 }
0x4c42   :  { %20421 = vmatprep.mubr.msk.f32.mxu1 %vm21846_vm3, %v21845_v30 }
0x4d08   :  { %v23240_v20 = vpop.f32.mrb[126].mxu1 }
0x4d09   :  { %v20375_v22 = vpop.f32.mrb[127].mxu1 }
0x4d0a   :  { %v18261_v22 = vld [vmem:[%s22521_s25 + $0xd8] sm:$0xff] }
0x4d0c   :  { %v23242_v23 = vpop.f32.mrb[128].mxu1 }
0x4d0d   :  { %v20385_v24 = vpop.f32.mrb[129].mxu1 }
0x4d0e   :  { %v21354_v24 = vpack.c.bf16 %v18261_v22, %v18260_v21  ;;  %v18264_v21 = vld [vmem:[%s22521_s25 + $0xf0] sm:$0xff]  ;;  %v18265_v22 = vld [vmem:[%s22521_s25 + $0xf8] sm:$0xff] }
0x4d14   :  { %v20407_v15 = vpop.f32.mrb[130].mxu1 }
0x4d15   :  { %v12797_v26 = vadd.f32 %v20407_v15, %v18313_v37  ;;  %v12791_v29 = vpop.f32.mrb[131].mxu1 }
0x4d16   :  { %v12792_v18 = vadd.f32 %v18313_v37, %v12791_v29 }
0x4d17   :  { %20430 = vmatpush3.xpose.msk.msra.mxu0 %vm627_vm4, %v12797_v26 }
0x4d18   :  { %20420 = vmatpush3.xpose.msk.msra.mxu1 %vm627_vm4, %v12792_v18  ;;  %20439 = vmatprep.subr.mxu0 %v18291_v3 }
0x4d19   :  { %20424 = vmatprep.subr.mxu1 %v21845_v30 }
0x4d1a   :  { %20432 = vmatmul.mubr.msk.f32.vlgmr.msra.gmra.mrb[136].mxu0 %vm627_vm4, %v12716_v34 }
0x4d1b   :  { %20422 = vmatmul.mubr.msk.f32.vlgmr.msra.gmra.mrb[132].mxu1 %vm627_vm4, %v12711_v36  ;;  %20440 = vmatpush3.msra.mxu0 %v18291_v3 }
0x4d1c   :  { %20425 = vmatpush3.msra.mxu1 %v12873_v28  ;;  %20426 = vmatprep.mubr.msk.f32.mxu1 %vm21846_vm3, %v21845_v30  ;;  %v18329_v28 = vld [vmem:[%s22578_s26 + $0x6] ss:$0 sm:$0xff] }
0x4d1d   :  { %20434 = vmatprep.subr.mxu1 %v21845_v30  ;;  %20444 = vmatprep.subr.mxu0 %v18290_v9 }
0x4ded   :  { %v13114_v27 = vpop.f32.mrb[136].mxu0 }
0x4dee   :  { %v13118_v7 = vmul.f32 0.35355338, %v13114_v27  ;;  %v12953_v38 = vpop.f32.mrb[132].mxu1  ;;  %v20433_v40 = vpop.f32.mrb[137].mxu0 }
0x4def   :  { %v12957_v35 = vmul.f32 0.35355338, %v12953_v38  ;;  %v20423_v42 = vpop.f32.mrb[133].mxu1 }
0x4df0   :  { %v13119_v43 = vsel %vm627_vm4, %v13118_v7, -inf }
0x4df1   :  { %13120 = vmax.xlane.f32.xlu1 %v13119_v43  ;;  %v12958_v8 = vsel %vm627_vm4, %v12957_v35, -inf }
0x4df2   :  { %12959 = vmax.xlane.f32.xlu0 %v12958_v8 }
0x4e7e   :  { %v13121_v44 = vpop.xlane.xlu1 %13120 }
0x4e7f   :  { %v13122_v45 = vsub.f32 %v13118_v7, %v13121_v44  ;;  %v12960_v32 = vpop.xlane.xlu0 %12959 }
0x4e80   :  { %v12961_v31 = vsub.f32 %v12957_v35, %v12960_v32 }
0x4e81   :  { %v13123_v46 = vmul.f32 1.442695, %v13122_v45 }
0x4e82   :  { %v12962_v39 = vmul.f32 1.442695, %v12961_v31 }
0x4e83   :  { %21771 = vpow2.f32 %v13123_v46 }
0x4e84   :  { %21773 = vpow2.f32 %v12962_v39 }
0x4e8d   :  { %v21772_v47 = vpop.eup %21771 }
0x4e8e   :  { %v21774_v48 = vpop.eup %21773  ;;  %v13125_v49 = vsel %vm627_vm4, %v21772_v47, 0.0 }
0x4e8f   :  { %13126 = vadd.xlane.f32.xlu1 %v13125_v49  ;;  %v12964_v50 = vsel %vm627_vm4, %v21774_v48, 0.0 }
0x4e90   :  { %12965 = vadd.xlane.f32.xlu0 %v12964_v50 }
0x4f1c   :  { %v13127_v51 = vpop.xlane.xlu1 %13126 }
0x4f1d   :  { %v12966_v41 = vpop.xlane.xlu0 %12965 }
0x4f1e   :  { %21775 = vrcp.f32 %v12966_v41 }
0x4f1f   :  { %21777 = vrcp.f32 %v13127_v51 }
0x4f28   :  { %v21776_v56 = vpop.eup %21775 }
0x4f29   :  { %v12968_v57 = vmul.f32 %v21776_v56, %v21774_v48  ;;  %v21778_v59 = vpop.eup %21777 }
0x4f2a   :  { %v13129_v0 = vmul.f32 %v21778_v59, %v21772_v47  ;;  %v18243_v59 = vld [vmem:[%s22507_s9 + $0xe8] sm:$0xff] }
0x4f2b   :  { %20427 = vmatmul.mubr.msk.f32.vlgmr.msra.gmra.mrb[134].mxu1 %vm627_vm4, %v12968_v57 }
0x4f2c   :  { %20435 = vmatpush3.msra.mxu1 %v23220_v55  ;;  %20436 = vmatprep.mubr.msk.f32.mxu1 %vm21846_vm3, %v21845_v30  ;;  %v18281_v55 = vld [vmem:[%s22514_s15 + $0xd8] sm:$0xff] }
0x4f2d   :  { %21343 = vmatprep.subr.bf16.mxu1 %v21342_v58  ;;  %v21362_v52 = vpack.c.bf16 %v18281_v55, %v18280_v11  ;;  %v18282_v55 = vld [vmem:[%s22514_s15 + $0xe0] sm:$0xff] }
0x4f2f   :  { %20437 = vmatmul.mubr.msk.f32.vlgmr.msra.gmra.mrb[136].mxu1 %vm627_vm4, %v13129_v0 }
0x4f30   :  { %21345 = vmatpush3.bf16.msra.mxu1 %v21342_v58  ;;  %20457 = vmatprep.mubr.msk.f32.mxu1 %vm383_vm2, %v23164_v13  ;;  %v18242_v58 = vld [vmem:[%s22507_s9 + $0xe0] sm:$0xff] }
0x4f31   :  { %21347 = vmatprep.subr.bf16.mxu1 %v21346_v1  ;;  %v21366_v0 = vpack.c.bf16 %v18243_v59, %v18242_v58 }
0x4f34   :  { %21349 = vmatpush3.bf16.msra.mxu1 %v21346_v1  ;;  %v18244_v1 = vld [vmem:[%s22507_s9 + $0xf0] sm:$0xff]  ;;  %s23662_s9 = sld [smem:[#allocation3_spill]] }
0x4f35   :  { %21359 = vmatprep.subr.bf16.mxu1 %v21358_v10  ;;  %v21370_v11 = vpack.c.bf16 %v18245_v2, %v18244_v1 }
0x4f37   :  { %20458 = vmatmul.mubr.msk.f32.vlgmr.msra.gmra.mrb[138].mxu1 %vm383_vm2, %v23166_v14 }
0x4f38   :  { %21361 = vmatpush3.bf16.msra.mxu1 %v21358_v10  ;;  %20479 = vmatprep.mubr.msk.f32.mxu1 %vm383_vm2, %v23164_v13 }
0x4f39   :  { %21363 = vmatprep.subr.bf16.mxu1 %v21362_v52 }
0x4f3c   :  { %21365 = vmatpush3.bf16.msra.mxu1 %v21362_v52  ;;  %v18283_v52 = vld [vmem:[%s22514_s15 + $0xe8] sm:$0xff] }
0x4f3d   :  { %20487 = vmatprep.subr.mxu1 %v21845_v30  ;;  %v21382_v3 = vpack.c.bf16 %v18283_v52, %v18282_v55 }
0x4f3f   :  { %20480 = vmatmul.mubr.msk.f32.vlgmr.msra.gmra.mrb[140].mxu1 %vm383_vm2, %v23166_v14 }
0x4f40   :  { %20489 = vmatprep.mubr.msk.f32.mxu1 %vm21846_vm3, %v21845_v30 }
0x4ffe   :  { %v13038_v33 = vpop.f32.mrb[134].mxu1 }
0x4fff   :  { %v20428_v16 = vpop.f32.mrb[135].mxu1  ;;  %20441 = vmatprep.mubr.msk.f32.mxu0 %vm627_vm4, %v13038_v33  ;;  %v18285_v33 = vld [vmem:[%s22514_s15 + $0xf8] sm:$0xff] }
0x5000   :  { %v18262_v16 = vld [vmem:[%s22521_s25 + $0xe0] sm:$0xff] }
0x5002   :  { %v13199_v6 = vpop.f32.mrb[136].mxu1 }
0x5003   :  { %v20438_v19 = vpop.f32.mrb[137].mxu1  ;;  %20442 = vmatmul.mubr.msk.f32.vlgmr.msra.gmra.mrb[138].mxu0 %vm627_vm4, %v13199_v6 }
0x5004   :  { %20445 = vmatpush3.msra.mxu0 %v18290_v9  ;;  %20446 = vmatprep.mubr.msk.f32.mxu0 %vm627_vm4, %v23240_v20  ;;  %v18284_v9 = vld [vmem:[%s22514_s15 + $0xf0] sm:$0xff]  ;;  %s23663_s15 = sld [smem:[#allocation4_spill]] }
0x5005   :  { %21351 = vmatprep.subr.bf16.mxu0 %v21350_v17  ;;  %v21386_v5 = vpack.c.bf16 %v18285_v33, %v18284_v9  ;;  %v18391_v9 = vld [vmem:[%s22797_s28 + $0x98] sm:$0xff] }
0x500a   :  { %v20459_v37 = vpop.f32.mrb[138].mxu1 }
0x500b   :  { %v13437_v15 = vpop.f32.mrb[139].mxu1  ;;  %20447 = vmatmul.mubr.msk.f32.vlgmr.msra.gmra.mrb[138].mxu0 %vm627_vm4, %v23242_v23  ;;  %v18332_v23 = vld [vmem:[%s22573_s7 + $0x6] ss:$0 sm:$0xff]  ;;  %v13443_v40 = vadd.f32 %v20459_v37, %v18329_v28  ;;  %v21378_v37 = vpack.c.bf16 %v18265_v22, %v18264_v21 }
0x500c   :  { %21353 = vmatpush3.bf16.msra.mxu0 %v21350_v17  ;;  %20468 = vmatprep.mubr.msk.f32.mxu0 %vm383_vm2, %v23164_v13  ;;  %v13438_v7 = vadd.f32 %v18329_v28, %v13437_v15  ;;  %v18263_v17 = vld [vmem:[%s22521_s25 + $0xe8] sm:$0xff]  ;;  %s21889_s25 = smov 7  }
0x500d   :  { %21355 = vmatprep.subr.bf16.mxu0 %v21354_v24  ;;  %v21374_v6 = vpack.c.bf16 %v18263_v17, %v18262_v16  ;;  %v18363_v17 = vld [vmem:[%s22785_s20 + $0x1] ss:$0 sm:$0xff] }
0x5010   :  { %21357 = vmatpush3.bf16.msra.mxu0 %v21354_v24 }
0x5011   :  { %20482 = vmatprep.subr.mxu0 %v21845_v30 }
0x5012   :  { %v20481_v20 = vpop.f32.mrb[140].mxu1 }
0x5013   :  { %v13605_v26 = vadd.f32 %v20481_v20, %v18335_v25  ;;  %20469 = vmatmul.mubr.msk.f32.vlgmr.msra.gmra.mrb[140].mxu0 %vm383_vm2, %v23166_v14  ;;  %v13599_v29 = vpop.f32.mrb[141].mxu1 }
0x5014   :  { %v13600_v18 = vadd.f32 %v18335_v25, %v13599_v29  ;;  %20484 = vmatprep.mubr.msk.f32.mxu0 %vm21846_vm3, %v21845_v30  ;;  %v18352_v29 = vld [vmem:[%s22564_s13 + $0x7] ss:$0 sm:$0xff] }
0x5016   :  { %20488 = vmatpush3.msra.mxu1 %v13600_v18 }
0x5017   :  { %20497 = vmatprep.subr.mxu1 %v21845_v30 }
0x50e6   :  { %v20470_v34 = vpop.f32.mrb[140].mxu0 }
0x50e7   :  { %v13518_v36 = vpop.f32.mrb[141].mxu0  ;;  %v13524_v38 = vadd.f32 %v20470_v34, %v18332_v23 }
0x50e8   :  { %v13519_v27 = vadd.f32 %v18332_v23, %v13518_v36  ;;  %v18349_v36 = vld [vmem:[%s22573_s7 + $0x7] ss:$0 sm:$0xff] }
0x50ea   :  { %20483 = vmatpush3.xpose.msk.msra.mxu0 %vm627_vm4, %v13519_v27  ;;  %v18346_v27 = vld [vmem:[%s22578_s26 + $0x7] ss:$0 sm:$0xff]  ;;  %s17786_s26 = sld [smem:[%s23657_s0 + %s21889_s25]]  }
0x50eb   :  { %20492 = vmatprep.subr.mxu0 %v21845_v30 }
0x50ed   :  { %20485 = vmatmul.mubr.msk.f32.vlgmr.msra.gmra.mrb[142].mxu0 %vm627_vm4, %v13438_v7 }
0x50ee   :  { %20493 = vmatpush3.xpose.msk.msra.mxu0 %vm627_vm4, %v13524_v38  ;;  %20494 = vmatprep.mubr.msk.f32.mxu0 %vm21846_vm3, %v21845_v30 }
0x50ef   :  { %20502 = vmatprep.subr.mxu0 %v18292_v12 }
0x50f1   :  { %20495 = vmatmul.mubr.msk.f32.vlgmr.msra.gmra.mrb[144].mxu0 %vm627_vm4, %v13443_v40 }
0x50f2   :  { %20503 = vmatpush3.msra.mxu0 %v18292_v12 }
0x50f3   :  { %21375 = vmatprep.subr.bf16.mxu0 %v21374_v6 }
0x51c0   :  { %v13680_v35 = vpop.f32.mrb[142].mxu0 }
0x51c1   :  { %v13684_v42 = vmul.f32 0.35355338, %v13680_v35  ;;  %v20486_v43 = vpop.f32.mrb[143].mxu0 }
0x51c3   :  { %v13685_v8 = vsel %vm627_vm4, %v13684_v42, -inf }
0x51c4   :  { %13686 = vmax.xlane.f32.xlu0 %v13685_v8  ;;  %v13841_v44 = vpop.f32.mrb[144].mxu0 }
0x51c5   :  { %v13845_v45 = vmul.f32 0.35355338, %v13841_v44  ;;  %v20496_v32 = vpop.f32.mrb[145].mxu0 }
0x51c7   :  { %v13846_v31 = vsel %vm627_vm4, %v13845_v45, -inf }
0x51c8   :  { %13847 = vmax.xlane.f32.xlu1 %v13846_v31 }
0x5251   :  { %v13687_v46 = vpop.xlane.xlu0 %13686 }
0x5252   :  { %v13688_v39 = vsub.f32 %v13684_v42, %v13687_v46 }
0x5254   :  { %v13689_v47 = vmul.f32 1.442695, %v13688_v39 }
0x5255   :  { %v13848_v48 = vpop.xlane.xlu1 %13847 }
0x5256   :  { %21779 = vpow2.f32 %v13689_v47  ;;  %v13849_v49 = vsub.f32 %v13845_v45, %v13848_v48 }
0x5258   :  { %v13850_v50 = vmul.f32 1.442695, %v13849_v49 }
0x525a   :  { %21781 = vpow2.f32 %v13850_v50 }
0x5260   :  { %v21780_v51 = vpop.eup %21779 }
0x5261   :  { %v13691_v41 = vsel %vm627_vm4, %v21780_v51, 0.0 }
0x5262   :  { %13692 = vadd.xlane.f32.xlu0 %v13691_v41 }
0x5264   :  { %v21782_v53 = vpop.eup %21781 }
0x5265   :  { %v13852_v54 = vsel %vm627_vm4, %v21782_v53, 0.0 }
0x5266   :  { %13853 = vadd.xlane.f32.xlu1 %v13852_v54 }
0x52ef   :  { %v13693_v56 = vpop.xlane.xlu0 %13692 }
0x52f0   :  { %21783 = vrcp.f32 %v13693_v56 }
0x52f3   :  { %v13854_v57 = vpop.xlane.xlu1 %13853 }
0x52f4   :  { %21785 = vrcp.f32 %v13854_v57 }
0x52fa   :  { %v21784_v60 = vpop.eup %21783 }
0x52fb   :  { %v13695_v61 = vmul.f32 %v21784_v60, %v21780_v51 }
0x52fd   :  { %20490 = vmatmul.mubr.msk.f32.vlgmr.msra.gmra.mrb[142].mxu1 %vm627_vm4, %v13695_v61 }
0x52fe   :  { %v21786_v63 = vpop.eup %21785  ;;  %20498 = vmatpush3.msra.mxu1 %v13605_v26  ;;  %20499 = vmatprep.mubr.msk.f32.mxu1 %vm21846_vm3, %v21845_v30 }
0x52ff   :  { %v13856_v10 = vmul.f32 %v21786_v63, %v21782_v53  ;;  %21367 = vmatprep.subr.bf16.mxu1 %v21366_v0  ;;  %v18293_v63 = vld [vmem:[%s22680_s12 + $0x38] sm:$0xff]  ;;  %s21890_s12 = smov 8  }
0x5301   :  { %20500 = vmatmul.mubr.msk.f32.vlgmr.msra.gmra.mrb[144].mxu1 %vm627_vm4, %v13856_v10  ;;  %v18388_v10 = vld [vmem:[%s22797_s28 + $0x80] sm:$0xff] }
0x5302   :  { %21369 = vmatpush3.bf16.msra.mxu1 %v21366_v0  ;;  %20515 = vmatprep.mubr.msk.f32.mxu1 %vm383_vm2, %v23164_v13 }
0x5303   :  { %21371 = vmatprep.subr.bf16.mxu1 %v21370_v11 }
0x5306   :  { %21373 = vmatpush3.bf16.msra.mxu1 %v21370_v11  ;;  %v18389_v11 = vld [vmem:[%s22797_s28 + $0x88] sm:$0xff] }
0x5307   :  { %21383 = vmatprep.subr.bf16.mxu1 %v21382_v3  ;;  %v21398_v55 = vpack.c.bf16 %v18389_v11, %v18388_v10  ;;  %v18433_v11 = vld [vmem:[%s22874_s2 + $0x4] ss:$0 sm:$0xff] }
0x5309   :  { %20516 = vmatmul.mubr.msk.f32.vlgmr.msra.gmra.mrb[146].mxu1 %vm383_vm2, %v23166_v14 }
0x530a   :  { %21385 = vmatpush3.bf16.msra.mxu1 %v21382_v3  ;;  %20537 = vmatprep.mubr.msk.f32.mxu1 %vm383_vm2, %v23164_v13  ;;  %v18390_v3 = vld [vmem:[%s22797_s28 + $0x90] sm:$0xff] }
0x530b   :  { %21387 = vmatprep.subr.bf16.mxu1 %v21386_v5 }
0x530e   :  { %21389 = vmatpush3.bf16.msra.mxu1 %v21386_v5  ;;  %v21402_v5 = vpack.c.bf16 %v18391_v9, %v18390_v3 }
0x530f   :  { %20550 = vmatprep.subr.mxu1 %v21845_v30 }
0x5311   :  { %20538 = vmatmul.mubr.msk.f32.vlgmr.msra.gmra.mrb[148].mxu1 %vm383_vm2, %v23166_v14 }
0x5312   :  { %20552 = vmatprep.mubr.msk.f32.mxu1 %vm21846_vm3, %v21845_v30 }
0x53d0   :  { %v13765_v19 = vpop.f32.mrb[142].mxu1 }
0x53d1   :  { %v20491_v24 = vpop.f32.mrb[143].mxu1  ;;  %20504 = vmatprep.mubr.msk.f32.mxu0 %vm627_vm4, %v13765_v19 }
0x53d4   :  { %v13926_v15 = vpop.f32.mrb[144].mxu1 }
0x53d5   :  { %v20501_v25 = vpop.f32.mrb[145].mxu1  ;;  %20505 = vmatmul.mubr.msk.f32.vlgmr.msra.gmra.mrb[138].mxu0 %vm627_vm4, %v13926_v15 }
0x53d6   :  { %21377 = vmatpush3.bf16.msra.mxu0 %v21374_v6  ;;  %20526 = vmatprep.mubr.msk.f32.mxu0 %vm383_vm2, %v23164_v13  ;;  %v18436_v25 = vld [vmem:[%s22866_s30 + $0x4] ss:$0 sm:$0xff] }
0x53d7   :  { %21379 = vmatprep.subr.bf16.mxu0 %v21378_v37 }
0x53da   :  { %21381 = vmatpush3.bf16.msra.mxu0 %v21378_v37 }
0x53db   :  { %20540 = vmatprep.subr.mxu0 %v21845_v30 }
0x53dc   :  { %v20517_v20 = vpop.f32.mrb[146].mxu1 }
0x53dd   :  { %v14085_v26 = vpop.f32.mrb[147].mxu1  ;;  %20527 = vmatmul.mubr.msk.f32.vlgmr.msra.gmra.mrb[146].mxu0 %vm383_vm2, %v23166_v14  ;;  %v14091_v35 = vadd.f32 %v20517_v20, %v18346_v27 }
0x53de   :  { %20542 = vmatprep.mubr.msk.f32.mxu0 %vm21846_vm3, %v21845_v30  ;;  %v14086_v42 = vadd.f32 %v18346_v27, %v14085_v26 }
0x53e4   :  { %v20539_v18 = vpop.f32.mrb[148].mxu1 }
0x53e5   :  { %v14253_v23 = vadd.f32 %v20539_v18, %v18352_v29  ;;  %v14247_v34 = vpop.f32.mrb[149].mxu1 }
0x53e6   :  { %v14248_v43 = vadd.f32 %v18352_v29, %v14247_v34 }
0x54b0   :  { %v20528_v28 = vpop.f32.mrb[146].mxu0 }
0x54b1   :  { %v14172_v7 = vadd.f32 %v20528_v28, %v18349_v36  ;;  %v14166_v38 = vpop.f32.mrb[147].mxu0 }
0x54b2   :  { %v14167_v40 = vadd.f32 %v18349_v36, %v14166_v38 }
0x54b3   :  { %20551 = vmatpush3.xpose.msk.msra.mxu1 %vm627_vm4, %v14172_v7 }
0x54b4   :  { %20541 = vmatpush3.xpose.msk.msra.mxu0 %vm627_vm4, %v14167_v40 }
0x54b5   :  { %20545 = vmatprep.subr.mxu0 %v21845_v30 }
0x54b6   :  { %20553 = vmatmul.mubr.msk.f32.vlgmr.msra.gmra.mrb[150].mxu1 %vm627_vm4, %v14091_v35 }
0x54b7   :  { %20543 = vmatmul.mubr.msk.f32.vlgmr.msra.gmra.mrb[148].mxu0 %vm627_vm4, %v14086_v42  ;;  %v18368_v42 = vld [vmem:[%s22819_s29 + $0x80] sm:$0xff] }
0x54b8   :  { %20546 = vmatpush3.msra.mxu0 %v14248_v43  ;;  %20547 = vmatprep.mubr.msk.f32.mxu0 %vm21846_vm3, %v21845_v30  ;;  %v18369_v43 = vld [vmem:[%s22819_s29 + $0x88] sm:$0xff] }
0x54b9   :  { %20555 = vmatprep.subr.mxu0 %v21845_v30 }
0x5589   :  { %v14489_v8 = vpop.f32.mrb[150].mxu1 }
0x558a   :  { %v14493_v44 = vmul.f32 0.35355338, %v14489_v8  ;;  %v14328_v45 = vpop.f32.mrb[148].mxu0  ;;  %v20554_v32 = vpop.f32.mrb[151].mxu1  ;;  %v21390_v8 = vpack.c.bf16 %v18369_v43, %v18368_v42 }
0x558b   :  { %v14332_v31 = vmul.f32 0.35355338, %v14328_v45  ;;  %v20544_v46 = vpop.f32.mrb[149].mxu0  ;;  %v18371_v45 = vld [vmem:[%s22819_s29 + $0x98] sm:$0xff] }
0x558c   :  { %v14494_v39 = vsel %vm627_vm4, %v14493_v44, -inf  ;;  %21391 = vmatprep.subr.bf16.mxu1 %v21390_v8  ;;  %v18409_v46 = vld [vmem:[%s22828_s21 + $0x88] sm:$0xff] }
0x558d   :  { %14495 = vmax.xlane.f32.xlu1 %v14494_v39  ;;  %v14333_v47 = vsel %vm627_vm4, %v14332_v31, -inf  ;;  %21393 = vmatpush3.bf16.msra.mxu1 %v21390_v8 }
0x558e   :  { %14334 = vmax.xlane.f32.xlu0 %v14333_v47 }
0x561a   :  { %v14496_v48 = vpop.xlane.xlu1 %14495 }
0x561b   :  { %v14497_v49 = vsub.f32 %v14493_v44, %v14496_v48  ;;  %v14335_v50 = vpop.xlane.xlu0 %14334  ;;  %v18370_v44 = vld [vmem:[%s22819_s29 + $0x90] sm:$0xff] }
0x561c   :  { %v14336_v51 = vsub.f32 %v14332_v31, %v14335_v50  ;;  %v21394_v32 = vpack.c.bf16 %v18371_v45, %v18370_v44  ;;  %v18408_v31 = vld [vmem:[%s22828_s21 + $0x80] sm:$0xff] }
0x561d   :  { %v14498_v41 = vmul.f32 1.442695, %v14497_v49  ;;  %v21406_v39 = vpack.c.bf16 %v18409_v46, %v18408_v31 }
0x561e   :  { %v14337_v53 = vmul.f32 1.442695, %v14336_v51  ;;  %21395 = vmatprep.subr.bf16.mxu1 %v21394_v32 }
0x561f   :  { %21787 = vpow2.f32 %v14498_v41  ;;  %21397 = vmatpush3.bf16.msra.mxu1 %v21394_v32 }
0x5620   :  { %21789 = vpow2.f32 %v14337_v53  ;;  %21407 = vmatprep.subr.bf16.mxu1 %v21406_v39 }
0x5629   :  { %v21788_v54 = vpop.eup %21787 }
0x562a   :  { %v21790_v56 = vpop.eup %21789  ;;  %v14500_v57 = vsel %vm627_vm4, %v21788_v54, 0.0 }
0x562b   :  { %14501 = vadd.xlane.f32.xlu1 %v14500_v57  ;;  %v14339_v58 = vsel %vm627_vm4, %v21790_v56, 0.0 }
0x562c   :  { %14340 = vadd.xlane.f32.xlu0 %v14339_v58 }
0x56b8   :  { %v14502_v59 = vpop.xlane.xlu1 %14501 }
0x56b9   :  { %v14341_v60 = vpop.xlane.xlu0 %14340 }
0x56ba   :  { %21791 = vrcp.f32 %v14341_v60 }
0x56bb   :  { %21793 = vrcp.f32 %v14502_v59  ;;  %v18367_v59 = vld [vmem:[%s22842_s24 + $0x1] ss:$0 sm:$0xff] }
0x56c4   :  { %v21792_v61 = vpop.eup %21791 }
0x56c5   :  { %v14343_v0 = vmul.f32 %v21792_v61, %v21790_v56  ;;  %v21794_v1 = vpop.eup %21793 }
0x56c6   :  { %v14504_v2 = vmul.f32 %v21794_v1, %v21788_v54  ;;  %v18366_v54 = vld [vmem:[%s22837_s22 + $0x1] ss:$0 sm:$0xff]  ;;  %v18411_v1 = vld [vmem:[%s22828_s21 + $0x98] sm:$0xff] }
0x56c7   :  { %20548 = vmatmul.mubr.msk.f32.vlgmr.msra.gmra.mrb[150].mxu0 %vm627_vm4, %v14343_v0  ;;  %v18410_v0 = vld [vmem:[%s22828_s21 + $0x90] sm:$0xff] }
0x56c8   :  { %20556 = vmatpush3.msra.mxu0 %v14253_v23  ;;  %20557 = vmatprep.mubr.msk.f32.mxu0 %vm21846_vm3, %v21845_v30  ;;  %v21410_v10 = vpack.c.bf16 %v18411_v1, %v18410_v0 }
0x56c9   :  { %20560 = vmatprep.subr.mxu0 %v18293_v63 }
0x56cb   :  { %20558 = vmatmul.mubr.msk.f32.vlgmr.msra.gmra.mrb[152].mxu0 %vm627_vm4, %v14504_v2 }
0x56cc   :  { %20561 = vmatpush3.msra.mxu0 %v18293_v63 }
0x56cd   :  { %21399 = vmatprep.subr.bf16.mxu0 %v21398_v55 }
0x579a   :  { %v14413_v52 = vpop.f32.mrb[150].mxu0 }
0x579b   :  { %v20549_v33 = vpop.f32.mrb[151].mxu0  ;;  %20562 = vmatprep.mubr.msk.f32.mxu0 %vm627_vm4, %v14413_v52  ;;  %v18373_v52 = vld [vmem:[%s22819_s29 + $0xa8] sm:$0xff] }
0x579e   :  { %v14574_v12 = vpop.f32.mrb[152].mxu0 }
0x579f   :  { %v20559_v16 = vpop.f32.mrb[153].mxu0  ;;  %20563 = vmatmul.mubr.msk.f32.vlgmr.msra.gmra.mrb[138].mxu0 %vm627_vm4, %v14574_v12  ;;  %v18374_v12 = vld [vmem:[%s22819_s29 + $0xb0] sm:$0xff] }
0x57a0   :  { %21401 = vmatpush3.bf16.msra.mxu0 %v21398_v55  ;;  %20584 = vmatprep.mubr.msk.f32.mxu0 %vm383_vm2, %v22808_v62  ;;  %v18372_v55 = vld [vmem:[%s22819_s29 + $0xa0] sm:$0xff]  ;;  %v18375_v16 = vld [vmem:[%s22819_s29 + $0xb8] sm:$0xff] }
0x57a1   :  { %21403 = vmatprep.subr.bf16.mxu0 %v21402_v5 }
0x57a4   :  { %21405 = vmatpush3.bf16.msra.mxu0 %v21402_v5  ;;  %v21414_v5 = vpack.c.bf16 %v18373_v52, %v18372_v55 }
0x57a5   :  { %20598 = vmatprep.subr.mxu0 %v21845_v30 }
0x57a7   :  { %20585 = vmatmul.mubr.msk.f32.vlgmr.msra.gmra.mrb[154].mxu0 %vm383_vm2, %v22810_v4 }
0x57a8   :  { %20600 = vmatprep.mubr.msk.f32.mxu0 %vm21846_vm3, %v21845_v30 }
0x5872   :  { %v20564_v6 = vpop.f32.mrb[138].mxu0 }
0x5873   :  { %v14668_v19 = vadd.f32 %v20564_v6, %v18363_v17  ;;  %v14650_v21 = vpop.f32.mrb[139].mxu0  ;;  %v18439_v6 = vld [vmem:[%s22879_s3 + $0x4] ss:$0 sm:$0xff] }
0x5874   :  { %v14667_v22 = vadd.f32 %v18363_v17, %v14650_v21  ;;  %v18412_v21 = vld [vmem:[%s22828_s21 + $0xa0] sm:$0xff] }
0x5875   :  { %v14670_v24 = vadd.f32 %v14668_v19, %v23166_v14  ;;  %v21418_v19 = vpack.c.bf16 %v18375_v16, %v18374_v12 }
0x5876   :  { %v14669_v37 = vadd.f32 %v14667_v22, %v23164_v13  ;;  %v18413_v22 = vld [vmem:[%s22828_s21 + $0xa8] sm:$0xff] }
0x5877   :  { %v14678_v15 = vsel %vm383_vm2, %v14670_v24, 0.0 }
0x5878   :  { %14679 = vadd.xlane.f32.xlu1 %v14678_v15  ;;  %v14675_v20 = vsel %vm383_vm2, %v14669_v37, 0.0 }
0x5879   :  { %14676 = vadd.xlane.f32.xlu0 %v14675_v20  ;;  %v21430_v20 = vpack.c.bf16 %v18413_v22, %v18412_v21 }
0x587a   :  { %v20586_v26 = vpop.f32.mrb[154].mxu0 }
0x587b   :  { %v23392_v29 = vadd.f32 %v20586_v26, %v18436_v25  ;;  %v14949_v18 = vpop.f32.mrb[155].mxu0  ;;  %v18414_v26 = vld [vmem:[%s22828_s21 + $0xb0] sm:$0xff] }
0x587c   :  { %v14950_v23 = vadd.f32 %v18436_v25, %v14949_v18 }
0x587e   :  { %20599 = vmatpush3.xpose.msk.msra.mxu0 %vm627_vm4, %v14950_v23 }
0x587f   :  { %20608 = vmatprep.subr.mxu0 %v21845_v30 }
0x5905   :  { %v14680_v14 = vpop.xlane.xlu1 %14679 }
0x5906   :  { %v14682_v13 = vmul.f32 0.03125, %v14680_v14  ;;  %v14677_v34 = vpop.xlane.xlu0 %14676 }
0x5907   :  { %v14681_v36 = vmul.f32 0.03125, %v14677_v34 }
0x5908   :  { %v14684_v28 = vsub.f32 %v14670_v24, %v14682_v13 }
0x5909   :  { %v14683_v27 = vsub.f32 %v14669_v37, %v14681_v36 }
0x590a   :  { %v14686_v7 = vmul.f32 %v14684_v28, %v14684_v28 }
0x590b   :  { %v14685_v38 = vmul.f32 %v14683_v27, %v14683_v27 }
0x590c   :  { %v14690_v40 = vsel %vm383_vm2, %v14686_v7, 0.0 }
0x590d   :  { %14691 = vadd.xlane.f32.xlu1 %v14690_v40  ;;  %v14687_v35 = vsel %vm383_vm2, %v14685_v38, 0.0 }
0x590e   :  { %14688 = vadd.xlane.f32.xlu0 %v14687_v35  ;;  %v18454_v35 = vld [vmem:[%s22879_s3 + $0x5] ss:$0 sm:$0xff] }
0x599a   :  { %v14692_v47 = vpop.xlane.xlu1 %14691 }
0x599b   :  { %v14694_v48 = vmul.f32 0.03125, %v14692_v47  ;;  %v14689_v49 = vpop.xlane.xlu0 %14688 }
0x599c   :  { %v14693_v50 = vmul.f32 0.03125, %v14689_v49 }
0x599d   :  { %v14696_v51 = vadd.f32 1e-05, %v14694_v48 }
0x599e   :  { %v14695_v41 = vadd.f32 1e-05, %v14693_v50 }
0x599f   :  { %21795 = vrsqrt.f32 %v14696_v51 }
0x59a0   :  { %21797 = vrsqrt.f32 %v14695_v41 }
0x59a9   :  { %v21796_v53 = vpop.eup %21795 }
0x59aa   :  { %v21798_v56 = vpop.eup %21797  ;;  %v14700_v57 = vmul.f32 %v21796_v53, %v14684_v28  ;;  %v18392_v53 = vld [vmem:[%s22797_s28 + $0xa0] sm:$0xff] }
0x59ab   :  { %v14699_v58 = vmul.f32 %v21798_v56, %v14683_v27 }
0x59ac   :  { %v14708_v60 = vmul.f32 %v18366_v54, %v14700_v57 }
0x59ad   :  { %v14707_v61 = vmul.f32 %v18366_v54, %v14699_v58  ;;  %v18393_v54 = vld [vmem:[%s22797_s28 + $0xa8] sm:$0xff] }
0x59ae   :  { %v23410_v63 = vadd.f32 %v18367_v59, %v14708_v60  ;;  %v21422_v58 = vpack.c.bf16 %v18393_v54, %v18392_v53  ;;  %v18395_v60 = vld [vmem:[%s22797_s28 + $0xb8] sm:$0xff]  ;;  %v18429_v53 = vld [vmem:[%s22978_s8 + $0x28] sm:$0xff]  ;;  %v18428_v54 = vld [vmem:[%s22978_s8 + $0x20] sm:$0xff] }
0x59af   :  { %v23408_v2 = vadd.f32 %v18367_v59, %v14707_v61  ;;  %v18394_v59 = vld [vmem:[%s22797_s28 + $0xb0] sm:$0xff] }
0x59b0   :  { %v21426_v1 = vpack.c.bf16 %v18395_v60, %v18394_v59 }
0x59b1   :  { %20573 = vmatprep.mubr.msk.f32.mxu1 %vm383_vm2, %v23408_v2 }
0x59b2   :  { %20574 = vmatmul.mubr.msk.f32.vlgmr.msra.gmra.mrb[152].mxu1 %vm383_vm2, %v23410_v63 }
0x59b3   :  { %21409 = vmatpush3.bf16.msra.mxu1 %v21406_v39  ;;  %20595 = vmatprep.mubr.msk.f32.mxu1 %vm383_vm2, %v22808_v62 }
0x59b4   :  { %21411 = vmatprep.subr.bf16.mxu1 %v21410_v10 }
0x59b7   :  { %21413 = vmatpush3.bf16.msra.mxu1 %v21410_v10 }
0x59b8   :  { %20603 = vmatprep.subr.mxu1 %v21845_v30 }
0x59ba   :  { %20596 = vmatmul.mubr.msk.f32.vlgmr.msra.gmra.mrb[154].mxu1 %vm383_vm2, %v22810_v4 }
0x59bb   :  { %20605 = vmatprep.mubr.msk.f32.mxu1 %vm21846_vm3, %v21845_v30 }
0x5a85   :  { %v20575_v3 = vpop.f32.mrb[152].mxu1 }
0x5a86   :  { %v14868_v9 = vpop.f32.mrb[153].mxu1  ;;  %v14874_v17 = vadd.f32 %v20575_v3, %v18433_v11  ;;  %v18451_v3 = vld [vmem:[%s22866_s30 + $0x5] ss:$0 sm:$0xff] }
0x5a87   :  { %v14869_v33 = vadd.f32 %v18433_v11, %v14868_v9 }
0x5a89   :  { %20601 = vmatmul.mubr.msk.f32.vlgmr.msra.gmra.mrb[156].mxu0 %vm627_vm4, %v14869_v33  ;;  %v18448_v33 = vld [vmem:[%s22874_s2 + $0x5] ss:$0 sm:$0xff] }
0x5a8a   :  { %20609 = vmatpush3.xpose.msk.msra.mxu0 %vm627_vm4, %v23392_v29  ;;  %20610 = vmatprep.mubr.msk.f32.mxu0 %vm21846_vm3, %v21845_v30  ;;  %v18415_v29 = vld [vmem:[%s22828_s21 + $0xb8] sm:$0xff] }
0x5a8b   :  { %21415 = vmatprep.subr.bf16.mxu0 %v21414_v5  ;;  %v21434_v18 = vpack.c.bf16 %v18415_v29, %v18414_v26 }
0x5a8d   :  { %v20597_v24 = vpop.f32.mrb[154].mxu1  ;;  %20611 = vmatmul.mubr.msk.f32.vlgmr.msra.gmra.mrb[158].mxu0 %vm627_vm4, %v14874_v17 }
0x5a8e   :  { %v23437_v37 = vadd.f32 %v20597_v24, %v18439_v6  ;;  %v15030_v15 = vpop.f32.mrb[155].mxu1  ;;  %21417 = vmatpush3.bf16.msra.mxu0 %v21414_v5  ;;  %20626 = vmatprep.mubr.msk.f32.mxu0 %vm383_vm2, %v23408_v2 }
0x5a8f   :  { %v15031_v25 = vadd.f32 %v18439_v6, %v15030_v15  ;;  %21419 = vmatprep.subr.bf16.mxu0 %v21418_v19 }
0x5a91   :  { %20604 = vmatpush3.msra.mxu1 %v15031_v25 }
0x5a92   :  { %21421 = vmatpush3.bf16.msra.mxu0 %v21418_v19  ;;  %20613 = vmatprep.subr.mxu1 %v21845_v30 }
0x5a93   :  { %21431 = vmatprep.subr.bf16.mxu0 %v21430_v20 }
0x5a95   :  { %20627 = vmatmul.mubr.msk.f32.vlgmr.msra.gmra.mrb[160].mxu0 %vm383_vm2, %v23410_v63 }
0x5a96   :  { %21433 = vmatpush3.bf16.msra.mxu0 %v21430_v20  ;;  %20648 = vmatprep.mubr.msk.f32.mxu0 %vm383_vm2, %v22808_v62 }
0x5a97   :  { %21435 = vmatprep.subr.bf16.mxu0 %v21434_v18 }
0x5a9a   :  { %21437 = vmatpush3.bf16.msra.mxu0 %v21434_v18 }
0x5a9b   :  { %20661 = vmatprep.subr.mxu0 %v21845_v30 }
0x5a9d   :  { %20649 = vmatmul.mubr.msk.f32.vlgmr.msra.gmra.mrb[162].mxu0 %vm383_vm2, %v22810_v4 }
0x5a9e   :  { %20663 = vmatprep.mubr.msk.f32.mxu0 %vm21846_vm3, %v21845_v30 }
0x5b5c   :  { %v15111_v23 = vpop.f32.mrb[156].mxu0 }
0x5b5d   :  { %v15115_v14 = vmul.f32 0.35355338, %v15111_v23  ;;  %v20602_v13 = vpop.f32.mrb[157].mxu0 }
0x5b5f   :  { %v15116_v34 = vsel %vm627_vm4, %v15115_v14, -inf }
0x5b60   :  { %15117 = vmax.xlane.f32.xlu0 %v15116_v34  ;;  %v15272_v36 = vpop.f32.mrb[158].mxu0 }
0x5b61   :  { %v15276_v28 = vmul.f32 0.35355338, %v15272_v36  ;;  %v20612_v27 = vpop.f32.mrb[159].mxu0 }
0x5b63   :  { %v15277_v7 = vsel %vm627_vm4, %v15276_v28, -inf }
0x5b64   :  { %15278 = vmax.xlane.f32.xlu1 %v15277_v7 }
0x5b68   :  { %v20628_v38 = vpop.f32.mrb[160].mxu0 }
0x5b69   :  { %v15433_v40 = vpop.f32.mrb[161].mxu0  ;;  %v15439_v17 = vadd.f32 %v20628_v38, %v18448_v33 }
0x5b6a   :  { %v15434_v6 = vadd.f32 %v18448_v33, %v15433_v40  ;;  %v18473_v33 = vld [vmem:[%s22879_s3 + $0x6] ss:$0 sm:$0xff] }
0x5b70   :  { %v20650_v42 = vpop.f32.mrb[162].mxu0 }
0x5b71   :  { %v23456_v43 = vadd.f32 %v20650_v42, %v18454_v35  ;;  %v15595_v8 = vpop.f32.mrb[163].mxu0  ;;  %v18377_v42 = vld [vmem:[%s22819_s29 + $0xc8] sm:$0xff] }
0x5b72   :  { %v15596_v19 = vadd.f32 %v18454_v35, %v15595_v8  ;;  %v18376_v35 = vld [vmem:[%s22819_s29 + $0xc0] sm:$0xff] }
0x5bed   :  { %v15118_v44 = vpop.xlane.xlu0 %15117 }
0x5bee   :  { %v15119_v45 = vsub.f32 %v15115_v14, %v15118_v44 }
0x5bf0   :  { %v15120_v32 = vmul.f32 1.442695, %v15119_v45  ;;  %v21438_v45 = vpack.c.bf16 %v18377_v42, %v18376_v35 }
0x5bf1   :  { %v15279_v31 = vpop.xlane.xlu1 %15278 }
0x5bf2   :  { %21799 = vpow2.f32 %v15120_v32  ;;  %v15280_v46 = vsub.f32 %v15276_v28, %v15279_v31  ;;  %v18378_v31 = vld [vmem:[%s22819_s29 + $0xd0] sm:$0xff] }
0x5bf4   :  { %v15281_v39 = vmul.f32 1.442695, %v15280_v46  ;;  %v18379_v46 = vld [vmem:[%s22819_s29 + $0xd8] sm:$0xff] }
0x5bf6   :  { %21801 = vpow2.f32 %v15281_v39 }
0x5bfc   :  { %v21800_v47 = vpop.eup %21799 }
0x5bfd   :  { %v15122_v48 = vsel %vm627_vm4, %v21800_v47, 0.0 }
0x5bfe   :  { %15123 = vadd.xlane.f32.xlu0 %v15122_v48  ;;  %v18416_v48 = vld [vmem:[%s22828_s21 + $0xc0] sm:$0xff] }
0x5c00   :  { %v21802_v49 = vpop.eup %21801 }
0x5c01   :  { %v15283_v50 = vsel %vm627_vm4, %v21802_v49, 0.0 }
0x5c02   :  { %15284 = vadd.xlane.f32.xlu1 %v15283_v50 }
0x5c8b   :  { %v15124_v51 = vpop.xlane.xlu0 %15123 }
0x5c8c   :  { %21803 = vrcp.f32 %v15124_v51  ;;  %v18418_v51 = vld [vmem:[%s22828_s21 + $0xd0] sm:$0xff] }
0x5c8f   :  { %v15285_v41 = vpop.xlane.xlu1 %15284 }
0x5c90   :  { %21805 = vrcp.f32 %v15285_v41 }
0x5c96   :  { %v21804_v56 = vpop.eup %21803 }
0x5c97   :  { %v15126_v57 = vmul.f32 %v21804_v56, %v21800_v47  ;;  %v21442_v47 = vpack.c.bf16 %v18379_v46, %v18378_v31 }
0x5c99   :  { %20606 = vmatmul.mubr.msk.f32.vlgmr.msra.gmra.mrb[156].mxu1 %vm627_vm4, %v15126_v57  ;;  %v18396_v57 = vld [vmem:[%s22797_s28 + $0xc0] sm:$0xff] }
0x5c9a   :  { %v21806_v61 = vpop.eup %21805  ;;  %20614 = vmatpush3.msra.mxu1 %v23437_v37  ;;  %20615 = vmatprep.mubr.msk.f32.mxu1 %vm21846_vm3, %v21845_v30 }
0x5c9b   :  { %v15287_v0 = vmul.f32 %v21806_v61, %v21802_v49  ;;  %21423 = vmatprep.subr.bf16.mxu1 %v21422_v58  ;;  %v18417_v49 = vld [vmem:[%s22828_s21 + $0xc8] sm:$0xff] }
0x5c9c   :  { %v21454_v50 = vpack.c.bf16 %v18417_v49, %v18416_v48  ;;  %v18383_v48 = vld [vmem:[%s22819_s29 + $0xf8] sm:$0xff] }
0x5c9d   :  { %20616 = vmatmul.mubr.msk.f32.vlgmr.msra.gmra.mrb[158].mxu1 %vm627_vm4, %v15287_v0 }
0x5c9e   :  { %21425 = vmatpush3.bf16.msra.mxu1 %v21422_v58  ;;  %20637 = vmatprep.mubr.msk.f32.mxu1 %vm383_vm2, %v22808_v62  ;;  %v18397_v58 = vld [vmem:[%s22797_s28 + $0xc8] sm:$0xff] }
0x5c9f   :  { %21427 = vmatprep.subr.bf16.mxu1 %v21426_v1  ;;  %v21446_v60 = vpack.c.bf16 %v18397_v58, %v18396_v57  ;;  %v18430_v58 = vld [vmem:[%s22978_s8 + $0x30] sm:$0xff] }
0x5ca2   :  { %21429 = vmatpush3.bf16.msra.mxu1 %v21426_v1  ;;  %v18398_v1 = vld [vmem:[%s22797_s28 + $0xd0] sm:$0xff] }
0x5ca3   :  { %20651 = vmatprep.subr.mxu1 %v21845_v30 }
0x5ca5   :  { %20638 = vmatmul.mubr.msk.f32.vlgmr.msra.gmra.mrb[160].mxu1 %vm383_vm2, %v22810_v4 }
0x5ca6   :  { %20653 = vmatprep.mubr.msk.f32.mxu1 %vm21846_vm3, %v21845_v30 }
0x5d6c   :  { %v23476_v10 = vpop.f32.mrb[156].mxu1 }
0x5d6d   :  { %v20607_v11 = vpop.f32.mrb[157].mxu1 }
0x5d6e   :  { %v18399_v11 = vld [vmem:[%s22797_s28 + $0xd8] sm:$0xff] }
0x5d70   :  { %v23478_v55 = vpop.f32.mrb[158].mxu1 }
0x5d71   :  { %v20617_v52 = vpop.f32.mrb[159].mxu1 }
0x5d72   :  { %v21450_v52 = vpack.c.bf16 %v18399_v11, %v18398_v1  ;;  %v18402_v1 = vld [vmem:[%s22797_s28 + $0xf0] sm:$0xff]  ;;  %v18403_v11 = vld [vmem:[%s22797_s28 + $0xf8] sm:$0xff] }
0x5d78   :  { %v20639_v9 = vpop.f32.mrb[160].mxu1 }
0x5d79   :  { %v15520_v5 = vadd.f32 %v20639_v9, %v18451_v3  ;;  %v15514_v12 = vpop.f32.mrb[161].mxu1 }
0x5d7a   :  { %v15515_v16 = vadd.f32 %v18451_v3, %v15514_v12 }
0x5d7b   :  { %20662 = vmatpush3.xpose.msk.msra.mxu0 %vm627_vm4, %v15520_v5 }
0x5d7c   :  { %20652 = vmatpush3.xpose.msk.msra.mxu1 %vm627_vm4, %v15515_v16  ;;  %20671 = vmatprep.subr.mxu0 %v18429_v53 }
0x5d7d   :  { %20656 = vmatprep.subr.mxu1 %v21845_v30 }
0x5d7e   :  { %20664 = vmatmul.mubr.msk.f32.vlgmr.msra.gmra.mrb[164].mxu0 %vm627_vm4, %v15439_v17 }
0x5d7f   :  { %20654 = vmatmul.mubr.msk.f32.vlgmr.msra.gmra.mrb[162].mxu1 %vm627_vm4, %v15434_v6  ;;  %20672 = vmatpush3.msra.mxu0 %v18429_v53 }
0x5d80   :  { %20657 = vmatpush3.msra.mxu1 %v15596_v19  ;;  %20658 = vmatprep.mubr.msk.f32.mxu1 %vm21846_vm3, %v21845_v30  ;;  %v18467_v19 = vld [vmem:[%s22874_s2 + $0x6] ss:$0 sm:$0xff] }
0x5d81   :  { %20666 = vmatprep.subr.mxu1 %v21845_v30  ;;  %20676 = vmatprep.subr.mxu0 %v18428_v54 }
0x5e51   :  { %v15837_v21 = vpop.f32.mrb[164].mxu0 }
0x5e52   :  { %v15841_v22 = vmul.f32 0.35355338, %v15837_v21  ;;  %v15676_v24 = vpop.f32.mrb[162].mxu1  ;;  %v20665_v37 = vpop.f32.mrb[165].mxu0 }
0x5e53   :  { %v15680_v15 = vmul.f32 0.35355338, %v15676_v24  ;;  %v20655_v25 = vpop.f32.mrb[163].mxu1 }
0x5e54   :  { %v15842_v20 = vsel %vm627_vm4, %v15841_v22, -inf }
0x5e55   :  { %15843 = vmax.xlane.f32.xlu1 %v15842_v20  ;;  %v15681_v26 = vsel %vm627_vm4, %v15680_v15, -inf }
0x5e56   :  { %15682 = vmax.xlane.f32.xlu0 %v15681_v26 }
0x5ee2   :  { %v15844_v29 = vpop.xlane.xlu1 %15843 }
0x5ee3   :  { %v15845_v18 = vsub.f32 %v15841_v22, %v15844_v29  ;;  %v15683_v23 = vpop.xlane.xlu0 %15682 }
0x5ee4   :  { %v15684_v14 = vsub.f32 %v15680_v15, %v15683_v23 }
0x5ee5   :  { %v15846_v13 = vmul.f32 1.442695, %v15845_v18 }
0x5ee6   :  { %v15685_v34 = vmul.f32 1.442695, %v15684_v14 }
0x5ee7   :  { %21807 = vpow2.f32 %v15846_v13 }
0x5ee8   :  { %21809 = vpow2.f32 %v15685_v34 }
0x5ef1   :  { %v21808_v36 = vpop.eup %21807 }
0x5ef2   :  { %v21810_v28 = vpop.eup %21809  ;;  %v15848_v27 = vsel %vm627_vm4, %v21808_v36, 0.0 }
0x5ef3   :  { %15849 = vadd.xlane.f32.xlu1 %v15848_v27  ;;  %v15687_v7 = vsel %vm627_vm4, %v21810_v28, 0.0 }
0x5ef4   :  { %15688 = vadd.xlane.f32.xlu0 %v15687_v7 }
0x5f80   :  { %v15850_v38 = vpop.xlane.xlu1 %15849 }
0x5f81   :  { %v15689_v40 = vpop.xlane.xlu0 %15688 }
0x5f82   :  { %21811 = vrcp.f32 %v15689_v40 }
0x5f83   :  { %21813 = vrcp.f32 %v15850_v38 }
0x5f8c   :  { %v21812_v8 = vpop.eup %21811 }
0x5f8d   :  { %v15691_v44 = vmul.f32 %v21812_v8, %v21810_v28  ;;  %v21814_v32 = vpop.eup %21813 }
0x5f8e   :  { %v15852_v39 = vmul.f32 %v21814_v32, %v21808_v36  ;;  %v18381_v32 = vld [vmem:[%s22819_s29 + $0xe8] sm:$0xff] }
0x5f8f   :  { %20659 = vmatmul.mubr.msk.f32.vlgmr.msra.gmra.mrb[164].mxu1 %vm627_vm4, %v15691_v44 }
0x5f90   :  { %20667 = vmatpush3.msra.mxu1 %v23456_v43  ;;  %20668 = vmatprep.mubr.msk.f32.mxu1 %vm21846_vm3, %v21845_v30  ;;  %v18419_v43 = vld [vmem:[%s22828_s21 + $0xd8] sm:$0xff] }
0x5f91   :  { %21439 = vmatprep.subr.bf16.mxu1 %v21438_v45  ;;  %v21458_v41 = vpack.c.bf16 %v18419_v43, %v18418_v51  ;;  %v18420_v43 = vld [vmem:[%s22828_s21 + $0xe0] sm:$0xff] }
0x5f93   :  { %20669 = vmatmul.mubr.msk.f32.vlgmr.msra.gmra.mrb[166].mxu1 %vm627_vm4, %v15852_v39 }
0x5f94   :  { %21441 = vmatpush3.bf16.msra.mxu1 %v21438_v45  ;;  %20689 = vmatprep.mubr.msk.f32.mxu1 %vm383_vm2, %v23408_v2  ;;  %v18380_v45 = vld [vmem:[%s22819_s29 + $0xe0] sm:$0xff] }
0x5f95   :  { %21443 = vmatprep.subr.bf16.mxu1 %v21442_v47  ;;  %v21462_v39 = vpack.c.bf16 %v18381_v32, %v18380_v45 }
0x5f98   :  { %21445 = vmatpush3.bf16.msra.mxu1 %v21442_v47  ;;  %v18382_v47 = vld [vmem:[%s22819_s29 + $0xf0] sm:$0xff]  ;;  %s17787_s29 = sld [smem:[%s23657_s0 + %s21890_s12]]  }
0x5f99   :  { %21455 = vmatprep.subr.bf16.mxu1 %v21454_v50  ;;  %v21466_v51 = vpack.c.bf16 %v18383_v48, %v18382_v47  ;;  %v18431_v47 = vld [vmem:[%s22978_s8 + $0x38] sm:$0xff] }
0x5f9b   :  { %20690 = vmatmul.mubr.msk.f32.vlgmr.msra.gmra.mrb[168].mxu1 %vm383_vm2, %v23410_v63 }
0x5f9c   :  { %21457 = vmatpush3.bf16.msra.mxu1 %v21454_v50  ;;  %20711 = vmatprep.mubr.msk.f32.mxu1 %vm383_vm2, %v22808_v62 }
0x5f9d   :  { %21459 = vmatprep.subr.bf16.mxu1 %v21458_v41 }
0x5fa0   :  { %21461 = vmatpush3.bf16.msra.mxu1 %v21458_v41  ;;  %v18421_v41 = vld [vmem:[%s22828_s21 + $0xe8] sm:$0xff] }
0x5fa1   :  { %20719 = vmatprep.subr.mxu1 %v21845_v30  ;;  %v21478_v53 = vpack.c.bf16 %v18421_v41, %v18420_v43  ;;  %v18501_v43 = vld [vmem:[%s23076_s23 + $0x1] ss:$0 sm:$0xff] }
0x5fa3   :  { %20712 = vmatmul.mubr.msk.f32.vlgmr.msra.gmra.mrb[170].mxu1 %vm383_vm2, %v22810_v4 }
0x5fa4   :  { %20721 = vmatprep.mubr.msk.f32.mxu1 %vm21846_vm3, %v21845_v30 }
0x6062   :  { %v15761_v56 = vpop.f32.mrb[164].mxu1 }
0x6063   :  { %v20660_v59 = vpop.f32.mrb[165].mxu1  ;;  %20673 = vmatprep.mubr.msk.f32.mxu0 %vm627_vm4, %v15761_v56  ;;  %v18423_v56 = vld [vmem:[%s22828_s21 + $0xf8] sm:$0xff] }
0x6064   :  { %v18400_v59 = vld [vmem:[%s22797_s28 + $0xe0] sm:$0xff] }
0x6066   :  { %v15922_v61 = vpop.f32.mrb[166].mxu1 }
0x6067   :  { %v20670_v0 = vpop.f32.mrb[167].mxu1  ;;  %20674 = vmatmul.mubr.msk.f32.vlgmr.msra.gmra.mrb[166].mxu0 %vm627_vm4, %v15922_v61 }
0x6068   :  { %20677 = vmatpush3.msra.mxu0 %v18428_v54  ;;  %20678 = vmatprep.mubr.msk.f32.mxu0 %vm627_vm4, %v23476_v10  ;;  %v18422_v54 = vld [vmem:[%s22828_s21 + $0xf0] sm:$0xff]  ;;  %s21891_s21 = smov 51  }
0x6069   :  { %21447 = vmatprep.subr.bf16.mxu0 %v21446_v60  ;;  %v21482_v57 = vpack.c.bf16 %v18423_v56, %v18422_v54 }
0x606e   :  { %v20691_v3 = vpop.f32.mrb[168].mxu1 }
0x606f   :  { %v16160_v9 = vpop.f32.mrb[169].mxu1  ;;  %20679 = vmatmul.mubr.msk.f32.vlgmr.msra.gmra.mrb[166].mxu0 %vm627_vm4, %v23478_v55  ;;  %v18470_v55 = vld [vmem:[%s22866_s30 + $0x6] ss:$0 sm:$0xff]  ;;  %v16166_v37 = vadd.f32 %v20691_v3, %v18467_v19  ;;  %v21474_v3 = vpack.c.bf16 %v18403_v11, %v18402_v1 }
0x6070   :  { %21449 = vmatpush3.bf16.msra.mxu0 %v21446_v60  ;;  %20700 = vmatprep.mubr.msk.f32.mxu0 %vm383_vm2, %v22808_v62  ;;  %v16161_v22 = vadd.f32 %v18467_v19, %v16160_v9  ;;  %v18401_v60 = vld [vmem:[%s22797_s28 + $0xe8] sm:$0xff] }
0x6071   :  { %21451 = vmatprep.subr.bf16.mxu0 %v21450_v52  ;;  %v21470_v61 = vpack.c.bf16 %v18401_v60, %v18400_v59 }
0x6074   :  { %21453 = vmatpush3.bf16.msra.mxu0 %v21450_v52 }
0x6075   :  { %20714 = vmatprep.subr.mxu0 %v21845_v30 }
0x6076   :  { %v20713_v10 = vpop.f32.mrb[170].mxu1 }
0x6077   :  { %v16328_v5 = vadd.f32 %v20713_v10, %v18473_v33  ;;  %20701 = vmatmul.mubr.msk.f32.vlgmr.msra.gmra.mrb[168].mxu0 %vm383_vm2, %v22810_v4  ;;  %v16322_v12 = vpop.f32.mrb[171].mxu1 }
0x6078   :  { %v16323_v16 = vadd.f32 %v18473_v33, %v16322_v12  ;;  %20716 = vmatprep.mubr.msk.f32.mxu0 %vm21846_vm3, %v21845_v30  ;;  %v18490_v12 = vld [vmem:[%s22879_s3 + $0x7] ss:$0 sm:$0xff] }
0x607a   :  { %20720 = vmatpush3.msra.mxu1 %v16323_v16 }
0x607b   :  { %20729 = vmatprep.subr.mxu1 %v21845_v30 }
0x614a   :  { %v20702_v17 = vpop.f32.mrb[168].mxu0 }
0x614b   :  { %v16241_v6 = vpop.f32.mrb[169].mxu0  ;;  %v16247_v24 = vadd.f32 %v20702_v17, %v18470_v55 }
0x614c   :  { %v16242_v21 = vadd.f32 %v18470_v55, %v16241_v6  ;;  %v18487_v6 = vld [vmem:[%s22866_s30 + $0x7] ss:$0 sm:$0xff]  ;;  %s17830_s30 = sld [smem:[%s23657_s0 + %s21891_s21]]  }
0x614e   :  { %20715 = vmatpush3.xpose.msk.msra.mxu0 %vm627_vm4, %v16242_v21  ;;  %v18484_v21 = vld [vmem:[%s22874_s2 + $0x7] ss:$0 sm:$0xff] }
0x614f   :  { %20724 = vmatprep.subr.mxu0 %v21845_v30 }
0x6151   :  { %20717 = vmatmul.mubr.msk.f32.vlgmr.msra.gmra.mrb[170].mxu0 %vm627_vm4, %v16161_v22 }
0x6152   :  { %20725 = vmatpush3.xpose.msk.msra.mxu0 %vm627_vm4, %v16247_v24  ;;  %20726 = vmatprep.mubr.msk.f32.mxu0 %vm21846_vm3, %v21845_v30 }
0x6153   :  { %20734 = vmatprep.subr.mxu0 %v18430_v58 }
0x6155   :  { %20727 = vmatmul.mubr.msk.f32.vlgmr.msra.gmra.mrb[172].mxu0 %vm627_vm4, %v16166_v37 }
0x6156   :  { %20735 = vmatpush3.msra.mxu0 %v18430_v58 }
0x6157   :  { %21471 = vmatprep.subr.bf16.mxu0 %v21470_v61 }
0x6224   :  { %v16403_v15 = vpop.f32.mrb[170].mxu0 }
0x6225   :  { %v16407_v25 = vmul.f32 0.35355338, %v16403_v15  ;;  %v20718_v20 = vpop.f32.mrb[171].mxu0 }
0x6227   :  { %v16408_v26 = vsel %vm627_vm4, %v16407_v25, -inf }
0x6228   :  { %16409 = vmax.xlane.f32.xlu0 %v16408_v26  ;;  %v16564_v29 = vpop.f32.mrb[172].mxu0 }
0x6229   :  { %v16568_v18 = vmul.f32 0.35355338, %v16564_v29  ;;  %v20728_v23 = vpop.f32.mrb[173].mxu0 }
0x622b   :  { %v16569_v14 = vsel %vm627_vm4, %v16568_v18, -inf }
0x622c   :  { %16570 = vmax.xlane.f32.xlu1 %v16569_v14 }
0x62b5   :  { %v16410_v13 = vpop.xlane.xlu0 %16409 }
0x62b6   :  { %v16411_v34 = vsub.f32 %v16407_v25, %v16410_v13 }
0x62b8   :  { %v16412_v36 = vmul.f32 1.442695, %v16411_v34 }
0x62b9   :  { %v16571_v28 = vpop.xlane.xlu1 %16570 }
0x62ba   :  { %21815 = vpow2.f32 %v16412_v36  ;;  %v16572_v27 = vsub.f32 %v16568_v18, %v16571_v28 }
0x62bc   :  { %v16573_v7 = vmul.f32 1.442695, %v16572_v27 }
0x62be   :  { %21817 = vpow2.f32 %v16573_v7 }
0x62c4   :  { %v21816_v38 = vpop.eup %21815 }
0x62c5   :  { %v16414_v40 = vsel %vm627_vm4, %v21816_v38, 0.0 }
0x62c6   :  { %16415 = vadd.xlane.f32.xlu0 %v16414_v40 }
0x62c8   :  { %v21818_v35 = vpop.eup %21817 }
0x62c9   :  { %v16575_v42 = vsel %vm627_vm4, %v21818_v35, 0.0 }
0x62ca   :  { %16576 = vadd.xlane.f32.xlu1 %v16575_v42 }
0x6353   :  { %v16416_v8 = vpop.xlane.xlu0 %16415 }
0x6354   :  { %21819 = vrcp.f32 %v16416_v8 }
0x6357   :  { %v16577_v44 = vpop.xlane.xlu1 %16576 }
0x6358   :  { %21821 = vrcp.f32 %v16577_v44 }
0x635e   :  { %v21820_v31 = vpop.eup %21819 }
0x635f   :  { %v16418_v46 = vmul.f32 %v21820_v31, %v21816_v38 }
0x6361   :  { %20722 = vmatmul.mubr.msk.f32.vlgmr.msra.gmra.mrb[172].mxu1 %vm627_vm4, %v16418_v46 }
0x6362   :  { %v21822_v49 = vpop.eup %21821  ;;  %20730 = vmatpush3.msra.mxu1 %v16328_v5  ;;  %20731 = vmatprep.mubr.msk.f32.mxu1 %vm21846_vm3, %v21845_v30 }
0x6363   :  { %v16579_v50 = vmul.f32 %v21822_v49, %v21818_v35  ;;  %21463 = vmatprep.subr.bf16.mxu1 %v21462_v39 }
0x6365   :  { %20732 = vmatmul.mubr.msk.f32.vlgmr.msra.gmra.mrb[174].mxu1 %vm627_vm4, %v16579_v50 }
0x6366   :  { %21465 = vmatpush3.bf16.msra.mxu1 %v21462_v39  ;;  %20747 = vmatprep.mubr.msk.f32.mxu1 %vm383_vm2, %v23408_v2 }
0x6367   :  { %21467 = vmatprep.subr.bf16.mxu1 %v21466_v51 }
0x636a   :  { %21469 = vmatpush3.bf16.msra.mxu1 %v21466_v51 }
0x636b   :  { %21479 = vmatprep.subr.bf16.mxu1 %v21478_v53 }
0x636d   :  { %20748 = vmatmul.mubr.msk.f32.vlgmr.msra.gmra.mrb[176].mxu1 %vm383_vm2, %v23410_v63 }
0x636e   :  { %21481 = vmatpush3.bf16.msra.mxu1 %v21478_v53  ;;  %20769 = vmatprep.mubr.msk.f32.mxu1 %vm383_vm2, %v22808_v62 }
0x636f   :  { %21483 = vmatprep.subr.bf16.mxu1 %v21482_v57 }
0x6372   :  { %21485 = vmatpush3.bf16.msra.mxu1 %v21482_v57 }
0x6373   :  { %20782 = vmatprep.subr.mxu1 %v21845_v30 }
0x6375   :  { %20770 = vmatmul.mubr.msk.f32.vlgmr.msra.gmra.mrb[178].mxu1 %vm383_vm2, %v22810_v4 }
0x6376   :  { %20784 = vmatprep.mubr.msk.f32.mxu1 %vm21846_vm3, %v21845_v30 }
0x6434   :  { %v16488_v0 = vpop.f32.mrb[172].mxu1 }
0x6435   :  { %v20723_v52 = vpop.f32.mrb[173].mxu1  ;;  %20736 = vmatprep.mubr.msk.f32.mxu0 %vm627_vm4, %v16488_v0 }
0x6438   :  { %v16649_v9 = vpop.f32.mrb[174].mxu1 }
0x6439   :  { %v20733_v33 = vpop.f32.mrb[175].mxu1  ;;  %20737 = vmatmul.mubr.msk.f32.vlgmr.msra.gmra.mrb[166].mxu0 %vm627_vm4, %v16649_v9 }
0x643a   :  { %21473 = vmatpush3.bf16.msra.mxu0 %v21470_v61  ;;  %20758 = vmatprep.mubr.msk.f32.mxu0 %vm383_vm2, %v22808_v62  ;;  %v18506_v33 = vld [vmem:[%s23088_s6 + $0x20] sm:$0xff] }
0x643b   :  { %21475 = vmatprep.subr.bf16.mxu0 %v21474_v3 }
0x643e   :  { %21477 = vmatpush3.bf16.msra.mxu0 %v21474_v3 }
0x643f   :  { %20772 = vmatprep.subr.mxu0 %v21845_v30 }
0x6440   :  { %v20749_v10 = vpop.f32.mrb[176].mxu1 }
0x6441   :  { %v16808_v5 = vpop.f32.mrb[177].mxu1  ;;  %20759 = vmatmul.mubr.msk.f32.vlgmr.msra.gmra.mrb[174].mxu0 %vm383_vm2, %v22810_v4  ;;  %v16814_v37 = vadd.f32 %v20749_v10, %v18484_v21  ;;  %v18507_v10 = vld [vmem:[%s23088_s6 + $0x28] sm:$0xff] }
0x6442   :  { %20774 = vmatprep.mubr.msk.f32.mxu0 %vm21846_vm3, %v21845_v30  ;;  %v16809_v15 = vadd.f32 %v18484_v21, %v16808_v5  ;;  %v21486_v5 = vpack.c.bf16 %v18507_v10, %v18506_v33  ;;  %v17685_v33 = vld [vmem:[%s17786_s26 + $0x18] sm:$0xff] }
0x6448   :  { %v20771_v16 = vpop.f32.mrb[178].mxu1 }
0x6449   :  { %v16976_v55 = vadd.f32 %v20771_v16, %v18490_v12  ;;  %v16970_v17 = vpop.f32.mrb[179].mxu1  ;;  %v18509_v16 = vld [vmem:[%s23088_s6 + $0x38] sm:$0xff] }
0x644a   :  { %v16971_v4 = vadd.f32 %v18490_v12, %v16970_v17  ;;  %v18508_v12 = vld [vmem:[%s23088_s6 + $0x30] sm:$0xff]  ;;  %v18514_v17 = vld [vmem:[%s23097_s16 + $0x40] sm:$0xff] }
0x6514   :  { %v20760_v19 = vpop.f32.mrb[174].mxu0 }
0x6515   :  { %v16895_v62 = vadd.f32 %v20760_v19, %v18487_v6  ;;  %v16889_v22 = vpop.f32.mrb[175].mxu0  ;;  %v18516_v19 = vld [vmem:[%s23097_s16 + $0x50] sm:$0xff] }
0x6516   :  { %v16890_v24 = vadd.f32 %v18487_v6, %v16889_v22  ;;  %v18515_v6 = vld [vmem:[%s23097_s16 + $0x48] sm:$0xff] }
0x6517   :  { %20783 = vmatpush3.xpose.msk.msra.mxu1 %vm627_vm4, %v16895_v62  ;;  %v21494_v21 = vpack.c.bf16 %v18515_v6, %v18514_v17  ;;  %v18517_v62 = vld [vmem:[%s23097_s16 + $0x58] sm:$0xff] }
0x6518   :  { %20773 = vmatpush3.xpose.msk.msra.mxu0 %vm627_vm4, %v16890_v24  ;;  %21487 = vmatprep.subr.bf16.mxu1 %v21486_v5  ;;  %v21498_v22 = vpack.c.bf16 %v18517_v62, %v18516_v19  ;;  %v18518_v24 = vld [vmem:[%s23097_s16 + $0x60] sm:$0xff] }
0x6519   :  { %20777 = vmatprep.subr.mxu0 %v21845_v30  ;;  %v18528_v62 = vld [vmem:[%s23153_s14 + $0x1] ss:$0 sm:$0xff] }
0x651a   :  { %20785 = vmatmul.mubr.msk.f32.vlgmr.msra.gmra.mrb[180].mxu1 %vm627_vm4, %v16814_v37  ;;  %v18519_v37 = vld [vmem:[%s23097_s16 + $0x68] sm:$0xff] }
0x651b   :  { %20775 = vmatmul.mubr.msk.f32.vlgmr.msra.gmra.mrb[176].mxu0 %vm627_vm4, %v16809_v15  ;;  %21489 = vmatpush3.bf16.msra.mxu1 %v21486_v5  ;;  %v21502_v15 = vpack.c.bf16 %v18519_v37, %v18518_v24  ;;  %v108_v5 = vstv %s17787_s29 }
0x651c   :  { %20778 = vmatpush3.msra.mxu0 %v16971_v4  ;;  %20779 = vmatprep.mubr.msk.f32.mxu0 %vm21846_vm3, %v21845_v30  ;;  %109 = vst [vmem:[#allocation2] sm:$0x1] %v108_v5 }
0x651d   :  { %20787 = vmatprep.subr.mxu0 %v21845_v30 }
0x65ed   :  { %v17212_v25 = vpop.f32.mrb[180].mxu1 }
0x65ee   :  { %v17216_v20 = vmul.f32 0.35355338, %v17212_v25  ;;  %v17051_v26 = vpop.f32.mrb[176].mxu0  ;;  %v20786_v29 = vpop.f32.mrb[181].mxu1 }
0x65ef   :  { %v17055_v18 = vmul.f32 0.35355338, %v17051_v26  ;;  %v20776_v23 = vpop.f32.mrb[177].mxu0 }
0x65f0   :  { %v17217_v14 = vsel %vm627_vm4, %v17216_v20, -inf }
0x65f1   :  { %17218 = vmax.xlane.f32.xlu1 %v17217_v14  ;;  %v17056_v13 = vsel %vm627_vm4, %v17055_v18, -inf  ;;  %v18504_v14 = vld [vmem:[%s23108_s19 + $0x1] ss:$0 sm:$0xff] }
0x65f2   :  { %17057 = vmax.xlane.f32.xlu0 %v17056_v13 }
0x667e   :  { %v17219_v34 = vpop.xlane.xlu1 %17218 }
0x667f   :  { %v17220_v36 = vsub.f32 %v17216_v20, %v17219_v34  ;;  %v17058_v28 = vpop.xlane.xlu0 %17057 }
0x6680   :  { %v17059_v27 = vsub.f32 %v17055_v18, %v17058_v28  ;;  %v18505_v28 = vld [vmem:[%s23113_s4 + $0x1] ss:$0 sm:$0xff] }
0x6681   :  { %v17221_v7 = vmul.f32 1.442695, %v17220_v36 }
0x6682   :  { %v17060_v38 = vmul.f32 1.442695, %v17059_v27 }
0x6683   :  { %21823 = vpow2.f32 %v17221_v7 }
0x6684   :  { %21825 = vpow2.f32 %v17060_v38 }
0x668d   :  { %v21824_v40 = vpop.eup %21823 }
0x668e   :  { %v21826_v35 = vpop.eup %21825  ;;  %v17223_v42 = vsel %vm627_vm4, %v21824_v40, 0.0 }
0x668f   :  { %17224 = vadd.xlane.f32.xlu1 %v17223_v42  ;;  %v17062_v8 = vsel %vm627_vm4, %v21826_v35, 0.0  ;;  %v18521_v42 = vld [vmem:[%s23097_s16 + $0x78] sm:$0xff] }
0x6690   :  { %17063 = vadd.xlane.f32.xlu0 %v17062_v8 }
0x671c   :  { %v17225_v44 = vpop.xlane.xlu1 %17224 }
0x671d   :  { %v17064_v45 = vpop.xlane.xlu0 %17063 }
0x671e   :  { %21827 = vrcp.f32 %v17064_v45 }
0x671f   :  { %21829 = vrcp.f32 %v17225_v44  ;;  %v18511_v44 = vld [vmem:[%s23662_s9 + $0x1] ss:$0 sm:$0xff] }
0x6728   :  { %v21828_v32 = vpop.eup %21827 }
0x6729   :  { %v17066_v31 = vmul.f32 %v21828_v32, %v21826_v35  ;;  %v21830_v46 = vpop.eup %21829  ;;  %v18520_v35 = vld [vmem:[%s23097_s16 + $0x70] sm:$0xff] }
0x672a   :  { %v17227_v39 = vmul.f32 %v21830_v46, %v21824_v40  ;;  %v21506_v8 = vpack.c.bf16 %v18521_v42, %v18520_v35 }
0x672b   :  { %20780 = vmatmul.mubr.msk.f32.vlgmr.msra.gmra.mrb[178].mxu0 %vm627_vm4, %v17066_v31 }
0x672c   :  { %20788 = vmatpush3.msra.mxu0 %v16976_v55  ;;  %20789 = vmatprep.mubr.msk.f32.mxu0 %vm21846_vm3, %v21845_v30  ;;  %v21490_v55 = vpack.c.bf16 %v18509_v16, %v18508_v12 }
0x672d   :  { %20792 = vmatprep.subr.mxu0 %v18431_v47 }
0x672e   :  { %21491 = vmatprep.subr.bf16.mxu1 %v21490_v55 }
0x672f   :  { %20790 = vmatmul.mubr.msk.f32.vlgmr.msra.gmra.mrb[180].mxu0 %vm627_vm4, %v17227_v39  ;;  %21493 = vmatpush3.bf16.msra.mxu1 %v21490_v55 }
0x6730   :  { %20793 = vmatpush3.msra.mxu0 %v18431_v47 }
0x6731   :  { %21495 = vmatprep.subr.bf16.mxu0 %v21494_v21 }
0x67fe   :  { %v17136_v48 = vpop.f32.mrb[178].mxu0 }
0x67ff   :  { %v20781_v49 = vpop.f32.mrb[179].mxu0  ;;  %20794 = vmatprep.mubr.msk.f32.mxu0 %vm627_vm4, %v17136_v48  ;;  %v18523_v48 = vld [vmem:[%s23663_s15 + $0x1] ss:$0 sm:$0xff] }
0x6802   :  { %v17297_v50 = vpop.f32.mrb[180].mxu0 }
0x6803   :  { %v20791_v51 = vpop.f32.mrb[181].mxu0  ;;  %20795 = vmatmul.mubr.msk.f32.vlgmr.msra.gmra.mrb[166].mxu0 %vm627_vm4, %v17297_v50 }
0x6804   :  { %21497 = vmatpush3.bf16.msra.mxu0 %v21494_v21 }
0x6805   :  { %21499 = vmatprep.subr.bf16.mxu0 %v21498_v22 }
0x6808   :  { %21501 = vmatpush3.bf16.msra.mxu0 %v21498_v22 }
0x6809   :  { %21503 = vmatprep.subr.bf16.mxu0 %v21502_v15 }
0x680c   :  { %21505 = vmatpush3.bf16.msra.mxu0 %v21502_v15  ;;  %v18529_v15 = vld [vmem:[%s23158_s10 + $0x1] ss:$0 sm:$0xff] }
0x680d   :  { %21507 = vmatprep.subr.bf16.mxu0 %v21506_v8 }
0x6810   :  { %21509 = vmatpush3.bf16.msra.mxu0 %v21506_v8 }
0x68d6   :  { %v20796_v41 = vpop.f32.mrb[166].mxu0 }
0x68d7   :  { %v17391_v53 = vadd.f32 %v20796_v41, %v18501_v43  ;;  %v17373_v54 = vpop.f32.mrb[167].mxu0 }
0x68d8   :  { %v17390_v56 = vadd.f32 %v18501_v43, %v17373_v54 }
0x68d9   :  { %v17393_v30 = vadd.f32 %v17391_v53, %v23410_v63 }
0x68da   :  { %v17392_v57 = vadd.f32 %v17390_v56, %v23408_v2 }
0x68db   :  { %v17401_v58 = vsel %vm383_vm2, %v17393_v30, 0.0 }
0x68dc   :  { %17402 = vadd.xlane.f32.xlu1 %v17401_v58  ;;  %v17398_v59 = vsel %vm383_vm2, %v17392_v57, 0.0 }
0x68dd   :  { %17399 = vadd.xlane.f32.xlu0 %v17398_v59 }
0x6969   :  { %v17403_v60 = vpop.xlane.xlu1 %17402 }
0x696a   :  { %v17405_v61 = vmul.f32 0.03125, %v17403_v60  ;;  %v17400_v0 = vpop.xlane.xlu0 %17399 }
0x696b   :  { %v17404_v1 = vmul.f32 0.03125, %v17400_v0 }
0x696c   :  { %v17407_v11 = vsub.f32 %v17393_v30, %v17405_v61 }
0x696d   :  { %v17406_v52 = vsub.f32 %v17392_v57, %v17404_v1 }
0x696e   :  { %v17409_v3 = vmul.f32 %v17407_v11, %v17407_v11 }
0x696f   :  { %v17408_v63 = vmul.f32 %v17406_v52, %v17406_v52 }
0x6970   :  { %v17413_v2 = vsel %vm383_vm2, %v17409_v3, 0.0  ;;  %v17682_v3 = vld [vmem:[%s17786_s26] sm:$0xff] }
0x6971   :  { %17414 = vadd.xlane.f32.xlu1 %v17413_v2  ;;  %v17410_v9 = vsel %vm383_vm2, %v17408_v63, 0.0  ;;  %v17683_v63 = vld [vmem:[%s17786_s26 + $0x8] sm:$0xff] }
0x6972   :  { %17411 = vadd.xlane.f32.xlu0 %v17410_v9  ;;  %v21510_v2 = vpack.c.bf16 %v17683_v63, %v17682_v3  ;;  %v17684_v9 = vld [vmem:[%s17786_s26 + $0x10] sm:$0xff] }
0x6973   :  { %v21514_v10 = vpack.c.bf16 %v17685_v33, %v17684_v9 }
0x6974   :  { %21511 = vmatprep.subr.bf16.mxu1 %v21510_v2 }
0x69fe   :  { %v17415_v4 = vpop.xlane.xlu1 %17414 }
0x69ff   :  { %v17417_v25 = vmul.f32 0.03125, %v17415_v4  ;;  %v17412_v20 = vpop.xlane.xlu0 %17411 }
0x6a00   :  { %v17416_v26 = vmul.f32 0.03125, %v17412_v20 }
0x6a01   :  { %v17419_v29 = vadd.f32 1e-05, %v17417_v25 }
0x6a02   :  { %v17418_v18 = vadd.f32 1e-05, %v17416_v26 }
0x6a03   :  { %21831 = vrsqrt.f32 %v17419_v29  ;;  %v18530_v29 = vld [vmem:[#allocation2] ss:$0 sm:$0xff] }
0x6a04   :  { %21833 = vrsqrt.f32 %v17418_v18 }
0x6a0d   :  { %v21832_v23 = vpop.eup %21831 }
0x6a0e   :  { %v21834_v13 = vpop.eup %21833  ;;  %v17423_v34 = vmul.f32 %v21832_v23, %v17407_v11 }
0x6a0f   :  { %v17422_v36 = vmul.f32 %v21834_v13, %v17406_v52 }
0x6a10   :  { %v17431_v27 = vmul.f32 %v18504_v14, %v17423_v34 }
0x6a11   :  { %v17430_v7 = vmul.f32 %v18504_v14, %v17422_v36 }
0x6a12   :  { %v17439_v40 = vadd.f32 %v18505_v28, %v17431_v27 }
0x6a13   :  { %v17438_v38 = vadd.f32 %v18505_v28, %v17430_v7 }
0x6a15   :  { %20805 = vmatprep.mubr.msk.f32.mxu1 %vm383_vm2, %v17438_v38 }
0x6a16   :  { %20806 = vmatmul.mubr.msk.f32.vlgmr.msra.gmra.mrb[182].mxu1 %vm383_vm2, %v17439_v40 }
0x6a17   :  { %21513 = vmatpush3.bf16.msra.mxu1 %v21510_v2 }
0x6a18   :  { %21515 = vmatprep.subr.bf16.mxu1 %v21514_v10 }
0x6a1b   :  { %21517 = vmatpush3.bf16.msra.mxu1 %v21514_v10 }
0x6ae9   :  { %v20807_v45 = vpop.f32.mrb[182].mxu1 }
0x6aea   :  { %v17531_v32 = vadd.f32 %v20807_v45, %v18511_v44  ;;  %v17525_v31 = vpop.f32.mrb[183].mxu1 }
0x6aeb   :  { %v17526_v46 = vadd.f32 %v18511_v44, %v17525_v31 }
0x6aec   :  { %v17535_v47 = vmax.f32 %v17531_v32, 0.0 }
0x6aed   :  { %v17534_v39 = vmax.f32 %v17526_v46, 0.0 }
0x6aef   :  { %20824 = vmatprep.mubr.msk.f32.mxu0 %vm3137_vm5, %v17534_v39 }
0x6af0   :  { %20825 = vmatmul.mubr.msk.f32.vlgmr.msra.gmra.mrb[182].mxu0 %vm3137_vm5, %v17535_v47 }
0x6bc3   :  { %v20826_v49 = vpop.f32.mrb[182].mxu0 }
0x6bc4   :  { %v17631_v50 = vadd.f32 %v20826_v49, %v18523_v48  ;;  %v17625_v51 = vpop.f32.mrb[183].mxu0 }
0x6bc5   :  { %v17626_v43 = vadd.f32 %v18523_v48, %v17625_v51 }
0x6bc6   :  { %v17635_v41 = vadd.f32 %v17631_v50, %v17439_v40 }
0x6bc7   :  { %v17634_v53 = vadd.f32 %v17626_v43, %v17438_v38 }
0x6bc8   :  { %v17643_v54 = vsel %vm383_vm2, %v17635_v41, 0.0 }
0x6bc9   :  { %17644 = vadd.xlane.f32.xlu1 %v17643_v54  ;;  %v17640_v56 = vsel %vm383_vm2, %v17634_v53, 0.0 }
0x6bca   :  { %17641 = vadd.xlane.f32.xlu0 %v17640_v56 }
0x6c56   :  { %v17645_v30 = vpop.xlane.xlu1 %17644 }
0x6c57   :  { %v17647_v57 = vmul.f32 0.03125, %v17645_v30  ;;  %v17642_v58 = vpop.xlane.xlu0 %17641 }
0x6c58   :  { %v17646_v59 = vmul.f32 0.03125, %v17642_v58 }
0x6c59   :  { %v17649_v60 = vsub.f32 %v17635_v41, %v17647_v57 }
0x6c5a   :  { %v17648_v61 = vsub.f32 %v17634_v53, %v17646_v59 }
0x6c5b   :  { %v17651_v0 = vmul.f32 %v17649_v60, %v17649_v60 }
0x6c5c   :  { %v17650_v1 = vmul.f32 %v17648_v61, %v17648_v61 }
0x6c5d   :  { %v17655_v11 = vsel %vm383_vm2, %v17651_v0, 0.0 }
0x6c5e   :  { %17656 = vadd.xlane.f32.xlu1 %v17655_v11  ;;  %v17652_v52 = vsel %vm383_vm2, %v17650_v1, 0.0 }
0x6c5f   :  { %17653 = vadd.xlane.f32.xlu0 %v17652_v52 }
0x6ceb   :  { %v17657_v12 = vpop.xlane.xlu1 %17656 }
0x6cec   :  { %v17659_v16 = vmul.f32 0.03125, %v17657_v12  ;;  %v17654_v55 = vpop.xlane.xlu0 %17653 }
0x6ced   :  { %v17658_v17 = vmul.f32 0.03125, %v17654_v55 }
0x6cee   :  { %v17661_v6 = vadd.f32 1e-05, %v17659_v16 }
0x6cef   :  { %v17660_v19 = vadd.f32 1e-05, %v17658_v17 }
0x6cf0   :  { %21835 = vrsqrt.f32 %v17661_v6 }
0x6cf1   :  { %21837 = vrsqrt.f32 %v17660_v19 }
0x6cfa   :  { %v21836_v21 = vpop.eup %21835 }
0x6cfb   :  { %v21838_v22 = vpop.eup %21837  ;;  %v17665_v24 = vmul.f32 %v21836_v21, %v17649_v60 }
0x6cfc   :  { %v17664_v37 = vmul.f32 %v21838_v22, %v17648_v61 }
0x6cfd   :  { %v17673_v4 = vmul.f32 %v18528_v62, %v17665_v24 }
0x6cfe   :  { %v17672_v25 = vmul.f32 %v18528_v62, %v17664_v37 }
0x6cff   :  { %v17681_v26 = vadd.f32 %v18529_v15, %v17673_v4 }
0x6d00   :  { %v17680_v20 = vadd.f32 %v18529_v15, %v17672_v25 }
0x6d02   :  { %20835 = vmatprep.mubr.msk.f32.mxu1 %vm383_vm2, %v17680_v20 }
0x6d03   :  { %20836 = vmatmul.mubr.msk.f32.vlgmr.msra.gmra.mrb[184].mxu1 %vm383_vm2, %v17681_v26 }
0x6dd6   :  { %v20837_v18 = vpop.f32.mrb[184].mxu1 }
0x6dd7   :  { %v17771_v23 = vadd.f32 %v20837_v18, %v18530_v29  ;;  %v17765_v14 = vpop.f32.mrb[185].mxu1 }
0x6dd8   :  { %v17766_v13 = vadd.f32 %v18530_v29, %v17765_v14 }
0x6dd9   :  { %17775 = vst.msk [vmem:[%s17830_s30 + $0x8] sm:$0xff] %vm6240_vm7, %v17771_v23 }
0x6dda   :  { %17774 = vst.msk [vmem:[%s17830_s30] sm:$0xff] %vm6240_vm7, %v17766_v13 }

</bundles_post_ra>
